<compile_context>
chip_gen: v6e
topology: v6e:2x2x1
jax: 0.10.0
libtpu: 0.0.40
codegen_flags: <defaults>
</compile_context>

<pallas_src>
import functools

import jax
import jax.numpy as jnp
from jax.experimental import pallas as pl
from jax.experimental.pallas import tpu as pltpu


N_FEATURES = 100
N_FEATURES_PAD = 128          # 100 -> 128: aligned MXU K / full-lane x DMA
H0, H1, H2 = 256, 512, 1024
N_OUT = 784
N_OUT_PAD = 896               # 784 -> 7 * 128: lane-dense output stores
TILE_B = 128                  # batch rows per grid step


def _leaky_relu(x, slope=0.2):
    return jnp.where(x > 0, x, slope * x)


def generator_kernel(x_ref,
                     w0_ref, b0_ref,
                     w1_ref, b1_ref,
                     w2_ref, b2_ref,
                     w3_ref, b3_ref,
                     o_ref):
    # Activations held in f32; each matmul casts its LHS to bf16 to match the
    # bf16-resident weights and accumulates in f32 on the MXU.
    h = x_ref[...]                                        # (TILE_B, 128) f32

    h = jnp.dot(h.astype(jnp.bfloat16), w0_ref[...],
                preferred_element_type=jnp.float32) + b0_ref[...]
    h = _leaky_relu(h)                                    # (TILE_B, 256)

    h = jnp.dot(h.astype(jnp.bfloat16), w1_ref[...],
                preferred_element_type=jnp.float32) + b1_ref[...]
    h = _leaky_relu(h)                                    # (TILE_B, 512)

    h = jnp.dot(h.astype(jnp.bfloat16), w2_ref[...],
                preferred_element_type=jnp.float32) + b2_ref[...]
    h = _leaky_relu(h)                                    # (TILE_B, 1024)

    h = jnp.dot(h.astype(jnp.bfloat16), w3_ref[...],
                preferred_element_type=jnp.float32) + b3_ref[...]
    o_ref[...] = jnp.tanh(h).astype(o_ref.dtype)          # (TILE_B, 896)


def _prepare_kernel_params(params):
    """Pad + cast fp32 params for the kernel.

    w0 fan_in is zero-padded 100 -> 128, w3/b3 fan_out is zero-padded
    784 -> 896.  Weights go to bf16 (MXU inputs); biases stay f32.
    """
    w0 = jnp.pad(params["w0"],
                 ((0, N_FEATURES_PAD - N_FEATURES), (0, 0))).astype(jnp.bfloat16)
    w1 = params["w1"].astype(jnp.bfloat16)
    w2 = params["w2"].astype(jnp.bfloat16)
    w3 = jnp.pad(params["w3"],
                 ((0, 0), (0, N_OUT_PAD - N_OUT))).astype(jnp.bfloat16)
    b0 = params["b0"].astype(jnp.float32)
    b1 = params["b1"].astype(jnp.float32)
    b2 = params["b2"].astype(jnp.float32)
    b3 = jnp.pad(params["b3"],
                 ((0, 0), (0, N_OUT_PAD - N_OUT))).astype(jnp.float32)
    return w0, b0, w1, b1, w2, b2, w3, b3


@functools.partial(jax.jit, static_argnames=("tile_b",))
def generator_forward(x, params, tile_b=TILE_B):
    """x: (B, 100) float32. params: dict of (fan_in, fan_out) weights + (1, fan_out) biases."""
    B = x.shape[0]
    b_pad = pl.cdiv(B, tile_b) * tile_b

    # Zero-pad batch to a tile multiple and features 100 -> 128.
    x_pad = jnp.zeros((b_pad, N_FEATURES_PAD), jnp.float32)
    x_pad = x_pad.at[:B, :N_FEATURES].set(x.astype(jnp.float32))

    w0, b0, w1, b1, w2, b2, w3, b3 = _prepare_kernel_params(params)

    # Weights / biases: full-array blocks with a constant index_map so they
    # stay resident in VMEM across all batch tiles (single DMA per call).
    def resident(a):
        nd = a.ndim
        return pl.BlockSpec(a.shape, lambda i, _nd=nd: (0,) * _nd)

    out_pad = pl.pallas_call(
        generator_kernel,
        out_shape=jax.ShapeDtypeStruct((b_pad, N_OUT_PAD), jnp.float32),
        grid_spec=pltpu.PrefetchScalarGridSpec(
            num_scalar_prefetch=0,
            grid=(b_pad // tile_b,),
            in_specs=[
                pl.BlockSpec((tile_b, N_FEATURES_PAD), lambda i: (i, 0)),
                resident(w0), resident(b0),
                resident(w1), resident(b1),
                resident(w2), resident(b2),
                resident(w3), resident(b3),
            ],
            out_specs=pl.BlockSpec((tile_b, N_OUT_PAD), lambda i: (i, 0)),
        ),
        compiler_params=pltpu.CompilerParams(
            dimension_semantics=("parallel",),   # 2 TCs on v7x; no-op elsewhere
            vmem_limit_bytes=32 << 20,
        ),
    )(x_pad, w0, b0, w1, b1, w2, b2, w3, b3)

    return out_pad[:B, :N_OUT]


def init_params(key):
    """nn.Linear-style init: U(-1/sqrt(fan_in), 1/sqrt(fan_in)).

    Weights stored transposed as (fan_in, fan_out) so the kernel computes
    x @ W directly (equivalent to PyTorch's x @ W_torch.T).
    """
    dims = [(N_FEATURES, H0), (H0, H1), (H1, H2), (H2, N_OUT)]
    params = {}
    for i, (fan_in, fan_out) in enumerate(dims):
        key, kw, kb = jax.random.split(key, 3)
        bound = 1.0 / jnp.sqrt(jnp.float32(fan_in))
        params[f"w{i}"] = jax.random.uniform(
            kw, (fan_in, fan_out), jnp.float32, minval=-bound, maxval=bound)
        params[f"b{i}"] = jax.random.uniform(
            kb, (1, fan_out), jnp.float32, minval=-bound, maxval=bound)
    return params


def reference_forward(x, params):
    h = x
    for i in range(3):
        h = h @ params[f"w{i}"] + params[f"b{i}"]
        h = jnp.where(h > 0, h, 0.2 * h)
    h = h @ params["w3"] + params["b3"]
    return jnp.tanh(h)


if __name__ == "__main__":
    key = jax.random.PRNGKey(0)
    kp, kx = jax.random.split(key)

    params = init_params(kp)
    B = 256  # two batch tiles -> exercises the pipelined, megacore-parallel grid
    x = jax.random.normal(kx, (B, N_FEATURES), jnp.float32)

    out = jax.block_until_ready(generator_forward(x, params))
    ref = reference_forward(x, params)

    assert out.shape == (B, N_OUT), out.shape
    assert bool(jnp.all(jnp.isfinite(out))), "non-finite output"
    # bf16 MXU inputs with f32 accumulation -> loosened tolerance vs the
    # pure-f32 reference.
    max_err = float(jnp.max(jnp.abs(out - ref)))
    assert max_err < 5e-2, f"mismatch vs JAX reference: max abs err {max_err}"

    print("KERNEL_OK")
</pallas_src>

<mosaic_0001>
module attributes {stable_mosaic.version = 11 : i64} {
  func.func @generator_kernel(%arg0: i32, %arg1: memref<128x128xf32, #tpu.memory_space<vmem>>, %arg2: memref<128x256xbf16, #tpu.memory_space<vmem>>, %arg3: memref<1x256xf32, #tpu.memory_space<vmem>>, %arg4: memref<256x512xbf16, #tpu.memory_space<vmem>>, %arg5: memref<1x512xf32, #tpu.memory_space<vmem>>, %arg6: memref<512x1024xbf16, #tpu.memory_space<vmem>>, %arg7: memref<1x1024xf32, #tpu.memory_space<vmem>>, %arg8: memref<1024x896xbf16, #tpu.memory_space<vmem>>, %arg9: memref<1x896xf32, #tpu.memory_space<vmem>>, %arg10: memref<128x896xf32, #tpu.memory_space<vmem>>) attributes {dimension_semantics = [#tpu.dimension_semantics<parallel>], iteration_bounds = array<i64: 2>, scalar_prefetch = 0 : i64, scratch_operands = 0 : i64, tpu.core_type = #tpu.core_type<tc>, window_params = [{transform_indices = @transform_0, window_bounds = array<i64: 128, 128>}, {pipeline_mode = #tpu.pipeline_mode<synchronous>, transform_indices = @transform_1, window_bounds = array<i64: 128, 256>}, {pipeline_mode = #tpu.pipeline_mode<synchronous>, transform_indices = @transform_2, window_bounds = array<i64: 1, 256>}, {pipeline_mode = #tpu.pipeline_mode<synchronous>, transform_indices = @transform_3, window_bounds = array<i64: 256, 512>}, {pipeline_mode = #tpu.pipeline_mode<synchronous>, transform_indices = @transform_4, window_bounds = array<i64: 1, 512>}, {pipeline_mode = #tpu.pipeline_mode<synchronous>, transform_indices = @transform_5, window_bounds = array<i64: 512, 1024>}, {pipeline_mode = #tpu.pipeline_mode<synchronous>, transform_indices = @transform_6, window_bounds = array<i64: 1, 1024>}, {pipeline_mode = #tpu.pipeline_mode<synchronous>, transform_indices = @transform_7, window_bounds = array<i64: 1024, 896>}, {pipeline_mode = #tpu.pipeline_mode<synchronous>, transform_indices = @transform_8, window_bounds = array<i64: 1, 896>}, {transform_indices = @transform_9, window_bounds = array<i64: 128, 896>}]} {
    %c0 = arith.constant 0 : index
    %c0_0 = arith.constant 0 : index
    %0 = vector.load %arg1[%c0, %c0_0] : memref<128x128xf32, #tpu.memory_space<vmem>>, vector<128x128xf32>
    %1 = arith.truncf %0 : vector<128x128xf32> to vector<128x128xbf16>
    %c0_1 = arith.constant 0 : index
    %c0_2 = arith.constant 0 : index
    %2 = vector.load %arg2[%c0_1, %c0_2] : memref<128x256xbf16, #tpu.memory_space<vmem>>, vector<128x256xbf16>
    %cst = arith.constant dense<0.000000e+00> : vector<128x256xf32>
    %3 = tpu.matmul %1, %2, %cst {dimension_numbers = #tpu.dot_dimension_numbers<[1], [0], [0], [1], [0, 0, 1, 1], [], []>} : vector<128x128xbf16>, vector<128x256xbf16>, vector<128x256xf32> -> vector<128x256xf32>
    %c0_3 = arith.constant 0 : index
    %c0_4 = arith.constant 0 : index
    %4 = vector.load %arg3[%c0_3, %c0_4] : memref<1x256xf32, #tpu.memory_space<vmem>>, vector<1x256xf32>
    %5 = vector.broadcast %4 : vector<1x256xf32> to vector<128x256xf32>
    %6 = arith.addf %3, %5 : vector<128x256xf32>
    %cst_5 = arith.constant 0.000000e+00 : f32
    %7 = vector.broadcast %cst_5 : f32 to vector<128x256xf32>
    %8 = arith.cmpf ogt, %6, %7 : vector<128x256xf32>
    %cst_6 = arith.constant 2.000000e-01 : f32
    %9 = vector.broadcast %cst_6 : f32 to vector<128x256xf32>
    %10 = arith.mulf %9, %6 : vector<128x256xf32>
    %11 = arith.select %8, %6, %10 : vector<128x256xi1>, vector<128x256xf32>
    %12 = arith.truncf %11 : vector<128x256xf32> to vector<128x256xbf16>
    %c0_7 = arith.constant 0 : index
    %c0_8 = arith.constant 0 : index
    %13 = vector.load %arg4[%c0_7, %c0_8] : memref<256x512xbf16, #tpu.memory_space<vmem>>, vector<256x512xbf16>
    %cst_9 = arith.constant dense<0.000000e+00> : vector<128x512xf32>
    %14 = tpu.matmul %12, %13, %cst_9 {dimension_numbers = #tpu.dot_dimension_numbers<[1], [0], [0], [1], [0, 0, 1, 1], [], []>} : vector<128x256xbf16>, vector<256x512xbf16>, vector<128x512xf32> -> vector<128x512xf32>
    %c0_10 = arith.constant 0 : index
    %c0_11 = arith.constant 0 : index
    %15 = vector.load %arg5[%c0_10, %c0_11] : memref<1x512xf32, #tpu.memory_space<vmem>>, vector<1x512xf32>
    %16 = vector.broadcast %15 : vector<1x512xf32> to vector<128x512xf32>
    %17 = arith.addf %14, %16 : vector<128x512xf32>
    %cst_12 = arith.constant 0.000000e+00 : f32
    %18 = vector.broadcast %cst_12 : f32 to vector<128x512xf32>
    %19 = arith.cmpf ogt, %17, %18 : vector<128x512xf32>
    %cst_13 = arith.constant 2.000000e-01 : f32
    %20 = vector.broadcast %cst_13 : f32 to vector<128x512xf32>
    %21 = arith.mulf %20, %17 : vector<128x512xf32>
    %22 = arith.select %19, %17, %21 : vector<128x512xi1>, vector<128x512xf32>
    %23 = arith.truncf %22 : vector<128x512xf32> to vector<128x512xbf16>
    %c0_14 = arith.constant 0 : index
    %c0_15 = arith.constant 0 : index
    %24 = vector.load %arg6[%c0_14, %c0_15] : memref<512x1024xbf16, #tpu.memory_space<vmem>>, vector<512x1024xbf16>
    %cst_16 = arith.constant dense<0.000000e+00> : vector<128x1024xf32>
    %25 = tpu.matmul %23, %24, %cst_16 {dimension_numbers = #tpu.dot_dimension_numbers<[1], [0], [0], [1], [0, 0, 1, 1], [], []>} : vector<128x512xbf16>, vector<512x1024xbf16>, vector<128x1024xf32> -> vector<128x1024xf32>
    %c0_17 = arith.constant 0 : index
    %c0_18 = arith.constant 0 : index
    %26 = vector.load %arg7[%c0_17, %c0_18] : memref<1x1024xf32, #tpu.memory_space<vmem>>, vector<1x1024xf32>
    %27 = vector.broadcast %26 : vector<1x1024xf32> to vector<128x1024xf32>
    %28 = arith.addf %25, %27 : vector<128x1024xf32>
    %cst_19 = arith.constant 0.000000e+00 : f32
    %29 = vector.broadcast %cst_19 : f32 to vector<128x1024xf32>
    %30 = arith.cmpf ogt, %28, %29 : vector<128x1024xf32>
    %cst_20 = arith.constant 2.000000e-01 : f32
    %31 = vector.broadcast %cst_20 : f32 to vector<128x1024xf32>
    %32 = arith.mulf %31, %28 : vector<128x1024xf32>
    %33 = arith.select %30, %28, %32 : vector<128x1024xi1>, vector<128x1024xf32>
    %34 = arith.truncf %33 : vector<128x1024xf32> to vector<128x1024xbf16>
    %c0_21 = arith.constant 0 : index
    %c0_22 = arith.constant 0 : index
    %35 = vector.load %arg8[%c0_21, %c0_22] : memref<1024x896xbf16, #tpu.memory_space<vmem>>, vector<1024x896xbf16>
    %cst_23 = arith.constant dense<0.000000e+00> : vector<128x896xf32>
    %36 = tpu.matmul %34, %35, %cst_23 {dimension_numbers = #tpu.dot_dimension_numbers<[1], [0], [0], [1], [0, 0, 1, 1], [], []>} : vector<128x1024xbf16>, vector<1024x896xbf16>, vector<128x896xf32> -> vector<128x896xf32>
    %c0_24 = arith.constant 0 : index
    %c0_25 = arith.constant 0 : index
    %37 = vector.load %arg9[%c0_24, %c0_25] : memref<1x896xf32, #tpu.memory_space<vmem>>, vector<1x896xf32>
    %38 = vector.broadcast %37 : vector<1x896xf32> to vector<128x896xf32>
    %39 = arith.addf %36, %38 : vector<128x896xf32>
    %40 = math.tanh %39 : vector<128x896xf32>
    %c0_26 = arith.constant 0 : index
    %c0_27 = arith.constant 0 : index
    %41 = vector.load %arg10[%c0_26, %c0_27] : memref<128x896xf32, #tpu.memory_space<vmem>>, vector<128x896xf32>
    tpu.vector_store %arg10[%c0_26, %c0_27], %40 {strides = array<i32>} : memref<128x896xf32, #tpu.memory_space<vmem>>, vector<128x896xf32>,
    return
  }
  func.func @transform_0(%arg0: i32) -> (i32, i32) {
    %c0_i32 = arith.constant 0 : i32
    %c0_i32_0 = arith.constant 0 : i32
    return %arg0, %c0_i32 : i32, i32
  }
  func.func @transform_1(%arg0: i32) -> (i32, i32) {
    %c0_i32 = arith.constant 0 : i32
    %c0_i32_0 = arith.constant 0 : i32
    %c0_i32_1 = arith.constant 0 : i32
    return %c0_i32, %c0_i32_0 : i32, i32
  }
  func.func @transform_2(%arg0: i32) -> (i32, i32) {
    %c0_i32 = arith.constant 0 : i32
    %c0_i32_0 = arith.constant 0 : i32
    %c0_i32_1 = arith.constant 0 : i32
    return %c0_i32, %c0_i32_0 : i32, i32
  }
  func.func @transform_3(%arg0: i32) -> (i32, i32) {
    %c0_i32 = arith.constant 0 : i32
    %c0_i32_0 = arith.constant 0 : i32
    %c0_i32_1 = arith.constant 0 : i32
    return %c0_i32, %c0_i32_0 : i32, i32
  }
  func.func @transform_4(%arg0: i32) -> (i32, i32) {
    %c0_i32 = arith.constant 0 : i32
    %c0_i32_0 = arith.constant 0 : i32
    %c0_i32_1 = arith.constant 0 : i32
    return %c0_i32, %c0_i32_0 : i32, i32
  }
  func.func @transform_5(%arg0: i32) -> (i32, i32) {
    %c0_i32 = arith.constant 0 : i32
    %c0_i32_0 = arith.constant 0 : i32
    %c0_i32_1 = arith.constant 0 : i32
    return %c0_i32, %c0_i32_0 : i32, i32
  }
  func.func @transform_6(%arg0: i32) -> (i32, i32) {
    %c0_i32 = arith.constant 0 : i32
    %c0_i32_0 = arith.constant 0 : i32
    %c0_i32_1 = arith.constant 0 : i32
    return %c0_i32, %c0_i32_0 : i32, i32
  }
  func.func @transform_7(%arg0: i32) -> (i32, i32) {
    %c0_i32 = arith.constant 0 : i32
    %c0_i32_0 = arith.constant 0 : i32
    %c0_i32_1 = arith.constant 0 : i32
    return %c0_i32, %c0_i32_0 : i32, i32
  }
  func.func @transform_8(%arg0: i32) -> (i32, i32) {
    %c0_i32 = arith.constant 0 : i32
    %c0_i32_0 = arith.constant 0 : i32
    %c0_i32_1 = arith.constant 0 : i32
    return %c0_i32, %c0_i32_0 : i32, i32
  }
  func.func @transform_9(%arg0: i32) -> (i32, i32) {
    %c0_i32 = arith.constant 0 : i32
    %c0_i32_0 = arith.constant 0 : i32
    return %arg0, %c0_i32 : i32, i32
  }
}

</mosaic_0001>

<bundles_post_ra>
// kernel: generator_forward.1
= control target key start
LH: loop header
LB: loop body
LE: loop exit
PB: predicated region body
PF: predicated region fallthrough
CT: control target
= control target key end

     0   :  { %s11484_s30 = smov 0   ;;  %s17065_s0 = inlined_call_operand.vmem [shape: f32[256,128], index: 0, kind: input, shape index: {}]   ;;  %s17066_s1 = inlined_call_operand.vmem [shape: bf16[128,256], index: 1, kind: input, shape index: {}]   ;;  %s17067_s2 = inlined_call_operand.vmem [shape: f32[1,256], index: 2, kind: input, shape index: {}]   ;;  %s17068_s3 = inlined_call_operand.vmem [shape: bf16[256,512], index: 3, kind: input, shape index: {}]   ;;  %s17069_s4 = inlined_call_operand.vmem [shape: f32[1,512], index: 4, kind: input, shape index: {}]   ;;  %s17070_s5 = inlined_call_operand.vmem [shape: bf16[512,1024], index: 5, kind: input, shape index: {}]   ;;  %s17071_s6 = inlined_call_operand.vmem [shape: f32[1,1024], index: 6, kind: input, shape index: {}]   ;;  %s17072_s7 = inlined_call_operand.vmem [shape: bf16[1024,896], index: 7, kind: input, shape index: {}]   ;;  %s17073_s8 = inlined_call_operand.vmem [shape: f32[1,896], index: 8, kind: input, shape index: {}]   ;;  %s17074_s9 = inlined_call_operand.vmem [shape: f32[256,896], index: 9, kind: output, shape index: {}]  }
   0x1 LB: > { %s9361_s10 = sadd.s32 4294967295, %s11431_s30   ;;  %p9365_p0 = scmp.ge.s32.totalorder %s11431_s30, 1  ;;  %s11431_s30 = sphi %s11484_s30, %s19_s30  }
   0x2   : > { %p288_p1 = scmp.lt.s32.totalorder %s11431_s30, 3 }
   0x4   : > { %p289_p2 = pnand %p9365_p0, %p288_p1 }
   0x6   : > { %292 = sbr.rel (%p289_p2) target bundleno = 1523 (0x5f3), region = 56 }
   0xb   : > { %v10438_v0 = vld [vmem:[%s17066_s1 + $0x74] ss:$8 sps:$4 sm:$0xff]   ;;  %v10440_v1 = vld [vmem:[%s17066_s1 + $0x70] ss:$8 sps:$4 sm:$0xff]   ;;  %v11433_v2 = vmov 0   ;;  %s9366_s25 = sshll.u32 %s9361_s10, 4 }
   0xc   : > { %503 = vmatprep.mubr.bf16.mxu0 %v11433_v2  ;;  %471 = vmatprep.subr.bf16.mxu0 %v10438_v0  ;;  %v10441_v3 = vld [vmem:[%s17066_s1 + $0x64] ss:$8 sps:$4 sm:$0xff]   ;;  %v10443_v4 = vld [vmem:[%s17066_s1 + $0x60] ss:$8 sps:$4 sm:$0xff]   ;;  %v10444_v5 = vld [vmem:[%s17066_s1 + $0x54] ss:$8 sps:$4 sm:$0xff]  }
   0xd   : > { %472 = vmatpush1.bf16.msra.mxu0 %v10440_v1  ;;  %v10446_v6 = vld [vmem:[%s17066_s1 + $0x50] ss:$8 sps:$4 sm:$0xff]   ;;  %v10447_v7 = vld [vmem:[%s17066_s1 + $0x44] ss:$8 sps:$4 sm:$0xff]   ;;  %v10449_v8 = vld [vmem:[%s17066_s1 + $0x40] ss:$8 sps:$4 sm:$0xff]  }
   0xe   : > { %473 = vmatprep.subr.bf16.mxu0 %v10441_v3  ;;  %v10450_v9 = vld [vmem:[%s17066_s1 + $0x34] ss:$8 sps:$4 sm:$0xff]   ;;  %p326_p3 = scmp.lt.s32.totalorder %s9366_s25, 31  ;;  %v10452_v10 = vld [vmem:[%s17066_s1 + $0x30] ss:$8 sps:$4 sm:$0xff]  }
   0xf   : > { %v10453_v11 = vld [vmem:[%s17066_s1 + $0x24] ss:$8 sps:$4 sm:$0xff]   ;;  %v10455_v13 = vld [vmem:[%s17066_s1 + $0x20] ss:$8 sps:$4 sm:$0xff]   ;;  %v10456_v16 = vld [vmem:[%s17066_s1 + $0x14] ss:$8 sps:$4 sm:$0xff]  }
  0x10   : > { %s17915_s25 = smov (!%p326_p3, %s9366_s25), 31  ;;  %v10462_v12 = vld [vmem:[%s17068_s3 + $0xe4] ss:$16 sps:$4 sm:$0xff]   ;;  %v10467_v14 = vld [vmem:[%s17068_s3 + $0xe0] ss:$16 sps:$4 sm:$0xff]  }
  0x11   : > { %474 = vmatpush1.bf16.msra.mxu0 %v10443_v4  ;;  %1102 = vmatprep.subr.bf16.mxu1 %v10462_v12  ;;  %v10468_v15 = vld [vmem:[%s17068_s3 + $0xc4] ss:$16 sps:$4 sm:$0xff]   ;;  %s9367_s24 = sshll.u32 %s17915_s25, 3  ;;  %v10473_v17 = vld [vmem:[%s17068_s3 + $0xc0] ss:$16 sps:$4 sm:$0xff]   ;;  %s10428_s11 = smul.u32 56, %s17915_s25 }
  0x12   : > { %475 = vmatprep.subr.bf16.mxu0 %v10444_v5  ;;  %1103 = vmatpush1.bf16.msra.mxu1 %v10467_v14  ;;  %v10474_v18 = vld [vmem:[%s17068_s3 + $0xa4] ss:$16 sps:$4 sm:$0xff]   ;;  %v10458_v19 = vld [vmem:[%s17066_s1 + $0x10] ss:$8 sps:$4 sm:$0xff]   ;;  %s11559_s16 = scalar_lea.vmem %s17065_s0, %s9367_s24  ;;  %v10461_v23 = vld [vmem:[%s17066_s1] ss:$8 sps:$4 sm:$0xff]  }
  0x13   : > { %1104 = vmatprep.subr.bf16.mxu1 %v10468_v15  ;;  %v10459_v20 = vld [vmem:[%s17066_s1 + $0x4] ss:$8 sps:$4 sm:$0xff]   ;;  %v10479_v21 = vld [vmem:[%s17068_s3 + $0xa0] ss:$16 sps:$4 sm:$0xff]   ;;  %v10464_v30 = vld [vmem:[%s17068_s3 + $0xe8] ss:$16 sps:$4 sm:$0xff]   ;;  %s15654_s21 = scalar_lea.vmem %s17074_s9, %s10428_s11 }
  0x14   : > { %v10480_v22 = vld [vmem:[%s17068_s3 + $0x84] ss:$16 sps:$4 sm:$0xff]   ;;  %v340_v25 = vld [vmem:[%s11559_s16 + $0x8] sm:$0xff]  ;;  %v10485_v27 = vld [vmem:[%s17068_s3 + $0x80] ss:$16 sps:$4 sm:$0xff]  }
  0x15   : > { %476 = vmatpush1.bf16.msra.mxu0 %v10446_v6  ;;  %v339_v24 = vld [vmem:[%s11559_s16] sm:$0xff]  ;;  %v10466_v26 = vld [vmem:[%s17068_s3 + $0xec] ss:$16 sps:$4 sm:$0xff]   ;;  %v341_v34 = vld [vmem:[%s11559_s16 + $0x10] sm:$0xff] }
  0x16   : > { %477 = vmatprep.subr.bf16.mxu0 %v10447_v7  ;;  %1105 = vmatpush1.bf16.msra.mxu1 %v10473_v17  ;;  %v10486_v28 = vld [vmem:[%s17068_s3 + $0x64] ss:$16 sps:$4 sm:$0xff]   ;;  %v355_v29 = vpack.c.bf16 %v340_v25, %v339_v24  ;;  %v10472_v31 = vld [vmem:[%s17068_s3 + $0xcc] ss:$16 sps:$4 sm:$0xff]   ;;  %v10491_v32 = vld [vmem:[%s17068_s3 + $0x60] ss:$16 sps:$4 sm:$0xff]  }
  0x17   : > { %1106 = vmatprep.subr.bf16.mxu1 %v10474_v18  ;;  %v10492_v33 = vld [vmem:[%s17068_s3 + $0x44] ss:$16 sps:$4 sm:$0xff]   ;;  %v342_v35 = vld [vmem:[%s11559_s16 + $0x18] sm:$0xff]  ;;  %v10497_v38 = vld [vmem:[%s17068_s3 + $0x40] ss:$16 sps:$4 sm:$0xff]  }
  0x18   : > { %v10470_v36 = vld [vmem:[%s17068_s3 + $0xc8] ss:$16 sps:$4 sm:$0xff]   ;;  %v10478_v37 = vld [vmem:[%s17068_s3 + $0xac] ss:$16 sps:$4 sm:$0xff]   ;;  %v10498_v39 = vld [vmem:[%s17068_s3 + $0x24] ss:$16 sps:$4 sm:$0xff]   ;;  %v356_v40 = vpack.c.bf16 %v342_v35, %v341_v34 }
  0x19   : > { %478 = vmatpush1.bf16.msra.mxu0 %v10449_v8  ;;  %v10476_v41 = vld [vmem:[%s17068_s3 + $0xa8] ss:$16 sps:$4 sm:$0xff]   ;;  %v10484_v42 = vld [vmem:[%s17068_s3 + $0x8c] ss:$16 sps:$4 sm:$0xff]   ;;  %v10503_v43 = vld [vmem:[%s17068_s3 + $0x20] ss:$16 sps:$4 sm:$0xff]  }
  0x1a   : > { %479 = vmatprep.subr.bf16.mxu0 %v10450_v9  ;;  %1107 = vmatpush1.bf16.msra.mxu1 %v10479_v21  ;;  %v10504_v44 = vld [vmem:[%s17068_s3 + $0x4] ss:$16 sps:$4 sm:$0xff]   ;;  %v344_v46 = vld [vmem:[%s11559_s16 + $0x28] sm:$0xff]  ;;  %v10509_v49 = vld [vmem:[%s17068_s3] ss:$16 sps:$4 sm:$0xff]  }
  0x1b   : > { %1108 = vmatprep.subr.bf16.mxu1 %v10480_v22  ;;  %v343_v45 = vld [vmem:[%s11559_s16 + $0x20] sm:$0xff]  ;;  %v10482_v47 = vld [vmem:[%s17068_s3 + $0x88] ss:$16 sps:$4 sm:$0xff]   ;;  %v10490_v48 = vld [vmem:[%s17068_s3 + $0x6c] ss:$16 sps:$4 sm:$0xff]  }
  0x1c   : > { %v10510_v50 = vld [vmem:[%s17068_s3 + $0x1e4] ss:$16 sps:$4 sm:$0xff]   ;;  %v357_v51 = vpack.c.bf16 %v344_v46, %v343_v45  ;;  %v10488_v52 = vld [vmem:[%s17068_s3 + $0x68] ss:$16 sps:$4 sm:$0xff]   ;;  %v10496_v53 = vld [vmem:[%s17068_s3 + $0x4c] ss:$16 sps:$4 sm:$0xff]  }
  0x1d   : > { %480 = vmatpush1.bf16.msra.mxu0 %v10452_v10  ;;  %v10515_v54 = vld [vmem:[%s17068_s3 + $0x1e0] ss:$16 sps:$4 sm:$0xff]   ;;  %v346_v56 = vld [vmem:[%s11559_s16 + $0x38] sm:$0xff]  ;;  %v10516_v58 = vld [vmem:[%s17068_s3 + $0x1c4] ss:$16 sps:$4 sm:$0xff]  }
  0x1e   : > { %481 = vmatprep.subr.bf16.mxu0 %v10453_v11  ;;  %1109 = vmatpush1.bf16.msra.mxu1 %v10485_v27  ;;  %v345_v55 = vld [vmem:[%s11559_s16 + $0x30] sm:$0xff]  ;;  %v10494_v57 = vld [vmem:[%s17068_s3 + $0x48] ss:$16 sps:$4 sm:$0xff]   ;;  %v10502_v59 = vld [vmem:[%s17068_s3 + $0x2c] ss:$16 sps:$4 sm:$0xff]  }
  0x1f   : > { %1110 = vmatprep.subr.bf16.mxu1 %v10486_v28  ;;  %v10521_v60 = vld [vmem:[%s17068_s3 + $0x1c0] ss:$16 sps:$4 sm:$0xff]   ;;  %v10522_v61 = vld [vmem:[%s17068_s3 + $0x1a4] ss:$16 sps:$4 sm:$0xff]   ;;  %v10500_v62 = vld [vmem:[%s17068_s3 + $0x28] ss:$16 sps:$4 sm:$0xff]   ;;  %v358_v63 = vpack.c.bf16 %v346_v56, %v345_v55 }
  0x20   : > { %v10508_v0 = vld [vmem:[%s17068_s3 + $0xc] ss:$16 sps:$4 sm:$0xff]   ;;  %v10527_v1 = vld [vmem:[%s17068_s3 + $0x1a0] ss:$16 sps:$4 sm:$0xff]   ;;  %v10528_v3 = vld [vmem:[%s17068_s3 + $0x184] ss:$16 sps:$4 sm:$0xff]  }
  0x21   : > { %482 = vmatpush1.bf16.msra.mxu0 %v10455_v13  ;;  %v347_v4 = vld [vmem:[%s11559_s16 + $0x40] sm:$0xff]  ;;  %v348_v5 = vld [vmem:[%s11559_s16 + $0x48] sm:$0xff]  ;;  %v349_v13 = vld [vmem:[%s11559_s16 + $0x50] sm:$0xff] }
  0x22   : > { %483 = vmatprep.subr.bf16.mxu0 %v10456_v16  ;;  %1111 = vmatpush1.bf16.msra.mxu1 %v10491_v32  ;;  %v10506_v6 = vld [vmem:[%s17068_s3 + $0x8] ss:$16 sps:$4 sm:$0xff]   ;;  %v10514_v7 = vld [vmem:[%s17068_s3 + $0x1ec] ss:$16 sps:$4 sm:$0xff]   ;;  %v10533_v8 = vld [vmem:[%s17068_s3 + $0x180] ss:$16 sps:$4 sm:$0xff]   ;;  %v359_v11 = vpack.c.bf16 %v348_v5, %v347_v4 }
  0x23   : > { %1112 = vmatprep.subr.bf16.mxu1 %v10492_v33  ;;  %v10534_v9 = vld [vmem:[%s17068_s3 + $0x164] ss:$16 sps:$4 sm:$0xff]   ;;  %v10512_v10 = vld [vmem:[%s17068_s3 + $0x1e8] ss:$16 sps:$4 sm:$0xff]   ;;  %v10520_v12 = vld [vmem:[%s17068_s3 + $0x1cc] ss:$16 sps:$4 sm:$0xff]  }
  0x24   : > { %v350_v14 = vld [vmem:[%s11559_s16 + $0x58] sm:$0xff]  ;;  %v352_v21 = vld [vmem:[%s11559_s16 + $0x68] sm:$0xff]  ;;  %v10545_v32 = vld [vmem:[%s17068_s3 + $0x140] ss:$16 sps:$4 sm:$0xff]  }
  0x25   : > { %484 = vmatpush1.bf16.msra.mxu0 %v10458_v19  ;;  %v10518_v15 = vld [vmem:[%s17068_s3 + $0x1c8] ss:$16 sps:$4 sm:$0xff]   ;;  %v10526_v16 = vld [vmem:[%s17068_s3 + $0x1ac] ss:$16 sps:$4 sm:$0xff]   ;;  %v360_v18 = vpack.c.bf16 %v350_v14, %v349_v13  ;;  %v10546_v33 = vld [vmem:[%s17068_s3 + $0x124] ss:$16 sps:$4 sm:$0xff]  }
  0x26   : > { %485 = vmatprep.subr.bf16.mxu0 %v10459_v20  ;;  %1113 = vmatpush1.bf16.msra.mxu1 %v10497_v38  ;;  %v10524_v17 = vld [vmem:[%s17068_s3 + $0x1a8] ss:$16 sps:$4 sm:$0xff]   ;;  %v10532_v19 = vld [vmem:[%s17068_s3 + $0x18c] ss:$16 sps:$4 sm:$0xff]   ;;  %v351_v20 = vld [vmem:[%s11559_s16 + $0x60] sm:$0xff] }
  0x27   : > { %1114 = vmatprep.subr.bf16.mxu1 %v10498_v39  ;;  %v10530_v22 = vld [vmem:[%s17068_s3 + $0x188] ss:$16 sps:$4 sm:$0xff]   ;;  %v361_v25 = vpack.c.bf16 %v352_v21, %v351_v20  ;;  %v10550_v34 = vld [vmem:[%s17068_s3 + $0x12c] ss:$16 sps:$4 sm:$0xff]   ;;  %v11786_v46 = vld [vmem:[%s17070_s5 + $0x5e0] sm:$0xff] }
  0x28   : > { %v10536_v24 = vld [vmem:[%s17068_s3 + $0x168] ss:$16 sps:$4 sm:$0xff]   ;;  %v10556_v38 = vld [vmem:[%s17068_s3 + $0x10c] ss:$16 sps:$4 sm:$0xff]   ;;  %v11816_v4 = vld [vmem:[%s17070_s5 + $0x180] sm:$0xff] }
  0x29   : > { %486 = vmatpush1.bf16.msra.mxu0 %v10461_v23  ;;  %v10538_v23 = vld [vmem:[%s17068_s3 + $0x16c] ss:$16 sps:$4 sm:$0xff]   ;;  %v10548_v35 = vld [vmem:[%s17068_s3 + $0x128] ss:$16 sps:$4 sm:$0xff]   ;;  %v11821_v5 = vld [vmem:[%s17070_s5 + $0x1a0] sm:$0xff] }
  0x2a   : > { %1215 = vmatprep.subr.bf16.mxu0 %v10466_v26  ;;  %1115 = vmatpush1.bf16.msra.mxu1 %v10503_v43  ;;  %v353_v26 = vld [vmem:[%s11559_s16 + $0x70] sm:$0xff]  ;;  %v354_v27 = vld [vmem:[%s11559_s16 + $0x78] sm:$0xff]  ;;  %v11777_v43 = vld [vmem:[%s17070_s5 + $0x5c0] sm:$0xff] }
  0x2b   : > { %1116 = vmatprep.subr.bf16.mxu1 %v10504_v44  ;;  %v362_v28 = vpack.c.bf16 %v354_v27, %v353_v26  ;;  %v10554_v39 = vld [vmem:[%s17068_s3 + $0x108] ss:$16 sps:$4 sm:$0xff]  }
  0x2c   : > { %504 = vmatmul.mubr.bf16.vlgmr.msra.gmra.mxu0 %v355_v29  ;;  %v10539_v29 = vld [vmem:[%s17068_s3 + $0x160] ss:$16 sps:$4 sm:$0xff]  }
  0x2d   : > { %513 = vmatprep.mubr.bf16.mxu0 %v11433_v2  ;;  %1216 = vmatpush1.bf16.msra.mxu0 %v10464_v30  ;;  %v10540_v30 = vld [vmem:[%s17068_s3 + $0x144] ss:$16 sps:$4 sm:$0xff]  }
  0x2e   : > { %1217 = vmatprep.subr.bf16.mxu0 %v10472_v31  ;;  %1117 = vmatpush1.bf16.msra.mxu1 %v10509_v49  ;;  %v10544_v31 = vld [vmem:[%s17068_s3 + $0x14c] ss:$16 sps:$4 sm:$0xff]   ;;  %v381_v49 = vlaneseq }
  0x2f   : > { %1118 = vmatprep.subr.bf16.mxu1 %v10510_v50 }
  0x30   : > { %v11792_v50 = vshrl.u32 %v381_v49, 7 }
  0x31   : > { %1218 = vmatpush1.bf16.msra.mxu0 %v10470_v36  ;;  %v10551_v36 = vld [vmem:[%s17068_s3 + $0x120] ss:$16 sps:$4 sm:$0xff]  }
  0x32   : > { %1219 = vmatprep.subr.bf16.mxu0 %v10478_v37  ;;  %1119 = vmatpush2.bf16.msra.mxu1 %v10515_v54  ;;  %v10552_v37 = vld [vmem:[%s17068_s3 + $0x104] ss:$16 sps:$4 sm:$0xff]   ;;  %17255 = vst [vmem:[#allocation2_spill] sm:$0xff] %v11792_v50 }
  0x33   : > { %1120 = vmatprep.subr.bf16.mxu1 %v10516_v58 }
  0x34   : > { %514 = vmatmul.mubr.bf16.gmra.mxu0 %v356_v40  ;;  %v10557_v40 = vld [vmem:[%s17068_s3 + $0x100] ss:$16 sps:$4 sm:$0xff]  }
  0x35   : > { %523 = vmatprep.mubr.bf16.mxu0 %v11433_v2  ;;  %1220 = vmatpush1.bf16.msra.mxu0 %v10476_v41  ;;  %v11767_v41 = vld [vmem:[%s17070_s5 + $0x1c0] sm:$0xff] }
  0x36   : > { %1221 = vmatprep.subr.bf16.mxu0 %v10484_v42  ;;  %1121 = vmatpush2.bf16.msra.mxu1 %v10521_v60  ;;  %v11772_v42 = vld [vmem:[%s17070_s5 + $0x1e0] sm:$0xff] }
  0x37   : > { %1122 = vmatprep.subr.bf16.mxu1 %v10522_v61  ;;  %v9506_v44 = vcombine.low %v11767_v41, %v11772_v42  ;;  %v9507_v45 = vcombine.high %v11767_v41, %v11772_v42 }
  0x39   : > { %1222 = vmatpush1.bf16.msra.mxu0 %v10482_v47  ;;  %v9634_v47 = vcombine.low %v11777_v43, %v11786_v46 }
  0x3a   : > { %1223 = vmatprep.subr.bf16.mxu0 %v10490_v48  ;;  %1123 = vmatpush2.bf16.msra.mxu1 %v10527_v1  ;;  %v9635_v48 = vcombine.high %v11777_v43, %v11786_v46 }
  0x3b   : > { %1124 = vmatprep.subr.bf16.mxu1 %v10528_v3 }
  0x3c   : > { %524 = vmatmul.mubr.bf16.gmra.mxu0 %v357_v51  ;;  %v11795_v51 = vsub.s32 0, %v11792_v50 }
  0x3d   : > { %533 = vmatprep.mubr.bf16.mxu0 %v11433_v2  ;;  %1224 = vmatpush1.bf16.msra.mxu0 %v10488_v52  ;;  %v11798_v52 = vsub.s32 1, %v11792_v50 }
  0x3e   : > { %1225 = vmatprep.subr.bf16.mxu0 %v10496_v53  ;;  %1125 = vmatpush2.bf16.msra.mxu1 %v10533_v8  ;;  %17256 = vst [vmem:[#allocation3_spill] sm:$0xff] %v11795_v51  ;;  %v379_v53 = vld [vmem:[%s17067_s2] sm:$0x3] }
  0x3f   : > { %1126 = vmatprep.subr.bf16.mxu1 %v10534_v9  ;;  %17257 = vst [vmem:[#allocation4_spill] sm:$0xff] %v11798_v52  ;;  %v11804_v54 = vrot.slane %v379_v53, %v11795_v51  ;;  %v11807_v55 = vrot.slane %v379_v53, %v11798_v52  ;;  %v11910_v53 = vld [vmem:[%s17070_s5 + $0xc0] sm:$0xff] }
  0x41   : > { %1226 = vmatpush1.bf16.msra.mxu0 %v10494_v57 }
  0x42   : > { %1227 = vmatprep.subr.bf16.mxu0 %v10502_v59  ;;  %1127 = vmatpush2.bf16.msra.mxu1 %v10539_v29 }
  0x43   : > { %1128 = vmatprep.subr.bf16.mxu1 %v10540_v30  ;;  %v9498_v30 = vcombine.low %v11816_v4, %v11821_v5 }
  0x44   : > { %534 = vmatmul.mubr.bf16.gmra.mxu0 %v358_v63 }
  0x45   : > { %543 = vmatprep.mubr.bf16.mxu0 %v11433_v2  ;;  %1228 = vmatpush1.bf16.msra.mxu0 %v10500_v62 }
  0x46   : > { %1229 = vmatprep.subr.bf16.mxu0 %v10508_v0  ;;  %1129 = vmatpush2.bf16.msra.mxu1 %v10545_v32 }
  0x47   : > { %1130 = vmatprep.subr.bf16.mxu1 %v10546_v33 }
  0x49   : > { %1230 = vmatpush1.bf16.msra.mxu0 %v10506_v6  ;;  %v11826_v6 = vld [vmem:[%s17070_s5 + $0x580] sm:$0xff] }
  0x4a   : > { %1231 = vmatprep.subr.bf16.mxu0 %v10514_v7  ;;  %1131 = vmatpush2.bf16.msra.mxu1 %v10551_v36  ;;  %v11831_v7 = vld [vmem:[%s17070_s5 + $0x5a0] sm:$0xff] }
  0x4b   : > { %1132 = vmatprep.subr.bf16.mxu1 %v10552_v37  ;;  %v9626_v37 = vcombine.low %v11826_v6, %v11831_v7 }
  0x4c   : > { %544 = vmatmul.mubr.bf16.gmra.mxu0 %v359_v11 }
  0x4d   : > { %553 = vmatprep.mubr.bf16.mxu0 %v11433_v2  ;;  %1232 = vmatpush2.bf16.msra.mxu0 %v10512_v10 }
  0x4e   : > { %1233 = vmatprep.subr.bf16.mxu0 %v10520_v12  ;;  %1133 = vmatpush2.bf16.msra.mxu1 %v10557_v40 }
  0x4f   : > { %3130 = vmatprep.subr.bf16.mxu1 %v9507_v45 }
  0x51   : > { %1234 = vmatpush2.bf16.msra.mxu0 %v10518_v15 }
  0x52   : > { %1235 = vmatprep.subr.bf16.mxu0 %v10526_v16  ;;  %v11838_v16 = vld [vmem:[%s17070_s5 + $0x140] sm:$0xff] }
  0x54   : > { %554 = vmatmul.mubr.bf16.gmra.mxu0 %v360_v18  ;;  %v11848_v18 = vld [vmem:[%s17070_s5 + $0x540] sm:$0xff] }
  0x55   : > { %563 = vmatprep.mubr.bf16.mxu0 %v11433_v2  ;;  %1236 = vmatpush2.bf16.msra.mxu0 %v10524_v17  ;;  %v11843_v17 = vld [vmem:[%s17070_s5 + $0x160] sm:$0xff] }
  0x56   : > { %1237 = vmatprep.subr.bf16.mxu0 %v10532_v19  ;;  %v11853_v19 = vld [vmem:[%s17070_s5 + $0x560] sm:$0xff]  ;;  %v9490_v43 = vcombine.low %v11838_v16, %v11843_v17 }
  0x59   : > { %1238 = vmatpush2.bf16.msra.mxu0 %v10530_v22 }
  0x5a   : > { %1239 = vmatprep.subr.bf16.mxu0 %v10538_v23  ;;  %v9499_v23 = vcombine.high %v11816_v4, %v11821_v5  ;;  %v11935_v5 = vld [vmem:[%s17070_s5 + $0x80] sm:$0xff] }
  0x5c   : > { %564 = vmatmul.mubr.bf16.gmra.mxu0 %v361_v25 }
  0x5d   : > { %573 = vmatprep.mubr.bf16.mxu0 %v11433_v2  ;;  %1240 = vmatpush2.bf16.msra.mxu0 %v10536_v24  ;;  %v10542_v2 = vld [vmem:[%s17068_s3 + $0x148] ss:$16 sps:$4 sm:$0xff]   ;;  %v9627_v24 = vcombine.high %v11826_v6, %v11831_v7  ;;  %v11940_v6 = vld [vmem:[%s17070_s5 + $0xa0] sm:$0xff] }
  0x5e   : > { %1241 = vmatprep.subr.bf16.mxu0 %v10544_v31  ;;  %v11865_v31 = vld [vmem:[%s17070_s5 + $0x100] sm:$0xff] }
  0x61   : > { %1242 = vmatpush2.bf16.msra.mxu0 %v10542_v2  ;;  %v11870_v2 = vld [vmem:[%s17070_s5 + $0x120] sm:$0xff] }
  0x62   : > { %1243 = vmatprep.subr.bf16.mxu0 %v10550_v34  ;;  %v11876_v34 = vld [vmem:[%s17070_s5 + $0x500] sm:$0xff]  ;;  %v9483_v49 = vcombine.high %v11865_v31, %v11870_v2 }
  0x64   : > { %574 = vmatmul.mubr.bf16.gmra.mxu0 %v362_v28 }
  0x65   : > { %1244 = vmatpush2.bf16.msra.mxu0 %v10548_v35  ;;  %v11881_v35 = vld [vmem:[%s17070_s5 + $0x520] sm:$0xff] }
  0x66   : > { %1245 = vmatprep.subr.bf16.mxu0 %v10556_v38  ;;  %v9491_v38 = vcombine.high %v11838_v16, %v11843_v17 }
  0x69   : > { %1246 = vmatpush2.bf16.msra.mxu0 %v10554_v39  ;;  %v9619_v39 = vcombine.high %v11848_v18, %v11853_v19 }
  0x6a   : > { %3243 = vmatprep.subr.bf16.mxu0 %v9635_v48 }
  0xec   : > { %v505_v56 = vpop.f32.mrf.mxu0 }
  0xed   : > { %v506_v57 = vadd.f32 %v505_v56, %v11804_v54  ;;  %v11915_v56 = vld [vmem:[%s17070_s5 + $0xe0] sm:$0xff] }
  0xee   : > { %v507_v58 = vpop.f32.mrf.mxu0 }
  0xef   : > { %v508_v59 = vadd.f32 %v507_v58, %v11807_v55  ;;  %v616_v61 = vmul.f32 0.2, %v506_v57  ;;  %vm584_vm2 = vcmp.gt.f32.partialorder %v506_v57, 0.0 }
  0xf0   : > { %v509_v60 = vpop.f32.mrf.mxu0 }
  0xf1   : > { %v617_v62 = vmul.f32 0.2, %v508_v59  ;;  %v510_v63 = vadd.f32 %v509_v60, %v11804_v54  ;;  %vm585_vm1 = vcmp.gt.f32.partialorder %v508_v59, 0.0  ;;  %v648_v22 = vsel %vm584_vm2, %v506_v57, %v616_v61  ;;  %v11923_v61 = vld [vmem:[%s17070_s5 + $0x4c0] sm:$0xff] }
  0xf2   : > { %v511_v0 = vpop.f32.mrf.mxu0  ;;  %v9611_v60 = vcombine.high %v11876_v34, %v11881_v35 }
  0xf3   : > { %vm586_vm0 = vcmp.gt.f32.partialorder %v510_v63, 0.0  ;;  %v618_v1 = vmul.f32 0.2, %v510_v63  ;;  %v512_v3 = vadd.f32 %v511_v0, %v11807_v55  ;;  %v649_v14 = vsel %vm585_vm1, %v508_v59, %v617_v62  ;;  %v11928_v62 = vld [vmem:[%s17070_s5 + $0x4e0] sm:$0xff] }
  0xf4   : > { %v515_v8 = vpop.f32.mrf.mxu0  ;;  %v9603_v16 = vcombine.high %v11923_v61, %v11928_v62 }
  0xf5   : > { %v619_v9 = vmul.f32 0.2, %v512_v3  ;;  %v516_v10 = vadd.f32 %v515_v8, %v11804_v54  ;;  %vm587_vm3 = vcmp.gt.f32.partialorder %v512_v3, 0.0  ;;  %v650_v12 = vsel %vm586_vm0, %v510_v63, %v618_v1 }
  0xf6   : > { %v517_v11 = vpop.f32.mrf.mxu0  ;;  %v680_v28 = vpack.c.bf16 %v650_v12, %v648_v22  ;;  %v9475_v12 = vcombine.high %v11910_v53, %v11915_v56 }
  0xf7   : > { %v518_v13 = vadd.f32 %v517_v11, %v11807_v55  ;;  %v651_v15 = vsel %vm587_vm3, %v512_v3, %v619_v9  ;;  %v620_v25 = vmul.f32 0.2, %v516_v10  ;;  %vm588_vm6 = vcmp.gt.f32.partialorder %v516_v10, 0.0 }
  0xf8   : > { %v519_v20 = vpop.f32.mrf.mxu0  ;;  %v681_v21 = vpack.c.bf16 %v651_v15, %v649_v14  ;;  %v9610_v11 = vcombine.low %v11876_v34, %v11881_v35  ;;  %v11957_v14 = vld [vmem:[%s17070_s5 + $0x4a0] sm:$0xff]  ;;  %v9466_v35 = vcombine.low %v11935_v5, %v11940_v6 }
  0xf9   : > { %v621_v26 = vmul.f32 0.2, %v518_v13  ;;  %v520_v27 = vadd.f32 %v519_v20, %v11804_v54  ;;  %vm589_vm4 = vcmp.gt.f32.partialorder %v518_v13, 0.0  ;;  %v652_v59 = vsel %vm588_vm6, %v516_v10, %v620_v25  ;;  %v11974_v25 = vld [vmem:[%s17070_s5 + $0x40] sm:$0xff] }
  0xfa   : > { %v521_v29 = vpop.f32.mrf.mxu0  ;;  %1134 = vmatprep.mubr.bf16.mxu1 %v681_v21  ;;  %1247 = vmatprep.mubr.bf16.mxu0 %v681_v21  ;;  %v9482_v10 = vcombine.low %v11865_v31, %v11870_v2  ;;  %v9602_v20 = vcombine.low %v11923_v61, %v11928_v62 }
  0xfb   : > { %vm590_vm5 = vcmp.gt.f32.partialorder %v520_v27, 0.0  ;;  %v622_v32 = vmul.f32 0.2, %v520_v27  ;;  %v522_v33 = vadd.f32 %v521_v29, %v11807_v55  ;;  %1135 = vmatmul.mubr.bf16.vlgmr.msra.gmra.mxu1 %v680_v28  ;;  %1248 = vmatmul.mubr.bf16.vlgmr.msra.gmra.mxu0 %v680_v28 }
  0xfc   : > { %v525_v36 = vpop.f32.mrf.mxu0  ;;  %3131 = vmatpush1.bf16.msra.mxu1 %v9506_v44  ;;  %3244 = vmatpush1.bf16.msra.mxu0 %v9634_v47  ;;  %v9618_v44 = vcombine.low %v11848_v18, %v11853_v19  ;;  %v653_v47 = vsel %vm589_vm4, %v518_v13, %v621_v26  ;;  %v11952_v13 = vld [vmem:[%s17070_s5 + $0x480] sm:$0xff]  ;;  %v9474_v19 = vcombine.low %v11910_v53, %v11915_v56 }
  0xfd   : > { %vm591_vm7 = vcmp.gt.f32.partialorder %v522_v33, 0.0  ;;  %v623_v40 = vmul.f32 0.2, %v522_v33  ;;  %v11896_v45 = vadd.f32 %v525_v36, %v11804_v54  ;;  %3132 = vmatprep.subr.bf16.mxu1 %v9499_v23  ;;  %3245 = vmatprep.subr.bf16.mxu0 %v9627_v24  ;;  %v654_v42 = vsel %vm590_vm5, %v520_v27, %v622_v32  ;;  %v11986_v32 = vld [vmem:[%s17070_s5 + $0x60] sm:$0xff] }
  0xfe   : > { %v527_v41 = vpop.f32.mrf.mxu0  ;;  %v682_v3 = vpack.c.bf16 %v654_v42, %v652_v59  ;;  %v9467_v24 = vcombine.high %v11935_v5, %v11940_v6  ;;  %v9595_v2 = vcombine.high %v11952_v13, %v11957_v14  ;;  %v1692_v36 = vld [vmem:[%s17070_s5 + $0x460] sm:$0xff]  ;;  %v9459_v42 = vcombine.high %v11974_v25, %v11986_v32 }
  0xff   : > { %v528_v46 = vadd.f32 %v527_v41, %v11807_v55  ;;  %v655_v48 = vsel %vm591_vm7, %v522_v33, %v623_v40  ;;  %v624_v63 = vmul.f32 0.2, %v11896_v45  ;;  %vm592_vm10 = vcmp.gt.f32.partialorder %v11896_v45, 0.0  ;;  %v11991_v33 = vld [vmem:[%s17070_s5 + $0x440] sm:$0xff] }
 0x100   : > { %v529_v57 = vpop.f32.mrf.mxu0  ;;  %v683_v58 = vpack.c.bf16 %v655_v48, %v653_v47  ;;  %3133 = vmatpush1.bf16.msra.mxu1 %v9498_v30  ;;  %3246 = vmatpush1.bf16.msra.mxu0 %v9626_v37  ;;  %v9594_v41 = vcombine.low %v11952_v13, %v11957_v14  ;;  %v9587_v47 = vcombine.high %v11991_v33, %v1692_v36 }
 0x101   : > { %v625_v0 = vmul.f32 0.2, %v528_v46  ;;  %v530_v1 = vadd.f32 %v529_v57, %v11804_v54  ;;  %3134 = vmatprep.subr.bf16.mxu1 %v9491_v38  ;;  %3247 = vmatprep.subr.bf16.mxu0 %v9619_v39  ;;  %vm593_vm8 = vcmp.gt.f32.partialorder %v528_v46, 0.0  ;;  %v656_v29 = vsel %vm592_vm10, %v11896_v45, %v624_v63  ;;  %v1680_v57 = vld [vmem:[%s17070_s5 + $0x400] sm:$0xff] }
 0x102   : > { %v531_v4 = vpop.f32.mrf.mxu0  ;;  %1144 = vmatprep.mubr.bf16.mxu1 %v683_v58  ;;  %1257 = vmatprep.mubr.bf16.mxu0 %v683_v58  ;;  %v9458_v53 = vcombine.low %v11974_v25, %v11986_v32  ;;  %v9586_v56 = vcombine.low %v11991_v33, %v1692_v36  ;;  %v1684_v58 = vld [vmem:[%s17070_s5 + $0x420] sm:$0xff] }
 0x103   : > { %vm594_vm9 = vcmp.gt.f32.partialorder %v530_v1, 0.0  ;;  %v626_v7 = vmul.f32 0.2, %v530_v1  ;;  %v532_v8 = vadd.f32 %v531_v4, %v11807_v55  ;;  %1145 = vmatmul.mubr.bf16.gmra.mxu1 %v682_v3  ;;  %1258 = vmatmul.mubr.bf16.gmra.mxu0 %v682_v3  ;;  %v657_v22 = vsel %vm593_vm8, %v528_v46, %v625_v0 }
 0x104   : > { %v535_v9 = vpop.f32.mrf.mxu0  ;;  %3135 = vmatpush1.bf16.msra.mxu1 %v9490_v43  ;;  %3248 = vmatpush1.bf16.msra.mxu0 %v9618_v44  ;;  %v12006_v43 = vld [vmem:[%s17070_s5] sm:$0xff]  ;;  %v9579_v6 = vcombine.high %v1680_v57, %v1684_v58 }
 0x105   : > { %vm595_vm11 = vcmp.gt.f32.partialorder %v532_v8, 0.0  ;;  %v627_v15 = vmul.f32 0.2, %v532_v8  ;;  %3136 = vmatprep.subr.bf16.mxu1 %v9483_v49  ;;  %3249 = vmatprep.subr.bf16.mxu0 %v9611_v60  ;;  %v658_v18 = vsel %vm594_vm9, %v530_v1, %v626_v7  ;;  %v536_v26 = vadd.f32 %v535_v9, %v11804_v54  ;;  %v12011_v44 = vld [vmem:[%s17070_s5 + $0x20] sm:$0xff] }
 0x106   : > { %v537_v17 = vpop.f32.mrf.mxu0  ;;  %v684_v31 = vpack.c.bf16 %v658_v18, %v656_v29  ;;  %v9451_v62 = vcombine.high %v12006_v43, %v12011_v44  ;;  %v12034_v7 = vld [vmem:[%s17070_s5 + $0x3c0] sm:$0xff]  ;;  %v9578_v18 = vcombine.low %v1680_v57, %v1684_v58 }
 0x107   : > { %v538_v21 = vadd.f32 %v537_v17, %v11807_v55  ;;  %v659_v23 = vsel %vm595_vm11, %v532_v8, %v627_v15  ;;  %v628_v40 = vmul.f32 0.2, %v536_v26  ;;  %vm596_vm14 = vcmp.gt.f32.partialorder %v536_v26, 0.0  ;;  %v12039_v8 = vld [vmem:[%s17070_s5 + $0x3e0] sm:$0xff] }
 0x108   : > { %v539_v27 = vpop.f32.mrf.mxu0  ;;  %v685_v28 = vpack.c.bf16 %v659_v23, %v657_v22  ;;  %3137 = vmatpush1.bf16.msra.mxu1 %v9482_v10  ;;  %3250 = vmatpush1.bf16.msra.mxu0 %v9610_v11  ;;  %v9450_v10 = vcombine.low %v12006_v43, %v12011_v44  ;;  %v1800_v11 = vld [vmem:[%s17070_s5 + $0x7c0] sm:$0xff] }
 0x109   : > { %v540_v30 = vadd.f32 %v539_v27, %v11804_v54  ;;  %3138 = vmatprep.subr.bf16.mxu1 %v9475_v12  ;;  %3251 = vmatprep.subr.bf16.mxu0 %v9603_v16  ;;  %v629_v37 = vmul.f32 0.2, %v538_v21  ;;  %vm597_vm13 = vcmp.gt.f32.partialorder %v538_v21, 0.0  ;;  %v660_v3 = vsel %vm596_vm14, %v536_v26, %v628_v40  ;;  %v1804_v12 = vld [vmem:[%s17070_s5 + $0x7e0] sm:$0xff] }
 0x10a   : > { %v541_v34 = vpop.f32.mrf.mxu0  ;;  %1154 = vmatprep.mubr.bf16.mxu1 %v685_v28  ;;  %1267 = vmatprep.mubr.bf16.mxu0 %v685_v28  ;;  %v9699_v23 = vcombine.high %v1800_v11, %v1804_v12  ;;  %v9570_v26 = vcombine.low %v12034_v7, %v12039_v8  ;;  %v9698_v27 = vcombine.low %v1800_v11, %v1804_v12  ;;  %v1792_v28 = vld [vmem:[%s17070_s5 + $0x780] sm:$0xff] }
 0x10b   : > { %vm598_vm12 = vcmp.gt.f32.partialorder %v540_v30, 0.0  ;;  %v630_v38 = vmul.f32 0.2, %v540_v30  ;;  %v542_v39 = vadd.f32 %v541_v34, %v11807_v55  ;;  %1155 = vmatmul.mubr.bf16.gmra.mxu1 %v684_v31  ;;  %1268 = vmatmul.mubr.bf16.gmra.mxu0 %v684_v31  ;;  %v661_v60 = vsel %vm597_vm13, %v538_v21, %v629_v37  ;;  %v12060_v21 = vld [vmem:[%s17070_s5 + $0x3a0] sm:$0xff] }
 0x10c   : > { %v545_v45 = vpop.f32.mrf.mxu0  ;;  %3139 = vmatpush1.bf16.msra.mxu1 %v9474_v19  ;;  %3252 = vmatpush1.bf16.msra.mxu0 %v9602_v20  ;;  %v9571_v19 = vcombine.high %v12034_v7, %v12039_v8  ;;  %v12055_v20 = vld [vmem:[%s17070_s5 + $0x380] sm:$0xff] }
 0x10d   : > { %vm599_vm15 = vcmp.gt.f32.partialorder %v542_v39, 0.0  ;;  %v631_v46 = vmul.f32 0.2, %v542_v39  ;;  %3140 = vmatprep.subr.bf16.mxu1 %v9467_v24  ;;  %3253 = vmatprep.subr.bf16.mxu0 %v9595_v2  ;;  %v662_v49 = vsel %vm598_vm12, %v540_v30, %v630_v38  ;;  %v546_v63 = vadd.f32 %v545_v45, %v11804_v54  ;;  %v1796_v29 = vld [vmem:[%s17070_s5 + $0x7a0] sm:$0xff] }
 0x10e   : > { %v547_v48 = vpop.f32.mrf.mxu0  ;;  %v686_v5 = vpack.c.bf16 %v662_v49, %v660_v3  ;;  %v9563_v32 = vcombine.high %v12055_v20, %v12060_v21  ;;  %v12081_v40 = vld [vmem:[%s17070_s5 + $0x340] sm:$0xff] }
 0x10f   : > { %v548_v59 = vadd.f32 %v547_v48, %v11807_v55  ;;  %v663_v61 = vsel %vm599_vm15, %v542_v39, %v631_v46  ;;  %v632_v16 = vmul.f32 0.2, %v546_v63  ;;  %vm600_vm2 = vcmp.gt.f32.partialorder %v546_v63, 0.0  ;;  %v12086_v45 = vld [vmem:[%s17070_s5 + $0x360] sm:$0xff] }
 0x110   : > { %v549_v0 = vpop.f32.mrf.mxu0  ;;  %v687_v1 = vpack.c.bf16 %v663_v61, %v661_v60  ;;  %3141 = vmatpush1.bf16.msra.mxu1 %v9466_v35  ;;  %3254 = vmatpush1.bf16.msra.mxu0 %v9594_v41  ;;  %v9691_v39 = vcombine.high %v1792_v28, %v1796_v29  ;;  %v1784_v43 = vld [vmem:[%s17070_s5 + $0x740] sm:$0xff]  ;;  %v9555_v57 = vcombine.high %v12081_v40, %v12086_v45 }
 0x111   : > { %v550_v4 = vadd.f32 %v549_v0, %v11804_v54  ;;  %3142 = vmatprep.subr.bf16.mxu1 %v9459_v42  ;;  %3255 = vmatprep.subr.bf16.mxu0 %v9587_v47  ;;  %v633_v13 = vmul.f32 0.2, %v548_v59  ;;  %vm601_vm1 = vcmp.gt.f32.partialorder %v548_v59, 0.0  ;;  %v664_v36 = vsel %vm600_vm2, %v546_v63, %v632_v16  ;;  %v1788_v44 = vld [vmem:[%s17070_s5 + $0x760] sm:$0xff] }
 0x112   : > { %v551_v9 = vpop.f32.mrf.mxu0  ;;  %1164 = vmatprep.mubr.bf16.mxu1 %v687_v1  ;;  %1277 = vmatprep.mubr.bf16.mxu0 %v687_v1  ;;  %v9562_v42 = vcombine.low %v12055_v20, %v12060_v21  ;;  %v12102_v58 = vld [vmem:[%s17070_s5 + $0x300] sm:$0xff]  ;;  %v9683_v61 = vcombine.high %v1784_v43, %v1788_v44  ;;  %v9554_v0 = vcombine.low %v12081_v40, %v12086_v45 }
 0x113   : > { %vm602_vm0 = vcmp.gt.f32.partialorder %v550_v4, 0.0  ;;  %v634_v14 = vmul.f32 0.2, %v550_v4  ;;  %v552_v15 = vadd.f32 %v551_v9, %v11807_v55  ;;  %1165 = vmatmul.mubr.bf16.gmra.mxu1 %v686_v5  ;;  %1278 = vmatmul.mubr.bf16.gmra.mxu0 %v686_v5  ;;  %v665_v31 = vsel %vm601_vm1, %v548_v59, %v633_v13  ;;  %v12107_v59 = vld [vmem:[%s17070_s5 + $0x320] sm:$0xff] }
 0x114   : > { %v555_v17 = vpop.f32.mrf.mxu0  ;;  %3143 = vmatpush1.bf16.msra.mxu1 %v9458_v53  ;;  %3256 = vmatpush1.bf16.msra.mxu0 %v9586_v56  ;;  %v9690_v56 = vcombine.low %v1792_v28, %v1796_v29  ;;  %v9682_v1 = vcombine.low %v1784_v43, %v1788_v44  ;;  %v1776_v3 = vld [vmem:[%s17070_s5 + $0x700] sm:$0xff]  ;;  %v9547_v8 = vcombine.high %v12102_v58, %v12107_v59 }
 0x115   : > { %vm603_vm3 = vcmp.gt.f32.partialorder %v552_v15, 0.0  ;;  %v635_v22 = vmul.f32 0.2, %v552_v15  ;;  %3144 = vmatprep.subr.bf16.mxu1 %v9451_v62  ;;  %3257 = vmatprep.subr.bf16.mxu0 %v9579_v6  ;;  %v666_v25 = vsel %vm602_vm0, %v550_v4, %v634_v14  ;;  %v556_v33 = vadd.f32 %v555_v17, %v11804_v54  ;;  %v1780_v4 = vld [vmem:[%s17070_s5 + $0x720] sm:$0xff] }
 0x116   : > { %v557_v24 = vpop.f32.mrf.mxu0  ;;  %v688_v38 = vpack.c.bf16 %v666_v25, %v664_v36  ;;  %v1640_v16 = vld [vmem:[%s17070_s5 + $0x2c0] sm:$0xff] }
 0x117   : > { %v558_v30 = vadd.f32 %v557_v24, %v11807_v55  ;;  %v667_v2 = vsel %vm603_vm3, %v552_v15, %v635_v22  ;;  %v636_v49 = vmul.f32 0.2, %v556_v33  ;;  %vm604_vm6 = vcmp.gt.f32.partialorder %v556_v33, 0.0  ;;  %v1644_v17 = vld [vmem:[%s17070_s5 + $0x2e0] sm:$0xff] }
 0x118   : > { %v559_v34 = vpop.f32.mrf.mxu0  ;;  %v689_v35 = vpack.c.bf16 %v667_v2, %v665_v31  ;;  %3145 = vmatpush1.bf16.msra.mxu1 %v9450_v10  ;;  %3258 = vmatpush1.bf16.msra.mxu0 %v9578_v18  ;;  %v9675_v15 = vcombine.high %v1776_v3, %v1780_v4  ;;  %v1768_v20 = vld [vmem:[%s17070_s5 + $0x6c0] sm:$0xff]  ;;  %v9539_v28 = vcombine.high %v1640_v16, %v1644_v17 }
 0x119   : > { %v560_v37 = vadd.f32 %v559_v34, %v11804_v54  ;;  %3146 = vmatprep.subr.bf16.mxu1 %v9571_v19  ;;  %3259 = vmatprep.subr.bf16.mxu0 %v9699_v23  ;;  %v637_v46 = vmul.f32 0.2, %v558_v30  ;;  %vm605_vm5 = vcmp.gt.f32.partialorder %v558_v30, 0.0  ;;  %v668_v12 = vsel %vm604_vm6, %v556_v33, %v636_v49  ;;  %v1772_v21 = vld [vmem:[%s17070_s5 + $0x6e0] sm:$0xff] }
 0x11a   : > { %v561_v41 = vpop.f32.mrf.mxu0  ;;  %1174 = vmatprep.mubr.bf16.mxu1 %v689_v35  ;;  %1287 = vmatprep.mubr.bf16.mxu0 %v689_v35  ;;  %v9546_v19 = vcombine.low %v12102_v58, %v12107_v59  ;;  %v9666_v36 = vcombine.low %v1768_v20, %v1772_v21  ;;  %v1636_v59 = vld [vmem:[%s17070_s5 + $0x2a0] sm:$0xff] }
 0x11b   : > { %vm606_vm4 = vcmp.gt.f32.partialorder %v560_v37, 0.0  ;;  %v638_v47 = vmul.f32 0.2, %v560_v37  ;;  %v562_v48 = vadd.f32 %v561_v41, %v11807_v55  ;;  %1175 = vmatmul.mubr.bf16.gmra.mxu1 %v688_v38  ;;  %1288 = vmatmul.mubr.bf16.gmra.mxu0 %v688_v38  ;;  %v669_v6 = vsel %vm605_vm5, %v558_v30, %v637_v46 }
 0x11c   : > { %v565_v53 = vpop.f32.mrf.mxu0  ;;  %3147 = vmatpush2.bf16.msra.mxu1 %v9570_v26  ;;  %3260 = vmatpush2.bf16.msra.mxu0 %v9698_v27  ;;  %v9674_v27 = vcombine.low %v1776_v3, %v1780_v4  ;;  %v9667_v30 = vcombine.high %v1768_v20, %v1772_v21  ;;  %v1624_v3 = vld [vmem:[%s17070_s5 + $0x240] sm:$0xff]  ;;  %v12191_v20 = vld [vmem:[%s17070_s5 + $0x1e8] sm:$0xff] }
 0x11d   : > { %vm607_vm7 = vcmp.gt.f32.partialorder %v562_v48, 0.0  ;;  %v639_v60 = vmul.f32 0.2, %v562_v48  ;;  %3148 = vmatprep.subr.bf16.mxu1 %v9563_v32  ;;  %3261 = vmatprep.subr.bf16.mxu0 %v9691_v39  ;;  %v670_v63 = vsel %vm606_vm4, %v560_v37, %v638_v47  ;;  %v566_v9 = vadd.f32 %v565_v53, %v11804_v54  ;;  %v1628_v4 = vld [vmem:[%s17070_s5 + $0x260] sm:$0xff]  ;;  %v12196_v21 = vld [vmem:[%s17070_s5 + $0x5c8] sm:$0xff] }
 0x11e   : > { %v567_v62 = vpop.f32.mrf.mxu0  ;;  %v690_v14 = vpack.c.bf16 %v670_v63, %v668_v12  ;;  %v9538_v32 = vcombine.low %v1640_v16, %v1644_v17  ;;  %v1620_v12 = vld [vmem:[%s17070_s5 + $0x220] sm:$0xff] }
 0x11f   : > { %v568_v5 = vadd.f32 %v567_v62, %v11807_v55  ;;  %v671_v7 = vsel %vm607_vm7, %v562_v48, %v639_v60  ;;  %v640_v25 = vmul.f32 0.2, %v566_v9  ;;  %vm608_vm10 = vcmp.gt.f32.partialorder %v566_v9, 0.0  ;;  %v1760_v60 = vld [vmem:[%s17070_s5 + $0x680] sm:$0xff] }
 0x120   : > { %v569_v10 = vpop.f32.mrf.mxu0  ;;  %v691_v11 = vpack.c.bf16 %v671_v7, %v669_v6  ;;  %3149 = vmatpush2.bf16.msra.mxu1 %v9562_v42  ;;  %3262 = vmatpush2.bf16.msra.mxu0 %v9690_v56  ;;  %v1764_v62 = vld [vmem:[%s17070_s5 + $0x6a0] sm:$0xff]  ;;  %v9523_v6 = vcombine.high %v1624_v3, %v1628_v4 }
 0x121   : > { %v570_v13 = vadd.f32 %v569_v10, %v11804_v54  ;;  %3150 = vmatprep.subr.bf16.mxu1 %v9555_v57  ;;  %3263 = vmatprep.subr.bf16.mxu0 %v9683_v61  ;;  %v641_v22 = vmul.f32 0.2, %v568_v5  ;;  %vm609_vm9 = vcmp.gt.f32.partialorder %v568_v5, 0.0  ;;  %v672_v40 = vsel %vm608_vm10, %v566_v9, %v640_v25  ;;  %v1756_v7 = vld [vmem:[%s17070_s5 + $0x660] sm:$0xff]  ;;  %v12574_v25 = vld [vmem:[%s17070_s5 + $0x6a8] sm:$0xff] }
 0x122   : > { %v571_v18 = vpop.f32.mrf.mxu0  ;;  %1184 = vmatprep.mubr.bf16.mxu1 %v691_v11  ;;  %1297 = vmatprep.mubr.bf16.mxu0 %v691_v11  ;;  %v1616_v11 = vld [vmem:[%s17070_s5 + $0x200] sm:$0xff]  ;;  %17283 = vst [vmem:[#allocation30_spill] sm:$0xff] %v12574_v25 }
 0x123   : > { %vm610_vm8 = vcmp.gt.f32.partialorder %v570_v13, 0.0  ;;  %v642_v23 = vmul.f32 0.2, %v570_v13  ;;  %v572_v24 = vadd.f32 %v571_v18, %v11807_v55  ;;  %1185 = vmatmul.mubr.bf16.gmra.mxu1 %v690_v14  ;;  %1298 = vmatmul.mubr.bf16.gmra.mxu0 %v690_v14  ;;  %v673_v34 = vsel %vm609_vm9, %v568_v5, %v641_v22  ;;  %v1752_v5 = vld [vmem:[%s17070_s5 + $0x640] sm:$0xff] }
 0x124   : > { %v575_v26 = vpop.f32.mrf.mxu0  ;;  %3151 = vmatpush2.bf16.msra.mxu1 %v9554_v0  ;;  %3264 = vmatpush2.bf16.msra.mxu0 %v9682_v1  ;;  %v9658_v0 = vcombine.low %v1760_v60, %v1764_v62  ;;  %v9659_v1 = vcombine.high %v1760_v60, %v1764_v62  ;;  %v9650_v9 = vcombine.low %v1752_v5, %v1756_v7  ;;  %v12477_v62 = vld [vmem:[%s17070_s5 + $0x748] sm:$0xff] }
 0x125   : > { %vm611_vm11 = vcmp.gt.f32.partialorder %v572_v24, 0.0  ;;  %v643_v29 = vmul.f32 0.2, %v572_v24  ;;  %3152 = vmatprep.subr.bf16.mxu1 %v9547_v8  ;;  %3265 = vmatprep.subr.bf16.mxu0 %v9675_v15  ;;  %v674_v2 = vsel %vm610_vm8, %v570_v13, %v642_v23  ;;  %v576_v37 = vadd.f32 %v575_v26, %v11804_v54  ;;  %v1744_v13 = vld [vmem:[%s17070_s5 + $0x600] sm:$0xff]  ;;  %v12203_v23 = vld [vmem:[%s17070_s5 + $0x5e8] sm:$0xff]  ;;  %17270 = vst [vmem:[#allocation17_spill] sm:$0xff] %v12477_v62 }
 0x126   : > { %v577_v31 = vpop.f32.mrf.mxu0  ;;  %v692_v41 = vpack.c.bf16 %v674_v2, %v672_v40  ;;  %v9522_v8 = vcombine.low %v1624_v3, %v1628_v4  ;;  %v9651_v10 = vcombine.high %v1752_v5, %v1756_v7  ;;  %v9515_v14 = vcombine.high %v1616_v11, %v1620_v12  ;;  %v1748_v15 = vld [vmem:[%s17070_s5 + $0x620] sm:$0xff]  ;;  %v12233_v2 = vld [vmem:[%s17070_s5 + $0x588] sm:$0xff] }
 0x127   : > { %v578_v33 = vadd.f32 %v577_v31, %v11807_v55  ;;  %v675_v35 = vsel %vm611_vm11, %v572_v24, %v643_v29  ;;  %v644_v47 = vmul.f32 0.2, %v576_v37  ;;  %vm612_vm14 = vcmp.gt.f32.partialorder %v576_v37, 0.0  ;;  %v12220_v29 = vld [vmem:[%s17070_s5 + $0x188] sm:$0xff] }
 0x128   : > { %v579_v38 = vpop.f32.mrf.mxu0  ;;  %v693_v39 = vpack.c.bf16 %v675_v35, %v673_v34  ;;  %3153 = vmatpush2.bf16.msra.mxu1 %v9546_v19  ;;  %3266 = vmatpush2.bf16.msra.mxu0 %v9674_v27  ;;  %v9514_v16 = vcombine.low %v1616_v11, %v1620_v12  ;;  %v9642_v17 = vcombine.low %v1744_v13, %v1748_v15  ;;  %v12186_v19 = vld [vmem:[%s17070_s5 + $0x1c8] sm:$0xff]  ;;  %v760_v27 = vld [vmem:[%s17069_s4] sm:$0xf]  ;;  %v12228_v31 = vsub.s32 3, %v11792_v50 }
 0x129   : > { %v580_v45 = vadd.f32 %v579_v38, %v11804_v54  ;;  %3154 = vmatprep.subr.bf16.mxu1 %v9539_v28  ;;  %3267 = vmatprep.subr.bf16.mxu0 %v9667_v30  ;;  %v645_v43 = vmul.f32 0.2, %v578_v33  ;;  %vm613_vm13 = vcmp.gt.f32.partialorder %v578_v33, 0.0  ;;  %v676_v57 = vsel %vm612_vm14, %v576_v37, %v644_v47  ;;  %v12225_v30 = vld [vmem:[%s17070_s5 + $0x1a8] sm:$0xff] }
 0x12a   : > { %v581_v42 = vpop.f32.mrf.mxu0  ;;  %1194 = vmatprep.mubr.bf16.mxu1 %v693_v39  ;;  %1307 = vmatprep.mubr.bf16.mxu0 %v693_v39  ;;  %v9643_v18 = vcombine.high %v1744_v13, %v1748_v15  ;;  %v9509_v22 = vcombine.high %v12186_v19, %v12191_v20  ;;  %v9637_v26 = vcombine.high %v12196_v21, %v12203_v23  ;;  %v12215_v28 = vsub.s32 2, %v11792_v50  ;;  %v12248_v34 = vld [vmem:[%s17070_s5 + $0x168] sm:$0xff] }
 0x12b   : > { %vm614_vm12 = vcmp.gt.f32.partialorder %v580_v45, 0.0  ;;  %v646_v44 = vmul.f32 0.2, %v580_v45  ;;  %v582_v46 = vadd.f32 %v581_v42, %v11807_v55  ;;  %1195 = vmatmul.mubr.bf16.gmra.mxu1 %v692_v41  ;;  %1308 = vmatmul.mubr.bf16.gmra.mxu0 %v692_v41  ;;  %v677_v49 = vsel %vm613_vm13, %v578_v33, %v645_v43  ;;  %v1632_v55 = vld [vmem:[%s17070_s5 + $0x280] sm:$0xff]  ;;  %17259 = vst [vmem:[#allocation6_spill] sm:$0xff] %v12228_v31  ;;  %v12243_v33 = vld [vmem:[%s17070_s5 + $0x148] sm:$0xff] }
 0x12c   : > { %3155 = vmatpush2.bf16.msra.mxu1 %v9538_v32  ;;  %3268 = vmatpush2.bf16.msra.mxu0 %v9666_v36  ;;  %v9531_v61 = vcombine.high %v1632_v55, %v1636_v59  ;;  %v9530_v63 = vcombine.low %v1632_v55, %v1636_v59  ;;  %17258 = vst [vmem:[#allocation5_spill] sm:$0xff] %v12215_v28  ;;  %v12238_v32 = vld [vmem:[%s17070_s5 + $0x5a8] sm:$0xff] }
 0x12d   : > { %vm615_vm15 = vcmp.gt.f32.partialorder %v582_v46, 0.0  ;;  %v647_v54 = vmul.f32 0.2, %v582_v46  ;;  %v678_v48 = vsel %vm614_vm12, %v580_v45, %v646_v44  ;;  %3269 = vmatprep.subr.bf16.mxu0 %v9659_v1  ;;  %v12253_v35 = vld [vmem:[%s17070_s5 + $0x548] sm:$0xff]  ;;  %v12291_v42 = vrot.slane %v760_v27, %v11795_v51 }
 0x12e   : > { %v694_v58 = vpack.c.bf16 %v678_v48, %v676_v57  ;;  %3156 = vmatprep.subr.bf16.mxu1 %v9531_v61  ;;  %v12258_v36 = vld [vmem:[%s17070_s5 + $0x568] sm:$0xff]  ;;  %v12294_v43 = vrot.slane %v760_v27, %v12215_v28  ;;  %v12317_v48 = vrot.slane %v760_v27, %v11798_v52 }
 0x12f   : > { %v679_v53 = vsel %vm615_vm15, %v582_v46, %v647_v54  ;;  %v12263_v37 = vld [vmem:[%s17070_s5 + $0x108] sm:$0xff] }
 0x130   : > { %v695_v56 = vpack.c.bf16 %v679_v53, %v677_v49  ;;  %3157 = vmatpush2.bf16.msra.mxu1 %v9530_v63  ;;  %3270 = vmatpush2.bf16.msra.mxu0 %v9658_v0  ;;  %v12268_v38 = vld [vmem:[%s17070_s5 + $0x128] sm:$0xff]  ;;  %v12320_v49 = vrot.slane %v760_v27, %v12228_v31 }
 0x131   : > { %3158 = vmatprep.subr.bf16.mxu1 %v9523_v6  ;;  %3271 = vmatprep.subr.bf16.mxu0 %v9651_v10  ;;  %v12273_v39 = vld [vmem:[%s17070_s5 + $0x508] sm:$0xff] }
 0x132   : > { %1204 = vmatprep.mubr.bf16.mxu1 %v695_v56  ;;  %1317 = vmatprep.mubr.bf16.mxu0 %v695_v56  ;;  %v12278_v40 = vld [vmem:[%s17070_s5 + $0x528] sm:$0xff] }
 0x133   : > { %1205 = vmatmul.mubr.bf16.gmra.mxu1 %v694_v58  ;;  %1318 = vmatmul.mubr.bf16.gmra.mxu0 %v694_v58  ;;  %v12283_v45 = vld [vmem:[%s17070_s5 + $0xc8] sm:$0xff] }
 0x134   : > { %3159 = vmatpush2.bf16.msra.mxu1 %v9522_v8  ;;  %3272 = vmatpush2.bf16.msra.mxu0 %v9650_v9  ;;  %v12288_v41 = vld [vmem:[%s17070_s5 + $0xe8] sm:$0xff] }
 0x135   : > { %3160 = vmatprep.subr.bf16.mxu1 %v9515_v14  ;;  %3273 = vmatprep.subr.bf16.mxu0 %v9643_v18  ;;  %v12299_v44 = vld [vmem:[%s17070_s5 + $0x4c8] sm:$0xff] }
 0x136   : > { %v12304_v46 = vld [vmem:[%s17070_s5 + $0x4e8] sm:$0xff] }
 0x137   : > { %v12309_v47 = vld [vmem:[%s17070_s5 + $0x88] sm:$0xff] }
 0x138   : > { %3161 = vmatpush2.bf16.msra.mxu1 %v9514_v16  ;;  %3274 = vmatpush2.bf16.msra.mxu0 %v9642_v17  ;;  %v12314_v54 = vld [vmem:[%s17070_s5 + $0xa8] sm:$0xff] }
 0x139   : > { %3356 = vmatprep.subr.bf16.mxu1 %v9509_v22  ;;  %3469 = vmatprep.subr.bf16.mxu0 %v9637_v26  ;;  %v12329_v57 = vld [vmem:[%s17070_s5 + $0x488] sm:$0xff] }
 0x13a   : > { %v12334_v58 = vld [vmem:[%s17070_s5 + $0x4a8] sm:$0xff] }
 0x13b   : > { %v12339_v55 = vld [vmem:[%s17070_s5 + $0x48] sm:$0xff] }
 0x13c   : > { %v12344_v59 = vld [vmem:[%s17070_s5 + $0x68] sm:$0xff] }
 0x13d   : > { %v12357_v0 = vld [vmem:[%s17070_s5 + $0x448] sm:$0xff] }
 0x13e   : > { %v12362_v1 = vld [vmem:[%s17070_s5 + $0x468] sm:$0xff] }
 0x13f   : > { %v12367_v3 = vld [vmem:[%s17070_s5 + $0x8] sm:$0xff] }
 0x140   : > { %v12380_v8 = vld [vmem:[%s17070_s5 + $0x28] sm:$0xff] }
 0x141   : > { %v12385_v9 = vld [vmem:[%s17070_s5 + $0x408] sm:$0xff] }
 0x142   : > { %v12390_v10 = vld [vmem:[%s17070_s5 + $0x428] sm:$0xff] }
 0x143   : > { %v12403_v15 = vld [vmem:[%s17070_s5 + $0x3c8] sm:$0xff] }
 0x144   : > { %17260 = vst [vmem:[#allocation7_spill] sm:$0xff] %v12403_v15  ;;  %v12408_v16 = vld [vmem:[%s17070_s5 + $0x3e8] sm:$0xff] }
 0x145   : > { %17261 = vst [vmem:[#allocation8_spill] sm:$0xff] %v12408_v16  ;;  %v12413_v17 = vld [vmem:[%s17070_s5 + $0x7c8] sm:$0xff] }
 0x146   : > { %17262 = vst [vmem:[#allocation9_spill] sm:$0xff] %v12413_v17  ;;  %v12426_v13 = vld [vmem:[%s17070_s5 + $0x7e8] sm:$0xff] }
 0x147   : > { %17263 = vst [vmem:[#allocation10_spill] sm:$0xff] %v12426_v13  ;;  %v12431_v14 = vld [vmem:[%s17070_s5 + $0x388] sm:$0xff] }
 0x148   : > { %17264 = vst [vmem:[#allocation11_spill] sm:$0xff] %v12431_v14  ;;  %v12436_v18 = vld [vmem:[%s17070_s5 + $0x3a8] sm:$0xff] }
 0x149   : > { %17265 = vst [vmem:[#allocation12_spill] sm:$0xff] %v12436_v18  ;;  %v12449_v6 = vld [vmem:[%s17070_s5 + $0x788] sm:$0xff] }
 0x14a   : > { %17266 = vst [vmem:[#allocation13_spill] sm:$0xff] %v12449_v6  ;;  %v12454_v12 = vld [vmem:[%s17070_s5 + $0x7a8] sm:$0xff] }
 0x14b   : > { %17267 = vst [vmem:[#allocation14_spill] sm:$0xff] %v12454_v12  ;;  %v12459_v26 = vld [vmem:[%s17070_s5 + $0x348] sm:$0xff] }
 0x14c   : > { %17268 = vst [vmem:[#allocation15_spill] sm:$0xff] %v12459_v26  ;;  %v12472_v4 = vld [vmem:[%s17070_s5 + $0x368] sm:$0xff] }
 0x14d   : > { %17269 = vst [vmem:[#allocation16_spill] sm:$0xff] %v12472_v4  ;;  %v12482_v22 = vld [vmem:[%s17070_s5 + $0x768] sm:$0xff] }
 0x14e   : > { %17271 = vst [vmem:[#allocation18_spill] sm:$0xff] %v12482_v22  ;;  %v12495_v63 = vld [vmem:[%s17070_s5 + $0x308] sm:$0xff] }
 0x14f   : > { %17272 = vst [vmem:[#allocation19_spill] sm:$0xff] %v12495_v63  ;;  %v12500_v60 = vld [vmem:[%s17070_s5 + $0x328] sm:$0xff] }
 0x150   : > { %17273 = vst [vmem:[#allocation20_spill] sm:$0xff] %v12500_v60  ;;  %v12505_v27 = vld [vmem:[%s17070_s5 + $0x708] sm:$0xff] }
 0x151   : > { %17274 = vst [vmem:[#allocation21_spill] sm:$0xff] %v12505_v27  ;;  %v12518_v61 = vld [vmem:[%s17070_s5 + $0x728] sm:$0xff] }
 0x152   : > { %17275 = vst [vmem:[#allocation22_spill] sm:$0xff] %v12518_v61  ;;  %v12523_v56 = vld [vmem:[%s17070_s5 + $0x2c8] sm:$0xff] }
 0x153   : > { %17276 = vst [vmem:[#allocation23_spill] sm:$0xff] %v12523_v56  ;;  %v12528_v11 = vld [vmem:[%s17070_s5 + $0x2e8] sm:$0xff] }
 0x154   : > { %17277 = vst [vmem:[#allocation24_spill] sm:$0xff] %v12528_v11  ;;  %v12541_v24 = vld [vmem:[%s17070_s5 + $0x6c8] sm:$0xff] }
 0x155   : > { %17278 = vst [vmem:[#allocation25_spill] sm:$0xff] %v12541_v24  ;;  %v12546_v50 = vld [vmem:[%s17070_s5 + $0x6e8] sm:$0xff] }
 0x156   : > { %17279 = vst [vmem:[#allocation26_spill] sm:$0xff] %v12546_v50  ;;  %v12551_v7 = vld [vmem:[%s17070_s5 + $0x288] sm:$0xff] }
 0x157   : > { %17280 = vst [vmem:[#allocation27_spill] sm:$0xff] %v12551_v7  ;;  %v12564_v51 = vld [vmem:[%s17070_s5 + $0x2a8] sm:$0xff] }
 0x158   : > { %17281 = vst [vmem:[#allocation28_spill] sm:$0xff] %v12564_v51  ;;  %v12569_v4 = vld [vmem:[%s17070_s5 + $0x688] sm:$0xff] }
 0x159   : > { %17282 = vst [vmem:[#allocation29_spill] sm:$0xff] %v12569_v4  ;;  %v12598_v52 = vld [vmem:[%s17070_s5 + $0x268] sm:$0xff] }
 0x15a   : > { %17285 = vst [vmem:[#allocation32_spill] sm:$0xff] %v12598_v52 }
 0x1bb   : > { %v1136_v53 = vpop.f32.mrf.mxu1  ;;  %v1249_v5 = vpop.f32.mrf.mxu0 }
 0x1bc   : > { %v1137_v28 = vadd.f32 %v1136_v53, %v12291_v42  ;;  %v1250_v31 = vadd.f32 %v1249_v5, %v12294_v43  ;;  %v12593_v5 = vld [vmem:[%s17070_s5 + $0x248] sm:$0xff] }
 0x1bd   : > { %v1138_v63 = vpop.f32.mrf.mxu1  ;;  %v1251_v22 = vpop.f32.mrf.mxu0  ;;  %17284 = vst [vmem:[#allocation31_spill] sm:$0xff] %v12593_v5 }
 0x1be   : > { %v1392_v62 = vmul.f32 0.2, %v1137_v28  ;;  %vm1328_vm0 = vcmp.gt.f32.partialorder %v1137_v28, 0.0  ;;  %v1139_v60 = vadd.f32 %v1138_v63, %v12317_v48  ;;  %v1252_v50 = vadd.f32 %v1251_v22, %v12320_v49 }
 0x1bf   : > { %v1140_v24 = vpop.f32.mrf.mxu1  ;;  %v1253_v11 = vpop.f32.mrf.mxu0  ;;  %v1394_v61 = vmul.f32 0.2, %v1250_v31  ;;  %vm1330_vm1 = vcmp.gt.f32.partialorder %v1250_v31, 0.0 }
 0x1c0   : > { %v1141_v27 = vadd.f32 %v1140_v24, %v12291_v42  ;;  %v1254_v26 = vadd.f32 %v1253_v11, %v12294_v43  ;;  %vm1329_vm2 = vcmp.gt.f32.partialorder %v1139_v60, 0.0  ;;  %v1393_v53 = vmul.f32 0.2, %v1139_v60 }
 0x1c1   : > { %v1142_v51 = vpop.f32.mrf.mxu1  ;;  %v1255_v63 = vpop.f32.mrf.mxu0  ;;  %v1456_v7 = vsel %vm1328_vm0, %v1137_v28, %v1392_v62  ;;  %v1395_v4 = vmul.f32 0.2, %v1252_v50  ;;  %v1458_v18 = vsel %vm1330_vm1, %v1250_v31, %v1394_v61  ;;  %vm1331_vm5 = vcmp.gt.f32.partialorder %v1252_v50, 0.0 }
 0x1c2   : > { %vm1332_vm3 = vcmp.gt.f32.partialorder %v1141_v27, 0.0  ;;  %v1396_v56 = vmul.f32 0.2, %v1141_v27  ;;  %v1398_v25 = vmul.f32 0.2, %v1254_v26  ;;  %vm1334_vm4 = vcmp.gt.f32.partialorder %v1254_v26, 0.0 }
 0x1c3   : > { %v1143_v24 = vadd.f32 %v1142_v51, %v12317_v48  ;;  %v1256_v11 = vadd.f32 %v1255_v63, %v12320_v49  ;;  %v1146_v12 = vpop.f32.mrf.mxu1  ;;  %v1259_v6 = vpop.f32.mrf.mxu0  ;;  %v1457_v14 = vsel %vm1329_vm2, %v1139_v60, %v1393_v53  ;;  %v1459_v16 = vsel %vm1331_vm5, %v1252_v50, %v1395_v4 }
 0x1c4   : > { %v1147_v22 = vadd.f32 %v1146_v12, %v12291_v42  ;;  %v1460_v52 = vsel %vm1332_vm3, %v1141_v27, %v1396_v56  ;;  %v1260_v62 = vadd.f32 %v1259_v6, %v12294_v43  ;;  %v1462_v17 = vsel %vm1334_vm4, %v1254_v26, %v1398_v25 }
 0x1c5   : > { %vm1333_vm6 = vcmp.gt.f32.partialorder %v1143_v24, 0.0  ;;  %v1397_v28 = vmul.f32 0.2, %v1143_v24  ;;  %v1148_v5 = vpop.f32.mrf.mxu1  ;;  %v1261_v13 = vpop.f32.mrf.mxu0  ;;  %vm1335_vm7 = vcmp.gt.f32.partialorder %v1256_v11, 0.0  ;;  %v1399_v51 = vmul.f32 0.2, %v1256_v11 }
 0x1c6   : > { %v1400_v63 = vmul.f32 0.2, %v1147_v22  ;;  %vm1336_vm8 = vcmp.gt.f32.partialorder %v1147_v22, 0.0  ;;  %v1149_v31 = vadd.f32 %v1148_v5, %v12317_v48  ;;  %v12624_v53 = vpack.c.bf16 %v1460_v52, %v1456_v7 }
 0x1c7   : > { %v1461_v15 = vsel %vm1333_vm6, %v1143_v24, %v1397_v28  ;;  %v1150_v60 = vpop.f32.mrf.mxu1  ;;  %v1263_v61 = vpop.f32.mrf.mxu0  ;;  %v1463_v12 = vsel %vm1335_vm7, %v1256_v11, %v1399_v51  ;;  %v1262_v6 = vadd.f32 %v1261_v13, %v12320_v49  ;;  %v12629_v27 = vpack.c.bf16 %v1462_v17, %v1458_v18 }
 0x1c8   : > { %17286 = vst [vmem:[#allocation33_spill] sm:$0xff] %v12624_v53  ;;  %v12626_v56 = vpack.c.bf16 %v1461_v15, %v1457_v14  ;;  %v12631_v25 = vpack.c.bf16 %v1463_v12, %v1459_v16  ;;  %vm1338_vm9 = vcmp.gt.f32.partialorder %v1260_v62, 0.0  ;;  %v1402_v26 = vmul.f32 0.2, %v1260_v62 }
 0x1c9   : > { %17287 = vst [vmem:[#allocation34_spill] sm:$0xff] %v12629_v27  ;;  %v1152_v50 = vpop.f32.mrf.mxu1  ;;  %v1265_v4 = vpop.f32.mrf.mxu0  ;;  %v1464_v24 = vsel %vm1336_vm8, %v1147_v22, %v1400_v63  ;;  %vm1337_vm10 = vcmp.gt.f32.partialorder %v1149_v31, 0.0  ;;  %v1151_v5 = vadd.f32 %v1150_v60, %v12291_v42  ;;  %v1264_v52 = vadd.f32 %v1263_v61, %v12294_v43 }
 0x1ca   : > { %3162 = vmatprep.mubr.bf16.mxu1 %v12626_v56  ;;  %v1401_v7 = vmul.f32 0.2, %v1149_v31  ;;  %vm1339_vm11 = vcmp.gt.f32.partialorder %v1262_v6, 0.0  ;;  %v1153_v13 = vadd.f32 %v1152_v50, %v12317_v48  ;;  %v1266_v14 = vadd.f32 %v1265_v4, %v12320_v49  ;;  %3275 = vmatprep.mubr.bf16.mxu0 %v12631_v25 }
 0x1cb   : > { %3163 = vmatmul.mubr.bf16.vlgmr.msra.gmra.mxu1 %v12624_v53  ;;  %v1156_v15 = vpop.f32.mrf.mxu1  ;;  %v1269_v16 = vpop.f32.mrf.mxu0  ;;  %v1403_v17 = vmul.f32 0.2, %v1262_v6  ;;  %vm1340_vm12 = vcmp.gt.f32.partialorder %v1151_v5, 0.0  ;;  %v1404_v18 = vmul.f32 0.2, %v1151_v5  ;;  %vm1342_vm13 = vcmp.gt.f32.partialorder %v1264_v52, 0.0  ;;  %3276 = vmatmul.mubr.bf16.vlgmr.msra.gmra.mxu0 %v12629_v27 }
 0x1cc   : > { %v17288_v22 = vcombine.low %v12186_v19, %v12191_v20  ;;  %v1406_v11 = vmul.f32 0.2, %v1264_v52  ;;  %vm1341_vm14 = vcmp.gt.f32.partialorder %v1153_v13, 0.0  ;;  %v1405_v28 = vmul.f32 0.2, %v1153_v13 }
 0x1cd   : > { %vm1343_vm15 = vcmp.gt.f32.partialorder %v1266_v14, 0.0  ;;  %v17289_v51 = vcombine.low %v12196_v21, %v12203_v23  ;;  %v1158_v63 = vpop.f32.mrf.mxu1  ;;  %v1271_v60 = vpop.f32.mrf.mxu0  ;;  %v17290_v61 = vcombine.high %v12220_v29, %v12225_v30  ;;  %v1466_v12 = vsel %vm1338_vm9, %v1260_v62, %v1402_v26 }
 0x1ce   : > { %3357 = vmatpush1.bf16.msra.mxu1 %v17288_v22  ;;  %v1468_v50 = vsel %vm1340_vm12, %v1151_v5, %v1404_v18  ;;  %v1407_v4 = vmul.f32 0.2, %v1266_v14  ;;  %v1157_v19 = vadd.f32 %v1156_v15, %v12291_v42  ;;  %v17291_v20 = vcombine.high %v12233_v2, %v12238_v32 }
 0x1cf   : > { %3470 = vmatpush1.bf16.msra.mxu0 %v17289_v51  ;;  %3358 = vmatprep.subr.bf16.mxu1 %v17290_v61  ;;  %v1465_v22 = vsel %vm1337_vm10, %v1149_v31, %v1401_v7  ;;  %v1470_v21 = vsel %vm1342_vm13, %v1264_v52, %v1406_v11  ;;  %v1469_v23 = vsel %vm1341_vm14, %v1153_v13, %v1405_v28  ;;  %v1160_v27 = vpop.f32.mrf.mxu1  ;;  %v1273_v53 = vpop.f32.mrf.mxu0 }
 0x1d0   : > { %3471 = vmatprep.subr.bf16.mxu0 %v17291_v20  ;;  %v1270_v51 = vadd.f32 %v1269_v16, %v12294_v43  ;;  %v1467_v61 = vsel %vm1339_vm11, %v1262_v6, %v1403_v17  ;;  %v12659_v62 = vpack.c.bf16 %v1469_v23, %v1465_v22  ;;  %v1471_v26 = vsel %vm1343_vm15, %v1266_v14, %v1407_v4 }
 0x1d1   : > { %v1159_v5 = vadd.f32 %v1158_v63, %v12317_v48  ;;  %v17292_v15 = vcombine.low %v12220_v29, %v12225_v30  ;;  %v12666_v31 = vpack.c.bf16 %v1468_v50, %v1464_v24  ;;  %v12668_v52 = vpack.c.bf16 %v1470_v21, %v1466_v12  ;;  %v1162_v6 = vpop.f32.mrf.mxu1  ;;  %v1275_v16 = vpop.f32.mrf.mxu0 }
 0x1d2   : > { %v12670_v7 = vpack.c.bf16 %v1471_v26, %v1467_v61  ;;  %v17293_v13 = vcombine.low %v12233_v2, %v12238_v32  ;;  %v17294_v14 = vcombine.high %v12243_v33, %v12248_v34  ;;  %vm1344_vm0 = vcmp.gt.f32.partialorder %v1157_v19, 0.0  ;;  %3172 = vmatprep.mubr.bf16.mxu1 %v12659_v62 }
 0x1d3   : > { %3359 = vmatpush1.bf16.msra.mxu1 %v17292_v15  ;;  %v1408_v17 = vmul.f32 0.2, %v1157_v19  ;;  %v1272_v29 = vadd.f32 %v1271_v60, %v12320_v49  ;;  %v1161_v30 = vadd.f32 %v1160_v27, %v12291_v42  ;;  %v17295_v24 = vcombine.high %v12253_v35, %v12258_v36  ;;  %v1166_v11 = vpop.f32.mrf.mxu1  ;;  %v1279_v28 = vpop.f32.mrf.mxu0 }
 0x1d4   : > { %3472 = vmatpush1.bf16.msra.mxu0 %v17293_v13  ;;  %3360 = vmatprep.subr.bf16.mxu1 %v17294_v14  ;;  %vm1346_vm1 = vcmp.gt.f32.partialorder %v1270_v51, 0.0  ;;  %v1410_v2 = vmul.f32 0.2, %v1270_v51  ;;  %v1274_v32 = vadd.f32 %v1273_v53, %v12294_v43  ;;  %v1163_v18 = vadd.f32 %v1162_v6, %v12317_v48 }
 0x1d5   : > { %3473 = vmatprep.subr.bf16.mxu0 %v17295_v24  ;;  %3285 = vmatprep.mubr.bf16.mxu0 %v12670_v7  ;;  %vm1345_vm2 = vcmp.gt.f32.partialorder %v1159_v5, 0.0  ;;  %v1409_v63 = vmul.f32 0.2, %v1159_v5  ;;  %v1411_v60 = vmul.f32 0.2, %v1272_v29  ;;  %vm1348_vm3 = vcmp.gt.f32.partialorder %v1161_v30, 0.0  ;;  %v1168_v4 = vpop.f32.mrf.mxu1  ;;  %v1281_v20 = vpop.f32.mrf.mxu0 }
 0x1d6   : > { %3173 = vmatmul.mubr.bf16.gmra.mxu1 %v12666_v31  ;;  %3286 = vmatmul.mubr.bf16.gmra.mxu0 %v12668_v52  ;;  %v1412_v27 = vmul.f32 0.2, %v1161_v30  ;;  %vm1350_vm4 = vcmp.gt.f32.partialorder %v1274_v32, 0.0  ;;  %v1414_v12 = vmul.f32 0.2, %v1274_v32  ;;  %vm1349_vm5 = vcmp.gt.f32.partialorder %v1163_v18, 0.0 }
 0x1d7   : > { %v17296_v53 = vcombine.low %v12243_v33, %v12248_v34  ;;  %v17297_v50 = vcombine.low %v12253_v35, %v12258_v36  ;;  %vm1347_vm6 = vcmp.gt.f32.partialorder %v1272_v29, 0.0  ;;  %v1413_v22 = vmul.f32 0.2, %v1163_v18  ;;  %v1170_v15 = vpop.f32.mrf.mxu1  ;;  %v1283_v13 = vpop.f32.mrf.mxu0 }
 0x1d8   : > { %v1276_v21 = vadd.f32 %v1275_v16, %v12320_v49  ;;  %v1167_v23 = vadd.f32 %v1166_v11, %v12291_v42  ;;  %v17298_v61 = vcombine.high %v12263_v37, %v12268_v38  ;;  %v17299_v33 = vcombine.high %v12273_v39, %v12278_v40 }
 0x1d9   : > { %3361 = vmatpush1.bf16.msra.mxu1 %v17296_v53  ;;  %3474 = vmatpush1.bf16.msra.mxu0 %v17297_v50  ;;  %v1472_v34 = vsel %vm1344_vm0, %v1157_v19, %v1408_v17  ;;  %v1476_v35 = vsel %vm1348_vm3, %v1161_v30, %v1412_v27  ;;  %v1478_v36 = vsel %vm1350_vm4, %v1274_v32, %v1414_v12  ;;  %v1285_v32 = vpop.f32.mrf.mxu0 }
 0x1da   : > { %3362 = vmatprep.subr.bf16.mxu1 %v17298_v61  ;;  %3475 = vmatprep.subr.bf16.mxu0 %v17299_v33  ;;  %v1280_v26 = vadd.f32 %v1279_v28, %v12294_v43  ;;  %v1473_v6 = vsel %vm1345_vm2, %v1159_v5, %v1409_v63  ;;  %v1477_v16 = vsel %vm1349_vm5, %v1163_v18, %v1413_v22  ;;  %vm1351_vm7 = vcmp.gt.f32.partialorder %v1276_v21, 0.0  ;;  %v1172_v5 = vpop.f32.mrf.mxu1 }
 0x1db   : > { %v1169_v14 = vadd.f32 %v1168_v4, %v12317_v48  ;;  %v1474_v24 = vsel %vm1346_vm1, %v1270_v51, %v1410_v2  ;;  %v1475_v11 = vsel %vm1347_vm6, %v1272_v29, %v1411_v60  ;;  %v12711_v53 = vpack.c.bf16 %v1477_v16, %v1473_v6  ;;  %v1289_v63 = vpop.f32.mrf.mxu0 }
 0x1dc   : > { %v1415_v19 = vmul.f32 0.2, %v1276_v21  ;;  %v17300_v17 = vcombine.low %v12263_v37, %v12268_v38  ;;  %v17301_v30 = vcombine.low %v12273_v39, %v12278_v40  ;;  %v12719_v18 = vpack.c.bf16 %v1476_v35, %v1472_v34  ;;  %v1176_v2 = vpop.f32.mrf.mxu1 }
 0x1dd   : > { %v12721_v28 = vpack.c.bf16 %v1478_v36, %v1474_v24  ;;  %vm1352_vm8 = vcmp.gt.f32.partialorder %v1167_v23, 0.0  ;;  %v1416_v51 = vmul.f32 0.2, %v1167_v23  ;;  %v17302_v29 = vcombine.high %v12283_v45, %v12288_v41  ;;  %3182 = vmatprep.mubr.bf16.mxu1 %v12711_v53  ;;  %v1291_v33 = vpop.f32.mrf.mxu0 }
 0x1de   : > { %3363 = vmatpush1.bf16.msra.mxu1 %v17300_v17  ;;  %3476 = vmatpush1.bf16.msra.mxu0 %v17301_v30  ;;  %v17303_v37 = vcombine.high %v12299_v44, %v12304_v46  ;;  %v1479_v38 = vsel %vm1351_vm7, %v1276_v21, %v1415_v19  ;;  %vm1354_vm9 = vcmp.gt.f32.partialorder %v1280_v26, 0.0  ;;  %v1282_v39 = vadd.f32 %v1281_v20, %v12320_v49  ;;  %v1178_v61 = vpop.f32.mrf.mxu1 }
 0x1df   : > { %3364 = vmatprep.subr.bf16.mxu1 %v17302_v29  ;;  %v1171_v40 = vadd.f32 %v1170_v15, %v12291_v42  ;;  %v12733_v60 = vpack.c.bf16 %v1479_v38, %v1475_v11  ;;  %v1418_v27 = vmul.f32 0.2, %v1280_v26  ;;  %v1417_v12 = vmul.f32 0.2, %v1169_v14  ;;  %3183 = vmatmul.mubr.bf16.gmra.mxu1 %v12719_v18 }
 0x1e0   : > { %3477 = vmatprep.subr.bf16.mxu0 %v17303_v37  ;;  %v1284_v50 = vadd.f32 %v1283_v13, %v12294_v43  ;;  %vm1353_vm10 = vcmp.gt.f32.partialorder %v1169_v14, 0.0  ;;  %v1419_v4 = vmul.f32 0.2, %v1282_v39  ;;  %v17304_v20 = vcombine.low %v12283_v45, %v12288_v41  ;;  %v1293_v13 = vpop.f32.mrf.mxu0 }
 0x1e1   : > { %vm1356_vm11 = vcmp.gt.f32.partialorder %v1171_v40, 0.0  ;;  %v1420_v22 = vmul.f32 0.2, %v1171_v40  ;;  %v17305_v21 = vcombine.low %v12299_v44, %v12304_v46  ;;  %vm1355_vm12 = vcmp.gt.f32.partialorder %v1282_v39, 0.0  ;;  %3295 = vmatprep.mubr.bf16.mxu0 %v12733_v60  ;;  %v1180_v46 = vpop.f32.mrf.mxu1 }
 0x1e2   : > { %3365 = vmatpush1.bf16.msra.mxu1 %v17304_v20  ;;  %v1422_v34 = vmul.f32 0.2, %v1284_v50  ;;  %v1173_v35 = vadd.f32 %v1172_v5, %v12317_v48  ;;  %v1286_v36 = vadd.f32 %v1285_v32, %v12320_v49  ;;  %v17306_v15 = vcombine.high %v12309_v47, %v12314_v54  ;;  %3296 = vmatmul.mubr.bf16.gmra.mxu0 %v12721_v28  ;;  %v1295_v32 = vpop.f32.mrf.mxu0 }
 0x1e3   : > { %3478 = vmatpush1.bf16.msra.mxu0 %v17305_v21  ;;  %v1480_v45 = vsel %vm1352_vm8, %v1167_v23, %v1416_v51  ;;  %v1484_v41 = vsel %vm1356_vm11, %v1171_v40, %v1420_v22  ;;  %vm1358_vm13 = vcmp.gt.f32.partialorder %v1284_v50, 0.0  ;;  %v1177_v44 = vadd.f32 %v1176_v2, %v12291_v42  ;;  %v1182_v5 = vpop.f32.mrf.mxu1 }
 0x1e4   : > { %3366 = vmatprep.subr.bf16.mxu1 %v17306_v15  ;;  %v1482_v6 = vsel %vm1354_vm9, %v1280_v26, %v1418_v27  ;;  %vm1357_vm14 = vcmp.gt.f32.partialorder %v1173_v35, 0.0  ;;  %v1421_v16 = vmul.f32 0.2, %v1173_v35  ;;  %v1290_v24 = vadd.f32 %v1289_v63, %v12294_v43  ;;  %v1299_v2 = vpop.f32.mrf.mxu0 }
 0x1e5   : > { %v17307_v11 = vcombine.high %v12329_v57, %v12334_v58  ;;  %v1481_v23 = vsel %vm1353_vm10, %v1169_v14, %v1417_v12  ;;  %v1483_v19 = vsel %vm1355_vm12, %v1282_v39, %v1419_v4  ;;  %vm1359_vm15 = vcmp.gt.f32.partialorder %v1286_v36, 0.0  ;;  %v1186_v40 = vpop.f32.mrf.mxu1 }
 0x1e6   : > { %v1423_v17 = vmul.f32 0.2, %v1286_v36  ;;  %v17308_v30 = vcombine.low %v12309_v47, %v12314_v54  ;;  %v17309_v26 = vcombine.low %v12329_v57, %v12334_v58  ;;  %v12765_v51 = vpack.c.bf16 %v1484_v41, %v1480_v45 }
 0x1e7   : > { %3479 = vmatprep.subr.bf16.mxu0 %v17307_v11  ;;  %v1486_v29 = vsel %vm1358_vm13, %v1284_v50, %v1422_v34  ;;  %v1485_v37 = vsel %vm1357_vm14, %v1173_v35, %v1421_v16  ;;  %v1424_v14 = vmul.f32 0.2, %v1177_v44  ;;  %v17310_v38 = vcombine.high %v12339_v55, %v12344_v59  ;;  %v1188_v21 = vpop.f32.mrf.mxu1 }
 0x1e8   : > { %3367 = vmatpush1.bf16.msra.mxu1 %v17308_v30  ;;  %3480 = vmatpush1.bf16.msra.mxu0 %v17309_v26  ;;  %v17311_v47 = vcombine.high %v12357_v0, %v12362_v1  ;;  %v12774_v54 = vpack.c.bf16 %v1485_v37, %v1481_v23  ;;  %v1487_v57 = vsel %vm1359_vm15, %v1286_v36, %v1423_v17  ;;  %vm1360_vm0 = vcmp.gt.f32.partialorder %v1177_v44, 0.0 }
 0x1e9   : > { %3368 = vmatprep.subr.bf16.mxu1 %v17310_v38  ;;  %v1179_v58 = vadd.f32 %v1178_v61, %v12317_v48  ;;  %v1292_v39 = vadd.f32 %v1291_v33, %v12320_v49  ;;  %v12778_v63 = vpack.c.bf16 %v1487_v57, %v1483_v19  ;;  %vm1362_vm1 = vcmp.gt.f32.partialorder %v1290_v24, 0.0  ;;  %v1301_v61 = vpop.f32.mrf.mxu0 }
 0x1ea   : > { %3481 = vmatprep.subr.bf16.mxu0 %v17311_v47  ;;  %v1181_v27 = vadd.f32 %v1180_v46, %v12291_v42  ;;  %v12781_v12 = vpack.c.bf16 %v1486_v29, %v1482_v6  ;;  %v1426_v50 = vmul.f32 0.2, %v1290_v24  ;;  %3192 = vmatprep.mubr.bf16.mxu1 %v12774_v54  ;;  %v17312_v20 = vcombine.low %v12339_v55, %v12344_v59  ;;  %v1190_v55 = vpop.f32.mrf.mxu1 }
 0x1eb   : > { %v1425_v4 = vmul.f32 0.2, %v1179_v58  ;;  %v1427_v22 = vmul.f32 0.2, %v1292_v39  ;;  %v1294_v34 = vadd.f32 %v1293_v13, %v12294_v43  ;;  %v1183_v35 = vadd.f32 %v1182_v5, %v12317_v48  ;;  %3305 = vmatprep.mubr.bf16.mxu0 %v12778_v63  ;;  %3193 = vmatmul.mubr.bf16.gmra.mxu1 %v12765_v51  ;;  %v1303_v59 = vpop.f32.mrf.mxu0  ;;  %v17317_v5 = vld [vmem:[#allocation7_spill] sm:$0xff] }
 0x1ec   : > { %3369 = vmatpush1.bf16.msra.mxu1 %v17312_v20  ;;  %vm1364_vm2 = vcmp.gt.f32.partialorder %v1181_v27, 0.0  ;;  %v1428_v33 = vmul.f32 0.2, %v1181_v27  ;;  %v1488_v36 = vsel %vm1360_vm0, %v1177_v44, %v1424_v14  ;;  %vm1361_vm3 = vcmp.gt.f32.partialorder %v1179_v58, 0.0  ;;  %3306 = vmatmul.mubr.bf16.gmra.mxu0 %v12781_v12  ;;  %v1192_v19 = vpop.f32.mrf.mxu1  ;;  %v17323_v20 = vld [vmem:[#allocation10_spill] sm:$0xff] }
 0x1ed   : > { %vm1363_vm4 = vcmp.gt.f32.partialorder %v1292_v39, 0.0  ;;  %v1296_v15 = vadd.f32 %v1295_v32, %v12320_v49  ;;  %vm1366_vm5 = vcmp.gt.f32.partialorder %v1294_v34, 0.0  ;;  %v1430_v45 = vmul.f32 0.2, %v1294_v34  ;;  %v17318_v32 = vld [vmem:[#allocation8_spill] sm:$0xff] }
 0x1ee   : > { %vm1365_vm6 = vcmp.gt.f32.partialorder %v1183_v35, 0.0  ;;  %v12795_v41 = vadd.f32 %v1186_v40, %v12291_v42  ;;  %v17313_v46 = vcombine.low %v12357_v0, %v12362_v1  ;;  %v17314_v44 = vcombine.high %v12367_v3, %v12380_v8  ;;  %v1305_v0 = vpop.f32.mrf.mxu0  ;;  %v1196_v38 = vpop.f32.mrf.mxu1 }
 0x1ef   : > { %v1492_v13 = vsel %vm1364_vm2, %v1181_v27, %v1428_v33  ;;  %v1429_v6 = vmul.f32 0.2, %v1183_v35  ;;  %vm1367_vm7 = vcmp.gt.f32.partialorder %v1296_v15, 0.0  ;;  %v1431_v16 = vmul.f32 0.2, %v1296_v15 }
 0x1f0   : > { %3482 = vmatpush1.bf16.msra.mxu0 %v17313_v46  ;;  %3370 = vmatprep.subr.bf16.mxu1 %v17314_v44  ;;  %v17315_v11 = vcombine.low %v12367_v3, %v12380_v8  ;;  %v17316_v23 = vcombine.high %v12385_v9, %v12390_v10  ;;  %v1490_v1 = vsel %vm1362_vm1, %v1290_v24, %v1426_v50  ;;  %v1309_v47 = vpop.f32.mrf.mxu0  ;;  %vm1368_vm8 = vcmp.gt.f32.partialorder %v12795_v41, 0.0  ;;  %v1198_v33 = vpop.f32.mrf.mxu1  ;;  %v17325_v44 = vld [vmem:[#allocation11_spill] sm:$0xff] }
 0x1f1   : > { %v1489_v17 = vsel %vm1361_vm3, %v1179_v58, %v1425_v4  ;;  %v1491_v30 = vsel %vm1363_vm4, %v1292_v39, %v1427_v22  ;;  %v1494_v26 = vsel %vm1366_vm5, %v1294_v34, %v1430_v45  ;;  %v17319_v29 = vcombine.high %v17317_v5, %v17318_v32  ;;  %v17322_v22 = vld [vmem:[#allocation9_spill] sm:$0xff] }
 0x1f2   : > { %3371 = vmatpush1.bf16.msra.mxu1 %v17315_v11  ;;  %3483 = vmatprep.subr.bf16.mxu0 %v17316_v23  ;;  %v1493_v3 = vsel %vm1365_vm6, %v1183_v35, %v1429_v6  ;;  %v1495_v8 = vsel %vm1367_vm7, %v1296_v15, %v1431_v16  ;;  %v1300_v37 = vadd.f32 %v1299_v2, %v12294_v43  ;;  %v1432_v2 = vmul.f32 0.2, %v12795_v41  ;;  %v1311_v34 = vpop.f32.mrf.mxu0  ;;  %v1200_v45 = vpop.f32.mrf.mxu1 }
 0x1f3   : > { %3372 = vmatprep.subr.bf16.mxu1 %v17319_v29  ;;  %v1189_v14 = vadd.f32 %v1188_v21, %v12317_v48  ;;  %v12820_v24 = vpack.c.bf16 %v1492_v13, %v1488_v36  ;;  %v12822_v57 = vpack.c.bf16 %v1493_v3, %v1489_v17  ;;  %v12824_v58 = vpack.c.bf16 %v1495_v8, %v1491_v30  ;;  %v17326_v13 = vld [vmem:[#allocation12_spill] sm:$0xff]  ;;  %v17333_v3 = vld [vmem:[#allocation15_spill] sm:$0xff] }
 0x1f4   : > { %v17320_v39 = vcombine.low %v12385_v9, %v12390_v10  ;;  %v12830_v40 = vpack.c.bf16 %v1494_v26, %v1490_v1  ;;  %v1302_v50 = vadd.f32 %v1301_v61, %v12320_v49  ;;  %v17321_v4 = vcombine.low %v17317_v5, %v17318_v32  ;;  %v1313_v46 = vpop.f32.mrf.mxu0  ;;  %v17330_v5 = vld [vmem:[#allocation13_spill] sm:$0xff]  ;;  %v17331_v32 = vld [vmem:[#allocation14_spill] sm:$0xff]  ;;  %v17334_v8 = vld [vmem:[#allocation16_spill] sm:$0xff] }
 0x1f5   : > { %v1433_v27 = vmul.f32 0.2, %v1189_v14  ;;  %v17324_v21 = vcombine.high %v17322_v22, %v17323_v20  ;;  %v1191_v9 = vadd.f32 %v1190_v55, %v12291_v42  ;;  %v1304_v10 = vadd.f32 %v1303_v59, %v12294_v43  ;;  %3202 = vmatprep.mubr.bf16.mxu1 %v12822_v57  ;;  %3315 = vmatprep.mubr.bf16.mxu0 %v12824_v58 }
 0x1f6   : > { %3484 = vmatpush1.bf16.msra.mxu0 %v17320_v39  ;;  %3373 = vmatpush2.bf16.msra.mxu1 %v17321_v4  ;;  %v1193_v35 = vadd.f32 %v1192_v19, %v12317_v48  ;;  %v1306_v36 = vadd.f32 %v1305_v0, %v12320_v49  ;;  %vm1370_vm9 = vcmp.gt.f32.partialorder %v1300_v37, 0.0  ;;  %v1434_v61 = vmul.f32 0.2, %v1300_v37  ;;  %v1202_v19 = vpop.f32.mrf.mxu1  ;;  %v1315_v0 = vpop.f32.mrf.mxu0 }
 0x1f7   : > { %3485 = vmatprep.subr.bf16.mxu0 %v17324_v21  ;;  %vm1369_vm10 = vcmp.gt.f32.partialorder %v1189_v14, 0.0  ;;  %v1435_v15 = vmul.f32 0.2, %v1302_v50  ;;  %3203 = vmatmul.mubr.bf16.gmra.mxu1 %v12820_v24  ;;  %vm1372_vm11 = vcmp.gt.f32.partialorder %v1191_v9, 0.0  ;;  %v1436_v55 = vmul.f32 0.2, %v1191_v9 }
 0x1f8   : > { %vm1374_vm12 = vcmp.gt.f32.partialorder %v1304_v10, 0.0  ;;  %v1438_v59 = vmul.f32 0.2, %v1304_v10  ;;  %3316 = vmatmul.mubr.bf16.gmra.mxu0 %v12830_v40  ;;  %v17327_v6 = vcombine.high %v17325_v44, %v17326_v13  ;;  %vm1371_vm13 = vcmp.gt.f32.partialorder %v1302_v50, 0.0 }
 0x1f9   : > { %vm1373_vm14 = vcmp.gt.f32.partialorder %v1193_v35, 0.0  ;;  %v1437_v16 = vmul.f32 0.2, %v1193_v35  ;;  %vm1375_vm15 = vcmp.gt.f32.partialorder %v1306_v36, 0.0  ;;  %v17328_v11 = vcombine.low %v17322_v22, %v17323_v20 }
 0x1fa   : > { %3374 = vmatprep.subr.bf16.mxu1 %v17327_v6  ;;  %v17329_v23 = vcombine.low %v17325_v44, %v17326_v13  ;;  %v1496_v1 = vsel %vm1368_vm8, %v12795_v41, %v1432_v2  ;;  %v1497_v17 = vsel %vm1369_vm10, %v1189_v14, %v1433_v27  ;;  %v1500_v30 = vsel %vm1372_vm11, %v1191_v9, %v1436_v55  ;;  %v1206_v2 = vpop.f32.mrf.mxu1  ;;  %v12871_v14 = vpop.f32.mrf.mxu0 }
 0x1fb   : > { %3486 = vmatpush2.bf16.msra.mxu0 %v17328_v11  ;;  %v1439_v26 = vmul.f32 0.2, %v1306_v36  ;;  %v17332_v29 = vcombine.high %v17330_v5, %v17331_v32  ;;  %v17335_v39 = vcombine.high %v17333_v3, %v17334_v8  ;;  %v1502_v4 = vsel %vm1374_vm12, %v1304_v10, %v1438_v59  ;;  %v17338_v11 = vld [vmem:[#allocation17_spill] sm:$0xff] }
 0x1fc   : > { %3375 = vmatpush2.bf16.msra.mxu1 %v17329_v23  ;;  %v1501_v22 = vsel %vm1373_vm14, %v1193_v35, %v1437_v16  ;;  %v1197_v20 = vadd.f32 %v1196_v38, %v12291_v42  ;;  %v1310_v41 = vadd.f32 %v1309_v47, %v12294_v43  ;;  %v1498_v27 = vsel %vm1370_vm9, %v1300_v37, %v1434_v61  ;;  %v17339_v23 = vld [vmem:[#allocation18_spill] sm:$0xff] }
 0x1fd   : > { %3487 = vmatprep.subr.bf16.mxu0 %v17332_v29  ;;  %3376 = vmatprep.subr.bf16.mxu1 %v17335_v39  ;;  %v1499_v21 = vsel %vm1371_vm13, %v1302_v50, %v1435_v15  ;;  %v12875_v9 = vpack.c.bf16 %v1501_v22, %v1497_v17  ;;  %v1503_v55 = vsel %vm1375_vm15, %v1306_v36, %v1439_v26  ;;  %v17342_v26 = vld [vmem:[#allocation19_spill] sm:$0xff]  ;;  %v17346_v39 = vld [vmem:[#allocation21_spill] sm:$0xff] }
 0x1fe   : > { %v12878_v44 = vpack.c.bf16 %v1500_v30, %v1496_v1  ;;  %v12880_v13 = vpack.c.bf16 %v1503_v55, %v1499_v21  ;;  %v1199_v10 = vadd.f32 %v1198_v33, %v12317_v48  ;;  %v17336_v38 = vcombine.low %v17330_v5, %v17331_v32  ;;  %v12898_v33 = vld [vmem:[%s17070_s5 + $0x648] sm:$0xff]  ;;  %v17343_v5 = vld [vmem:[#allocation20_spill] sm:$0xff] }
 0x1ff   : > { %v17337_v47 = vcombine.low %v17333_v3, %v17334_v8  ;;  %v12889_v37 = vpack.c.bf16 %v1502_v4, %v1498_v27  ;;  %v1312_v50 = vadd.f32 %v1311_v34, %v12320_v49  ;;  %v1201_v35 = vadd.f32 %v1200_v45, %v12291_v42  ;;  %3212 = vmatprep.mubr.bf16.mxu1 %v12875_v9  ;;  %v1208_v34 = vpop.f32.mrf.mxu1  ;;  %v1321_v45 = vpop.f32.mrf.mxu0  ;;  %v17347_v4 = vld [vmem:[#allocation22_spill] sm:$0xff] }
 0x200   : > { %3488 = vmatpush2.bf16.msra.mxu0 %v17336_v38  ;;  %v1314_v36 = vadd.f32 %v1313_v46, %v12294_v43  ;;  %vm1376_vm0 = vcmp.gt.f32.partialorder %v1197_v20, 0.0  ;;  %v1440_v61 = vmul.f32 0.2, %v1197_v20  ;;  %v1442_v15 = vmul.f32 0.2, %v1310_v41  ;;  %3325 = vmatprep.mubr.bf16.mxu0 %v12880_v13  ;;  %v12906_v46 = vld [vmem:[%s17070_s5 + $0x668] sm:$0xff] }
 0x201   : > { %3377 = vmatpush2.bf16.msra.mxu1 %v17337_v47  ;;  %v1203_v59 = vadd.f32 %v1202_v19, %v12317_v48  ;;  %vm1378_vm1 = vcmp.gt.f32.partialorder %v1310_v41, 0.0  ;;  %v1441_v6 = vmul.f32 0.2, %v1199_v10  ;;  %vm1380_vm2 = vcmp.gt.f32.partialorder %v1201_v35, 0.0  ;;  %3326 = vmatmul.mubr.bf16.gmra.mxu0 %v12889_v37  ;;  %v1210_v38 = vpop.f32.mrf.mxu1  ;;  %v1323_v47 = vpop.f32.mrf.mxu0 }
 0x202   : > { %3213 = vmatmul.mubr.bf16.gmra.mxu1 %v12878_v44  ;;  %v1444_v16 = vmul.f32 0.2, %v1201_v35  ;;  %v17340_v19 = vcombine.high %v17338_v11, %v17339_v23  ;;  %vm1377_vm3 = vcmp.gt.f32.partialorder %v1199_v10, 0.0  ;;  %v1443_v1 = vmul.f32 0.2, %v1312_v50 }
 0x203   : > { %v1446_v17 = vmul.f32 0.2, %v1314_v36  ;;  %vm1381_vm4 = vcmp.gt.f32.partialorder %v1203_v59, 0.0  ;;  %v17341_v30 = vcombine.low %v17338_v11, %v17339_v23  ;;  %v17344_v32 = vcombine.high %v17342_v26, %v17343_v5  ;;  %v17349_v11 = vld [vmem:[#allocation23_spill] sm:$0xff]  ;;  %v17350_v23 = vld [vmem:[#allocation24_spill] sm:$0xff] }
 0x204   : > { %3489 = vmatprep.subr.bf16.mxu0 %v17340_v19  ;;  %vm1379_vm5 = vcmp.gt.f32.partialorder %v1312_v50, 0.0  ;;  %vm1382_vm6 = vcmp.gt.f32.partialorder %v1314_v36, 0.0  ;;  %v1445_v29 = vmul.f32 0.2, %v1203_v59  ;;  %v1316_v3 = vadd.f32 %v1315_v0, %v12320_v49 }
 0x205   : > { %3490 = vmatpush2.bf16.msra.mxu0 %v17341_v30  ;;  %3378 = vmatprep.subr.bf16.mxu1 %v17344_v32  ;;  %v17345_v8 = vcombine.low %v17342_v26, %v17343_v5  ;;  %v17348_v22 = vcombine.high %v17346_v39, %v17347_v4  ;;  %v1504_v27 = vsel %vm1376_vm0, %v1197_v20, %v1440_v61 }
 0x206   : > { %v1506_v21 = vsel %vm1378_vm1, %v1310_v41, %v1442_v15  ;;  %v1508_v55 = vsel %vm1380_vm2, %v1201_v35, %v1444_v16  ;;  %v17351_v19 = vcombine.high %v17349_v11, %v17350_v23  ;;  %v9652_v0 = vcombine.low %v12898_v33, %v12906_v46 }
 0x207   : > { %3379 = vmatpush2.bf16.msra.mxu1 %v17345_v8  ;;  %3491 = vmatprep.subr.bf16.mxu0 %v17348_v22  ;;  %v1505_v30 = vsel %vm1377_vm3, %v1199_v10, %v1441_v6  ;;  %v1509_v26 = vsel %vm1381_vm4, %v1203_v59, %v1445_v29  ;;  %vm1383_vm7 = vcmp.gt.f32.partialorder %v1316_v3, 0.0  ;;  %v1447_v5 = vmul.f32 0.2, %v1316_v3  ;;  %v17355_v6 = vld [vmem:[#allocation26_spill] sm:$0xff]  ;;  %v1212_v8 = vpop.f32.mrf.mxu1 }
 0x208   : > { %3380 = vmatprep.subr.bf16.mxu1 %v17351_v19  ;;  %v1507_v20 = vsel %vm1379_vm5, %v1312_v50, %v1443_v1  ;;  %v1510_v41 = vsel %vm1382_vm6, %v1314_v36, %v1446_v17  ;;  %v12937_v35 = vpack.c.bf16 %v1509_v26, %v1505_v30  ;;  %v1207_v61 = vadd.f32 %v1206_v2, %v12291_v42  ;;  %v17354_v50 = vld [vmem:[#allocation25_spill] sm:$0xff]  ;;  %v12955_v2 = vld [vmem:[%s17070_s5 + $0x208] sm:$0xff] }
 0x209   : > { %v17352_v15 = vcombine.low %v17346_v39, %v17347_v4  ;;  %v12943_v16 = vpack.c.bf16 %v1508_v55, %v1504_v27  ;;  %v1511_v32 = vsel %vm1383_vm7, %v1316_v3, %v1447_v5  ;;  %v1209_v10 = vadd.f32 %v1208_v34, %v12317_v48  ;;  %v12960_v1 = vld [vmem:[%s17070_s5 + $0x228] sm:$0xff]  ;;  %v1325_v39 = vpop.f32.mrf.mxu0  ;;  %v17358_v55 = vld [vmem:[#allocation28_spill] sm:$0xff]  ;;  %v17362_v5 = vld [vmem:[#allocation29_spill] sm:$0xff] }
 0x20a   : > { %v17353_v59 = vcombine.low %v17349_v11, %v17350_v23  ;;  %v17356_v36 = vcombine.high %v17354_v50, %v17355_v6  ;;  %v12962_v17 = vpack.c.bf16 %v1511_v32, %v1507_v20  ;;  %v1322_v34 = vadd.f32 %v1321_v45, %v12320_v49  ;;  %3222 = vmatprep.mubr.bf16.mxu1 %v12937_v35  ;;  %v17357_v27 = vld [vmem:[#allocation27_spill] sm:$0xff]  ;;  %v17363_v20 = vld [vmem:[#allocation30_spill] sm:$0xff]  ;;  %v17366_v32 = vld [vmem:[#allocation32_spill] sm:$0xff] }
 0x20b   : > { %3492 = vmatpush2.bf16.msra.mxu0 %v17352_v15  ;;  %v1211_v29 = vadd.f32 %v1210_v38, %v12291_v42  ;;  %v1324_v3 = vadd.f32 %v1323_v47, %v12294_v43  ;;  %v12968_v4 = vpack.c.bf16 %v1510_v41, %v1506_v21  ;;  %v1320_v22 = vadd.f32 %v12871_v14, %v12294_v43  ;;  %v17365_v15 = vld [vmem:[#allocation31_spill] sm:$0xff] }
 0x20c   : > { %3381 = vmatpush2.bf16.msra.mxu1 %v17353_v59  ;;  %3493 = vmatprep.subr.bf16.mxu0 %v17356_v36  ;;  %v17359_v11 = vcombine.high %v17357_v27, %v17358_v55  ;;  %v9653_v42 = vcombine.high %v12898_v33, %v12906_v46  ;;  %vm1384_vm8 = vcmp.gt.f32.partialorder %v1207_v61, 0.0  ;;  %v1449_v45 = vmul.f32 0.2, %v1209_v10  ;;  %v1602_v33 = vld [vmem:[%s17070_s5 + $0x190] sm:$0xff] }
 0x20d   : > { %3223 = vmatmul.mubr.bf16.gmra.mxu1 %v12943_v16  ;;  %v1452_v38 = vmul.f32 0.2, %v1211_v29  ;;  %3335 = vmatprep.mubr.bf16.mxu0 %v12962_v17  ;;  %v17360_v21 = vcombine.low %v17354_v50, %v17355_v6  ;;  %v9517_v43 = vcombine.high %v12955_v2, %v12960_v1  ;;  %vm1388_vm9 = vcmp.gt.f32.partialorder %v1211_v29, 0.0  ;;  %v1606_v46 = vld [vmem:[%s17070_s5 + $0x1b0] sm:$0xff] }
 0x20e   : > { %3382 = vmatprep.subr.bf16.mxu1 %v17359_v11  ;;  %v1454_v14 = vmul.f32 0.2, %v1324_v3  ;;  %v1213_v47 = vadd.f32 %v1212_v8, %v12317_v48  ;;  %v1326_v23 = vadd.f32 %v1325_v39, %v12320_v49  ;;  %3336 = vmatmul.mubr.bf16.gmra.mxu0 %v12968_v4  ;;  %v17361_v19 = vcombine.low %v17357_v27, %v17358_v55  ;;  %v1745_v8 = vld [vmem:[%s17070_s5 + $0x608] sm:$0xff] }
 0x20f   : > { %3494 = vmatpush2.bf16.msra.mxu0 %v17360_v21  ;;  %v1448_v30 = vmul.f32 0.2, %v1207_v61  ;;  %vm1385_vm10 = vcmp.gt.f32.partialorder %v1209_v10, 0.0  ;;  %v1451_v26 = vmul.f32 0.2, %v1322_v34  ;;  %vm1390_vm11 = vcmp.gt.f32.partialorder %v1324_v3, 0.0 }
 0x210   : > { %3383 = vmatpush2.bf16.msra.mxu1 %v17361_v19  ;;  %v17364_v41 = vcombine.high %v17362_v5, %v17363_v20  ;;  %v17367_v59 = vcombine.high %v17365_v15, %v17366_v32  ;;  %v1450_v48 = vmul.f32 0.2, %v1320_v22  ;;  %vm1387_vm12 = vcmp.gt.f32.partialorder %v1322_v34, 0.0  ;;  %v1614_v21 = vld [vmem:[%s17070_s5 + $0x1f0] sm:$0xff] }
 0x211   : > { %vm1389_vm13 = vcmp.gt.f32.partialorder %v1213_v47, 0.0  ;;  %v1453_v49 = vmul.f32 0.2, %v1213_v47  ;;  %vm1386_vm14 = vcmp.gt.f32.partialorder %v1320_v22, 0.0  ;;  %v1516_v50 = vsel %vm1388_vm9, %v1211_v29, %v1452_v38  ;;  %v1749_v29 = vld [vmem:[%s17070_s5 + $0x628] sm:$0xff]  ;;  %v1610_v38 = vld [vmem:[%s17070_s5 + $0x1d0] sm:$0xff] }
 0x212   : > { %3495 = vmatprep.subr.bf16.mxu0 %v17364_v41  ;;  %3384 = vmatprep.subr.bf16.mxu1 %v17367_v59  ;;  %vm1391_vm15 = vcmp.gt.f32.partialorder %v1326_v23, 0.0  ;;  %v1455_v6 = vmul.f32 0.2, %v1326_v23  ;;  %v17368_v36 = vcombine.low %v17362_v5, %v17363_v20  ;;  %v1513_v39 = vsel %vm1385_vm10, %v1209_v10, %v1449_v45  ;;  %v1738_v20 = vld [vmem:[%s17070_s5 + $0x5d0] sm:$0xff]  ;;  %v17370_v59 = vld [vmem:[#allocation33_spill] sm:$0xff] }
 0x213   : > { %v1518_v27 = vsel %vm1390_vm11, %v1324_v3, %v1454_v14  ;;  %v1517_v55 = vsel %vm1389_vm13, %v1213_v47, %v1453_v49  ;;  %v17369_v11 = vcombine.low %v17365_v15, %v17366_v32  ;;  %v1512_v10 = vsel %vm1384_vm8, %v1207_v61, %v1448_v30  ;;  %v1742_v61 = vld [vmem:[%s17070_s5 + $0x5f0] sm:$0xff]  ;;  %v17371_v49 = vld [vmem:[#allocation34_spill] sm:$0xff] }
 0x214   : > { %3496 = vmatpush2.bf16.msra.mxu0 %v17368_v36  ;;  %v1515_v3 = vsel %vm1387_vm12, %v1322_v34, %v1451_v26  ;;  %v13017_v45 = vpack.c.bf16 %v1517_v55, %v1513_v39  ;;  %v1519_v14 = vsel %vm1391_vm15, %v1326_v23, %v1455_v6  ;;  %v13020_v47 = vpack.c.bf16 %v1516_v50, %v1512_v10  ;;  %v1730_v23 = vld [vmem:[%s17070_s5 + $0x590] sm:$0xff] }
 0x215   : > { %3385 = vmatpush2.bf16.msra.mxu1 %v17369_v11  ;;  %3497 = vmatprep.subr.bf16.mxu0 %v9653_v42  ;;  %v1514_v42 = vsel %vm1386_vm14, %v1320_v22, %v1450_v48  ;;  %v13022_v19 = vpack.c.bf16 %v1519_v14, %v1515_v3  ;;  %v9516_v5 = vcombine.low %v12955_v2, %v12960_v1  ;;  %v1734_v30 = vld [vmem:[%s17070_s5 + $0x5b0] sm:$0xff] }
 0x216   : > { %3386 = vmatprep.subr.bf16.mxu1 %v9517_v43  ;;  %v13032_v34 = vpack.c.bf16 %v1518_v27, %v1514_v42  ;;  %3232 = vmatprep.mubr.bf16.mxu1 %v13017_v45  ;;  %v9645_v22 = vcombine.high %v1745_v8, %v1749_v29  ;;  %v9511_v43 = vcombine.high %v1610_v38, %v1614_v21  ;;  %v1594_v15 = vld [vmem:[%s17070_s5 + $0x150] sm:$0xff] }
 0x217   : > { %3345 = vmatprep.mubr.bf16.mxu0 %v13022_v19  ;;  %3233 = vmatmul.mubr.bf16.gmra.mxu1 %v13020_v47  ;;  %v9644_v2 = vcombine.low %v1745_v8, %v1749_v29  ;;  %v9639_v1 = vcombine.high %v1738_v20, %v1742_v61  ;;  %v9638_v26 = vcombine.low %v1738_v20, %v1742_v61  ;;  %v1598_v32 = vld [vmem:[%s17070_s5 + $0x170] sm:$0xff] }
 0x218   : > { %3498 = vmatpush2.bf16.msra.mxu0 %v9652_v0  ;;  %3388 = vmatprep.mubr.bf16.mxu1 %v12626_v56  ;;  %v9510_v0 = vcombine.low %v1610_v38, %v1614_v21  ;;  %v9503_v41 = vcombine.high %v1602_v33, %v1606_v46  ;;  %v9631_v48 = vcombine.high %v1730_v23, %v1734_v30  ;;  %v1722_v6 = vld [vmem:[%s17070_s5 + $0x550] sm:$0xff] }
 0x219   : > { %3346 = vmatmul.mubr.bf16.gmra.mxu0 %v13032_v34  ;;  %3387 = vmatpush2.bf16.msra.mxu1 %v9516_v5  ;;  %v9502_v50 = vcombine.low %v1602_v33, %v1606_v46  ;;  %v1726_v36 = vld [vmem:[%s17070_s5 + $0x570] sm:$0xff]  ;;  %v9495_v8 = vcombine.high %v1594_v15, %v1598_v32  ;;  %v9630_v39 = vcombine.low %v1730_v23, %v1734_v30 }
 0x21a   : > { %3501 = vmatprep.mubr.bf16.mxu0 %v12631_v25  ;;  %3499 = vmatprep.subr.bf16.mxu0 %v9645_v22  ;;  %v9623_v27 = vcombine.high %v1722_v6, %v1726_v36  ;;  %v1586_v55 = vld [vmem:[%s17070_s5 + $0x110] sm:$0xff]  ;;  %v9494_v29 = vcombine.low %v1594_v15, %v1598_v32  ;;  %v9622_v10 = vcombine.low %v1722_v6, %v1726_v36 }
 0x21b   : > { %3582 = vmatprep.subr.bf16.mxu1 %v9511_v43  ;;  %v1590_v11 = vld [vmem:[%s17070_s5 + $0x130] sm:$0xff] }
 0x21c   : > { %3500 = vmatpush2.bf16.msra.mxu0 %v9644_v2  ;;  %v1714_v38 = vld [vmem:[%s17070_s5 + $0x510] sm:$0xff]  ;;  %v9487_v3 = vcombine.high %v1586_v55, %v1590_v11  ;;  %v9486_v20 = vcombine.low %v1586_v55, %v1590_v11 }
 0x21d   : > { %3695 = vmatprep.subr.bf16.mxu0 %v9639_v1  ;;  %v1718_v21 = vld [vmem:[%s17070_s5 + $0x530] sm:$0xff] }
 0x21e   : > { %v1578_v14 = vld [vmem:[%s17070_s5 + $0xd0] sm:$0xff]  ;;  %v9615_v5 = vcombine.high %v1714_v38, %v1718_v21  ;;  %v9614_v2 = vcombine.low %v1714_v38, %v1718_v21 }
 0x21f   : > { %3389 = vmatmul.mubr.bf16.vlgmr.msra.gmra.mxu1 %v17370_v59  ;;  %v1582_v42 = vld [vmem:[%s17070_s5 + $0xf0] sm:$0xff] }
 0x220   : > { %3583 = vmatpush1.bf16.msra.mxu1 %v9510_v0  ;;  %3398 = vmatprep.mubr.bf16.mxu1 %v12659_v62  ;;  %v1706_v61 = vld [vmem:[%s17070_s5 + $0x4d0] sm:$0xff]  ;;  %v9479_v43 = vcombine.high %v1578_v14, %v1582_v42  ;;  %v9478_v0 = vcombine.low %v1578_v14, %v1582_v42 }
 0x221   : > { %3502 = vmatmul.mubr.bf16.vlgmr.msra.gmra.mxu0 %v17371_v49  ;;  %3584 = vmatprep.subr.bf16.mxu1 %v9503_v41  ;;  %v1710_v22 = vld [vmem:[%s17070_s5 + $0x4f0] sm:$0xff] }
 0x222   : > { %3511 = vmatprep.mubr.bf16.mxu0 %v12670_v7  ;;  %3696 = vmatpush1.bf16.msra.mxu0 %v9638_v26  ;;  %v9607_v1 = vcombine.high %v1706_v61, %v1710_v22  ;;  %v1570_v33 = vld [vmem:[%s17070_s5 + $0x90] sm:$0xff]  ;;  %v9606_v26 = vcombine.low %v1706_v61, %v1710_v22 }
 0x223   : > { %3697 = vmatprep.subr.bf16.mxu0 %v9631_v48  ;;  %v1574_v46 = vld [vmem:[%s17070_s5 + $0xb0] sm:$0xff] }
 0x224   : > { %3585 = vmatpush1.bf16.msra.mxu1 %v9502_v50  ;;  %v1698_v23 = vld [vmem:[%s17070_s5 + $0x490] sm:$0xff]  ;;  %v9471_v41 = vcombine.high %v1570_v33, %v1574_v46  ;;  %v9470_v50 = vcombine.low %v1570_v33, %v1574_v46 }
 0x225   : > { %3586 = vmatprep.subr.bf16.mxu1 %v9495_v8  ;;  %v1702_v30 = vld [vmem:[%s17070_s5 + $0x4b0] sm:$0xff] }
 0x226   : > { %3698 = vmatpush1.bf16.msra.mxu0 %v9630_v39  ;;  %v1562_v15 = vld [vmem:[%s17070_s5 + $0x50] sm:$0xff]  ;;  %v9599_v48 = vcombine.high %v1698_v23, %v1702_v30  ;;  %v9598_v39 = vcombine.low %v1698_v23, %v1702_v30 }
 0x227   : > { %3399 = vmatmul.mubr.bf16.gmra.mxu1 %v12666_v31  ;;  %3699 = vmatprep.subr.bf16.mxu0 %v9623_v27  ;;  %v1566_v32 = vld [vmem:[%s17070_s5 + $0x70] sm:$0xff] }
 0x228   : > { %3587 = vmatpush1.bf16.msra.mxu1 %v9494_v29  ;;  %3408 = vmatprep.mubr.bf16.mxu1 %v12711_v53  ;;  %v1690_v6 = vld [vmem:[%s17070_s5 + $0x450] sm:$0xff]  ;;  %v9463_v8 = vcombine.high %v1562_v15, %v1566_v32  ;;  %v9462_v29 = vcombine.low %v1562_v15, %v1566_v32 }
 0x229   : > { %3512 = vmatmul.mubr.bf16.gmra.mxu0 %v12668_v52  ;;  %3588 = vmatprep.subr.bf16.mxu1 %v9487_v3  ;;  %v1694_v36 = vld [vmem:[%s17070_s5 + $0x470] sm:$0xff] }
 0x22a   : > { %3521 = vmatprep.mubr.bf16.mxu0 %v12733_v60  ;;  %3700 = vmatpush1.bf16.msra.mxu0 %v9622_v10  ;;  %v9591_v27 = vcombine.high %v1690_v6, %v1694_v36  ;;  %v1554_v55 = vld [vmem:[%s17070_s5 + $0x10] sm:$0xff]  ;;  %v9590_v10 = vcombine.low %v1690_v6, %v1694_v36 }
 0x22b   : > { %3701 = vmatprep.subr.bf16.mxu0 %v9615_v5  ;;  %v1558_v11 = vld [vmem:[%s17070_s5 + $0x30] sm:$0xff] }
 0x22c   : > { %3589 = vmatpush1.bf16.msra.mxu1 %v9486_v20  ;;  %v1682_v38 = vld [vmem:[%s17070_s5 + $0x410] sm:$0xff]  ;;  %v9455_v3 = vcombine.high %v1554_v55, %v1558_v11  ;;  %v9454_v20 = vcombine.low %v1554_v55, %v1558_v11 }
 0x22d   : > { %3590 = vmatprep.subr.bf16.mxu1 %v9479_v43  ;;  %v1686_v21 = vld [vmem:[%s17070_s5 + $0x430] sm:$0xff] }
 0x22e   : > { %3702 = vmatpush1.bf16.msra.mxu0 %v9614_v2  ;;  %v1674_v14 = vld [vmem:[%s17070_s5 + $0x3d0] sm:$0xff]  ;;  %v9583_v5 = vcombine.high %v1682_v38, %v1686_v21  ;;  %v9582_v2 = vcombine.low %v1682_v38, %v1686_v21 }
 0x22f   : > { %3409 = vmatmul.mubr.bf16.gmra.mxu1 %v12719_v18  ;;  %3703 = vmatprep.subr.bf16.mxu0 %v9607_v1  ;;  %v1678_v42 = vld [vmem:[%s17070_s5 + $0x3f0] sm:$0xff] }
 0x230   : > { %3591 = vmatpush1.bf16.msra.mxu1 %v9478_v0  ;;  %3418 = vmatprep.mubr.bf16.mxu1 %v12774_v54  ;;  %v1802_v61 = vld [vmem:[%s17070_s5 + $0x7d0] sm:$0xff]  ;;  %v9575_v43 = vcombine.high %v1674_v14, %v1678_v42  ;;  %v9574_v0 = vcombine.low %v1674_v14, %v1678_v42 }
 0x231   : > { %3522 = vmatmul.mubr.bf16.gmra.mxu0 %v12721_v28  ;;  %3592 = vmatprep.subr.bf16.mxu1 %v9471_v41  ;;  %v1806_v22 = vld [vmem:[%s17070_s5 + $0x7f0] sm:$0xff] }
 0x232   : > { %3531 = vmatprep.mubr.bf16.mxu0 %v12778_v63  ;;  %3704 = vmatpush1.bf16.msra.mxu0 %v9606_v26  ;;  %v9703_v1 = vcombine.high %v1802_v61, %v1806_v22  ;;  %v1666_v33 = vld [vmem:[%s17070_s5 + $0x390] sm:$0xff]  ;;  %v9702_v26 = vcombine.low %v1802_v61, %v1806_v22 }
 0x233   : > { %3705 = vmatprep.subr.bf16.mxu0 %v9599_v48  ;;  %v1670_v46 = vld [vmem:[%s17070_s5 + $0x3b0] sm:$0xff] }
 0x234   : > { %3593 = vmatpush1.bf16.msra.mxu1 %v9470_v50  ;;  %v1794_v23 = vld [vmem:[%s17070_s5 + $0x790] sm:$0xff]  ;;  %v9567_v41 = vcombine.high %v1666_v33, %v1670_v46  ;;  %v9566_v50 = vcombine.low %v1666_v33, %v1670_v46 }
 0x235   : > { %3594 = vmatprep.subr.bf16.mxu1 %v9463_v8  ;;  %v1798_v30 = vld [vmem:[%s17070_s5 + $0x7b0] sm:$0xff] }
 0x236   : > { %3706 = vmatpush1.bf16.msra.mxu0 %v9598_v39  ;;  %v1658_v15 = vld [vmem:[%s17070_s5 + $0x350] sm:$0xff]  ;;  %v9695_v48 = vcombine.high %v1794_v23, %v1798_v30  ;;  %v9694_v39 = vcombine.low %v1794_v23, %v1798_v30 }
 0x237   : > { %3419 = vmatmul.mubr.bf16.gmra.mxu1 %v12765_v51  ;;  %3707 = vmatprep.subr.bf16.mxu0 %v9591_v27  ;;  %v1662_v32 = vld [vmem:[%s17070_s5 + $0x370] sm:$0xff] }
 0x238   : > { %3595 = vmatpush1.bf16.msra.mxu1 %v9462_v29  ;;  %3428 = vmatprep.mubr.bf16.mxu1 %v12822_v57  ;;  %v1786_v6 = vld [vmem:[%s17070_s5 + $0x750] sm:$0xff]  ;;  %v9559_v8 = vcombine.high %v1658_v15, %v1662_v32  ;;  %v9558_v29 = vcombine.low %v1658_v15, %v1662_v32 }
 0x239   : > { %3532 = vmatmul.mubr.bf16.gmra.mxu0 %v12781_v12  ;;  %3596 = vmatprep.subr.bf16.mxu1 %v9455_v3  ;;  %v1790_v36 = vld [vmem:[%s17070_s5 + $0x770] sm:$0xff] }
 0x23a   : > { %3541 = vmatprep.mubr.bf16.mxu0 %v12824_v58  ;;  %3708 = vmatpush1.bf16.msra.mxu0 %v9590_v10  ;;  %v9687_v27 = vcombine.high %v1786_v6, %v1790_v36  ;;  %v1650_v55 = vld [vmem:[%s17070_s5 + $0x310] sm:$0xff]  ;;  %v9686_v10 = vcombine.low %v1786_v6, %v1790_v36 }
 0x23b   : > { %3709 = vmatprep.subr.bf16.mxu0 %v9583_v5  ;;  %v1654_v11 = vld [vmem:[%s17070_s5 + $0x330] sm:$0xff] }
 0x23c   : > { %3597 = vmatpush1.bf16.msra.mxu1 %v9454_v20  ;;  %v1778_v38 = vld [vmem:[%s17070_s5 + $0x710] sm:$0xff]  ;;  %v9551_v3 = vcombine.high %v1650_v55, %v1654_v11  ;;  %v9550_v20 = vcombine.low %v1650_v55, %v1654_v11 }
 0x23d   : > { %3598 = vmatprep.subr.bf16.mxu1 %v9575_v43  ;;  %v1782_v21 = vld [vmem:[%s17070_s5 + $0x730] sm:$0xff] }
 0x23e   : > { %3710 = vmatpush1.bf16.msra.mxu0 %v9582_v2  ;;  %v1642_v14 = vld [vmem:[%s17070_s5 + $0x2d0] sm:$0xff]  ;;  %v9679_v5 = vcombine.high %v1778_v38, %v1782_v21  ;;  %v9678_v2 = vcombine.low %v1778_v38, %v1782_v21 }
 0x23f   : > { %3429 = vmatmul.mubr.bf16.gmra.mxu1 %v12820_v24  ;;  %3711 = vmatprep.subr.bf16.mxu0 %v9703_v1  ;;  %v1646_v42 = vld [vmem:[%s17070_s5 + $0x2f0] sm:$0xff] }
 0x240   : > { %3599 = vmatpush2.bf16.msra.mxu1 %v9574_v0  ;;  %3438 = vmatprep.mubr.bf16.mxu1 %v12875_v9  ;;  %v1770_v61 = vld [vmem:[%s17070_s5 + $0x6d0] sm:$0xff]  ;;  %v9543_v43 = vcombine.high %v1642_v14, %v1646_v42  ;;  %v9542_v0 = vcombine.low %v1642_v14, %v1646_v42  ;;  %v1611_v14 = vld [vmem:[%s17070_s5 + $0x1d8] sm:$0xff] }
 0x241   : > { %3542 = vmatmul.mubr.bf16.gmra.mxu0 %v12830_v40  ;;  %3600 = vmatprep.subr.bf16.mxu1 %v9567_v41  ;;  %v1774_v22 = vld [vmem:[%s17070_s5 + $0x6f0] sm:$0xff]  ;;  %v1615_v42 = vld [vmem:[%s17070_s5 + $0x1f8] sm:$0xff] }
 0x242   : > { %3551 = vmatprep.mubr.bf16.mxu0 %v12880_v13  ;;  %3712 = vmatpush2.bf16.msra.mxu0 %v9702_v26  ;;  %v9671_v1 = vcombine.high %v1770_v61, %v1774_v22  ;;  %v1634_v33 = vld [vmem:[%s17070_s5 + $0x290] sm:$0xff]  ;;  %v9670_v26 = vcombine.low %v1770_v61, %v1774_v22  ;;  %v1739_v61 = vld [vmem:[%s17070_s5 + $0x5d8] sm:$0xff] }
 0x243   : > { %3713 = vmatprep.subr.bf16.mxu0 %v9695_v48  ;;  %v1638_v46 = vld [vmem:[%s17070_s5 + $0x2b0] sm:$0xff]  ;;  %v1743_v22 = vld [vmem:[%s17070_s5 + $0x5f8] sm:$0xff] }
 0x244   : > { %3601 = vmatpush2.bf16.msra.mxu1 %v9566_v50  ;;  %v1762_v23 = vld [vmem:[%s17070_s5 + $0x690] sm:$0xff]  ;;  %v9535_v41 = vcombine.high %v1634_v33, %v1638_v46  ;;  %v9534_v50 = vcombine.low %v1634_v33, %v1638_v46  ;;  %v1607_v33 = vld [vmem:[%s17070_s5 + $0x1b8] sm:$0xff]  ;;  %v9641_v46 = vcombine.high %v1739_v61, %v1743_v22 }
 0x245   : > { %3602 = vmatprep.subr.bf16.mxu1 %v9559_v8  ;;  %v1766_v30 = vld [vmem:[%s17070_s5 + $0x6b0] sm:$0xff] }
 0x246   : > { %3714 = vmatpush2.bf16.msra.mxu0 %v9694_v39  ;;  %v1626_v15 = vld [vmem:[%s17070_s5 + $0x250] sm:$0xff]  ;;  %v9663_v48 = vcombine.high %v1762_v23, %v1766_v30  ;;  %v9662_v39 = vcombine.low %v1762_v23, %v1766_v30  ;;  %v1731_v23 = vld [vmem:[%s17070_s5 + $0x598] sm:$0xff] }
 0x247   : > { %3439 = vmatmul.mubr.bf16.gmra.mxu1 %v12878_v44  ;;  %3715 = vmatprep.subr.bf16.mxu0 %v9687_v27  ;;  %v1630_v32 = vld [vmem:[%s17070_s5 + $0x270] sm:$0xff]  ;;  %v1735_v30 = vld [vmem:[%s17070_s5 + $0x5b8] sm:$0xff] }
 0x248   : > { %3603 = vmatpush2.bf16.msra.mxu1 %v9558_v29  ;;  %3448 = vmatprep.mubr.bf16.mxu1 %v12937_v35  ;;  %v1754_v6 = vld [vmem:[%s17070_s5 + $0x650] sm:$0xff]  ;;  %v9527_v8 = vcombine.high %v1626_v15, %v1630_v32  ;;  %v9526_v29 = vcombine.low %v1626_v15, %v1630_v32  ;;  %v1595_v15 = vld [vmem:[%s17070_s5 + $0x158] sm:$0xff] }
 0x249   : > { %3552 = vmatmul.mubr.bf16.gmra.mxu0 %v12889_v37  ;;  %3604 = vmatprep.subr.bf16.mxu1 %v9551_v3  ;;  %v1758_v36 = vld [vmem:[%s17070_s5 + $0x670] sm:$0xff]  ;;  %v1599_v32 = vld [vmem:[%s17070_s5 + $0x178] sm:$0xff] }
 0x24a   : > { %3561 = vmatprep.mubr.bf16.mxu0 %v12962_v17  ;;  %3716 = vmatpush2.bf16.msra.mxu0 %v9686_v10  ;;  %v9655_v27 = vcombine.high %v1754_v6, %v1758_v36  ;;  %v1618_v55 = vld [vmem:[%s17070_s5 + $0x210] sm:$0xff]  ;;  %v9654_v10 = vcombine.low %v1754_v6, %v1758_v36  ;;  %v1723_v6 = vld [vmem:[%s17070_s5 + $0x558] sm:$0xff] }
 0x24b   : > { %3717 = vmatprep.subr.bf16.mxu0 %v9679_v5  ;;  %v1622_v11 = vld [vmem:[%s17070_s5 + $0x230] sm:$0xff]  ;;  %v1727_v36 = vld [vmem:[%s17070_s5 + $0x578] sm:$0xff] }
 0x24c   : > { %3605 = vmatpush2.bf16.msra.mxu1 %v9550_v20  ;;  %v1746_v38 = vld [vmem:[%s17070_s5 + $0x610] sm:$0xff]  ;;  %v9519_v3 = vcombine.high %v1618_v55, %v1622_v11  ;;  %v9518_v20 = vcombine.low %v1618_v55, %v1622_v11  ;;  %v1591_v55 = vld [vmem:[%s17070_s5 + $0x138] sm:$0xff]  ;;  %v9625_v11 = vcombine.high %v1723_v6, %v1727_v36 }
 0x24d   : > { %3606 = vmatprep.subr.bf16.mxu1 %v9543_v43  ;;  %v1750_v21 = vld [vmem:[%s17070_s5 + $0x630] sm:$0xff]  ;;  %v9513_v43 = vcombine.high %v1611_v14, %v1615_v42 }
 0x24e   : > { %3718 = vmatpush2.bf16.msra.mxu0 %v9678_v2  ;;  %v9647_v5 = vcombine.high %v1746_v38, %v1750_v21  ;;  %v9646_v2 = vcombine.low %v1746_v38, %v1750_v21  ;;  %v1715_v38 = vld [vmem:[%s17070_s5 + $0x518] sm:$0xff] }
 0x24f   : > { %3449 = vmatmul.mubr.bf16.gmra.mxu1 %v12943_v16  ;;  %3719 = vmatprep.subr.bf16.mxu0 %v9671_v1  ;;  %v1603_v1 = vld [vmem:[%s17070_s5 + $0x198] sm:$0xff] }
 0x250   : > { %3607 = vmatpush2.bf16.msra.mxu1 %v9542_v0  ;;  %3458 = vmatprep.mubr.bf16.mxu1 %v13017_v45  ;;  %v9512_v0 = vcombine.low %v1611_v14, %v1615_v42  ;;  %v1719_v21 = vld [vmem:[%s17070_s5 + $0x538] sm:$0xff] }
 0x251   : > { %3562 = vmatmul.mubr.bf16.gmra.mxu0 %v12968_v4  ;;  %3608 = vmatprep.subr.bf16.mxu1 %v9535_v41  ;;  %v9640_v41 = vcombine.low %v1739_v61, %v1743_v22  ;;  %v1579_v14 = vld [vmem:[%s17070_s5 + $0xd8] sm:$0xff] }
 0x252   : > { %3571 = vmatprep.mubr.bf16.mxu0 %v13022_v19  ;;  %3720 = vmatpush2.bf16.msra.mxu0 %v9670_v26  ;;  %v9505_v26 = vcombine.high %v1603_v1, %v1607_v33  ;;  %v1583_v42 = vld [vmem:[%s17070_s5 + $0xf8] sm:$0xff] }
 0x253   : > { %3721 = vmatprep.subr.bf16.mxu0 %v9663_v48  ;;  %v9633_v48 = vcombine.high %v1731_v23, %v1735_v30  ;;  %v1707_v61 = vld [vmem:[%s17070_s5 + $0x4d8] sm:$0xff] }
 0x254   : > { %3609 = vmatpush2.bf16.msra.mxu1 %v9534_v50  ;;  %v9504_v50 = vcombine.low %v1603_v1, %v1607_v33  ;;  %v1711_v22 = vld [vmem:[%s17070_s5 + $0x4f8] sm:$0xff] }
 0x255   : > { %3610 = vmatprep.subr.bf16.mxu1 %v9527_v8  ;;  %v9497_v8 = vcombine.high %v1595_v15, %v1599_v32  ;;  %v1571_v1 = vld [vmem:[%s17070_s5 + $0x98] sm:$0xff] }
 0x256   : > { %3722 = vmatpush2.bf16.msra.mxu0 %v9662_v39  ;;  %v9632_v39 = vcombine.low %v1731_v23, %v1735_v30  ;;  %v1575_v33 = vld [vmem:[%s17070_s5 + $0xb8] sm:$0xff] }
 0x257   : > { %3459 = vmatmul.mubr.bf16.gmra.mxu1 %v13020_v47  ;;  %3723 = vmatprep.subr.bf16.mxu0 %v9655_v27  ;;  %v1587_v27 = vld [vmem:[%s17070_s5 + $0x118] sm:$0xff] }
 0x258   : > { %3611 = vmatpush2.bf16.msra.mxu1 %v9526_v29  ;;  %3614 = vmatprep.mubr.bf16.mxu1 %v12626_v56  ;;  %v9496_v29 = vcombine.low %v1595_v15, %v1599_v32  ;;  %v1699_v23 = vld [vmem:[%s17070_s5 + $0x498] sm:$0xff] }
 0x259   : > { %3572 = vmatmul.mubr.bf16.gmra.mxu0 %v13032_v34  ;;  %3612 = vmatprep.subr.bf16.mxu1 %v9519_v3  ;;  %v9624_v3 = vcombine.low %v1723_v6, %v1727_v36  ;;  %v1703_v30 = vld [vmem:[%s17070_s5 + $0x4b8] sm:$0xff] }
 0x25a   : > { %3727 = vmatprep.mubr.bf16.mxu0 %v12631_v25  ;;  %3724 = vmatpush2.bf16.msra.mxu0 %v9654_v10  ;;  %v9489_v10 = vcombine.high %v1587_v27, %v1591_v55  ;;  %v1563_v15 = vld [vmem:[%s17070_s5 + $0x58] sm:$0xff] }
 0x25b   : > { %3725 = vmatprep.subr.bf16.mxu0 %v9647_v5  ;;  %v9617_v5 = vcombine.high %v1715_v38, %v1719_v21  ;;  %v1567_v32 = vld [vmem:[%s17070_s5 + $0x78] sm:$0xff] }
 0x25c   : > { %3613 = vmatpush2.bf16.msra.mxu1 %v9518_v20  ;;  %v9488_v20 = vcombine.low %v1587_v27, %v1591_v55  ;;  %v1691_v6 = vld [vmem:[%s17070_s5 + $0x458] sm:$0xff] }
 0x25d   : > { %3808 = vmatprep.subr.bf16.mxu1 %v9513_v43  ;;  %v9481_v43 = vcombine.high %v1579_v14, %v1583_v42  ;;  %v1695_v36 = vld [vmem:[%s17070_s5 + $0x478] sm:$0xff] }
 0x25e   : > { %3726 = vmatpush2.bf16.msra.mxu0 %v9646_v2  ;;  %v9616_v2 = vcombine.low %v1715_v38, %v1719_v21  ;;  %v1555_v27 = vld [vmem:[%s17070_s5 + $0x18] sm:$0xff] }
 0x25f   : > { %3615 = vmatmul.mubr.bf16.vlgmr.msra.gmra.mxu1 %v17370_v59  ;;  %3921 = vmatprep.subr.bf16.mxu0 %v9641_v46  ;;  %v9609_v46 = vcombine.high %v1707_v61, %v1711_v22  ;;  %v1559_v55 = vld [vmem:[%s17070_s5 + $0x38] sm:$0xff] }
 0x260   : > { %3809 = vmatpush1.bf16.msra.mxu1 %v9512_v0  ;;  %3624 = vmatprep.mubr.bf16.mxu1 %v12659_v62  ;;  %v9480_v0 = vcombine.low %v1579_v14, %v1583_v42  ;;  %v1683_v38 = vld [vmem:[%s17070_s5 + $0x418] sm:$0xff] }
 0x261   : > { %3728 = vmatmul.mubr.bf16.vlgmr.msra.gmra.mxu0 %v17371_v49  ;;  %3810 = vmatprep.subr.bf16.mxu1 %v9505_v26  ;;  %v9473_v26 = vcombine.high %v1571_v1, %v1575_v33  ;;  %v1687_v21 = vld [vmem:[%s17070_s5 + $0x438] sm:$0xff] }
 0x262   : > { %3737 = vmatprep.mubr.bf16.mxu0 %v12670_v7  ;;  %3922 = vmatpush1.bf16.msra.mxu0 %v9640_v41  ;;  %v9608_v41 = vcombine.low %v1707_v61, %v1711_v22  ;;  %v1675_v14 = vld [vmem:[%s17070_s5 + $0x3d8] sm:$0xff] }
 0x263   : > { %3923 = vmatprep.subr.bf16.mxu0 %v9633_v48  ;;  %v9601_v48 = vcombine.high %v1699_v23, %v1703_v30  ;;  %v1679_v42 = vld [vmem:[%s17070_s5 + $0x3f8] sm:$0xff] }
 0x264   : > { %3811 = vmatpush1.bf16.msra.mxu1 %v9504_v50  ;;  %v9472_v50 = vcombine.low %v1571_v1, %v1575_v33  ;;  %v1803_v61 = vld [vmem:[%s17070_s5 + $0x7d8] sm:$0xff] }
 0x265   : > { %3812 = vmatprep.subr.bf16.mxu1 %v9497_v8  ;;  %v9465_v8 = vcombine.high %v1563_v15, %v1567_v32  ;;  %v1807_v22 = vld [vmem:[%s17070_s5 + $0x7f8] sm:$0xff] }
 0x266   : > { %3924 = vmatpush1.bf16.msra.mxu0 %v9632_v39  ;;  %v9600_v39 = vcombine.low %v1699_v23, %v1703_v30  ;;  %v1667_v1 = vld [vmem:[%s17070_s5 + $0x398] sm:$0xff] }
 0x267   : > { %3625 = vmatmul.mubr.bf16.gmra.mxu1 %v12666_v31  ;;  %3925 = vmatprep.subr.bf16.mxu0 %v9625_v11  ;;  %v9593_v11 = vcombine.high %v1691_v6, %v1695_v36  ;;  %v1671_v33 = vld [vmem:[%s17070_s5 + $0x3b8] sm:$0xff] }
 0x268   : > { %3813 = vmatpush1.bf16.msra.mxu1 %v9496_v29  ;;  %3634 = vmatprep.mubr.bf16.mxu1 %v12711_v53  ;;  %v9464_v29 = vcombine.low %v1563_v15, %v1567_v32  ;;  %v1795_v23 = vld [vmem:[%s17070_s5 + $0x798] sm:$0xff] }
 0x269   : > { %3738 = vmatmul.mubr.bf16.gmra.mxu0 %v12668_v52  ;;  %3814 = vmatprep.subr.bf16.mxu1 %v9489_v10  ;;  %v9457_v10 = vcombine.high %v1555_v27, %v1559_v55  ;;  %v1799_v30 = vld [vmem:[%s17070_s5 + $0x7b8] sm:$0xff] }
 0x26a   : > { %3747 = vmatprep.mubr.bf16.mxu0 %v12733_v60  ;;  %3926 = vmatpush1.bf16.msra.mxu0 %v9624_v3  ;;  %v9592_v3 = vcombine.low %v1691_v6, %v1695_v36  ;;  %v1659_v15 = vld [vmem:[%s17070_s5 + $0x358] sm:$0xff] }
 0x26b   : > { %3927 = vmatprep.subr.bf16.mxu0 %v9617_v5  ;;  %v9585_v5 = vcombine.high %v1683_v38, %v1687_v21  ;;  %v1663_v32 = vld [vmem:[%s17070_s5 + $0x378] sm:$0xff] }
 0x26c   : > { %3815 = vmatpush1.bf16.msra.mxu1 %v9488_v20  ;;  %v9456_v20 = vcombine.low %v1555_v27, %v1559_v55  ;;  %v1787_v6 = vld [vmem:[%s17070_s5 + $0x758] sm:$0xff] }
 0x26d   : > { %3816 = vmatprep.subr.bf16.mxu1 %v9481_v43  ;;  %v9577_v43 = vcombine.high %v1675_v14, %v1679_v42  ;;  %v1791_v36 = vld [vmem:[%s17070_s5 + $0x778] sm:$0xff] }
 0x26e   : > { %3928 = vmatpush1.bf16.msra.mxu0 %v9616_v2  ;;  %v9584_v2 = vcombine.low %v1683_v38, %v1687_v21  ;;  %v1651_v27 = vld [vmem:[%s17070_s5 + $0x318] sm:$0xff] }
 0x26f   : > { %3635 = vmatmul.mubr.bf16.gmra.mxu1 %v12719_v18  ;;  %3929 = vmatprep.subr.bf16.mxu0 %v9609_v46  ;;  %v9705_v46 = vcombine.high %v1803_v61, %v1807_v22  ;;  %v1655_v55 = vld [vmem:[%s17070_s5 + $0x338] sm:$0xff] }
 0x270   : > { %3817 = vmatpush1.bf16.msra.mxu1 %v9480_v0  ;;  %3644 = vmatprep.mubr.bf16.mxu1 %v12774_v54  ;;  %v9576_v0 = vcombine.low %v1675_v14, %v1679_v42  ;;  %v1779_v38 = vld [vmem:[%s17070_s5 + $0x718] sm:$0xff] }
 0x271   : > { %3748 = vmatmul.mubr.bf16.gmra.mxu0 %v12721_v28  ;;  %3818 = vmatprep.subr.bf16.mxu1 %v9473_v26  ;;  %v9569_v26 = vcombine.high %v1667_v1, %v1671_v33  ;;  %v1783_v21 = vld [vmem:[%s17070_s5 + $0x738] sm:$0xff] }
 0x272   : > { %3757 = vmatprep.mubr.bf16.mxu0 %v12778_v63  ;;  %3930 = vmatpush1.bf16.msra.mxu0 %v9608_v41  ;;  %v9704_v41 = vcombine.low %v1803_v61, %v1807_v22  ;;  %v1643_v14 = vld [vmem:[%s17070_s5 + $0x2d8] sm:$0xff] }
 0x273   : > { %3931 = vmatprep.subr.bf16.mxu0 %v9601_v48  ;;  %v9697_v48 = vcombine.high %v1795_v23, %v1799_v30  ;;  %v1647_v42 = vld [vmem:[%s17070_s5 + $0x2f8] sm:$0xff] }
 0x274   : > { %3819 = vmatpush1.bf16.msra.mxu1 %v9472_v50  ;;  %v9568_v50 = vcombine.low %v1667_v1, %v1671_v33  ;;  %v1771_v61 = vld [vmem:[%s17070_s5 + $0x6d8] sm:$0xff] }
 0x275   : > { %3820 = vmatprep.subr.bf16.mxu1 %v9465_v8  ;;  %v9561_v8 = vcombine.high %v1659_v15, %v1663_v32  ;;  %v1775_v22 = vld [vmem:[%s17070_s5 + $0x6f8] sm:$0xff] }
 0x276   : > { %3932 = vmatpush1.bf16.msra.mxu0 %v9600_v39  ;;  %v9696_v39 = vcombine.low %v1795_v23, %v1799_v30  ;;  %v1635_v1 = vld [vmem:[%s17070_s5 + $0x298] sm:$0xff] }
 0x277   : > { %3645 = vmatmul.mubr.bf16.gmra.mxu1 %v12765_v51  ;;  %3933 = vmatprep.subr.bf16.mxu0 %v9593_v11  ;;  %v9689_v11 = vcombine.high %v1787_v6, %v1791_v36  ;;  %v1639_v33 = vld [vmem:[%s17070_s5 + $0x2b8] sm:$0xff] }
 0x278   : > { %3821 = vmatpush1.bf16.msra.mxu1 %v9464_v29  ;;  %3654 = vmatprep.mubr.bf16.mxu1 %v12822_v57  ;;  %v9560_v29 = vcombine.low %v1659_v15, %v1663_v32  ;;  %v1763_v23 = vld [vmem:[%s17070_s5 + $0x698] sm:$0xff] }
 0x279   : > { %3758 = vmatmul.mubr.bf16.gmra.mxu0 %v12781_v12  ;;  %3822 = vmatprep.subr.bf16.mxu1 %v9457_v10  ;;  %v9553_v10 = vcombine.high %v1651_v27, %v1655_v55  ;;  %v1767_v30 = vld [vmem:[%s17070_s5 + $0x6b8] sm:$0xff] }
 0x27a   : > { %3767 = vmatprep.mubr.bf16.mxu0 %v12824_v58  ;;  %3934 = vmatpush1.bf16.msra.mxu0 %v9592_v3  ;;  %v9688_v3 = vcombine.low %v1787_v6, %v1791_v36  ;;  %v1627_v15 = vld [vmem:[%s17070_s5 + $0x258] sm:$0xff] }
 0x27b   : > { %3935 = vmatprep.subr.bf16.mxu0 %v9585_v5  ;;  %v9681_v5 = vcombine.high %v1779_v38, %v1783_v21  ;;  %v1631_v32 = vld [vmem:[%s17070_s5 + $0x278] sm:$0xff] }
 0x27c   : > { %3823 = vmatpush1.bf16.msra.mxu1 %v9456_v20  ;;  %v9552_v20 = vcombine.low %v1651_v27, %v1655_v55  ;;  %v1755_v6 = vld [vmem:[%s17070_s5 + $0x658] sm:$0xff] }
 0x27d   : > { %3824 = vmatprep.subr.bf16.mxu1 %v9577_v43  ;;  %v9545_v43 = vcombine.high %v1643_v14, %v1647_v42  ;;  %v1759_v36 = vld [vmem:[%s17070_s5 + $0x678] sm:$0xff] }
 0x27e   : > { %3936 = vmatpush1.bf16.msra.mxu0 %v9584_v2  ;;  %v9680_v2 = vcombine.low %v1779_v38, %v1783_v21  ;;  %v1619_v27 = vld [vmem:[%s17070_s5 + $0x218] sm:$0xff] }
 0x27f   : > { %3655 = vmatmul.mubr.bf16.gmra.mxu1 %v12820_v24  ;;  %3937 = vmatprep.subr.bf16.mxu0 %v9705_v46  ;;  %v9673_v46 = vcombine.high %v1771_v61, %v1775_v22  ;;  %v1623_v55 = vld [vmem:[%s17070_s5 + $0x238] sm:$0xff] }
 0x280   : > { %3825 = vmatpush2.bf16.msra.mxu1 %v9576_v0  ;;  %3664 = vmatprep.mubr.bf16.mxu1 %v12875_v9  ;;  %v9544_v0 = vcombine.low %v1643_v14, %v1647_v42  ;;  %v1747_v38 = vld [vmem:[%s17070_s5 + $0x618] sm:$0xff]  ;;  %v9520_v42 = vcombine.low %v1619_v27, %v1623_v55 }
 0x281   : > { %3768 = vmatmul.mubr.bf16.gmra.mxu0 %v12830_v40  ;;  %3826 = vmatprep.subr.bf16.mxu1 %v9569_v26  ;;  %v9537_v26 = vcombine.high %v1635_v1, %v1639_v33  ;;  %v1751_v21 = vld [vmem:[%s17070_s5 + $0x638] sm:$0xff] }
 0x282   : > { %3777 = vmatprep.mubr.bf16.mxu0 %v12880_v13  ;;  %3938 = vmatpush2.bf16.msra.mxu0 %v9704_v41  ;;  %v9672_v41 = vcombine.low %v1771_v61, %v1775_v22  ;;  %v9649_v14 = vcombine.high %v1747_v38, %v1751_v21  ;;  %v10560_v61 = vld [vmem:[%s17072_s7 + $0x18c] ss:$28 sps:$4 sm:$0xff]   ;;  %v9648_v22 = vcombine.low %v1747_v38, %v1751_v21 }
 0x283   : > { %3939 = vmatprep.subr.bf16.mxu0 %v9697_v48  ;;  %v9665_v48 = vcombine.high %v1763_v23, %v1767_v30  ;;  %v10572_v38 = vld [vmem:[%s17072_s7 + $0xac] ss:$28 sps:$4 sm:$0xff]  }
 0x284   : > { %3827 = vmatpush2.bf16.msra.mxu1 %v9568_v50  ;;  %v9536_v50 = vcombine.low %v1635_v1, %v1639_v33  ;;  %v10558_v1 = vld [vmem:[%s17072_s7 + $0x188] ss:$28 sps:$4 sm:$0xff]  }
 0x285   : > { %3828 = vmatprep.subr.bf16.mxu1 %v9561_v8  ;;  %v9529_v8 = vcombine.high %v1627_v15, %v1631_v32 }
 0x286   : > { %3940 = vmatpush2.bf16.msra.mxu0 %v9696_v39  ;;  %v9664_v39 = vcombine.low %v1763_v23, %v1767_v30  ;;  %v10573_v23 = vld [vmem:[%s17072_s7 + $0x508] ss:$28 sps:$4 sm:$0xff]  }
 0x287   : > { %3665 = vmatmul.mubr.bf16.gmra.mxu1 %v12878_v44  ;;  %3941 = vmatprep.subr.bf16.mxu0 %v9689_v11  ;;  %v9657_v11 = vcombine.high %v1755_v6, %v1759_v36 }
 0x288   : > { %3829 = vmatpush2.bf16.msra.mxu1 %v9560_v29  ;;  %3674 = vmatprep.mubr.bf16.mxu1 %v12937_v35  ;;  %v9528_v29 = vcombine.low %v1627_v15, %v1631_v32  ;;  %v10566_v32 = vld [vmem:[%s17072_s7 + $0x11c] ss:$28 sps:$4 sm:$0xff]  }
 0x289   : > { %3778 = vmatmul.mubr.bf16.gmra.mxu0 %v12889_v37  ;;  %3830 = vmatprep.subr.bf16.mxu1 %v9553_v10  ;;  %v9521_v10 = vcombine.high %v1619_v27, %v1623_v55  ;;  %v10593_v55 = vld [vmem:[%s17072_s7 + $0x464] ss:$28 sps:$4 sm:$0xff]  }
 0x28a   : > { %3787 = vmatprep.mubr.bf16.mxu0 %v12962_v17  ;;  %3942 = vmatpush2.bf16.msra.mxu0 %v9688_v3  ;;  %v9656_v3 = vcombine.low %v1755_v6, %v1759_v36  ;;  %v10564_v6 = vld [vmem:[%s17072_s7 + $0x118] ss:$28 sps:$4 sm:$0xff]  }
 0x28b   : > { %3943 = vmatprep.subr.bf16.mxu0 %v9681_v5  ;;  %v13477_v5 = vpop.f32.mrf.mxu1 }
 0x28c   : > { %3831 = vmatpush2.bf16.msra.mxu1 %v9552_v20  ;;  %v13480_v20 = vpop.f32.mrf.mxu0 }
 0x28d   : > { %3832 = vmatprep.subr.bf16.mxu1 %v9545_v43  ;;  %v13486_v43 = vpop.f32.mrf.mxu1 }
 0x28e   : > { %3944 = vmatpush2.bf16.msra.mxu0 %v9680_v2  ;;  %v10575_v2 = vld [vmem:[%s17072_s7 + $0x50c] ss:$28 sps:$4 sm:$0xff]  }
 0x28f   : > { %3675 = vmatmul.mubr.bf16.gmra.mxu1 %v12943_v16  ;;  %3945 = vmatprep.subr.bf16.mxu0 %v9673_v46  ;;  %v13496_v33 = vpop.f32.mrf.mxu1 }
 0x290   : > { %3833 = vmatpush2.bf16.msra.mxu1 %v9544_v0  ;;  %3684 = vmatprep.mubr.bf16.mxu1 %v13017_v45 }
 0x291   : > { %3788 = vmatmul.mubr.bf16.gmra.mxu0 %v12968_v4  ;;  %3834 = vmatprep.subr.bf16.mxu1 %v9537_v26  ;;  %v13503_v0 = vpop.f32.mrf.mxu1  ;;  %v10581_v26 = vld [vmem:[%s17072_s7 + $0x4d4] ss:$28 sps:$4 sm:$0xff]  }
 0x292   : > { %3797 = vmatprep.mubr.bf16.mxu0 %v13022_v19  ;;  %3946 = vmatpush2.bf16.msra.mxu0 %v9672_v41  ;;  %v10561_v41 = vld [vmem:[%s17072_s7 + $0x150] ss:$28 sps:$4 sm:$0xff]  }
 0x293   : > { %3947 = vmatprep.subr.bf16.mxu0 %v9665_v48 }
 0x294   : > { %3835 = vmatpush2.bf16.msra.mxu1 %v9536_v50 }
 0x295   : > { %3836 = vmatprep.subr.bf16.mxu1 %v9529_v8  ;;  %v10569_v8 = vld [vmem:[%s17072_s7 + $0xe4] ss:$28 sps:$4 sm:$0xff]  }
 0x296   : > { %3948 = vmatpush2.bf16.msra.mxu0 %v9664_v39  ;;  %v13519_v15 = vpop.f32.mrf.mxu1  ;;  %v10585_v39 = vld [vmem:[%s17072_s7 + $0x498] ss:$28 sps:$4 sm:$0xff]  }
 0x297   : > { %3685 = vmatmul.mubr.bf16.gmra.mxu1 %v13020_v47  ;;  %3949 = vmatprep.subr.bf16.mxu0 %v9657_v11  ;;  %v10567_v11 = vld [vmem:[%s17072_s7 + $0xe0] ss:$28 sps:$4 sm:$0xff]  }
 0x298   : > { %3837 = vmatpush2.bf16.msra.mxu1 %v9528_v29  ;;  %3840 = vmatprep.mubr.bf16.mxu1 %v12626_v56  ;;  %v13488_v56 = vpop.f32.mrf.mxu0  ;;  %v13530_v48 = vpop.f32.mrf.mxu1 }
 0x299   : > { %3798 = vmatmul.mubr.bf16.gmra.mxu0 %v13032_v34  ;;  %3838 = vmatprep.subr.bf16.mxu1 %v9521_v10 }
 0x29a   : > { %3950 = vmatpush2.bf16.msra.mxu0 %v9656_v3  ;;  %3953 = vmatprep.mubr.bf16.mxu0 %v12631_v25  ;;  %v13498_v46 = vpop.f32.mrf.mxu0  ;;  %v10563_v25 = vld [vmem:[%s17072_s7 + $0x154] ss:$28 sps:$4 sm:$0xff]   ;;  %v10570_v3 = vld [vmem:[%s17072_s7 + $0xa8] ss:$28 sps:$4 sm:$0xff]  }
 0x29b   : > { %3951 = vmatprep.subr.bf16.mxu0 %v9649_v14  ;;  %v10578_v14 = vld [vmem:[%s17072_s7 + $0x74] ss:$28 sps:$4 sm:$0xff]  }
 0x29c   : > { %3839 = vmatpush2.bf16.msra.mxu1 %v9520_v42  ;;  %v13509_v30 = vpop.f32.mrf.mxu0 }
 0x29d   : > { %7335 = vmatprep.subr.bf16.mxu1 %v10560_v61  ;;  %v10597_v61 = vld [vmem:[%s17072_s7 + $0x428] ss:$28 sps:$4 sm:$0xff]  }
 0x29e   : > { %3952 = vmatpush2.bf16.msra.mxu0 %v9648_v22 }
 0x29f   : > { %3841 = vmatmul.mubr.bf16.vlgmr.msra.gmra.mxu1 %v17370_v59  ;;  %7448 = vmatprep.subr.bf16.mxu0 %v10575_v2  ;;  %v13521_v59 = vpop.f32.mrf.mxu0  ;;  %v10605_v2 = vld [vmem:[%s17072_s7 + $0x3f4] ss:$28 sps:$4 sm:$0xff]  }
 0x2a0   : > { %3850 = vmatprep.mubr.bf16.mxu1 %v12659_v62  ;;  %7336 = vmatpush1.bf16.msra.mxu1 %v10558_v1  ;;  %v10579_v62 = vld [vmem:[%s17072_s7 + $0x4d0] ss:$28 sps:$4 sm:$0xff]  }
 0x2a1   : > { %3954 = vmatmul.mubr.bf16.vlgmr.msra.gmra.mxu0 %v17371_v49  ;;  %7337 = vmatprep.subr.bf16.mxu1 %v10563_v25  ;;  %v13532_v50 = vpop.f32.mrf.mxu0  ;;  %v10587_v49 = vld [vmem:[%s17072_s7 + $0x49c] ss:$28 sps:$4 sm:$0xff]   ;;  %v10576_v25 = vld [vmem:[%s17072_s7 + $0x70] ss:$28 sps:$4 sm:$0xff]  }
 0x2a2   : > { %3963 = vmatprep.mubr.bf16.mxu0 %v12670_v7  ;;  %7449 = vmatpush1.bf16.msra.mxu0 %v10573_v23  ;;  %v13540_v7 = vpop.f32.mrf.mxu1 }
 0x2a3   : > { %7450 = vmatprep.subr.bf16.mxu0 %v10581_v26  ;;  %v13542_v36 = vpop.f32.mrf.mxu0 }
 0x2a4   : > { %7338 = vmatpush1.bf16.msra.mxu1 %v10561_v41  ;;  %v13551_v27 = vpop.f32.mrf.mxu1 }
 0x2a5   : > { %7339 = vmatprep.subr.bf16.mxu1 %v10566_v32  ;;  %v13560_v29 = vpop.f32.mrf.mxu0 }
 0x2a6   : > { %7451 = vmatpush1.bf16.msra.mxu0 %v10579_v62  ;;  %v10590_v62 = vld [vmem:[%s17072_s7 + $0x4] ss:$28 sps:$4 sm:$0xff]  }
 0x2a7   : > { %3851 = vmatmul.mubr.bf16.gmra.mxu1 %v12666_v31  ;;  %7452 = vmatprep.subr.bf16.mxu0 %v10587_v49  ;;  %v13563_v31 = vpop.f32.mrf.mxu1  ;;  %v13577_v10 = vpop.f32.mrf.mxu0 }
 0x2a8   : > { %3860 = vmatprep.mubr.bf16.mxu1 %v12711_v53  ;;  %7340 = vmatpush1.bf16.msra.mxu1 %v10564_v6  ;;  %v10591_v53 = vld [vmem:[%s17072_s7 + $0x460] ss:$28 sps:$4 sm:$0xff]   ;;  %v10609_v6 = vld [vmem:[%s17072_s7 + $0x3b8] ss:$28 sps:$4 sm:$0xff]  }
 0x2a9   : > { %3964 = vmatmul.mubr.bf16.gmra.mxu0 %v12668_v52  ;;  %7341 = vmatprep.subr.bf16.mxu1 %v10569_v8  ;;  %v13572_v21 = vpop.f32.mrf.mxu1  ;;  %v10599_v52 = vld [vmem:[%s17072_s7 + $0x42c] ss:$28 sps:$4 sm:$0xff]   ;;  %v13587_v42 = vpop.f32.mrf.mxu0 }
 0x2aa   : > { %3973 = vmatprep.mubr.bf16.mxu0 %v12733_v60  ;;  %7453 = vmatpush1.bf16.msra.mxu0 %v10585_v39  ;;  %v10617_v39 = vld [vmem:[%s17072_s7 + $0x384] ss:$28 sps:$4 sm:$0xff]  }
 0x2ab   : > { %7454 = vmatprep.subr.bf16.mxu0 %v10593_v55  ;;  %v13582_v60 = vpop.f32.mrf.mxu1  ;;  %v13599_v1 = vpop.f32.mrf.mxu0 }
 0x2ac   : > { %7342 = vmatpush1.bf16.msra.mxu1 %v10567_v11  ;;  %v10588_v11 = vld [vmem:[%s17072_s7] ss:$28 sps:$4 sm:$0xff]  }
 0x2ad   : > { %7343 = vmatprep.subr.bf16.mxu1 %v10572_v38  ;;  %v13593_v22 = vpop.f32.mrf.mxu1  ;;  %v13609_v23 = vpop.f32.mrf.mxu0 }
 0x2ae   : > { %7455 = vmatpush1.bf16.msra.mxu0 %v10591_v53 }
 0x2af   : > { %3861 = vmatmul.mubr.bf16.gmra.mxu1 %v12719_v18  ;;  %7456 = vmatprep.subr.bf16.mxu0 %v10599_v52  ;;  %v10584_v18 = vld [vmem:[%s17072_s7 + $0x3c] ss:$28 sps:$4 sm:$0xff]   ;;  %v13614_v26 = vpop.f32.mrf.mxu1  ;;  %v13619_v41 = vpop.f32.mrf.mxu0 }
 0x2b0   : > { %3870 = vmatprep.mubr.bf16.mxu1 %v12774_v54  ;;  %7344 = vmatpush1.bf16.msra.mxu1 %v10570_v3  ;;  %v10603_v54 = vld [vmem:[%s17072_s7 + $0x3f0] ss:$28 sps:$4 sm:$0xff]   ;;  %v10615_v52 = vld [vmem:[%s17072_s7 + $0x380] ss:$28 sps:$4 sm:$0xff]  }
 0x2b1   : > { %3974 = vmatmul.mubr.bf16.gmra.mxu0 %v12721_v28  ;;  %7345 = vmatprep.subr.bf16.mxu1 %v10578_v14  ;;  %v10611_v28 = vld [vmem:[%s17072_s7 + $0x3bc] ss:$28 sps:$4 sm:$0xff]   ;;  %v13624_v32 = vpop.f32.mrf.mxu1  ;;  %v13629_v49 = vpop.f32.mrf.mxu0  ;;  %v17372_v3 = vld [vmem:[#allocation3_spill] sm:$0xff] }
 0x2b2   : > { %3983 = vmatprep.mubr.bf16.mxu0 %v12778_v63  ;;  %7457 = vmatpush1.bf16.msra.mxu0 %v10597_v61  ;;  %v10582_v63 = vld [vmem:[%s17072_s7 + $0x38] ss:$28 sps:$4 sm:$0xff]  }
 0x2b3   : > { %7458 = vmatprep.subr.bf16.mxu0 %v10605_v2  ;;  %v13635_v8 = vpop.f32.mrf.mxu1  ;;  %v13641_v55 = vpop.f32.mrf.mxu0  ;;  %v17373_v2 = vld [vmem:[#allocation4_spill] sm:$0xff] }
 0x2b4   : > { %7346 = vmatpush1.bf16.msra.mxu1 %v10576_v25 }
 0x2b5   : > { %7347 = vmatprep.subr.bf16.mxu1 %v10584_v18  ;;  %v13652_v38 = vpop.f32.mrf.mxu1  ;;  %v13658_v53 = vpop.f32.mrf.mxu0 }
 0x2b6   : > { %7459 = vmatpush1.bf16.msra.mxu0 %v10603_v54  ;;  %v10602_v54 = vld [vmem:[%s17072_s7 + $0x314] ss:$28 sps:$4 sm:$0xff]  }
 0x2b7   : > { %3871 = vmatmul.mubr.bf16.gmra.mxu1 %v12765_v51  ;;  %7460 = vmatprep.subr.bf16.mxu0 %v10611_v28  ;;  %v13649_v51 = vld [vmem:[%s17071_s6] sm:$0xff]  ;;  %v13670_v61 = vpop.f32.mrf.mxu1 }
 0x2b8   : > { %3880 = vmatprep.mubr.bf16.mxu1 %v12822_v57  ;;  %7348 = vmatpush1.bf16.msra.mxu1 %v10582_v63  ;;  %v10596_v57 = vld [vmem:[%s17072_s7 + $0x34c] ss:$28 sps:$4 sm:$0xff]   ;;  %v13668_v14 = vrot.slane %v13649_v51, %v17372_v3  ;;  %v13677_v25 = vrot.slane %v13649_v51, %v17373_v2  ;;  %v13679_v18 = vpop.f32.mrf.mxu0 }
 0x2b9   : > { %3984 = vmatmul.mubr.bf16.gmra.mxu0 %v12781_v12  ;;  %7349 = vmatprep.subr.bf16.mxu1 %v10590_v62  ;;  %v10623_v12 = vld [vmem:[%s17072_s7 + $0x6cc] ss:$28 sps:$4 sm:$0xff]   ;;  %v13686_v63 = vpop.f32.mrf.mxu1 }
 0x2ba   : > { %3993 = vmatprep.mubr.bf16.mxu0 %v12824_v58  ;;  %7461 = vmatpush1.bf16.msra.mxu0 %v10609_v6  ;;  %v10594_v58 = vld [vmem:[%s17072_s7 + $0x348] ss:$28 sps:$4 sm:$0xff]   ;;  %v3169_v28 = vadd.f32 %v13496_v33, %v13668_v14  ;;  %v3171_v6 = vadd.f32 %v13503_v0, %v13677_v25  ;;  %v3165_v33 = vadd.f32 %v13477_v5, %v13668_v14  ;;  %v10600_v0 = vld [vmem:[%s17072_s7 + $0x310] ss:$28 sps:$4 sm:$0xff]   ;;  %v10608_v5 = vld [vmem:[%s17072_s7 + $0x2dc] ss:$28 sps:$4 sm:$0xff]  }
 0x2bb   : > { %7462 = vmatprep.subr.bf16.mxu0 %v10617_v39  ;;  %v10621_v62 = vld [vmem:[%s17072_s7 + $0x6c8] ss:$28 sps:$4 sm:$0xff]   ;;  %v13694_v39 = vpop.f32.mrf.mxu0 }
 0x2bc   : > { %7350 = vmatpush1.bf16.msra.mxu1 %v10588_v11  ;;  %v10629_v11 = vld [vmem:[%s17072_s7 + $0x694] ss:$28 sps:$4 sm:$0xff]  }
 0x2bd   : > { %7351 = vmatprep.subr.bf16.mxu1 %v10596_v57  ;;  %v13702_v57 = vpop.f32.mrf.mxu1 }
 0x2be   : > { %7463 = vmatpush1.bf16.msra.mxu0 %v10615_v52  ;;  %v13710_v52 = vpop.f32.mrf.mxu0 }
 0x2bf   : > { %3881 = vmatmul.mubr.bf16.gmra.mxu1 %v12820_v24  ;;  %7464 = vmatprep.subr.bf16.mxu0 %v10623_v12  ;;  %v3167_v24 = vadd.f32 %v13486_v43, %v13677_v25  ;;  %v13717_v12 = vpop.f32.mrf.mxu1  ;;  %v10627_v43 = vld [vmem:[%s17072_s7 + $0x690] ss:$28 sps:$4 sm:$0xff]  }
 0x2c0   : > { %3890 = vmatprep.mubr.bf16.mxu1 %v12875_v9  ;;  %7352 = vmatpush2.bf16.msra.mxu1 %v10594_v58  ;;  %v3282_v9 = vadd.f32 %v13498_v46, %v3169_v28  ;;  %v13723_v58 = vpop.f32.mrf.mxu0  ;;  %v3278_v46 = vadd.f32 %v13480_v20, %v3165_v33  ;;  %v10606_v28 = vld [vmem:[%s17072_s7 + $0x2d8] ss:$28 sps:$4 sm:$0xff]   ;;  %v3179_v33 = vadd.f32 %v13540_v7, %v13668_v14 }
 0x2c1   : > { %3994 = vmatmul.mubr.bf16.gmra.mxu0 %v12830_v40  ;;  %7353 = vmatprep.subr.bf16.mxu1 %v10602_v54  ;;  %v3284_v40 = vadd.f32 %v13509_v30, %v3171_v6  ;;  %v10635_v54 = vld [vmem:[%s17072_s7 + $0x65c] ss:$28 sps:$4 sm:$0xff]   ;;  %v3175_v30 = vadd.f32 %v13519_v15, %v13668_v14 }
 0x2c2   : > { %4003 = vmatprep.mubr.bf16.mxu0 %v12880_v13  ;;  %7465 = vmatpush2.bf16.msra.mxu0 %v10621_v62  ;;  %v13729_v13 = vpop.f32.mrf.mxu1  ;;  %v3280_v62 = vadd.f32 %v13488_v56, %v3167_v24  ;;  %v13737_v6 = vpop.f32.mrf.mxu0  ;;  %v4170_v20 = vmul.f32 0.2, %v3282_v9  ;;  %v10633_v56 = vld [vmem:[%s17072_s7 + $0x658] ss:$28 sps:$4 sm:$0xff]   ;;  %vm4042_vm0 = vcmp.gt.f32.partialorder %v3282_v9, 0.0  ;;  %vm4034_vm2 = vcmp.gt.f32.partialorder %v3278_v46, 0.0 }
 0x2c3   : > { %7466 = vmatprep.subr.bf16.mxu0 %v10629_v11  ;;  %v10614_v11 = vld [vmem:[%s17072_s7 + $0x2a4] ss:$28 sps:$4 sm:$0xff]   ;;  %v4171_v15 = vmul.f32 0.2, %v3284_v40  ;;  %v4162_v2 = vmul.f32 0.2, %v3278_v46  ;;  %v3288_v3 = vadd.f32 %v13521_v59, %v3175_v30  ;;  %v3181_v59 = vadd.f32 %v13551_v27, %v13677_v25 }
 0x2c4   : > { %7354 = vmatpush2.bf16.msra.mxu1 %v10600_v0  ;;  %v13744_v0 = vpop.f32.mrf.mxu1  ;;  %v13750_v24 = vpop.f32.mrf.mxu0  ;;  %vm4043_vm1 = vcmp.gt.f32.partialorder %v3284_v40, 0.0  ;;  %vm4035_vm3 = vcmp.gt.f32.partialorder %v3280_v62, 0.0  ;;  %v3189_v27 = vadd.f32 %v13582_v60, %v13668_v14 }
 0x2c5   : > { %7355 = vmatprep.subr.bf16.mxu1 %v10608_v5  ;;  %17374 = vst [vmem:[#allocation7_spill] sm:$0xff] %v13744_v0  ;;  %17375 = vst [vmem:[#allocation8_spill] sm:$0xff] %v13750_v24  ;;  %v10641_v5 = vld [vmem:[%s17072_s7 + $0x624] ss:$28 sps:$4 sm:$0xff]   ;;  %v3292_v0 = vadd.f32 %v13542_v36, %v3179_v33  ;;  %v4299_v30 = vsel %vm4043_vm1, %v3284_v40, %v4171_v15  ;;  %v3187_v36 = vadd.f32 %v13572_v21, %v13677_v25  ;;  %v17376_v21 = vld [vmem:[#allocation5_spill] sm:$0xff] }
 0x2c6   : > { %7467 = vmatpush2.bf16.msra.mxu0 %v10627_v43  ;;  %v13756_v7 = vpop.f32.mrf.mxu1  ;;  %v10612_v43 = vld [vmem:[%s17072_s7 + $0x2a0] ss:$28 sps:$4 sm:$0xff]   ;;  %v13765_v24 = vpop.f32.mrf.mxu0  ;;  %v3191_v40 = vadd.f32 %v13593_v22, %v13677_v25  ;;  %v13800_v60 = vrot.slane %v13649_v51, %v17376_v21  ;;  %vm4050_vm4 = vcmp.gt.f32.partialorder %v3288_v3, 0.0 }
 0x2c7   : > { %3891 = vmatmul.mubr.bf16.gmra.mxu1 %v12878_v44  ;;  %7468 = vmatprep.subr.bf16.mxu0 %v10635_v54  ;;  %v4163_v44 = vmul.f32 0.2, %v3280_v62  ;;  %v3177_v54 = vadd.f32 %v13530_v48, %v13677_v25  ;;  %v17377_v33 = vld [vmem:[#allocation6_spill] sm:$0xff]  ;;  %vm4058_vm5 = vcmp.gt.f32.partialorder %v3292_v0, 0.0 }
 0x2c8   : > { %3900 = vmatprep.mubr.bf16.mxu1 %v12937_v35  ;;  %7356 = vmatpush2.bf16.msra.mxu1 %v10606_v28  ;;  %v10620_v35 = vld [vmem:[%s17072_s7 + $0x26c] ss:$28 sps:$4 sm:$0xff]   ;;  %v4298_v28 = vsel %vm4042_vm0, %v3282_v9, %v4170_v20  ;;  %v13775_v48 = vpop.f32.mrf.mxu1  ;;  %v13787_v9 = vpop.f32.mrf.mxu0  ;;  %v4290_v20 = vsel %vm4034_vm2, %v3278_v46, %v4162_v2  ;;  %v4178_v2 = vmul.f32 0.2, %v3288_v3 }
 0x2c9   : > { %4004 = vmatmul.mubr.bf16.gmra.mxu0 %v12889_v37  ;;  %7357 = vmatprep.subr.bf16.mxu1 %v10614_v11  ;;  %v10639_v37 = vld [vmem:[%s17072_s7 + $0x620] ss:$28 sps:$4 sm:$0xff]   ;;  %v3185_v11 = vadd.f32 %v13563_v31, %v13668_v14  ;;  %v10618_v31 = vld [vmem:[%s17072_s7 + $0x268] ss:$28 sps:$4 sm:$0xff]   ;;  %v4291_v15 = vsel %vm4035_vm3, %v3280_v62, %v4163_v44  ;;  %v13810_v22 = vadd.f32 %v13532_v50, %v3177_v54 }
 0x2ca   : > { %4013 = vmatprep.mubr.bf16.mxu0 %v12962_v17  ;;  %7469 = vmatpush2.bf16.msra.mxu0 %v10633_v56  ;;  %v10644_v17 = vld [vmem:[%s17072_s7 + $0x5ec] ss:$28 sps:$4 sm:$0xff]   ;;  %v13804_v56 = vrot.slane %v13649_v51, %v17377_v33  ;;  %v13817_v21 = vpack.c.bf16 %v4299_v30, %v4291_v15  ;;  %v4186_v51 = vmul.f32 0.2, %v3292_v0  ;;  %v3294_v33 = vadd.f32 %v13560_v29, %v3181_v59  ;;  %v10647_v29 = vld [vmem:[%s17072_s7 + $0x5b4] ss:$28 sps:$4 sm:$0xff]  }
 0x2cb   : > { %7470 = vmatprep.subr.bf16.mxu0 %v10641_v5  ;;  %v13807_v5 = vpack.c.bf16 %v4298_v28, %v4290_v20  ;;  %v10642_v62 = vld [vmem:[%s17072_s7 + $0x5e8] ss:$28 sps:$4 sm:$0xff]   ;;  %v3298_v50 = vadd.f32 %v13577_v10, %v3185_v11  ;;  %v3300_v44 = vadd.f32 %v13587_v42, %v3187_v36  ;;  %v13826_v54 = vadd.f32 %v13599_v1, %v3189_v27  ;;  %v10632_v1 = vld [vmem:[%s17072_s7 + $0x1fc] ss:$28 sps:$4 sm:$0xff]   ;;  %v10645_v30 = vld [vmem:[%s17072_s7 + $0x5b0] ss:$28 sps:$4 sm:$0xff]  }
 0x2cc   : > { %7358 = vmatpush2.bf16.msra.mxu1 %v10612_v43  ;;  %v10626_v43 = vld [vmem:[%s17072_s7 + $0x234] ss:$28 sps:$4 sm:$0xff]   ;;  %17379 = vst [vmem:[#allocation10_spill] sm:$0xff] %v13817_v21  ;;  %v3304_v59 = vadd.f32 %v13609_v23, %v3191_v40  ;;  %v3195_v10 = vadd.f32 %v13614_v26, %v13668_v14  ;;  %v3197_v42 = vadd.f32 %v13624_v32, %v13677_v25  ;;  %vm4051_vm6 = vcmp.gt.f32.partialorder %v13810_v22, 0.0 }
 0x2cd   : > { %17378 = vst [vmem:[#allocation9_spill] sm:$0xff] %v13807_v5  ;;  %v13812_v46 = vpop.f32.mrf.mxu1  ;;  %7359 = vmatprep.subr.bf16.mxu1 %v10620_v35  ;;  %v3199_v23 = vadd.f32 %v13635_v8, %v13668_v14  ;;  %v3201_v26 = vadd.f32 %v13652_v38, %v13677_v25  ;;  %v4179_v8 = vmul.f32 0.2, %v13810_v22  ;;  %v4314_v11 = vsel %vm4058_vm5, %v3292_v0, %v4186_v51 }
 0x2ce   : > { %7471 = vmatpush2.bf16.msra.mxu0 %v10639_v37  ;;  %v13828_v35 = vpop.f32.mrf.mxu0  ;;  %v4306_v37 = vsel %vm4050_vm4, %v3288_v3, %v4178_v2  ;;  %v10650_v3 = vld [vmem:[%s17072_s7 + $0x57c] ss:$28 sps:$4 sm:$0xff]   ;;  %vm4059_vm7 = vcmp.gt.f32.partialorder %v3294_v33, 0.0  ;;  %v4187_v38 = vmul.f32 0.2, %v3294_v33  ;;  %vm4066_vm8 = vcmp.gt.f32.partialorder %v3298_v50, 0.0 }
 0x2cf   : > { %3901 = vmatmul.mubr.bf16.gmra.mxu1 %v12943_v16  ;;  %v13831_v28 = vpop.f32.mrf.mxu1  ;;  %7472 = vmatprep.subr.bf16.mxu0 %v10644_v17  ;;  %v10624_v16 = vld [vmem:[%s17072_s7 + $0x230] ss:$28 sps:$4 sm:$0xff]   ;;  %vm4067_vm9 = vcmp.gt.f32.partialorder %v3300_v44, 0.0  ;;  %v4195_v36 = vmul.f32 0.2, %v3300_v44  ;;  %v13877_v0 = vadd.f32 %v13629_v49, %v3197_v42  ;;  %vm4074_vm10 = vcmp.gt.f32.partialorder %v13826_v54, 0.0 }
 0x2d0   : > { %3910 = vmatprep.mubr.bf16.mxu1 %v13017_v45  ;;  %7360 = vmatpush2.bf16.msra.mxu1 %v10618_v31  ;;  %v13855_v45 = vpop.f32.mrf.mxu0  ;;  %v4202_v20 = vmul.f32 0.2, %v13826_v54  ;;  %v4203_v40 = vmul.f32 0.2, %v3304_v59  ;;  %v13874_v31 = vadd.f32 %v13619_v41, %v3195_v10  ;;  %vm4075_vm11 = vcmp.gt.f32.partialorder %v3304_v59, 0.0 }
 0x2d1   : > { %4014 = vmatmul.mubr.bf16.gmra.mxu0 %v12968_v4  ;;  %v13857_v32 = vpop.f32.mrf.mxu1  ;;  %7361 = vmatprep.subr.bf16.mxu1 %v10626_v43  ;;  %v4194_v4 = vmul.f32 0.2, %v3298_v50  ;;  %v3312_v15 = vadd.f32 %v13641_v55, %v3199_v23  ;;  %v3314_v2 = vadd.f32 %v13658_v53, %v3201_v26  ;;  %v10638_v41 = vld [vmem:[%s17072_s7 + $0x1c4] ss:$28 sps:$4 sm:$0xff]   ;;  %v4307_v49 = vsel %vm4051_vm6, %v13810_v22, %v4179_v8  ;;  %v10648_v53 = vld [vmem:[%s17072_s7 + $0x578] ss:$28 sps:$4 sm:$0xff]  }
 0x2d2   : > { %4023 = vmatprep.mubr.bf16.mxu0 %v13022_v19  ;;  %7473 = vmatpush2.bf16.msra.mxu0 %v10642_v62  ;;  %v13868_v27 = vpop.f32.mrf.mxu0  ;;  %v10630_v19 = vld [vmem:[%s17072_s7 + $0x1f8] ss:$28 sps:$4 sm:$0xff]   ;;  %v13893_v51 = vpack.c.bf16 %v4314_v11, %v4306_v37  ;;  %v4315_v62 = vsel %vm4059_vm7, %v3294_v33, %v4187_v38  ;;  %v3209_v55 = vadd.f32 %v13702_v57, %v13668_v14  ;;  %v10653_v57 = vld [vmem:[%s17072_s7 + $0x544] ss:$28 sps:$4 sm:$0xff]   ;;  %v10656_v26 = vld [vmem:[%s17072_s7 + $0x88c] ss:$28 sps:$4 sm:$0xff]  }
 0x2d3   : > { %v13870_v17 = vpop.f32.mrf.mxu1  ;;  %7474 = vmatprep.subr.bf16.mxu0 %v10647_v29  ;;  %v4322_v29 = vsel %vm4066_vm8, %v3298_v50, %v4194_v4  ;;  %v4323_v10 = vsel %vm4067_vm9, %v3300_v44, %v4195_v36  ;;  %v3211_v42 = vadd.f32 %v13717_v12, %v13677_v25  ;;  %v4330_v33 = vsel %vm4074_vm10, %v13826_v54, %v4202_v20 }
 0x2d4   : > { %7362 = vmatpush2.bf16.msra.mxu1 %v10624_v16  ;;  %v13885_v43 = vpop.f32.mrf.mxu0  ;;  %17380 = vst [vmem:[#allocation11_spill] sm:$0xff] %v13893_v51  ;;  %v4331_v50 = vsel %vm4075_vm11, %v3304_v59, %v4203_v40  ;;  %v4210_v44 = vmul.f32 0.2, %v13874_v31  ;;  %v4211_v16 = vmul.f32 0.2, %v13877_v0  ;;  %v3205_v54 = vadd.f32 %v13670_v61, %v13668_v14 }
 0x2d5   : > { %7363 = vmatprep.subr.bf16.mxu1 %v10632_v1  ;;  %v4218_v1 = vmul.f32 0.2, %v3312_v15  ;;  %v4219_v37 = vmul.f32 0.2, %v3314_v2  ;;  %v3207_v59 = vadd.f32 %v13686_v63, %v13677_v25  ;;  %vm4090_vm12 = vcmp.gt.f32.partialorder %v3312_v15, 0.0 }
 0x2d6   : > { %7475 = vmatpush2.bf16.msra.mxu0 %v10645_v30  ;;  %vm4091_vm13 = vcmp.gt.f32.partialorder %v3314_v2, 0.0  ;;  %v3322_v30 = vadd.f32 %v13710_v52, %v3209_v55  ;;  %vm4082_vm14 = vcmp.gt.f32.partialorder %v13874_v31, 0.0  ;;  %vm4083_vm15 = vcmp.gt.f32.partialorder %v13877_v0, 0.0 }
 0x2d7   : > { %v13905_v22 = vpop.f32.mrf.mxu1  ;;  %3911 = vmatmul.mubr.bf16.gmra.mxu1 %v13020_v47  ;;  %7476 = vmatprep.subr.bf16.mxu0 %v10650_v3  ;;  %v10636_v47 = vld [vmem:[%s17072_s7 + $0x1c0] ss:$28 sps:$4 sm:$0xff]   ;;  %v3215_v3 = vadd.f32 %v13729_v13, %v13668_v14  ;;  %v3324_v63 = vadd.f32 %v13723_v58, %v3211_v42  ;;  %v3219_v8 = vadd.f32 %v13756_v7, %v13668_v14  ;;  %v10704_v13 = vld [vmem:[%s17072_s7 + $0xc0c] ss:$28 sps:$4 sm:$0xff]  }
 0x2d8   : > { %7364 = vmatpush2.bf16.msra.mxu1 %v10630_v19  ;;  %7367 = vmatprep.mubr.bf16.mxu1 %v13817_v21  ;;  %v13951_v11 = vpack.c.bf16 %v4315_v62, %v4307_v49  ;;  %v13953_v38 = vpack.c.bf16 %v4330_v33, %v4322_v29  ;;  %v13955_v4 = vpack.c.bf16 %v4331_v50, %v4323_v10  ;;  %v10654_v7 = vld [vmem:[%s17072_s7 + $0x888] ss:$28 sps:$4 sm:$0xff]   ;;  %vm4106_vm0 = vcmp.gt.f32.partialorder %v3322_v30, 0.0  ;;  %v10657_v33 = vld [vmem:[%s17072_s7 + $0x850] ss:$28 sps:$4 sm:$0xff]  }
 0x2d9   : > { %v13917_v12 = vpop.f32.mrf.mxu0  ;;  %4024 = vmatmul.mubr.bf16.gmra.mxu0 %v13032_v34  ;;  %v13928_v23 = vpop.f32.mrf.mxu1  ;;  %7365 = vmatprep.subr.bf16.mxu1 %v10638_v41  ;;  %v10651_v34 = vld [vmem:[%s17072_s7 + $0x540] ss:$28 sps:$4 sm:$0xff]   ;;  %v3221_v36 = vadd.f32 %v13775_v48, %v13677_v25  ;;  %v4346_v20 = vsel %vm4090_vm12, %v3312_v15, %v4218_v1  ;;  %v4347_v40 = vsel %vm4091_vm13, %v3314_v2, %v4219_v37  ;;  %v10659_v48 = vld [vmem:[%s17072_s7 + $0x854] ss:$28 sps:$4 sm:$0xff]   ;;  %v4234_v2 = vmul.f32 0.2, %v3322_v30 }
 0x2da   : > { %7477 = vmatpush2.bf16.msra.mxu0 %v10648_v53  ;;  %17381 = vst [vmem:[#allocation12_spill] sm:$0xff] %v13951_v11  ;;  %17382 = vst [vmem:[#allocation13_spill] sm:$0xff] %v13953_v38  ;;  %v3318_v19 = vadd.f32 %v13679_v18, %v3205_v54  ;;  %v3320_v41 = vadd.f32 %v13694_v39, %v3207_v59  ;;  %v4338_v62 = vsel %vm4082_vm14, %v13874_v31, %v4210_v44  ;;  %v17384_v53 = vld [vmem:[#allocation7_spill] sm:$0xff] }
 0x2db   : > { %v13936_v61 = vpop.f32.mrf.mxu0  ;;  %v13946_v52 = vpop.f32.mrf.mxu1  ;;  %7478 = vmatprep.subr.bf16.mxu0 %v10653_v57  ;;  %17383 = vst [vmem:[#allocation14_spill] sm:$0xff] %v13955_v4  ;;  %v4339_v15 = vsel %vm4083_vm15, %v13877_v0, %v4211_v16  ;;  %v3328_v18 = vadd.f32 %v13737_v6, %v3215_v3  ;;  %v4235_v39 = vmul.f32 0.2, %v3324_v63  ;;  %v3217_v29 = vadd.f32 %v17384_v53, %v13677_v25 }
 0x2dc   : > { %7366 = vmatpush2.bf16.msra.mxu1 %v10636_v47  ;;  %v3332_v10 = vadd.f32 %v13765_v24, %v3219_v8  ;;  %v13986_v31 = vpack.c.bf16 %v4346_v20, %v4338_v62  ;;  %v13988_v0 = vpack.c.bf16 %v4347_v40, %v4339_v15  ;;  %vm4107_vm1 = vcmp.gt.f32.partialorder %v3324_v63, 0.0  ;;  %v10662_v24 = vld [vmem:[%s17072_s7 + $0x81c] ss:$28 sps:$4 sm:$0xff]  }
 0x2dd   : > { %v13959_v58 = vpop.f32.mrf.mxu0  ;;  %v13968_v49 = vpop.f32.mrf.mxu1  ;;  %7561 = vmatprep.subr.bf16.mxu1 %v10656_v26  ;;  %v3334_v6 = vadd.f32 %v13787_v9, %v3221_v36  ;;  %vm4098_vm2 = vcmp.gt.f32.partialorder %v3318_v19, 0.0  ;;  %v4226_v50 = vmul.f32 0.2, %v3318_v19  ;;  %vm4099_vm3 = vcmp.gt.f32.partialorder %v3320_v41, 0.0  ;;  %v17387_v26 = vld [vmem:[#allocation8_spill] sm:$0xff] }
 0x2de   : > { %7479 = vmatpush2.bf16.msra.mxu0 %v10651_v34  ;;  %17385 = vst [vmem:[#allocation15_spill] sm:$0xff] %v13986_v31  ;;  %17386 = vst [vmem:[#allocation16_spill] sm:$0xff] %v13988_v0  ;;  %v4227_v44 = vmul.f32 0.2, %v3320_v41  ;;  %v4362_v9 = vsel %vm4106_vm0, %v3322_v30, %v4234_v2  ;;  %v4242_v47 = vmul.f32 0.2, %v3328_v18  ;;  %v4363_v59 = vsel %vm4107_vm1, %v3324_v63, %v4235_v39 }
 0x2df   : > { %v13980_v55 = vpop.f32.mrf.mxu0  ;;  %v3390_v42 = vpop.f32.mrf.mxu1  ;;  %7368 = vmatmul.mubr.bf16.vlgmr.msra.gmra.mxu1 %v13807_v5  ;;  %7674 = vmatprep.subr.bf16.mxu0 %v10704_v13  ;;  %vm4114_vm4 = vcmp.gt.f32.partialorder %v3328_v18, 0.0  ;;  %v3330_v3 = vadd.f32 %v17387_v26, %v3217_v29  ;;  %v4250_v34 = vmul.f32 0.2, %v3332_v10  ;;  %vm4122_vm5 = vcmp.gt.f32.partialorder %v3332_v10, 0.0  ;;  %v10660_v20 = vld [vmem:[%s17072_s7 + $0x818] ss:$28 sps:$4 sm:$0xff]  }
 0x2e0   : > { %7377 = vmatprep.mubr.bf16.mxu1 %v13951_v11  ;;  %7562 = vmatpush1.bf16.msra.mxu1 %v10654_v7  ;;  %v3391_v1 = vadd.f32 %v3390_v42, %v13800_v60  ;;  %v4251_v13 = vmul.f32 0.2, %v3334_v6  ;;  %v3225_v36 = vadd.f32 %v13812_v46, %v13668_v14  ;;  %v4354_v63 = vsel %vm4098_vm2, %v3318_v19, %v4226_v50  ;;  %v10665_v46 = vld [vmem:[%s17072_s7 + $0x7e4] ss:$28 sps:$4 sm:$0xff]  }
 0x2e1   : > { %v3503_v57 = vpop.f32.mrf.mxu0  ;;  %v3392_v16 = vpop.f32.mrf.mxu1  ;;  %7563 = vmatprep.subr.bf16.mxu1 %v10659_v48  ;;  %v4355_v40 = vsel %vm4099_vm3, %v3320_v41, %v4227_v44  ;;  %vm4123_vm6 = vcmp.gt.f32.partialorder %v3334_v6, 0.0  ;;  %v14014_v15 = vpack.c.bf16 %v4362_v9, %v4354_v63  ;;  %v4370_v39 = vsel %vm4114_vm4, %v3328_v18, %v4242_v47 }
 0x2e2   : > { %v3393_v37 = vadd.f32 %v3392_v16, %v13804_v56  ;;  %v14016_v2 = vpack.c.bf16 %v4363_v59, %v4355_v40  ;;  %v3504_v53 = vadd.f32 %v3503_v57, %v3391_v1  ;;  %v4243_v42 = vmul.f32 0.2, %v3330_v3  ;;  %v10668_v16 = vld [vmem:[%s17072_s7 + $0x7ac] ss:$28 sps:$4 sm:$0xff]  }
 0x2e3   : > { %v3505_v54 = vpop.f32.mrf.mxu0  ;;  %v3394_v8 = vpop.f32.mrf.mxu1  ;;  %17388 = vst [vmem:[#allocation17_spill] sm:$0xff] %v14014_v15  ;;  %v4378_v19 = vsel %vm4122_vm5, %v3332_v10, %v4250_v34  ;;  %vm4115_vm7 = vcmp.gt.f32.partialorder %v3330_v3, 0.0  ;;  %v14024_v44 = vadd.f32 %v13828_v35, %v3225_v36  ;;  %v3227_v18 = vadd.f32 %v13831_v28, %v13677_v25  ;;  %v10663_v10 = vld [vmem:[%s17072_s7 + $0x7e0] ss:$28 sps:$4 sm:$0xff]  }
 0x2e4   : > { %v3395_v30 = vadd.f32 %v3394_v8, %v13800_v60  ;;  %7564 = vmatpush1.bf16.msra.mxu1 %v10657_v33  ;;  %v3506_v48 = vadd.f32 %v3505_v54, %v3393_v37  ;;  %17389 = vst [vmem:[#allocation18_spill] sm:$0xff] %v14016_v2  ;;  %v4164_v1 = vmul.f32 0.2, %v3504_v53  ;;  %v4371_v59 = vsel %vm4115_vm7, %v3330_v3, %v4243_v42 }
 0x2e5   : > { %v3507_v7 = vpop.f32.mrf.mxu0  ;;  %v3396_v62 = vpop.f32.mrf.mxu1  ;;  %7565 = vmatprep.subr.bf16.mxu1 %v10662_v24  ;;  %v4379_v24 = vsel %vm4123_vm6, %v3334_v6, %v4251_v13  ;;  %vm4036_vm10 = vcmp.gt.f32.partialorder %v3504_v53, 0.0  ;;  %v14038_v8 = vpack.c.bf16 %v4378_v19, %v4370_v39  ;;  %v3340_v36 = vadd.f32 %v13855_v45, %v3227_v18  ;;  %v10702_v19 = vld [vmem:[%s17072_s7 + $0xc08] ss:$28 sps:$4 sm:$0xff]   ;;  %v10669_v18 = vld [vmem:[%s17072_s7 + $0x770] ss:$28 sps:$4 sm:$0xff]  }
 0x2e6   : > { %v3508_v41 = vadd.f32 %v3507_v7, %v3395_v30  ;;  %v3397_v33 = vadd.f32 %v3396_v62, %v13804_v56  ;;  %v4165_v9 = vmul.f32 0.2, %v3506_v48  ;;  %vm4037_vm9 = vcmp.gt.f32.partialorder %v3506_v48, 0.0 }
 0x2e7   : > { %v3509_v29 = vpop.f32.mrf.mxu0  ;;  %v3400_v50 = vpop.f32.mrf.mxu1  ;;  %7378 = vmatmul.mubr.bf16.gmra.mxu1 %v13893_v51  ;;  %17390 = vst [vmem:[#allocation19_spill] sm:$0xff] %v14038_v8  ;;  %v14040_v13 = vpack.c.bf16 %v4379_v24, %v4371_v59  ;;  %vm4130_vm12 = vcmp.gt.f32.partialorder %v14024_v44, 0.0  ;;  %v4292_v39 = vsel %vm4036_vm10, %v3504_v53, %v4164_v1  ;;  %vm4131_vm13 = vcmp.gt.f32.partialorder %v3340_v36, 0.0 }
 0x2e8   : > { %7387 = vmatprep.mubr.bf16.mxu1 %v13955_v4  ;;  %7566 = vmatpush1.bf16.msra.mxu1 %v10660_v20  ;;  %vm4044_vm8 = vcmp.gt.f32.partialorder %v3508_v41, 0.0  ;;  %v4172_v6 = vmul.f32 0.2, %v3508_v41  ;;  %v3510_v35 = vadd.f32 %v3509_v29, %v3397_v33  ;;  %v3401_v28 = vadd.f32 %v3400_v50, %v13800_v60 }
 0x2e9   : > { %v3513_v57 = vpop.f32.mrf.mxu0  ;;  %v3402_v47 = vpop.f32.mrf.mxu1  ;;  %7567 = vmatprep.subr.bf16.mxu1 %v10665_v46  ;;  %17391 = vst [vmem:[#allocation20_spill] sm:$0xff] %v14040_v13  ;;  %v4293_v20 = vsel %vm4037_vm9, %v3506_v48, %v4165_v9  ;;  %v10666_v46 = vld [vmem:[%s17072_s7 + $0x7a8] ss:$28 sps:$4 sm:$0xff]   ;;  %v10671_v48 = vld [vmem:[%s17072_s7 + $0x774] ss:$28 sps:$4 sm:$0xff]  }
 0x2ea   : > { %v3403_v37 = vadd.f32 %v3402_v47, %v13804_v56  ;;  %vm4045_vm11 = vcmp.gt.f32.partialorder %v3510_v35, 0.0  ;;  %v4173_v26 = vmul.f32 0.2, %v3510_v35  ;;  %v4300_v30 = vsel %vm4044_vm8, %v3508_v41, %v4172_v6  ;;  %v10674_v6 = vld [vmem:[%s17072_s7 + $0x73c] ss:$28 sps:$4 sm:$0xff]  }
 0x2eb   : > { %v3515_v54 = vpop.f32.mrf.mxu0  ;;  %v3404_v34 = vpop.f32.mrf.mxu1  ;;  %v3514_v29 = vadd.f32 %v3513_v57, %v3401_v28  ;;  %v3229_v41 = vadd.f32 %v13857_v32, %v13668_v14  ;;  %v14060_v33 = vpack.c.bf16 %v4300_v30, %v4292_v39  ;;  %v10710_v57 = vld [vmem:[%s17072_s7 + $0xbd4] ss:$28 sps:$4 sm:$0xff]   ;;  %v4259_v32 = vmul.f32 0.2, %v3340_v36 }
 0x2ec   : > { %7568 = vmatpush1.bf16.msra.mxu1 %v10663_v10  ;;  %v4301_v63 = vsel %vm4045_vm11, %v3510_v35, %v4173_v26  ;;  %v3516_v40 = vadd.f32 %v3515_v54, %v3403_v37  ;;  %v3405_v62 = vadd.f32 %v3404_v34, %v13800_v60  ;;  %v4258_v10 = vmul.f32 0.2, %v14024_v44  ;;  %v10708_v26 = vld [vmem:[%s17072_s7 + $0xbd0] ss:$28 sps:$4 sm:$0xff]  }
 0x2ed   : > { %v3517_v7 = vpop.f32.mrf.mxu0  ;;  %v3406_v3 = vpop.f32.mrf.mxu1  ;;  %7569 = vmatprep.subr.bf16.mxu1 %v10668_v16  ;;  %v14050_v45 = vpack.c.bf16 %v4301_v63, %v4293_v20  ;;  %v3231_v16 = vadd.f32 %v13870_v17, %v13677_v25  ;;  %v4180_v37 = vmul.f32 0.2, %v3514_v29  ;;  %v3342_v34 = vadd.f32 %v13868_v27, %v3229_v41  ;;  %v10716_v20 = vld [vmem:[%s17072_s7 + $0xb9c] ss:$28 sps:$4 sm:$0xff]  }
 0x2ee   : > { %v3518_v50 = vadd.f32 %v3517_v7, %v3405_v62  ;;  %v3407_v53 = vadd.f32 %v3406_v3, %v13804_v56  ;;  %v4181_v35 = vmul.f32 0.2, %v3516_v40  ;;  %vm4053_vm15 = vcmp.gt.f32.partialorder %v3516_v40, 0.0 }
 0x2ef   : > { %17392 = vst [vmem:[#allocation21_spill] sm:$0xff] %v14050_v45  ;;  %v3519_v42 = vpop.f32.mrf.mxu0  ;;  %v3410_v24 = vpop.f32.mrf.mxu1  ;;  %7388 = vmatmul.mubr.bf16.gmra.mxu1 %v13953_v38  ;;  %7480 = vmatprep.mubr.bf16.mxu0 %v14050_v45  ;;  %vm4052_vm0 = vcmp.gt.f32.partialorder %v3514_v29, 0.0  ;;  %v14091_v63 = vsel %vm4130_vm12, %v14024_v44, %v4258_v10  ;;  %v14094_v62 = vsel %vm4131_vm13, %v3340_v36, %v4259_v32  ;;  %v10672_v44 = vld [vmem:[%s17072_s7 + $0x738] ss:$28 sps:$4 sm:$0xff]   ;;  %vm4138_vm2 = vcmp.gt.f32.partialorder %v3342_v34, 0.0 }
 0x2f0   : > { %7397 = vmatprep.mubr.bf16.mxu1 %v13988_v0  ;;  %vm4060_vm14 = vcmp.gt.f32.partialorder %v3518_v50, 0.0  ;;  %v4188_v47 = vmul.f32 0.2, %v3518_v50  ;;  %v3520_v1 = vadd.f32 %v3519_v42, %v3407_v53  ;;  %7481 = vmatmul.mubr.bf16.vlgmr.msra.gmra.mxu0 %v14060_v33  ;;  %v3411_v17 = vadd.f32 %v3410_v24, %v13800_v60 }
 0x2f1   : > { %v3523_v9 = vpop.f32.mrf.mxu0  ;;  %v3412_v28 = vpop.f32.mrf.mxu1  ;;  %7570 = vmatpush1.bf16.msra.mxu1 %v10666_v46  ;;  %7675 = vmatpush1.bf16.msra.mxu0 %v10702_v19  ;;  %v3344_v3 = vadd.f32 %v13885_v43, %v3231_v16  ;;  %v4309_v39 = vsel %vm4053_vm15, %v3516_v40, %v4181_v35  ;;  %v4308_v36 = vsel %vm4052_vm0, %v3514_v29, %v4180_v37  ;;  %v10677_v40 = vld [vmem:[%s17072_s7 + $0x704] ss:$28 sps:$4 sm:$0xff]  }
 0x2f2   : > { %v3413_v54 = vadd.f32 %v3412_v28, %v13804_v56  ;;  %7571 = vmatprep.subr.bf16.mxu1 %v10671_v48  ;;  %vm4061_vm1 = vcmp.gt.f32.partialorder %v3520_v1, 0.0  ;;  %v4189_v30 = vmul.f32 0.2, %v3520_v1  ;;  %7676 = vmatprep.subr.bf16.mxu0 %v10710_v57  ;;  %v4316_v27 = vsel %vm4060_vm14, %v3518_v50, %v4188_v47  ;;  %v10714_v50 = vld [vmem:[%s17072_s7 + $0xb98] ss:$28 sps:$4 sm:$0xff]  }
 0x2f3   : > { %v3525_v59 = vpop.f32.mrf.mxu0  ;;  %v3414_v7 = vpop.f32.mrf.mxu1  ;;  %v3524_v43 = vadd.f32 %v3523_v9, %v3411_v17  ;;  %v14112_v57 = vpack.c.bf16 %v4316_v27, %v4308_v36  ;;  %v10675_v16 = vld [vmem:[%s17072_s7 + $0x700] ss:$28 sps:$4 sm:$0xff]   ;;  %vm4139_vm3 = vcmp.gt.f32.partialorder %v3344_v3, 0.0  ;;  %v14124_v35 = vadd.f32 %v13905_v22, %v13668_v14 }
 0x2f4   : > { %v4317_v42 = vsel %vm4061_vm1, %v3520_v1, %v4189_v30  ;;  %v3526_v48 = vadd.f32 %v3525_v59, %v3413_v54  ;;  %v3415_v19 = vadd.f32 %v3414_v7, %v13800_v60  ;;  %v10722_v9 = vld [vmem:[%s17072_s7 + $0xb64] ss:$28 sps:$4 sm:$0xff]   ;;  %v10680_v1 = vld [vmem:[%s17072_s7 + $0xa4c] ss:$28 sps:$4 sm:$0xff]  }
 0x2f5   : > { %v3527_v46 = vpop.f32.mrf.mxu0  ;;  %v3416_v41 = vpop.f32.mrf.mxu1  ;;  %7572 = vmatpush1.bf16.msra.mxu1 %v10669_v18  ;;  %v14104_v53 = vpack.c.bf16 %v4317_v42, %v4309_v39  ;;  %7677 = vmatpush1.bf16.msra.mxu0 %v10708_v26  ;;  %v4266_v18 = vmul.f32 0.2, %v3342_v34  ;;  %v4196_v59 = vmul.f32 0.2, %v3524_v43  ;;  %v10720_v7 = vld [vmem:[%s17072_s7 + $0xb60] ss:$28 sps:$4 sm:$0xff]  }
 0x2f6   : > { %7573 = vmatprep.subr.bf16.mxu1 %v10674_v6  ;;  %v3528_v10 = vadd.f32 %v3527_v46, %v3415_v19  ;;  %v3417_v29 = vadd.f32 %v3416_v41, %v13804_v56  ;;  %7678 = vmatprep.subr.bf16.mxu0 %v10716_v20  ;;  %v4267_v6 = vmul.f32 0.2, %v3344_v3  ;;  %v4197_v28 = vmul.f32 0.2, %v3526_v48  ;;  %v10728_v39 = vld [vmem:[%s17072_s7 + $0xb2c] ss:$28 sps:$4 sm:$0xff]  }
 0x2f7   : > { %v3529_v24 = vpop.f32.mrf.mxu0  ;;  %v3420_v32 = vpop.f32.mrf.mxu1  ;;  %7398 = vmatmul.mubr.bf16.gmra.mxu1 %v13986_v31  ;;  %7490 = vmatprep.mubr.bf16.mxu0 %v14104_v53  ;;  %vm4069_vm5 = vcmp.gt.f32.partialorder %v3526_v48, 0.0  ;;  %v4394_v20 = vsel %vm4138_vm2, %v3342_v34, %v4266_v18  ;;  %vm4068_vm6 = vcmp.gt.f32.partialorder %v3524_v43, 0.0  ;;  %v3237_v19 = vadd.f32 %v13928_v23, %v13677_v25 }
 0x2f8   : > { %7407 = vmatprep.mubr.bf16.mxu1 %v14016_v2  ;;  %vm4076_vm4 = vcmp.gt.f32.partialorder %v3528_v10, 0.0  ;;  %v4204_v37 = vmul.f32 0.2, %v3528_v10  ;;  %v3530_v17 = vadd.f32 %v3529_v24, %v3417_v29  ;;  %7491 = vmatmul.mubr.bf16.gmra.mxu0 %v14112_v57  ;;  %v3421_v22 = vadd.f32 %v3420_v32, %v13800_v60 }
 0x2f9   : > { %v3533_v47 = vpop.f32.mrf.mxu0  ;;  %v3422_v54 = vpop.f32.mrf.mxu1  ;;  %7574 = vmatpush1.bf16.msra.mxu1 %v10672_v44  ;;  %7679 = vmatpush1.bf16.msra.mxu0 %v10714_v50  ;;  %v4395_v42 = vsel %vm4139_vm3, %v3344_v3, %v4267_v6  ;;  %v3241_v41 = vadd.f32 %v13968_v49, %v13677_v25  ;;  %v4325_v36 = vsel %vm4069_vm5, %v3526_v48, %v4197_v28  ;;  %v10678_v3 = vld [vmem:[%s17072_s7 + $0xa48] ss:$28 sps:$4 sm:$0xff]   ;;  %v10683_v48 = vld [vmem:[%s17072_s7 + $0xa14] ss:$28 sps:$4 sm:$0xff]  }
 0x2fa   : > { %v3423_v26 = vadd.f32 %v3422_v54, %v13804_v56  ;;  %7575 = vmatprep.subr.bf16.mxu1 %v10677_v40  ;;  %vm4077_vm7 = vcmp.gt.f32.partialorder %v3530_v17, 0.0  ;;  %v4205_v27 = vmul.f32 0.2, %v3530_v17  ;;  %7680 = vmatprep.subr.bf16.mxu0 %v10722_v9  ;;  %v4332_v44 = vsel %vm4076_vm4, %v3528_v10, %v4204_v37  ;;  %v10726_v10 = vld [vmem:[%s17072_s7 + $0xb28] ss:$28 sps:$4 sm:$0xff]  }
 0x2fb   : > { %v3535_v30 = vpop.f32.mrf.mxu0  ;;  %v3424_v46 = vpop.f32.mrf.mxu1  ;;  %v4324_v23 = vsel %vm4068_vm6, %v3524_v43, %v4196_v59  ;;  %v3534_v25 = vadd.f32 %v3533_v47, %v3421_v22  ;;  %v10734_v6 = vld [vmem:[%s17072_s7 + $0xaf4] ss:$28 sps:$4 sm:$0xff]   ;;  %v14169_v47 = vpack.c.bf16 %v4394_v20, %v14091_v63  ;;  %v3354_v28 = vadd.f32 %v13980_v55, %v3241_v41  ;;  %v10686_v54 = vld [vmem:[%s17072_s7 + $0x9dc] ss:$28 sps:$4 sm:$0xff]  }
 0x2fc   : > { %v4333_v24 = vsel %vm4077_vm7, %v3530_v17, %v4205_v27  ;;  %v3536_v40 = vadd.f32 %v3535_v30, %v3423_v26  ;;  %v3425_v50 = vadd.f32 %v3424_v46, %v13800_v60  ;;  %v14161_v32 = vpack.c.bf16 %v4332_v44, %v4324_v23  ;;  %v10681_v17 = vld [vmem:[%s17072_s7 + $0xa10] ss:$28 sps:$4 sm:$0xff]  }
 0x2fd   : > { %v3537_v34 = vpop.f32.mrf.mxu0  ;;  %v3426_v18 = vpop.f32.mrf.mxu1  ;;  %7576 = vmatpush1.bf16.msra.mxu1 %v10675_v16  ;;  %v14153_v29 = vpack.c.bf16 %v4333_v24, %v4325_v36  ;;  %7681 = vmatpush1.bf16.msra.mxu0 %v10720_v7  ;;  %17394 = vst [vmem:[#allocation23_spill] sm:$0xff] %v14169_v47  ;;  %v4212_v22 = vmul.f32 0.2, %v3534_v25  ;;  %v10732_v20 = vld [vmem:[%s17072_s7 + $0xaf0] ss:$28 sps:$4 sm:$0xff]   ;;  %v3350_v27 = vadd.f32 %v13936_v61, %v3237_v19  ;;  %vm4084_vm10 = vcmp.gt.f32.partialorder %v3534_v25, 0.0 }
 0x2fe   : > { %7577 = vmatprep.subr.bf16.mxu1 %v10680_v1  ;;  %17393 = vst [vmem:[#allocation22_spill] sm:$0xff] %v14161_v32  ;;  %v3538_v16 = vadd.f32 %v3537_v34, %v3425_v50  ;;  %v3427_v9 = vadd.f32 %v3426_v18, %v13804_v56  ;;  %7682 = vmatprep.subr.bf16.mxu0 %v10728_v39  ;;  %v4213_v63 = vmul.f32 0.2, %v3536_v40  ;;  %vm4085_vm9 = vcmp.gt.f32.partialorder %v3536_v40, 0.0 }
 0x2ff   : > { %v3539_v49 = vpop.f32.mrf.mxu0  ;;  %v3430_v43 = vpop.f32.mrf.mxu1  ;;  %7408 = vmatmul.mubr.bf16.gmra.mxu1 %v14014_v15  ;;  %v14172_v1 = vpack.c.bf16 %v4395_v42, %v14094_v62  ;;  %7500 = vmatprep.mubr.bf16.mxu0 %v14153_v29  ;;  %v10740_v42 = vld [vmem:[%s17072_s7 + $0xabc] ss:$28 sps:$4 sm:$0xff]   ;;  %v3239_v41 = vadd.f32 %v13946_v52, %v13668_v14  ;;  %vm4155_vm12 = vcmp.gt.f32.partialorder %v3354_v28, 0.0  ;;  %v4283_v44 = vmul.f32 0.2, %v3354_v28 }
 0x300   : > { %7417 = vmatprep.mubr.bf16.mxu1 %v14040_v13  ;;  %vm4092_vm8 = vcmp.gt.f32.partialorder %v3538_v16, 0.0  ;;  %v4220_v59 = vmul.f32 0.2, %v3538_v16  ;;  %v3540_v62 = vadd.f32 %v3539_v49, %v3427_v9  ;;  %7501 = vmatmul.mubr.bf16.gmra.mxu0 %v14161_v32  ;;  %v3431_v26 = vadd.f32 %v3430_v43, %v13800_v60 }
 0x301   : > { %17395 = vst [vmem:[#allocation24_spill] sm:$0xff] %v14172_v1  ;;  %v3543_v37 = vpop.f32.mrf.mxu0  ;;  %v3432_v55 = vpop.f32.mrf.mxu1  ;;  %7578 = vmatpush2.bf16.msra.mxu1 %v10678_v3  ;;  %7683 = vmatpush1.bf16.msra.mxu0 %v10726_v10  ;;  %v4341_v24 = vsel %vm4085_vm9, %v3536_v40, %v4213_v63  ;;  %v10684_v3 = vld [vmem:[%s17072_s7 + $0x9d8] ss:$28 sps:$4 sm:$0xff]   ;;  %v4340_v23 = vsel %vm4084_vm10, %v3534_v25, %v4212_v22  ;;  %v10689_v40 = vld [vmem:[%s17072_s7 + $0x9a4] ss:$28 sps:$4 sm:$0xff]   ;;  %vm4147_vm13 = vcmp.gt.f32.partialorder %v3350_v27, 0.0 }
 0x302   : > { %v3433_v30 = vadd.f32 %v3432_v55, %v13804_v56  ;;  %7579 = vmatprep.subr.bf16.mxu1 %v10683_v48  ;;  %vm4093_vm11 = vcmp.gt.f32.partialorder %v3540_v62, 0.0  ;;  %v4221_v46 = vmul.f32 0.2, %v3540_v62  ;;  %7684 = vmatprep.subr.bf16.mxu0 %v10734_v6  ;;  %v4348_v34 = vsel %vm4092_vm8, %v3538_v16, %v4220_v59  ;;  %v10738_v48 = vld [vmem:[%s17072_s7 + $0xab8] ss:$28 sps:$4 sm:$0xff]  }
 0x303   : > { %v3545_v7 = vpop.f32.mrf.mxu0  ;;  %v3434_v39 = vpop.f32.mrf.mxu1  ;;  %v3544_v52 = vadd.f32 %v3543_v37, %v3431_v26  ;;  %v4275_v10 = vmul.f32 0.2, %v3350_v27  ;;  %v14210_v16 = vpack.c.bf16 %v4348_v34, %v4340_v23  ;;  %v10746_v6 = vld [vmem:[%s17072_s7 + $0xa84] ss:$28 sps:$4 sm:$0xff]   ;;  %v14219_v37 = vadd.f32 %v13917_v12, %v14124_v35 }
 0x304   : > { %v4349_v61 = vsel %vm4093_vm11, %v3540_v62, %v4221_v46  ;;  %v3546_v19 = vadd.f32 %v3545_v7, %v3433_v30  ;;  %v3435_v50 = vadd.f32 %v3434_v39, %v13800_v60  ;;  %v10687_v59 = vld [vmem:[%s17072_s7 + $0x9a0] ss:$28 sps:$4 sm:$0xff]   ;;  %v10692_v62 = vld [vmem:[%s17072_s7 + $0x96c] ss:$28 sps:$4 sm:$0xff]  }
 0x305   : > { %v3547_v36 = vpop.f32.mrf.mxu0  ;;  %v3436_v18 = vpop.f32.mrf.mxu1  ;;  %7580 = vmatpush2.bf16.msra.mxu1 %v10681_v17  ;;  %v14202_v14 = vpack.c.bf16 %v4349_v61, %v4341_v24  ;;  %7685 = vmatpush1.bf16.msra.mxu0 %v10732_v20  ;;  %17397 = vst [vmem:[#allocation26_spill] sm:$0xff] %v14210_v16  ;;  %v3352_v17 = vadd.f32 %v13959_v58, %v3239_v41  ;;  %v10744_v7 = vld [vmem:[%s17072_s7 + $0xa80] ss:$28 sps:$4 sm:$0xff]   ;;  %vm4100_vm0 = vcmp.gt.f32.partialorder %v3544_v52, 0.0  ;;  %vm4146_vm3 = vcmp.gt.f32.partialorder %v14219_v37, 0.0 }
 0x306   : > { %7581 = vmatprep.subr.bf16.mxu1 %v10686_v54  ;;  %v3548_v9 = vadd.f32 %v3547_v36, %v3435_v50  ;;  %v3437_v25 = vadd.f32 %v3436_v18, %v13804_v56  ;;  %7686 = vmatprep.subr.bf16.mxu0 %v10740_v42  ;;  %v4411_v54 = vsel %vm4155_vm12, %v3354_v28, %v4283_v44  ;;  %v4229_v12 = vmul.f32 0.2, %v3546_v19  ;;  %v10752_v42 = vld [vmem:[%s17072_s7 + $0xdcc] ss:$28 sps:$4 sm:$0xff]  }
 0x307   : > { %17396 = vst [vmem:[#allocation25_spill] sm:$0xff] %v14202_v14  ;;  %v3549_v49 = vpop.f32.mrf.mxu0  ;;  %v3440_v43 = vpop.f32.mrf.mxu1  ;;  %7418 = vmatmul.mubr.bf16.gmra.mxu1 %v14038_v8  ;;  %7510 = vmatprep.mubr.bf16.mxu0 %v14202_v14  ;;  %v4228_v28 = vmul.f32 0.2, %v3544_v52  ;;  %vm4101_vm15 = vcmp.gt.f32.partialorder %v3546_v19, 0.0  ;;  %v4403_v20 = vsel %vm4147_vm13, %v3350_v27, %v4275_v10  ;;  %vm4154_vm2 = vcmp.gt.f32.partialorder %v3352_v17, 0.0 }
 0x308   : > { %7427 = vmatprep.mubr.bf16.mxu1 %v14172_v1  ;;  %vm4108_vm14 = vcmp.gt.f32.partialorder %v3548_v9, 0.0  ;;  %v4236_v35 = vmul.f32 0.2, %v3548_v9  ;;  %v3550_v55 = vadd.f32 %v3549_v49, %v3437_v25  ;;  %7511 = vmatmul.mubr.bf16.gmra.mxu0 %v14210_v16  ;;  %v3441_v22 = vadd.f32 %v3440_v43, %v13800_v60  ;;  %v10750_v10 = vld [vmem:[%s17072_s7 + $0xdc8] ss:$28 sps:$4 sm:$0xff]  }
 0x309   : > { %v3553_v63 = vpop.f32.mrf.mxu0  ;;  %v3442_v58 = vpop.f32.mrf.mxu1  ;;  %7582 = vmatpush2.bf16.msra.mxu1 %v10684_v3  ;;  %7687 = vmatpush1.bf16.msra.mxu0 %v10738_v48  ;;  %v4282_v41 = vmul.f32 0.2, %v3352_v17  ;;  %v14241_v44 = vpack.c.bf16 %v4411_v54, %v4403_v20  ;;  %v4357_v24 = vsel %vm4101_vm15, %v3546_v19, %v4229_v12  ;;  %v10690_v3 = vld [vmem:[%s17072_s7 + $0x968] ss:$28 sps:$4 sm:$0xff]   ;;  %v4356_v23 = vsel %vm4100_vm0, %v3544_v52, %v4228_v28  ;;  %v10695_v19 = vld [vmem:[%s17072_s7 + $0x934] ss:$28 sps:$4 sm:$0xff]  }
 0x30a   : > { %v3443_v26 = vadd.f32 %v3442_v58, %v13804_v56  ;;  %7583 = vmatprep.subr.bf16.mxu1 %v10689_v40  ;;  %vm4109_vm1 = vcmp.gt.f32.partialorder %v3550_v55, 0.0  ;;  %v4237_v46 = vmul.f32 0.2, %v3550_v55  ;;  %7688 = vmatprep.subr.bf16.mxu0 %v10746_v6  ;;  %v4364_v34 = vsel %vm4108_vm14, %v3548_v9, %v4236_v35  ;;  %v10758_v54 = vld [vmem:[%s17072_s7 + $0xd94] ss:$28 sps:$4 sm:$0xff]  }
 0x30b   : > { %v3555_v30 = vpop.f32.mrf.mxu0  ;;  %v3444_v39 = vpop.f32.mrf.mxu1  ;;  %17398 = vst [vmem:[#allocation27_spill] sm:$0xff] %v14241_v44  ;;  %v3554_v40 = vadd.f32 %v3553_v63, %v3441_v22  ;;  %v4274_v9 = vmul.f32 0.2, %v14219_v37  ;;  %v14259_v25 = vpack.c.bf16 %v4364_v34, %v4356_v23  ;;  %v4410_v63 = vsel %vm4154_vm2, %v3352_v17, %v4282_v41  ;;  %v10698_v12 = vld [vmem:[%s17072_s7 + $0x8fc] ss:$28 sps:$4 sm:$0xff]  }
 0x30c   : > { %v4365_v61 = vsel %vm4109_vm1, %v3550_v55, %v4237_v46  ;;  %v3556_v27 = vadd.f32 %v3555_v30, %v3443_v26  ;;  %v3445_v50 = vadd.f32 %v3444_v39, %v13800_v60 }
 0x30d   : > { %v3557_v36 = vpop.f32.mrf.mxu0  ;;  %v3446_v18 = vpop.f32.mrf.mxu1  ;;  %7584 = vmatpush2.bf16.msra.mxu1 %v10687_v59  ;;  %v14250_v49 = vpack.c.bf16 %v4365_v61, %v4357_v24  ;;  %7689 = vmatpush1.bf16.msra.mxu0 %v10744_v7  ;;  %17400 = vst [vmem:[#allocation29_spill] sm:$0xff] %v14259_v25  ;;  %v4244_v28 = vmul.f32 0.2, %v3554_v40  ;;  %v10756_v7 = vld [vmem:[%s17072_s7 + $0xd90] ss:$28 sps:$4 sm:$0xff]   ;;  %v4402_v20 = vsel %vm4146_vm3, %v14219_v37, %v4274_v9  ;;  %vm4116_vm6 = vcmp.gt.f32.partialorder %v3554_v40, 0.0 }
 0x30e   : > { %7585 = vmatprep.subr.bf16.mxu1 %v10692_v62  ;;  %v3558_v43 = vadd.f32 %v3557_v36, %v3445_v50  ;;  %v3447_v52 = vadd.f32 %v3446_v18, %v13804_v56  ;;  %7690 = vmatprep.subr.bf16.mxu0 %v10752_v42  ;;  %v10693_v62 = vld [vmem:[%s17072_s7 + $0x930] ss:$28 sps:$4 sm:$0xff]   ;;  %v4245_v35 = vmul.f32 0.2, %v3556_v27  ;;  %vm4117_vm5 = vcmp.gt.f32.partialorder %v3556_v27, 0.0 }
 0x30f   : > { %17399 = vst [vmem:[#allocation28_spill] sm:$0xff] %v14250_v49  ;;  %v3559_v48 = vpop.f32.mrf.mxu0  ;;  %v3450_v6 = vpop.f32.mrf.mxu1  ;;  %7428 = vmatmul.mubr.bf16.gmra.mxu1 %v14169_v47  ;;  %7520 = vmatprep.mubr.bf16.mxu0 %v14250_v49  ;;  %v10764_v42 = vld [vmem:[%s17072_s7 + $0xd5c] ss:$28 sps:$4 sm:$0xff]   ;;  %v14288_v41 = vpack.c.bf16 %v4410_v63, %v4402_v20  ;;  %v4372_v23 = vsel %vm4116_vm6, %v3554_v40, %v4244_v28 }
 0x310   : > { %7437 = vmatprep.mubr.bf16.mxu1 %v14241_v44  ;;  %vm4124_vm4 = vcmp.gt.f32.partialorder %v3558_v43, 0.0  ;;  %v4252_v55 = vmul.f32 0.2, %v3558_v43  ;;  %v3560_v58 = vadd.f32 %v3559_v48, %v3447_v52  ;;  %7521 = vmatmul.mubr.bf16.gmra.mxu0 %v14259_v25  ;;  %v3451_v22 = vadd.f32 %v3450_v6, %v13800_v60  ;;  %v10762_v9 = vld [vmem:[%s17072_s7 + $0xd58] ss:$28 sps:$4 sm:$0xff]  }
 0x311   : > { %v3563_v59 = vpop.f32.mrf.mxu0  ;;  %v3452_v17 = vpop.f32.mrf.mxu1  ;;  %7586 = vmatpush2.bf16.msra.mxu1 %v10690_v3  ;;  %7691 = vmatpush2.bf16.msra.mxu0 %v10750_v10  ;;  %17401 = vst [vmem:[#allocation30_spill] sm:$0xff] %v14288_v41  ;;  %v4373_v24 = vsel %vm4117_vm5, %v3556_v27, %v4245_v35  ;;  %v10696_v3 = vld [vmem:[%s17072_s7 + $0x8f8] ss:$28 sps:$4 sm:$0xff]   ;;  %v10701_v27 = vld [vmem:[%s17072_s7 + $0x8c4] ss:$28 sps:$4 sm:$0xff]  }
 0x312   : > { %v3453_v26 = vadd.f32 %v3452_v17, %v13804_v56  ;;  %7587 = vmatprep.subr.bf16.mxu1 %v10695_v19  ;;  %vm4125_vm7 = vcmp.gt.f32.partialorder %v3560_v58, 0.0  ;;  %v4253_v46 = vmul.f32 0.2, %v3560_v58  ;;  %7692 = vmatprep.subr.bf16.mxu0 %v10758_v54  ;;  %v4380_v34 = vsel %vm4124_vm4, %v3558_v43, %v4252_v55  ;;  %v10770_v54 = vld [vmem:[%s17072_s7 + $0xd24] ss:$28 sps:$4 sm:$0xff]  }
 0x313   : > { %v3565_v30 = vpop.f32.mrf.mxu0  ;;  %v3454_v39 = vpop.f32.mrf.mxu1  ;;  %v3564_v19 = vadd.f32 %v3563_v59, %v3451_v22  ;;  %v14305_v43 = vpack.c.bf16 %v4380_v34, %v4372_v23  ;;  %v17404_v59 = vld [vmem:[#allocation2_spill] sm:$0xff]  ;;  %v10707_v55 = vld [vmem:[%s17072_s7 + $0x194] ss:$28 sps:$4 sm:$0xff]   ;;  %v10776_v34 = vld [vmem:[%s17072_s7 + $0xcec] ss:$28 sps:$4 sm:$0xff]  }
 0x314   : > { %v4381_v61 = vsel %vm4125_vm7, %v3560_v58, %v4253_v46  ;;  %v3566_v50 = vadd.f32 %v3565_v30, %v3453_v26  ;;  %v3455_v37 = vadd.f32 %v3454_v39, %v13800_v60  ;;  %v10699_v35 = vld [vmem:[%s17072_s7 + $0x8c0] ss:$28 sps:$4 sm:$0xff]  }
 0x315   : > { %v3567_v36 = vpop.f32.mrf.mxu0  ;;  %v3456_v18 = vpop.f32.mrf.mxu1  ;;  %7588 = vmatpush2.bf16.msra.mxu1 %v10693_v62  ;;  %v14297_v48 = vpack.c.bf16 %v4381_v61, %v4373_v24  ;;  %7693 = vmatpush2.bf16.msra.mxu0 %v10756_v7  ;;  %17403 = vst [vmem:[#allocation32_spill] sm:$0xff] %v14305_v43  ;;  %v17142_v62 = vsub.s32 4, %v17404_v59  ;;  %v4260_v26 = vmul.f32 0.2, %v3564_v19  ;;  %v10768_v46 = vld [vmem:[%s17072_s7 + $0xd20] ss:$28 sps:$4 sm:$0xff]  }
 0x316   : > { %7589 = vmatprep.subr.bf16.mxu1 %v10698_v12  ;;  %v3568_v52 = vadd.f32 %v3567_v36, %v3455_v37  ;;  %v3457_v6 = vadd.f32 %v3456_v18, %v13804_v56  ;;  %7694 = vmatprep.subr.bf16.mxu0 %v10764_v42  ;;  %v17141_v12 = vsub.s32 5, %v17404_v59  ;;  %v4261_v58 = vmul.f32 0.2, %v3566_v50  ;;  %v14334_v61 = vld [vmem:[%s17071_s6] sm:$0xff] }
 0x317   : > { %17402 = vst [vmem:[#allocation31_spill] sm:$0xff] %v14297_v48  ;;  %v3569_v10 = vpop.f32.mrf.mxu0  ;;  %v3460_v40 = vpop.f32.mrf.mxu1  ;;  %7438 = vmatmul.mubr.bf16.gmra.mxu1 %v14288_v41  ;;  %7530 = vmatprep.mubr.bf16.mxu0 %v14297_v48  ;;  %vm4133_vm9 = vcmp.gt.f32.partialorder %v3566_v50, 0.0  ;;  %vm4132_vm10 = vcmp.gt.f32.partialorder %v3564_v19, 0.0  ;;  %v14339_v37 = vrot.slane %v14334_v61, %v17142_v62 }
 0x318   : > { %vm4140_vm8 = vcmp.gt.f32.partialorder %v3568_v52, 0.0  ;;  %v4268_v17 = vmul.f32 0.2, %v3568_v52  ;;  %v3570_v28 = vadd.f32 %v3569_v10, %v3457_v6  ;;  %7531 = vmatmul.mubr.bf16.gmra.mxu0 %v14305_v43  ;;  %v3461_v30 = vadd.f32 %v3460_v40, %v13800_v60 }
 0x319   : > { %v3573_v63 = vpop.f32.mrf.mxu0  ;;  %v3462_v22 = vpop.f32.mrf.mxu1  ;;  %7590 = vmatpush2.bf16.msra.mxu1 %v10696_v3  ;;  %7695 = vmatpush2.bf16.msra.mxu0 %v10762_v9  ;;  %v14344_v18 = vrot.slane %v14334_v61, %v17141_v12  ;;  %v4389_v3 = vsel %vm4133_vm9, %v3566_v50, %v4261_v58 }
 0x31a   : > { %v3463_v7 = vadd.f32 %v3462_v22, %v13804_v56  ;;  %7591 = vmatprep.subr.bf16.mxu1 %v10701_v27  ;;  %vm4141_vm11 = vcmp.gt.f32.partialorder %v3570_v28, 0.0  ;;  %v4269_v39 = vmul.f32 0.2, %v3570_v28  ;;  %7696 = vmatprep.subr.bf16.mxu0 %v10770_v54  ;;  %v4396_v36 = vsel %vm4140_vm8, %v3568_v52, %v4268_v17  ;;  %v10774_v17 = vld [vmem:[%s17072_s7 + $0xce8] ss:$28 sps:$4 sm:$0xff]  }
 0x31b   : > { %v3575_v20 = vpop.f32.mrf.mxu0  ;;  %v3464_v42 = vpop.f32.mrf.mxu1  ;;  %v4388_v52 = vsel %vm4132_vm10, %v3564_v19, %v4260_v26  ;;  %v3574_v40 = vadd.f32 %v3573_v63, %v3461_v30  ;;  %v10782_v19 = vld [vmem:[%s17072_s7 + $0xcb4] ss:$28 sps:$4 sm:$0xff]  }
 0x31c   : > { %v4397_v23 = vsel %vm4141_vm11, %v3570_v28, %v4269_v39  ;;  %v3576_v10 = vadd.f32 %v3575_v20, %v3463_v7  ;;  %v3465_v27 = vadd.f32 %v3464_v42, %v13800_v60  ;;  %v14354_v22 = vpack.c.bf16 %v4396_v36, %v4388_v52  ;;  %v10780_v20 = vld [vmem:[%s17072_s7 + $0xcb0] ss:$28 sps:$4 sm:$0xff]  }
 0x31d   : > { %v3577_v24 = vpop.f32.mrf.mxu0  ;;  %v3466_v9 = vpop.f32.mrf.mxu1  ;;  %7592 = vmatpush2.bf16.msra.mxu1 %v10699_v35  ;;  %v14349_v6 = vpack.c.bf16 %v4397_v23, %v4389_v3  ;;  %7697 = vmatpush2.bf16.msra.mxu0 %v10768_v46  ;;  %v4276_v30 = vmul.f32 0.2, %v3574_v40  ;;  %vm4148_vm14 = vcmp.gt.f32.partialorder %v3574_v40, 0.0 }
 0x31e   : > { %7787 = vmatprep.subr.bf16.mxu1 %v10707_v55  ;;  %17406 = vst [vmem:[#allocation34_spill] sm:$0xff] %v14354_v22  ;;  %v3578_v50 = vadd.f32 %v3577_v24, %v3465_v27  ;;  %v3467_v58 = vadd.f32 %v3466_v9, %v13804_v56  ;;  %7698 = vmatprep.subr.bf16.mxu0 %v10776_v34  ;;  %v4277_v63 = vmul.f32 0.2, %v3576_v10  ;;  %vm4149_vm13 = vcmp.gt.f32.partialorder %v3576_v10, 0.0  ;;  %v10788_v34 = vld [vmem:[%s17072_s7 + $0xc7c] ss:$28 sps:$4 sm:$0xff]  }
 0x31f   : > { %17405 = vst [vmem:[#allocation33_spill] sm:$0xff] %v14349_v6  ;;  %v3579_v54 = vpop.f32.mrf.mxu0  ;;  %v3616_v60 = vpop.f32.mrf.mxu1  ;;  %7540 = vmatprep.mubr.bf16.mxu0 %v14349_v6 }
 0x320   : > { %vm4156_vm12 = vcmp.gt.f32.partialorder %v3578_v50, 0.0  ;;  %v4284_v35 = vmul.f32 0.2, %v3578_v50  ;;  %v3580_v55 = vadd.f32 %v3579_v54, %v3467_v58  ;;  %7541 = vmatmul.mubr.bf16.gmra.mxu0 %v14354_v22  ;;  %v3617_v56 = vadd.f32 %v3616_v60, %v14339_v37  ;;  %v10786_v60 = vld [vmem:[%s17072_s7 + $0xc78] ss:$28 sps:$4 sm:$0xff]  }
 0x321   : > { %v3729_v28 = vpop.f32.mrf.mxu0  ;;  %v3618_v26 = vpop.f32.mrf.mxu1  ;;  %7699 = vmatpush2.bf16.msra.mxu0 %v10774_v17  ;;  %v4405_v24 = vsel %vm4149_vm13, %v3576_v10, %v4277_v63  ;;  %v4404_v54 = vsel %vm4148_vm14, %v3574_v40, %v4276_v30  ;;  %v10794_v40 = vld [vmem:[%s17072_s7 + $0xc44] ss:$28 sps:$4 sm:$0xff]  }
 0x322   : > { %v3619_v7 = vadd.f32 %v3618_v26, %v14344_v18  ;;  %vm4157_vm15 = vcmp.gt.f32.partialorder %v3580_v55, 0.0  ;;  %v4285_v46 = vmul.f32 0.2, %v3580_v55  ;;  %7700 = vmatprep.subr.bf16.mxu0 %v10782_v19  ;;  %v4412_v36 = vsel %vm4156_vm12, %v3578_v50, %v4284_v35 }
 0x323   : > { %v3731_v39 = vpop.f32.mrf.mxu0  ;;  %v3620_v42 = vpop.f32.mrf.mxu1  ;;  %v3730_v58 = vadd.f32 %v3729_v28, %v3617_v56  ;;  %v14377_v19 = vpack.c.bf16 %v4412_v36, %v4404_v54 }
 0x324   : > { %v4413_v3 = vsel %vm4157_vm15, %v3580_v55, %v4285_v46  ;;  %v3732_v23 = vadd.f32 %v3731_v39, %v3619_v7  ;;  %v3621_v27 = vadd.f32 %v3620_v42, %v14339_v37  ;;  %v10792_v39 = vld [vmem:[%s17072_s7 + $0xc40] ss:$28 sps:$4 sm:$0xff]  }
 0x325   : > { %v3733_v9 = vpop.f32.mrf.mxu0  ;;  %v3622_v52 = vpop.f32.mrf.mxu1  ;;  %v14372_v17 = vpack.c.bf16 %v4413_v3, %v4405_v24  ;;  %7701 = vmatpush2.bf16.msra.mxu0 %v10780_v20  ;;  %17408 = vst [vmem:[#allocation8_spill] sm:$0xff] %v14377_v19  ;;  %v4166_v7 = vmul.f32 0.2, %v3730_v58  ;;  %vm4038_vm2 = vcmp.gt.f32.partialorder %v3730_v58, 0.0  ;;  %v10800_v24 = vld [vmem:[%s17072_s7 + $0x514] ss:$28 sps:$4 sm:$0xff]  }
 0x326   : > { %v3734_v26 = vadd.f32 %v3733_v9, %v3621_v27  ;;  %v3623_v10 = vadd.f32 %v3622_v52, %v14344_v18  ;;  %7702 = vmatprep.subr.bf16.mxu0 %v10788_v34  ;;  %v4167_v35 = vmul.f32 0.2, %v3732_v23  ;;  %vm4039_vm1 = vcmp.gt.f32.partialorder %v3732_v23, 0.0 }
 0x327   : > { %17407 = vst [vmem:[#allocation7_spill] sm:$0xff] %v14372_v17  ;;  %v3735_v50 = vpop.f32.mrf.mxu0  ;;  %v3626_v63 = vpop.f32.mrf.mxu1  ;;  %7550 = vmatprep.mubr.bf16.mxu0 %v14372_v17 }
 0x328   : > { %vm4046_vm0 = vcmp.gt.f32.partialorder %v3734_v26, 0.0  ;;  %v4174_v55 = vmul.f32 0.2, %v3734_v26  ;;  %v3736_v28 = vadd.f32 %v3735_v50, %v3623_v10  ;;  %7551 = vmatmul.mubr.bf16.gmra.mxu0 %v14377_v19  ;;  %v3627_v20 = vadd.f32 %v3626_v63, %v14339_v37 }
 0x329   : > { %v3739_v30 = vpop.f32.mrf.mxu0  ;;  %v3628_v56 = vpop.f32.mrf.mxu1  ;;  %7703 = vmatpush2.bf16.msra.mxu0 %v10786_v60  ;;  %v4295_v27 = vsel %vm4039_vm1, %v3732_v23, %v4167_v35  ;;  %v4294_v50 = vsel %vm4038_vm2, %v3730_v58, %v4166_v7 }
 0x32a   : > { %v3629_v46 = vadd.f32 %v3628_v56, %v14344_v18  ;;  %vm4047_vm3 = vcmp.gt.f32.partialorder %v3736_v28, 0.0  ;;  %v4175_v42 = vmul.f32 0.2, %v3736_v28  ;;  %7704 = vmatprep.subr.bf16.mxu0 %v10794_v40  ;;  %v4302_v3 = vsel %vm4046_vm0, %v3734_v26, %v4174_v55  ;;  %v10705_v40 = vld [vmem:[%s17072_s7 + $0x190] ss:$28 sps:$4 sm:$0xff]  }
 0x32b   : > { %v3741_v34 = vpop.f32.mrf.mxu0  ;;  %v3630_v36 = vpop.f32.mrf.mxu1  ;;  %v3740_v56 = vadd.f32 %v3739_v30, %v3627_v20  ;;  %v14400_v12 = vpack.c.bf16 %v4302_v3, %v4294_v50  ;;  %v10713_v55 = vld [vmem:[%s17072_s7 + $0x15c] ss:$28 sps:$4 sm:$0xff]  }
 0x32c   : > { %v4303_v9 = vsel %vm4047_vm3, %v3736_v28, %v4175_v42  ;;  %v3742_v52 = vadd.f32 %v3741_v34, %v3629_v46  ;;  %v3631_v54 = vadd.f32 %v3630_v36, %v14339_v37  ;;  %v10711_v34 = vld [vmem:[%s17072_s7 + $0x158] ss:$28 sps:$4 sm:$0xff]  }
 0x32d   : > { %v3743_v60 = vpop.f32.mrf.mxu0  ;;  %v3632_v10 = vpop.f32.mrf.mxu1  ;;  %v14395_v63 = vpack.c.bf16 %v4303_v9, %v4295_v27  ;;  %7705 = vmatpush2.bf16.msra.mxu0 %v10792_v39  ;;  %v4182_v46 = vmul.f32 0.2, %v3740_v56  ;;  %vm4054_vm6 = vcmp.gt.f32.partialorder %v3740_v56, 0.0  ;;  %v10719_v27 = vld [vmem:[%s17072_s7 + $0x124] ss:$28 sps:$4 sm:$0xff]  }
 0x32e   : > { %v3744_v62 = vadd.f32 %v3743_v60, %v3631_v54  ;;  %v3633_v23 = vadd.f32 %v3632_v10, %v14344_v18  ;;  %7900 = vmatprep.subr.bf16.mxu0 %v10800_v24  ;;  %v4183_v58 = vmul.f32 0.2, %v3742_v52  ;;  %vm4055_vm5 = vcmp.gt.f32.partialorder %v3742_v52, 0.0 }
 0x32f   : > { %17409 = vst [vmem:[#allocation35_spill] sm:$0xff] %v14395_v63  ;;  %v3745_v26 = vpop.f32.mrf.mxu0  ;;  %v3636_v35 = vpop.f32.mrf.mxu1  ;;  %7593 = vmatprep.mubr.bf16.mxu1 %v14395_v63 }
 0x330   : > { %vm4062_vm4 = vcmp.gt.f32.partialorder %v3744_v62, 0.0  ;;  %v4190_v28 = vmul.f32 0.2, %v3744_v62  ;;  %v3746_v30 = vadd.f32 %v3745_v26, %v3633_v23  ;;  %7594 = vmatmul.mubr.bf16.vlgmr.msra.gmra.mxu1 %v14400_v12  ;;  %v3637_v39 = vadd.f32 %v3636_v35, %v14339_v37 }
 0x331   : > { %v3749_v7 = vpop.f32.mrf.mxu0  ;;  %v3638_v20 = vpop.f32.mrf.mxu1  ;;  %7788 = vmatpush1.bf16.msra.mxu1 %v10705_v40  ;;  %v4311_v54 = vsel %vm4055_vm5, %v3742_v52, %v4183_v58  ;;  %v4310_v26 = vsel %vm4054_vm6, %v3740_v56, %v4182_v46  ;;  %v10725_v56 = vld [vmem:[%s17072_s7 + $0xec] ss:$28 sps:$4 sm:$0xff]  }
 0x332   : > { %v3639_v42 = vadd.f32 %v3638_v20, %v14344_v18  ;;  %vm4063_vm7 = vcmp.gt.f32.partialorder %v3746_v30, 0.0  ;;  %v4191_v36 = vmul.f32 0.2, %v3746_v30  ;;  %7789 = vmatprep.subr.bf16.mxu1 %v10713_v55  ;;  %v4318_v9 = vsel %vm4062_vm4, %v3744_v62, %v4190_v28  ;;  %v10717_v55 = vld [vmem:[%s17072_s7 + $0x120] ss:$28 sps:$4 sm:$0xff]  }
 0x333   : > { %v3751_v24 = vpop.f32.mrf.mxu0  ;;  %v3640_v3 = vpop.f32.mrf.mxu1  ;;  %v3750_v20 = vadd.f32 %v3749_v7, %v3637_v39  ;;  %v14423_v19 = vpack.c.bf16 %v4318_v9, %v4310_v26 }
 0x334   : > { %v4319_v60 = vsel %vm4063_vm7, %v3746_v30, %v4191_v36  ;;  %v3752_v10 = vadd.f32 %v3751_v24, %v3639_v42  ;;  %v3641_v50 = vadd.f32 %v3640_v3, %v14339_v37  ;;  %v10723_v24 = vld [vmem:[%s17072_s7 + $0xe8] ss:$28 sps:$4 sm:$0xff]  }
 0x335   : > { %v3753_v40 = vpop.f32.mrf.mxu0  ;;  %v3642_v23 = vpop.f32.mrf.mxu1  ;;  %v14418_v35 = vpack.c.bf16 %v4319_v60, %v4311_v54  ;;  %7790 = vmatpush1.bf16.msra.mxu1 %v10711_v34  ;;  %v4198_v42 = vmul.f32 0.2, %v3750_v20  ;;  %vm4070_vm10 = vcmp.gt.f32.partialorder %v3750_v20, 0.0  ;;  %v10731_v54 = vld [vmem:[%s17072_s7 + $0xb4] ss:$28 sps:$4 sm:$0xff]  }
 0x336   : > { %v3754_v17 = vadd.f32 %v3753_v40, %v3641_v50  ;;  %v3643_v62 = vadd.f32 %v3642_v23, %v14344_v18  ;;  %7791 = vmatprep.subr.bf16.mxu1 %v10719_v27  ;;  %v4199_v28 = vmul.f32 0.2, %v3752_v10  ;;  %vm4071_vm9 = vcmp.gt.f32.partialorder %v3752_v10, 0.0 }
 0x337   : > { %v3755_v52 = vpop.f32.mrf.mxu0  ;;  %v3646_v58 = vpop.f32.mrf.mxu1  ;;  %7603 = vmatprep.mubr.bf16.mxu1 %v14418_v35 }
 0x338   : > { %vm4078_vm8 = vcmp.gt.f32.partialorder %v3754_v17, 0.0  ;;  %v4206_v30 = vmul.f32 0.2, %v3754_v17  ;;  %v3756_v7 = vadd.f32 %v3755_v52, %v3643_v62  ;;  %7604 = vmatmul.mubr.bf16.gmra.mxu1 %v14423_v19  ;;  %v3647_v34 = vadd.f32 %v3646_v58, %v14339_v37 }
 0x339   : > { %v3759_v46 = vpop.f32.mrf.mxu0  ;;  %v3648_v39 = vpop.f32.mrf.mxu1  ;;  %7792 = vmatpush1.bf16.msra.mxu1 %v10717_v55  ;;  %v4327_v50 = vsel %vm4071_vm9, %v3752_v10, %v4199_v28  ;;  %v4326_v52 = vsel %vm4070_vm10, %v3750_v20, %v4198_v42  ;;  %v10737_v20 = vld [vmem:[%s17072_s7 + $0x7c] ss:$28 sps:$4 sm:$0xff]  }
 0x33a   : > { %v3649_v36 = vadd.f32 %v3648_v39, %v14344_v18  ;;  %vm4079_vm11 = vcmp.gt.f32.partialorder %v3756_v7, 0.0  ;;  %v4207_v3 = vmul.f32 0.2, %v3756_v7  ;;  %7793 = vmatprep.subr.bf16.mxu1 %v10725_v56  ;;  %v4334_v60 = vsel %vm4078_vm8, %v3754_v17, %v4206_v30  ;;  %v10729_v56 = vld [vmem:[%s17072_s7 + $0xb0] ss:$28 sps:$4 sm:$0xff]  }
 0x33b   : > { %v3761_v27 = vpop.f32.mrf.mxu0  ;;  %v3650_v9 = vpop.f32.mrf.mxu1  ;;  %v3760_v39 = vadd.f32 %v3759_v46, %v3647_v34  ;;  %v14446_v22 = vpack.c.bf16 %v4334_v60, %v4326_v52 }
 0x33c   : > { %v4335_v40 = vsel %vm4079_vm11, %v3756_v7, %v4207_v3  ;;  %v3762_v23 = vadd.f32 %v3761_v27, %v3649_v36  ;;  %v3651_v26 = vadd.f32 %v3650_v9, %v14339_v37  ;;  %v10735_v27 = vld [vmem:[%s17072_s7 + $0x78] ss:$28 sps:$4 sm:$0xff]  }
 0x33d   : > { %v3763_v55 = vpop.f32.mrf.mxu0  ;;  %v3652_v62 = vpop.f32.mrf.mxu1  ;;  %v14441_v58 = vpack.c.bf16 %v4335_v40, %v4327_v50  ;;  %7794 = vmatpush1.bf16.msra.mxu1 %v10723_v24  ;;  %17410 = vst [vmem:[#allocation36_spill] sm:$0xff] %v14446_v22  ;;  %v4214_v36 = vmul.f32 0.2, %v3760_v39  ;;  %vm4086_vm14 = vcmp.gt.f32.partialorder %v3760_v39, 0.0  ;;  %v10743_v50 = vld [vmem:[%s17072_s7 + $0x44] ss:$28 sps:$4 sm:$0xff]  }
 0x33e   : > { %v3764_v6 = vadd.f32 %v3763_v55, %v3651_v26  ;;  %v3653_v17 = vadd.f32 %v3652_v62, %v14344_v18  ;;  %7795 = vmatprep.subr.bf16.mxu1 %v10731_v54  ;;  %v4215_v30 = vmul.f32 0.2, %v3762_v23  ;;  %vm4087_vm13 = vcmp.gt.f32.partialorder %v3762_v23, 0.0 }
 0x33f   : > { %v3765_v10 = vpop.f32.mrf.mxu0  ;;  %v3656_v28 = vpop.f32.mrf.mxu1  ;;  %7613 = vmatprep.mubr.bf16.mxu1 %v14441_v58 }
 0x340   : > { %vm4094_vm12 = vcmp.gt.f32.partialorder %v3764_v6, 0.0  ;;  %v4222_v7 = vmul.f32 0.2, %v3764_v6  ;;  %v3766_v46 = vadd.f32 %v3765_v10, %v3653_v17  ;;  %7614 = vmatmul.mubr.bf16.gmra.mxu1 %v14446_v22  ;;  %v3657_v24 = vadd.f32 %v3656_v28, %v14339_v37 }
 0x341   : > { %v3769_v42 = vpop.f32.mrf.mxu0  ;;  %v3658_v34 = vpop.f32.mrf.mxu1  ;;  %7796 = vmatpush1.bf16.msra.mxu1 %v10729_v56  ;;  %v4343_v26 = vsel %vm4087_vm13, %v3762_v23, %v4215_v30  ;;  %v4342_v10 = vsel %vm4086_vm14, %v3760_v39, %v4214_v36  ;;  %v10749_v39 = vld [vmem:[%s17072_s7 + $0xc] ss:$28 sps:$4 sm:$0xff]  }
 0x342   : > { %v3659_v3 = vadd.f32 %v3658_v34, %v14344_v18  ;;  %vm4095_vm15 = vcmp.gt.f32.partialorder %v3766_v46, 0.0  ;;  %v4223_v9 = vmul.f32 0.2, %v3766_v46  ;;  %7797 = vmatprep.subr.bf16.mxu1 %v10737_v20  ;;  %v4350_v40 = vsel %vm4094_vm12, %v3764_v6, %v4222_v7  ;;  %v10741_v20 = vld [vmem:[%s17072_s7 + $0x40] ss:$28 sps:$4 sm:$0xff]  }
 0x343   : > { %v3771_v54 = vpop.f32.mrf.mxu0  ;;  %v3660_v60 = vpop.f32.mrf.mxu1  ;;  %v3770_v34 = vadd.f32 %v3769_v42, %v3657_v24  ;;  %v14469_v43 = vpack.c.bf16 %v4350_v40, %v4342_v10 }
 0x344   : > { %v4351_v55 = vsel %vm4095_vm15, %v3766_v46, %v4223_v9  ;;  %v3772_v62 = vadd.f32 %v3771_v54, %v3659_v3  ;;  %v3661_v52 = vadd.f32 %v3660_v60, %v14339_v37  ;;  %v10747_v54 = vld [vmem:[%s17072_s7 + $0x8] ss:$28 sps:$4 sm:$0xff]  }
 0x345   : > { %v3773_v56 = vpop.f32.mrf.mxu0  ;;  %v3662_v17 = vpop.f32.mrf.mxu1  ;;  %v14464_v28 = vpack.c.bf16 %v4351_v55, %v4343_v26  ;;  %7798 = vmatpush1.bf16.msra.mxu1 %v10735_v27  ;;  %17412 = vst [vmem:[#allocation38_spill] sm:$0xff] %v14469_v43  ;;  %v4230_v3 = vmul.f32 0.2, %v3770_v34  ;;  %vm4102_vm2 = vcmp.gt.f32.partialorder %v3770_v34, 0.0  ;;  %v10755_v26 = vld [vmem:[%s17072_s7 + $0x354] ss:$28 sps:$4 sm:$0xff]  }
 0x346   : > { %v3774_v48 = vadd.f32 %v3773_v56, %v3661_v52  ;;  %v3663_v6 = vadd.f32 %v3662_v17, %v14344_v18  ;;  %7799 = vmatprep.subr.bf16.mxu1 %v10743_v50  ;;  %v4231_v7 = vmul.f32 0.2, %v3772_v62  ;;  %vm4103_vm1 = vcmp.gt.f32.partialorder %v3772_v62, 0.0 }
 0x347   : > { %17411 = vst [vmem:[#allocation37_spill] sm:$0xff] %v14464_v28  ;;  %v3775_v23 = vpop.f32.mrf.mxu0  ;;  %v3666_v30 = vpop.f32.mrf.mxu1  ;;  %7623 = vmatprep.mubr.bf16.mxu1 %v14464_v28 }
 0x348   : > { %vm4110_vm0 = vcmp.gt.f32.partialorder %v3774_v48, 0.0  ;;  %v4238_v46 = vmul.f32 0.2, %v3774_v48  ;;  %v3776_v42 = vadd.f32 %v3775_v23, %v3663_v6  ;;  %7624 = vmatmul.mubr.bf16.gmra.mxu1 %v14469_v43  ;;  %v3667_v27 = vadd.f32 %v3666_v30, %v14339_v37 }
 0x349   : > { %v3779_v36 = vpop.f32.mrf.mxu0  ;;  %v3668_v24 = vpop.f32.mrf.mxu1  ;;  %7800 = vmatpush1.bf16.msra.mxu1 %v10741_v20  ;;  %v4359_v52 = vsel %vm4103_vm1, %v3772_v62, %v4231_v7  ;;  %v4358_v23 = vsel %vm4102_vm2, %v3770_v34, %v4230_v3  ;;  %v10761_v34 = vld [vmem:[%s17072_s7 + $0x31c] ss:$28 sps:$4 sm:$0xff]  }
 0x34a   : > { %v3669_v9 = vadd.f32 %v3668_v24, %v14344_v18  ;;  %vm4111_vm3 = vcmp.gt.f32.partialorder %v3776_v42, 0.0  ;;  %v4239_v60 = vmul.f32 0.2, %v3776_v42  ;;  %7801 = vmatprep.subr.bf16.mxu1 %v10749_v39  ;;  %v4366_v55 = vsel %vm4110_vm0, %v3774_v48, %v4238_v46  ;;  %v10753_v39 = vld [vmem:[%s17072_s7 + $0x350] ss:$28 sps:$4 sm:$0xff]  }
 0x34b   : > { %v3781_v50 = vpop.f32.mrf.mxu0  ;;  %v3670_v40 = vpop.f32.mrf.mxu1  ;;  %v3780_v24 = vadd.f32 %v3779_v36, %v3667_v27  ;;  %v14492_v25 = vpack.c.bf16 %v4366_v55, %v4358_v23 }
 0x34c   : > { %v4367_v56 = vsel %vm4111_vm3, %v3776_v42, %v4239_v60  ;;  %v3782_v17 = vadd.f32 %v3781_v50, %v3669_v9  ;;  %v3671_v10 = vadd.f32 %v3670_v40, %v14339_v37  ;;  %v10759_v50 = vld [vmem:[%s17072_s7 + $0x318] ss:$28 sps:$4 sm:$0xff]  }
 0x34d   : > { %v3783_v20 = vpop.f32.mrf.mxu0  ;;  %v3672_v6 = vpop.f32.mrf.mxu1  ;;  %v14487_v30 = vpack.c.bf16 %v4367_v56, %v4359_v52  ;;  %7802 = vmatpush1.bf16.msra.mxu1 %v10747_v54  ;;  %17414 = vst [vmem:[#allocation40_spill] sm:$0xff] %v14492_v25  ;;  %v4246_v9 = vmul.f32 0.2, %v3780_v24  ;;  %vm4118_vm6 = vcmp.gt.f32.partialorder %v3780_v24, 0.0  ;;  %v10767_v52 = vld [vmem:[%s17072_s7 + $0x2e4] ss:$28 sps:$4 sm:$0xff]  }
 0x34e   : > { %v3784_v49 = vadd.f32 %v3783_v20, %v3671_v10  ;;  %v3673_v48 = vadd.f32 %v3672_v6, %v14344_v18  ;;  %7803 = vmatprep.subr.bf16.mxu1 %v10755_v26  ;;  %v4247_v46 = vmul.f32 0.2, %v3782_v17  ;;  %vm4119_vm5 = vcmp.gt.f32.partialorder %v3782_v17, 0.0 }
 0x34f   : > { %17413 = vst [vmem:[#allocation39_spill] sm:$0xff] %v14487_v30  ;;  %v3785_v62 = vpop.f32.mrf.mxu0  ;;  %v3676_v7 = vpop.f32.mrf.mxu1  ;;  %7633 = vmatprep.mubr.bf16.mxu1 %v14487_v30 }
 0x350   : > { %vm4126_vm4 = vcmp.gt.f32.partialorder %v3784_v49, 0.0  ;;  %v4254_v42 = vmul.f32 0.2, %v3784_v49  ;;  %v3786_v36 = vadd.f32 %v3785_v62, %v3673_v48  ;;  %7634 = vmatmul.mubr.bf16.gmra.mxu1 %v14492_v25  ;;  %v3677_v54 = vadd.f32 %v3676_v7, %v14339_v37 }
 0x351   : > { %v3789_v3 = vpop.f32.mrf.mxu0  ;;  %v3678_v27 = vpop.f32.mrf.mxu1  ;;  %7804 = vmatpush2.bf16.msra.mxu1 %v10753_v39  ;;  %v4375_v10 = vsel %vm4119_vm5, %v3782_v17, %v4247_v46  ;;  %v4374_v62 = vsel %vm4118_vm6, %v3780_v24, %v4246_v9  ;;  %v10773_v24 = vld [vmem:[%s17072_s7 + $0x2ac] ss:$28 sps:$4 sm:$0xff]  }
 0x352   : > { %v3679_v60 = vadd.f32 %v3678_v27, %v14344_v18  ;;  %vm4127_vm7 = vcmp.gt.f32.partialorder %v3786_v36, 0.0  ;;  %v4255_v40 = vmul.f32 0.2, %v3786_v36  ;;  %7805 = vmatprep.subr.bf16.mxu1 %v10761_v34  ;;  %v4382_v56 = vsel %vm4126_vm4, %v3784_v49, %v4254_v42  ;;  %v10765_v34 = vld [vmem:[%s17072_s7 + $0x2e0] ss:$28 sps:$4 sm:$0xff]  }
 0x353   : > { %v3791_v26 = vpop.f32.mrf.mxu0  ;;  %v3680_v55 = vpop.f32.mrf.mxu1  ;;  %v3790_v27 = vadd.f32 %v3789_v3, %v3677_v54  ;;  %v14515_v25 = vpack.c.bf16 %v4382_v56, %v4374_v62  ;;  %v17167_v42 = vsub.s32 6, %v17404_v59 }
 0x354   : > { %v4383_v20 = vsel %vm4127_vm7, %v3786_v36, %v4255_v40  ;;  %v3792_v6 = vadd.f32 %v3791_v26, %v3679_v60  ;;  %v3681_v23 = vadd.f32 %v3680_v55, %v14339_v37  ;;  %v1840_v36 = vsub.s32 7, %v17404_v59 }
 0x355   : > { %v3793_v39 = vpop.f32.mrf.mxu0  ;;  %v3682_v48 = vpop.f32.mrf.mxu1  ;;  %v14510_v7 = vpack.c.bf16 %v4383_v20, %v4375_v10  ;;  %7806 = vmatpush2.bf16.msra.mxu1 %v10759_v50  ;;  %17416 = vst [vmem:[#allocation42_spill] sm:$0xff] %v14515_v25  ;;  %v4262_v40 = vmul.f32 0.2, %v3790_v27  ;;  %vm4134_vm10 = vcmp.gt.f32.partialorder %v3790_v27, 0.0 }
 0x356   : > { %v3794_v30 = vadd.f32 %v3793_v39, %v3681_v23  ;;  %v3683_v49 = vadd.f32 %v3682_v48, %v14344_v18  ;;  %7807 = vmatprep.subr.bf16.mxu1 %v10767_v52  ;;  %v4263_v3 = vmul.f32 0.2, %v3792_v6  ;;  %vm4135_vm9 = vcmp.gt.f32.partialorder %v3792_v6, 0.0  ;;  %v10771_v52 = vld [vmem:[%s17072_s7 + $0x2a8] ss:$28 sps:$4 sm:$0xff]  }
 0x357   : > { %17415 = vst [vmem:[#allocation41_spill] sm:$0xff] %v14510_v7  ;;  %v3795_v17 = vpop.f32.mrf.mxu0  ;;  %v3686_v46 = vpop.f32.mrf.mxu1  ;;  %7643 = vmatprep.mubr.bf16.mxu1 %v14510_v7  ;;  %v10779_v23 = vld [vmem:[%s17072_s7 + $0x274] ss:$28 sps:$4 sm:$0xff]   ;;  %v14537_v48 = vrot.slane %v14334_v61, %v17167_v42 }
 0x358   : > { %vm4142_vm8 = vcmp.gt.f32.partialorder %v3794_v30, 0.0  ;;  %v4270_v9 = vmul.f32 0.2, %v3794_v30  ;;  %v3796_v54 = vadd.f32 %v3795_v17, %v3683_v49  ;;  %7644 = vmatmul.mubr.bf16.gmra.mxu1 %v14515_v25  ;;  %v3687_v26 = vadd.f32 %v3686_v46, %v14339_v37 }
 0x359   : > { %v3799_v60 = vpop.f32.mrf.mxu0  ;;  %v3688_v50 = vpop.f32.mrf.mxu1  ;;  %7808 = vmatpush2.bf16.msra.mxu1 %v10765_v34  ;;  %v4391_v62 = vsel %vm4135_vm9, %v3792_v6, %v4263_v3  ;;  %v4390_v25 = vsel %vm4134_vm10, %v3790_v27, %v4262_v40  ;;  %v10785_v27 = vld [vmem:[%s17072_s7 + $0x23c] ss:$28 sps:$4 sm:$0xff]  }
 0x35a   : > { %v3689_v55 = vadd.f32 %v3688_v50, %v14344_v18  ;;  %vm4143_vm11 = vcmp.gt.f32.partialorder %v3796_v54, 0.0  ;;  %v4271_v56 = vmul.f32 0.2, %v3796_v54  ;;  %7809 = vmatprep.subr.bf16.mxu1 %v10773_v24  ;;  %v4398_v39 = vsel %vm4142_vm8, %v3794_v30, %v4270_v9  ;;  %v10777_v30 = vld [vmem:[%s17072_s7 + $0x270] ss:$28 sps:$4 sm:$0xff]  }
 0x35b   : > { %v3801_v10 = vpop.f32.mrf.mxu0  ;;  %v3690_v20 = vpop.f32.mrf.mxu1  ;;  %v3800_v7 = vadd.f32 %v3799_v60, %v3687_v26  ;;  %v14546_v9 = vrot.slane %v14334_v61, %v1840_v36  ;;  %v14548_v42 = vpack.c.bf16 %v4398_v39, %v4390_v25 }
 0x35c   : > { %v4399_v34 = vsel %vm4143_vm11, %v3796_v54, %v4271_v56  ;;  %v3802_v49 = vadd.f32 %v3801_v10, %v3689_v55  ;;  %v3691_v17 = vadd.f32 %v3690_v20, %v14339_v37 }
 0x35d   : > { %v3803_v46 = vpop.f32.mrf.mxu0  ;;  %v3692_v50 = vpop.f32.mrf.mxu1  ;;  %v14540_v24 = vpack.c.bf16 %v4399_v34, %v4391_v62  ;;  %7810 = vmatpush2.bf16.msra.mxu1 %v10771_v52  ;;  %17418 = vst [vmem:[#allocation44_spill] sm:$0xff] %v14548_v42  ;;  %v4278_v36 = vmul.f32 0.2, %v3800_v7  ;;  %v10783_v52 = vld [vmem:[%s17072_s7 + $0x238] ss:$28 sps:$4 sm:$0xff]   ;;  %vm4150_vm14 = vcmp.gt.f32.partialorder %v3800_v7, 0.0 }
 0x35e   : > { %v3804_v6 = vadd.f32 %v3803_v46, %v3691_v17  ;;  %v3693_v3 = vadd.f32 %v3692_v50, %v14344_v18  ;;  %7811 = vmatprep.subr.bf16.mxu1 %v10779_v23  ;;  %v4279_v60 = vmul.f32 0.2, %v3802_v49  ;;  %vm4151_vm13 = vcmp.gt.f32.partialorder %v3802_v49, 0.0  ;;  %v10791_v23 = vld [vmem:[%s17072_s7 + $0x204] ss:$28 sps:$4 sm:$0xff]  }
 0x35f   : > { %17417 = vst [vmem:[#allocation43_spill] sm:$0xff] %v14540_v24  ;;  %v3805_v37 = vpop.f32.mrf.mxu0  ;;  %v3842_v54 = vpop.f32.mrf.mxu1  ;;  %7653 = vmatprep.mubr.bf16.mxu1 %v14540_v24 }
 0x360   : > { %vm4158_vm12 = vcmp.gt.f32.partialorder %v3804_v6, 0.0  ;;  %v4286_v40 = vmul.f32 0.2, %v3804_v6  ;;  %v3806_v26 = vadd.f32 %v3805_v37, %v3693_v3  ;;  %7654 = vmatmul.mubr.bf16.gmra.mxu1 %v14548_v42  ;;  %v3843_v18 = vadd.f32 %v3842_v54, %v14537_v48 }
 0x361   : > { %v3955_v61 = vpop.f32.mrf.mxu0  ;;  %v3844_v25 = vpop.f32.mrf.mxu1  ;;  %7812 = vmatpush2.bf16.msra.mxu1 %v10777_v30  ;;  %v4407_v62 = vsel %vm4151_vm13, %v3802_v49, %v4279_v60  ;;  %v4406_v3 = vsel %vm4150_vm14, %v3800_v7, %v4278_v36  ;;  %v10797_v7 = vld [vmem:[%s17072_s7 + $0x1cc] ss:$28 sps:$4 sm:$0xff]  }
 0x362   : > { %v3845_v55 = vadd.f32 %v3844_v25, %v14546_v9  ;;  %vm4159_vm15 = vcmp.gt.f32.partialorder %v3806_v26, 0.0  ;;  %v4287_v56 = vmul.f32 0.2, %v3806_v26  ;;  %7813 = vmatprep.subr.bf16.mxu1 %v10785_v27  ;;  %v4414_v39 = vsel %vm4158_vm12, %v3804_v6, %v4286_v40  ;;  %v10789_v27 = vld [vmem:[%s17072_s7 + $0x200] ss:$28 sps:$4 sm:$0xff]  }
 0x363   : > { %v3957_v10 = vpop.f32.mrf.mxu0  ;;  %v3846_v20 = vpop.f32.mrf.mxu1  ;;  %v3956_v54 = vadd.f32 %v3955_v61, %v3843_v18  ;;  %v14571_v25 = vpack.c.bf16 %v4414_v39, %v4406_v3 }
 0x364   : > { %v4415_v34 = vsel %vm4159_vm15, %v3806_v26, %v4287_v56  ;;  %v3958_v17 = vadd.f32 %v3957_v10, %v3845_v55  ;;  %v3847_v46 = vadd.f32 %v3846_v20, %v14537_v48  ;;  %v10795_v10 = vld [vmem:[%s17072_s7 + $0x1c8] ss:$28 sps:$4 sm:$0xff]  }
 0x365   : > { %v3959_v50 = vpop.f32.mrf.mxu0  ;;  %v3848_v30 = vpop.f32.mrf.mxu1  ;;  %v14566_v37 = vpack.c.bf16 %v4415_v34, %v4407_v62  ;;  %7814 = vmatpush2.bf16.msra.mxu1 %v10783_v52  ;;  %17420 = vst [vmem:[#allocation46_spill] sm:$0xff] %v14571_v25  ;;  %v4168_v55 = vmul.f32 0.2, %v3956_v54  ;;  %vm4040_vm2 = vcmp.gt.f32.partialorder %v3956_v54, 0.0  ;;  %v10803_v62 = vld [vmem:[%s17072_s7 + $0x894] ss:$28 sps:$4 sm:$0xff]  }
 0x366   : > { %v3960_v59 = vadd.f32 %v3959_v50, %v3847_v46  ;;  %v3849_v49 = vadd.f32 %v3848_v30, %v14546_v9  ;;  %7815 = vmatprep.subr.bf16.mxu1 %v10791_v23  ;;  %v4169_v40 = vmul.f32 0.2, %v3958_v17  ;;  %vm4041_vm1 = vcmp.gt.f32.partialorder %v3958_v17, 0.0 }
 0x367   : > { %17419 = vst [vmem:[#allocation45_spill] sm:$0xff] %v14566_v37  ;;  %v3961_v6 = vpop.f32.mrf.mxu0  ;;  %v3852_v60 = vpop.f32.mrf.mxu1  ;;  %7663 = vmatprep.mubr.bf16.mxu1 %v14566_v37 }
 0x368   : > { %vm4048_vm0 = vcmp.gt.f32.partialorder %v3960_v59, 0.0  ;;  %v4176_v26 = vmul.f32 0.2, %v3960_v59  ;;  %v3962_v61 = vadd.f32 %v3961_v6, %v3849_v49  ;;  %7664 = vmatmul.mubr.bf16.gmra.mxu1 %v14571_v25  ;;  %v3853_v52 = vadd.f32 %v3852_v60, %v14537_v48 }
 0x369   : > { %v3965_v36 = vpop.f32.mrf.mxu0  ;;  %v3854_v18 = vpop.f32.mrf.mxu1  ;;  %7816 = vmatpush2.bf16.msra.mxu1 %v10789_v27  ;;  %7819 = vmatprep.mubr.bf16.mxu1 %v13817_v21  ;;  %v4297_v46 = vsel %vm4041_vm1, %v3958_v17, %v4169_v40  ;;  %v4296_v6 = vsel %vm4040_vm2, %v3956_v54, %v4168_v55  ;;  %v10806_v54 = vld [vmem:[%s17072_s7 + $0x4dc] ss:$28 sps:$4 sm:$0xff]  }
 0x36a   : > { %v3855_v56 = vadd.f32 %v3854_v18, %v14546_v9  ;;  %vm4049_vm3 = vcmp.gt.f32.partialorder %v3962_v61, 0.0  ;;  %v4177_v20 = vmul.f32 0.2, %v3962_v61  ;;  %7817 = vmatprep.subr.bf16.mxu1 %v10797_v7  ;;  %v4304_v34 = vsel %vm4048_vm0, %v3960_v59, %v4176_v26  ;;  %v10798_v7 = vld [vmem:[%s17072_s7 + $0x510] ss:$28 sps:$4 sm:$0xff]  }
 0x36b   : > { %v3967_v23 = vpop.f32.mrf.mxu0  ;;  %v3856_v39 = vpop.f32.mrf.mxu1  ;;  %v3966_v18 = vadd.f32 %v3965_v36, %v3853_v52  ;;  %v14595_v21 = vpack.c.bf16 %v4304_v34, %v4296_v6  ;;  %v10801_v26 = vld [vmem:[%s17072_s7 + $0x890] ss:$28 sps:$4 sm:$0xff]   ;;  %v10809_v36 = vld [vmem:[%s17072_s7 + $0x85c] ss:$28 sps:$4 sm:$0xff]   ;;  %v10815_v6 = vld [vmem:[%s17072_s7 + $0x824] ss:$28 sps:$4 sm:$0xff]  }
 0x36c   : > { %v4305_v50 = vsel %vm4049_vm3, %v3962_v61, %v4177_v20  ;;  %v3968_v30 = vadd.f32 %v3967_v23, %v3855_v56  ;;  %v3857_v3 = vadd.f32 %v3856_v39, %v14537_v48  ;;  %v10804_v61 = vld [vmem:[%s17072_s7 + $0x4d8] ss:$28 sps:$4 sm:$0xff]  }
 0x36d   : > { %v3969_v27 = vpop.f32.mrf.mxu0  ;;  %v3858_v49 = vpop.f32.mrf.mxu1  ;;  %v14590_v60 = vpack.c.bf16 %v4305_v50, %v4297_v46  ;;  %7818 = vmatpush2.bf16.msra.mxu1 %v10795_v10  ;;  %17422 = vst [vmem:[#allocation48_spill] sm:$0xff] %v14595_v21  ;;  %v4184_v23 = vmul.f32 0.2, %v3966_v18  ;;  %v10807_v34 = vld [vmem:[%s17072_s7 + $0x858] ss:$28 sps:$4 sm:$0xff]   ;;  %vm4056_vm6 = vcmp.gt.f32.partialorder %v3966_v18, 0.0 }
 0x36e   : > { %v3970_v25 = vadd.f32 %v3969_v27, %v3857_v3  ;;  %v3859_v59 = vadd.f32 %v3858_v49, %v14546_v9  ;;  %8013 = vmatprep.subr.bf16.mxu1 %v10803_v62  ;;  %v4185_v55 = vmul.f32 0.2, %v3968_v30  ;;  %vm4057_vm5 = vcmp.gt.f32.partialorder %v3968_v30, 0.0  ;;  %v10812_v27 = vld [vmem:[%s17072_s7 + $0x4a4] ss:$28 sps:$4 sm:$0xff]  }
 0x36f   : > { %17421 = vst [vmem:[#allocation47_spill] sm:$0xff] %v14590_v60  ;;  %v3971_v17 = vpop.f32.mrf.mxu0  ;;  %v3862_v40 = vpop.f32.mrf.mxu1  ;;  %7706 = vmatprep.mubr.bf16.mxu0 %v14590_v60 }
 0x370   : > { %vm4064_vm4 = vcmp.gt.f32.partialorder %v3970_v25, 0.0  ;;  %v4192_v52 = vmul.f32 0.2, %v3970_v25  ;;  %v3972_v56 = vadd.f32 %v3971_v17, %v3859_v59  ;;  %7707 = vmatmul.mubr.bf16.vlgmr.msra.gmra.mxu0 %v14595_v21  ;;  %7820 = vmatmul.mubr.bf16.vlgmr.msra.gmra.mxu1 %v13807_v5  ;;  %v3863_v39 = vadd.f32 %v3862_v40, %v14537_v48 }
 0x371   : > { %v3975_v10 = vpop.f32.mrf.mxu0  ;;  %v3864_v20 = vpop.f32.mrf.mxu1  ;;  %7901 = vmatpush1.bf16.msra.mxu0 %v10798_v7  ;;  %7829 = vmatprep.mubr.bf16.mxu1 %v13951_v11  ;;  %v4313_v7 = vsel %vm4057_vm5, %v3968_v30, %v4185_v55 }
 0x372   : > { %v3865_v62 = vadd.f32 %v3864_v20, %v14546_v9  ;;  %vm4065_vm7 = vcmp.gt.f32.partialorder %v3972_v56, 0.0  ;;  %v4193_v46 = vmul.f32 0.2, %v3972_v56  ;;  %8014 = vmatpush1.bf16.msra.mxu1 %v10801_v26  ;;  %7902 = vmatprep.subr.bf16.mxu0 %v10806_v54  ;;  %v4320_v49 = vsel %vm4064_vm4, %v3970_v25, %v4192_v52  ;;  %v10810_v25 = vld [vmem:[%s17072_s7 + $0x4a0] ss:$28 sps:$4 sm:$0xff]  }
 0x373   : > { %v3977_v50 = vpop.f32.mrf.mxu0  ;;  %v3866_v3 = vpop.f32.mrf.mxu1  ;;  %8015 = vmatprep.subr.bf16.mxu1 %v10809_v36  ;;  %v4312_v54 = vsel %vm4056_vm6, %v3966_v18, %v4184_v23  ;;  %v3976_v5 = vadd.f32 %v3975_v10, %v3863_v39  ;;  %v10813_v18 = vld [vmem:[%s17072_s7 + $0x820] ss:$28 sps:$4 sm:$0xff]   ;;  %v10816_v10 = vld [vmem:[%s17072_s7 + $0x468] ss:$28 sps:$4 sm:$0xff]  }
 0x374   : > { %v4321_v59 = vsel %vm4065_vm7, %v3972_v56, %v4193_v46  ;;  %v3978_v17 = vadd.f32 %v3977_v50, %v3865_v62  ;;  %v3867_v40 = vadd.f32 %v3866_v3, %v14537_v48  ;;  %v14634_v36 = vpack.c.bf16 %v4320_v49, %v4312_v54  ;;  %v10821_v23 = vld [vmem:[%s17072_s7 + $0x7ec] ss:$28 sps:$4 sm:$0xff]   ;;  %v10827_v54 = vld [vmem:[%s17072_s7 + $0x7b4] ss:$28 sps:$4 sm:$0xff]  }
 0x375   : > { %v3979_v26 = vpop.f32.mrf.mxu0  ;;  %v3868_v20 = vpop.f32.mrf.mxu1  ;;  %v14629_v11 = vpack.c.bf16 %v4321_v59, %v4313_v7  ;;  %7903 = vmatpush1.bf16.msra.mxu0 %v10804_v61  ;;  %v10818_v61 = vld [vmem:[%s17072_s7 + $0x46c] ss:$28 sps:$4 sm:$0xff]   ;;  %v4200_v3 = vmul.f32 0.2, %v3976_v5  ;;  %vm4072_vm10 = vcmp.gt.f32.partialorder %v3976_v5, 0.0 }
 0x376   : > { %17424 = vst [vmem:[#allocation50_spill] sm:$0xff] %v14634_v36  ;;  %v3980_v52 = vadd.f32 %v3979_v26, %v3867_v40  ;;  %v3869_v30 = vadd.f32 %v3868_v20, %v14546_v9  ;;  %8016 = vmatpush1.bf16.msra.mxu1 %v10807_v34  ;;  %7904 = vmatprep.subr.bf16.mxu0 %v10812_v27  ;;  %v4201_v39 = vmul.f32 0.2, %v3978_v17  ;;  %vm4073_vm9 = vcmp.gt.f32.partialorder %v3978_v17, 0.0  ;;  %v10824_v26 = vld [vmem:[%s17072_s7 + $0x434] ss:$28 sps:$4 sm:$0xff]  }
 0x377   : > { %17423 = vst [vmem:[#allocation49_spill] sm:$0xff] %v14629_v11  ;;  %v3981_v55 = vpop.f32.mrf.mxu0  ;;  %v3872_v56 = vpop.f32.mrf.mxu1  ;;  %7716 = vmatprep.mubr.bf16.mxu0 %v14629_v11  ;;  %8017 = vmatprep.subr.bf16.mxu1 %v10815_v6  ;;  %v10819_v6 = vld [vmem:[%s17072_s7 + $0x7e8] ss:$28 sps:$4 sm:$0xff]  }
 0x378   : > { %vm4080_vm8 = vcmp.gt.f32.partialorder %v3980_v52, 0.0  ;;  %v4208_v62 = vmul.f32 0.2, %v3980_v52  ;;  %v3982_v34 = vadd.f32 %v3981_v55, %v3869_v30  ;;  %7717 = vmatmul.mubr.bf16.gmra.mxu0 %v14634_v36  ;;  %7830 = vmatmul.mubr.bf16.gmra.mxu1 %v13893_v51  ;;  %v3873_v27 = vadd.f32 %v3872_v56, %v14537_v48 }
 0x379   : > { %v3985_v46 = vpop.f32.mrf.mxu0  ;;  %v3874_v50 = vpop.f32.mrf.mxu1  ;;  %7905 = vmatpush1.bf16.msra.mxu0 %v10810_v25  ;;  %7839 = vmatprep.mubr.bf16.mxu1 %v13955_v4  ;;  %v4329_v25 = vsel %vm4073_vm9, %v3978_v17, %v4201_v39 }
 0x37a   : > { %v3875_v49 = vadd.f32 %v3874_v50, %v14546_v9  ;;  %vm4081_vm11 = vcmp.gt.f32.partialorder %v3982_v34, 0.0  ;;  %v4209_v7 = vmul.f32 0.2, %v3982_v34  ;;  %8018 = vmatpush1.bf16.msra.mxu1 %v10813_v18  ;;  %7906 = vmatprep.subr.bf16.mxu0 %v10818_v61  ;;  %v4336_v20 = vsel %vm4080_vm8, %v3980_v52, %v4208_v62  ;;  %v10822_v52 = vld [vmem:[%s17072_s7 + $0x430] ss:$28 sps:$4 sm:$0xff]  }
 0x37b   : > { %v3987_v59 = vpop.f32.mrf.mxu0  ;;  %v3876_v40 = vpop.f32.mrf.mxu1  ;;  %8019 = vmatprep.subr.bf16.mxu1 %v10821_v23  ;;  %v4328_v61 = vsel %vm4072_vm10, %v3976_v5, %v4200_v3  ;;  %v3986_v51 = vadd.f32 %v3985_v46, %v3873_v27  ;;  %v10825_v5 = vld [vmem:[%s17072_s7 + $0x7b0] ss:$28 sps:$4 sm:$0xff]   ;;  %v10828_v46 = vld [vmem:[%s17072_s7 + $0x3f8] ss:$28 sps:$4 sm:$0xff]  }
 0x37c   : > { %v4337_v30 = vsel %vm4081_vm11, %v3982_v34, %v4209_v7  ;;  %v3988_v55 = vadd.f32 %v3987_v59, %v3875_v49  ;;  %v3877_v56 = vadd.f32 %v3876_v40, %v14537_v48  ;;  %v14673_v23 = vpack.c.bf16 %v4336_v20, %v4328_v61  ;;  %v10833_v3 = vld [vmem:[%s17072_s7 + $0x77c] ss:$28 sps:$4 sm:$0xff]   ;;  %v10839_v61 = vld [vmem:[%s17072_s7 + $0x744] ss:$28 sps:$4 sm:$0xff]  }
 0x37d   : > { %v3989_v18 = vpop.f32.mrf.mxu0  ;;  %v3878_v50 = vpop.f32.mrf.mxu1  ;;  %v14668_v4 = vpack.c.bf16 %v4337_v30, %v4329_v25  ;;  %7907 = vmatpush1.bf16.msra.mxu0 %v10816_v10  ;;  %v10830_v10 = vld [vmem:[%s17072_s7 + $0x3fc] ss:$28 sps:$4 sm:$0xff]   ;;  %v4216_v40 = vmul.f32 0.2, %v3986_v51  ;;  %vm4088_vm14 = vcmp.gt.f32.partialorder %v3986_v51, 0.0 }
 0x37e   : > { %17426 = vst [vmem:[#allocation52_spill] sm:$0xff] %v14673_v23  ;;  %v3990_v62 = vadd.f32 %v3989_v18, %v3877_v56  ;;  %v3879_v17 = vadd.f32 %v3878_v50, %v14546_v9  ;;  %8020 = vmatpush1.bf16.msra.mxu1 %v10819_v6  ;;  %7908 = vmatprep.subr.bf16.mxu0 %v10824_v26  ;;  %v4217_v27 = vmul.f32 0.2, %v3988_v55  ;;  %vm4089_vm13 = vcmp.gt.f32.partialorder %v3988_v55, 0.0  ;;  %v10836_v18 = vld [vmem:[%s17072_s7 + $0x3c4] ss:$28 sps:$4 sm:$0xff]  }
 0x37f   : > { %17425 = vst [vmem:[#allocation51_spill] sm:$0xff] %v14668_v4  ;;  %v3991_v39 = vpop.f32.mrf.mxu0  ;;  %v3882_v34 = vpop.f32.mrf.mxu1  ;;  %7726 = vmatprep.mubr.bf16.mxu0 %v14668_v4  ;;  %8021 = vmatprep.subr.bf16.mxu1 %v10827_v54  ;;  %v10831_v54 = vld [vmem:[%s17072_s7 + $0x778] ss:$28 sps:$4 sm:$0xff]  }
 0x380   : > { %vm4096_vm12 = vcmp.gt.f32.partialorder %v3990_v62, 0.0  ;;  %v4224_v49 = vmul.f32 0.2, %v3990_v62  ;;  %v3992_v6 = vadd.f32 %v3991_v39, %v3879_v17  ;;  %7727 = vmatmul.mubr.bf16.gmra.mxu0 %v14673_v23  ;;  %7840 = vmatmul.mubr.bf16.gmra.mxu1 %v13953_v38  ;;  %v3883_v26 = vadd.f32 %v3882_v34, %v14537_v48 }
 0x381   : > { %v3995_v7 = vpop.f32.mrf.mxu0  ;;  %v3884_v59 = vpop.f32.mrf.mxu1  ;;  %7909 = vmatpush1.bf16.msra.mxu0 %v10822_v52  ;;  %7849 = vmatprep.mubr.bf16.mxu1 %v13988_v0  ;;  %v4345_v52 = vsel %vm4089_vm13, %v3988_v55, %v4217_v27 }
 0x382   : > { %v3885_v20 = vadd.f32 %v3884_v59, %v14546_v9  ;;  %vm4097_vm15 = vcmp.gt.f32.partialorder %v3992_v6, 0.0  ;;  %v4225_v25 = vmul.f32 0.2, %v3992_v6  ;;  %8022 = vmatpush1.bf16.msra.mxu1 %v10825_v5  ;;  %7910 = vmatprep.subr.bf16.mxu0 %v10830_v10  ;;  %v4352_v50 = vsel %vm4096_vm12, %v3990_v62, %v4224_v49  ;;  %v10834_v62 = vld [vmem:[%s17072_s7 + $0x3c0] ss:$28 sps:$4 sm:$0xff]  }
 0x383   : > { %v3997_v30 = vpop.f32.mrf.mxu0  ;;  %v3886_v56 = vpop.f32.mrf.mxu1  ;;  %8023 = vmatprep.subr.bf16.mxu1 %v10833_v3  ;;  %v4344_v10 = vsel %vm4088_vm14, %v3986_v51, %v4216_v40  ;;  %v3996_v38 = vadd.f32 %v3995_v7, %v3883_v26  ;;  %v10837_v51 = vld [vmem:[%s17072_s7 + $0x740] ss:$28 sps:$4 sm:$0xff]   ;;  %v10840_v7 = vld [vmem:[%s17072_s7 + $0x388] ss:$28 sps:$4 sm:$0xff]  }
 0x384   : > { %v4353_v17 = vsel %vm4097_vm15, %v3992_v6, %v4225_v25  ;;  %v3998_v39 = vadd.f32 %v3997_v30, %v3885_v20  ;;  %v3887_v34 = vadd.f32 %v3886_v56, %v14537_v48  ;;  %v14712_v3 = vpack.c.bf16 %v4352_v50, %v4344_v10  ;;  %v10845_v40 = vld [vmem:[%s17072_s7 + $0x70c] ss:$28 sps:$4 sm:$0xff]   ;;  %v10851_v10 = vld [vmem:[%s17072_s7 + $0xa54] ss:$28 sps:$4 sm:$0xff]  }
 0x385   : > { %v3999_v5 = vpop.f32.mrf.mxu0  ;;  %v3888_v59 = vpop.f32.mrf.mxu1  ;;  %v14707_v0 = vpack.c.bf16 %v4353_v17, %v4345_v52  ;;  %7911 = vmatpush1.bf16.msra.mxu0 %v10828_v46  ;;  %v10842_v46 = vld [vmem:[%s17072_s7 + $0x38c] ss:$28 sps:$4 sm:$0xff]   ;;  %v4232_v56 = vmul.f32 0.2, %v3996_v38  ;;  %vm4104_vm2 = vcmp.gt.f32.partialorder %v3996_v38, 0.0 }
 0x386   : > { %17428 = vst [vmem:[#allocation54_spill] sm:$0xff] %v14712_v3  ;;  %v4000_v49 = vadd.f32 %v3999_v5, %v3887_v34  ;;  %v3889_v55 = vadd.f32 %v3888_v59, %v14546_v9  ;;  %8024 = vmatpush1.bf16.msra.mxu1 %v10831_v54  ;;  %7912 = vmatprep.subr.bf16.mxu0 %v10836_v18  ;;  %v4233_v26 = vmul.f32 0.2, %v3998_v39  ;;  %vm4105_vm1 = vcmp.gt.f32.partialorder %v3998_v39, 0.0  ;;  %v10848_v5 = vld [vmem:[%s17072_s7 + $0x6d4] ss:$28 sps:$4 sm:$0xff]  }
 0x387   : > { %17427 = vst [vmem:[#allocation53_spill] sm:$0xff] %v14707_v0  ;;  %v4001_v27 = vpop.f32.mrf.mxu0  ;;  %v3892_v6 = vpop.f32.mrf.mxu1  ;;  %7736 = vmatprep.mubr.bf16.mxu0 %v14707_v0  ;;  %8025 = vmatprep.subr.bf16.mxu1 %v10839_v61  ;;  %v10843_v61 = vld [vmem:[%s17072_s7 + $0x708] ss:$28 sps:$4 sm:$0xff]  }
 0x388   : > { %vm4112_vm0 = vcmp.gt.f32.partialorder %v4000_v49, 0.0  ;;  %v4240_v20 = vmul.f32 0.2, %v4000_v49  ;;  %v4002_v54 = vadd.f32 %v4001_v27, %v3889_v55  ;;  %7737 = vmatmul.mubr.bf16.gmra.mxu0 %v14712_v3  ;;  %7850 = vmatmul.mubr.bf16.gmra.mxu1 %v13986_v31  ;;  %v3893_v18 = vadd.f32 %v3892_v6, %v14537_v48 }
 0x389   : > { %v4005_v25 = vpop.f32.mrf.mxu0  ;;  %v3894_v30 = vpop.f32.mrf.mxu1  ;;  %7913 = vmatpush1.bf16.msra.mxu0 %v10834_v62  ;;  %7859 = vmatprep.mubr.bf16.mxu1 %v14016_v2  ;;  %v4361_v62 = vsel %vm4105_vm1, %v3998_v39, %v4233_v26 }
 0x38a   : > { %v3895_v50 = vadd.f32 %v3894_v30, %v14546_v9  ;;  %vm4113_vm3 = vcmp.gt.f32.partialorder %v4002_v54, 0.0  ;;  %v4241_v52 = vmul.f32 0.2, %v4002_v54  ;;  %8026 = vmatpush1.bf16.msra.mxu1 %v10837_v51  ;;  %7914 = vmatprep.subr.bf16.mxu0 %v10842_v46  ;;  %v4368_v59 = vsel %vm4112_vm0, %v4000_v49, %v4240_v20  ;;  %v10846_v49 = vld [vmem:[%s17072_s7 + $0x6d0] ss:$28 sps:$4 sm:$0xff]  }
 0x38b   : > { %v4007_v17 = vpop.f32.mrf.mxu0  ;;  %v3896_v34 = vpop.f32.mrf.mxu1  ;;  %8027 = vmatprep.subr.bf16.mxu1 %v10845_v40  ;;  %v4360_v46 = vsel %vm4104_vm2, %v3996_v38, %v4232_v56  ;;  %v4006_v31 = vadd.f32 %v4005_v25, %v3893_v18  ;;  %v10849_v38 = vld [vmem:[%s17072_s7 + $0xa50] ss:$28 sps:$4 sm:$0xff]   ;;  %v10852_v25 = vld [vmem:[%s17072_s7 + $0x698] ss:$28 sps:$4 sm:$0xff]  }
 0x38c   : > { %v4369_v55 = vsel %vm4113_vm3, %v4002_v54, %v4241_v52  ;;  %v4008_v27 = vadd.f32 %v4007_v17, %v3895_v50  ;;  %v3897_v6 = vadd.f32 %v3896_v34, %v14537_v48  ;;  %v14751_v40 = vpack.c.bf16 %v4368_v59, %v4360_v46  ;;  %v10857_v56 = vld [vmem:[%s17072_s7 + $0xa1c] ss:$28 sps:$4 sm:$0xff]   ;;  %v10863_v46 = vld [vmem:[%s17072_s7 + $0x9e4] ss:$28 sps:$4 sm:$0xff]  }
 0x38d   : > { %v4009_v51 = vpop.f32.mrf.mxu0  ;;  %v3898_v30 = vpop.f32.mrf.mxu1  ;;  %v14746_v2 = vpack.c.bf16 %v4369_v55, %v4361_v62  ;;  %7915 = vmatpush1.bf16.msra.mxu0 %v10840_v7  ;;  %v10854_v7 = vld [vmem:[%s17072_s7 + $0x69c] ss:$28 sps:$4 sm:$0xff]   ;;  %v4248_v34 = vmul.f32 0.2, %v4006_v31  ;;  %vm4120_vm6 = vcmp.gt.f32.partialorder %v4006_v31, 0.0 }
 0x38e   : > { %17430 = vst [vmem:[#allocation56_spill] sm:$0xff] %v14751_v40  ;;  %v4010_v20 = vadd.f32 %v4009_v51, %v3897_v6  ;;  %v3899_v39 = vadd.f32 %v3898_v30, %v14546_v9  ;;  %8028 = vmatpush1.bf16.msra.mxu1 %v10843_v61  ;;  %7916 = vmatprep.subr.bf16.mxu0 %v10848_v5  ;;  %v4249_v18 = vmul.f32 0.2, %v4008_v27  ;;  %vm4121_vm5 = vcmp.gt.f32.partialorder %v4008_v27, 0.0  ;;  %v10860_v51 = vld [vmem:[%s17072_s7 + $0x664] ss:$28 sps:$4 sm:$0xff]  }
 0x38f   : > { %17429 = vst [vmem:[#allocation55_spill] sm:$0xff] %v14746_v2  ;;  %v4011_v26 = vpop.f32.mrf.mxu0  ;;  %v3902_v54 = vpop.f32.mrf.mxu1  ;;  %7746 = vmatprep.mubr.bf16.mxu0 %v14746_v2  ;;  %8029 = vmatprep.subr.bf16.mxu1 %v10851_v10  ;;  %v10855_v10 = vld [vmem:[%s17072_s7 + $0xa18] ss:$28 sps:$4 sm:$0xff]  }
 0x390   : > { %vm4128_vm4 = vcmp.gt.f32.partialorder %v4010_v20, 0.0  ;;  %v4256_v50 = vmul.f32 0.2, %v4010_v20  ;;  %v4012_v61 = vadd.f32 %v4011_v26, %v3899_v39  ;;  %7747 = vmatmul.mubr.bf16.gmra.mxu0 %v14751_v40  ;;  %7860 = vmatmul.mubr.bf16.gmra.mxu1 %v14014_v15  ;;  %v3903_v5 = vadd.f32 %v3902_v54, %v14537_v48 }
 0x391   : > { %v4015_v52 = vpop.f32.mrf.mxu0  ;;  %v3904_v17 = vpop.f32.mrf.mxu1  ;;  %7917 = vmatpush2.bf16.msra.mxu0 %v10846_v49  ;;  %7869 = vmatprep.mubr.bf16.mxu1 %v14040_v13  ;;  %v4377_v49 = vsel %vm4121_vm5, %v4008_v27, %v4249_v18 }
 0x392   : > { %v3905_v59 = vadd.f32 %v3904_v17, %v14546_v9  ;;  %vm4129_vm7 = vcmp.gt.f32.partialorder %v4012_v61, 0.0  ;;  %v4257_v62 = vmul.f32 0.2, %v4012_v61  ;;  %8030 = vmatpush2.bf16.msra.mxu1 %v10849_v38  ;;  %7918 = vmatprep.subr.bf16.mxu0 %v10854_v7  ;;  %v4384_v30 = vsel %vm4128_vm4, %v4010_v20, %v4256_v50  ;;  %v10858_v20 = vld [vmem:[%s17072_s7 + $0x660] ss:$28 sps:$4 sm:$0xff]  }
 0x393   : > { %v4017_v55 = vpop.f32.mrf.mxu0  ;;  %v3906_v6 = vpop.f32.mrf.mxu1  ;;  %8031 = vmatprep.subr.bf16.mxu1 %v10857_v56  ;;  %v4376_v7 = vsel %vm4120_vm6, %v4006_v31, %v4248_v34  ;;  %v4016_v15 = vadd.f32 %v4015_v52, %v3903_v5  ;;  %v10861_v31 = vld [vmem:[%s17072_s7 + $0x9e0] ss:$28 sps:$4 sm:$0xff]   ;;  %v10864_v52 = vld [vmem:[%s17072_s7 + $0x628] ss:$28 sps:$4 sm:$0xff]  }
 0x394   : > { %v4385_v39 = vsel %vm4129_vm7, %v4012_v61, %v4257_v62  ;;  %v4018_v26 = vadd.f32 %v4017_v55, %v3905_v59  ;;  %v3907_v54 = vadd.f32 %v3906_v6, %v14537_v48  ;;  %v14790_v56 = vpack.c.bf16 %v4384_v30, %v4376_v7  ;;  %v10869_v34 = vld [vmem:[%s17072_s7 + $0x9ac] ss:$28 sps:$4 sm:$0xff]   ;;  %v10875_v7 = vld [vmem:[%s17072_s7 + $0x974] ss:$28 sps:$4 sm:$0xff]  }
 0x395   : > { %v4019_v38 = vpop.f32.mrf.mxu0  ;;  %v3908_v17 = vpop.f32.mrf.mxu1  ;;  %v14785_v13 = vpack.c.bf16 %v4385_v39, %v4377_v49  ;;  %7919 = vmatpush2.bf16.msra.mxu0 %v10852_v25  ;;  %v10866_v25 = vld [vmem:[%s17072_s7 + $0x62c] ss:$28 sps:$4 sm:$0xff]   ;;  %v4264_v6 = vmul.f32 0.2, %v4016_v15  ;;  %vm4136_vm10 = vcmp.gt.f32.partialorder %v4016_v15, 0.0 }
 0x396   : > { %17432 = vst [vmem:[#allocation58_spill] sm:$0xff] %v14790_v56  ;;  %v4020_v50 = vadd.f32 %v4019_v38, %v3907_v54  ;;  %v3909_v27 = vadd.f32 %v3908_v17, %v14546_v9  ;;  %8032 = vmatpush2.bf16.msra.mxu1 %v10855_v10  ;;  %7920 = vmatprep.subr.bf16.mxu0 %v10860_v51  ;;  %v4265_v5 = vmul.f32 0.2, %v4018_v26  ;;  %vm4137_vm9 = vcmp.gt.f32.partialorder %v4018_v26, 0.0  ;;  %v10872_v38 = vld [vmem:[%s17072_s7 + $0x5f4] ss:$28 sps:$4 sm:$0xff]  }
 0x397   : > { %17431 = vst [vmem:[#allocation57_spill] sm:$0xff] %v14785_v13  ;;  %v4021_v18 = vpop.f32.mrf.mxu0  ;;  %v3912_v61 = vpop.f32.mrf.mxu1  ;;  %7756 = vmatprep.mubr.bf16.mxu0 %v14785_v13  ;;  %8033 = vmatprep.subr.bf16.mxu1 %v10863_v46  ;;  %v10867_v46 = vld [vmem:[%s17072_s7 + $0x9a8] ss:$28 sps:$4 sm:$0xff]  }
 0x398   : > { %vm4144_vm8 = vcmp.gt.f32.partialorder %v4020_v50, 0.0  ;;  %v4272_v59 = vmul.f32 0.2, %v4020_v50  ;;  %v4022_v10 = vadd.f32 %v4021_v18, %v3909_v27  ;;  %7757 = vmatmul.mubr.bf16.gmra.mxu0 %v14790_v56  ;;  %7870 = vmatmul.mubr.bf16.gmra.mxu1 %v14038_v8  ;;  %v3913_v51 = vadd.f32 %v3912_v61, %v14537_v48 }
 0x399   : > { %v4025_v62 = vpop.f32.mrf.mxu0  ;;  %v3914_v55 = vpop.f32.mrf.mxu1  ;;  %7921 = vmatpush2.bf16.msra.mxu0 %v10858_v20  ;;  %7879 = vmatprep.mubr.bf16.mxu1 %v14172_v1  ;;  %v4393_v20 = vsel %vm4137_vm9, %v4018_v26, %v4265_v5 }
 0x39a   : > { %v3915_v30 = vadd.f32 %v3914_v55, %v14546_v9  ;;  %vm4145_vm11 = vcmp.gt.f32.partialorder %v4022_v10, 0.0  ;;  %v4273_v49 = vmul.f32 0.2, %v4022_v10  ;;  %8034 = vmatpush2.bf16.msra.mxu1 %v10861_v31  ;;  %7922 = vmatprep.subr.bf16.mxu0 %v10866_v25  ;;  %v4400_v17 = vsel %vm4144_vm8, %v4020_v50, %v4272_v59  ;;  %v10870_v50 = vld [vmem:[%s17072_s7 + $0x5f0] ss:$28 sps:$4 sm:$0xff]  }
 0x39b   : > { %v4027_v39 = vpop.f32.mrf.mxu0  ;;  %v3916_v54 = vpop.f32.mrf.mxu1  ;;  %8035 = vmatprep.subr.bf16.mxu1 %v10869_v34  ;;  %v4392_v25 = vsel %vm4136_vm10, %v4016_v15, %v4264_v6  ;;  %v4026_v8 = vadd.f32 %v4025_v62, %v3913_v51  ;;  %v10873_v15 = vld [vmem:[%s17072_s7 + $0x970] ss:$28 sps:$4 sm:$0xff]  }
 0x39c   : > { %v4401_v27 = vsel %vm4145_vm11, %v4022_v10, %v4273_v49  ;;  %v4028_v18 = vadd.f32 %v4027_v39, %v3915_v30  ;;  %v3917_v61 = vadd.f32 %v3916_v54, %v14537_v48  ;;  %v14829_v34 = vpack.c.bf16 %v4400_v17, %v4392_v25  ;;  %v10878_v48 = vld [vmem:[%s17072_s7 + $0x5bc] ss:$28 sps:$4 sm:$0xff]  }
 0x39d   : > { %v4029_v31 = vpop.f32.mrf.mxu0  ;;  %v3918_v55 = vpop.f32.mrf.mxu1  ;;  %v14824_v1 = vpack.c.bf16 %v4401_v27, %v4393_v20  ;;  %7923 = vmatpush2.bf16.msra.mxu0 %v10864_v52  ;;  %v10881_v10 = vld [vmem:[%s17072_s7 + $0x93c] ss:$28 sps:$4 sm:$0xff]   ;;  %vm4152_vm14 = vcmp.gt.f32.partialorder %v4026_v8, 0.0 }
 0x39e   : > { %17434 = vst [vmem:[#allocation60_spill] sm:$0xff] %v14829_v34  ;;  %v4030_v59 = vadd.f32 %v4029_v31, %v3917_v61  ;;  %v3919_v26 = vadd.f32 %v3918_v55, %v14546_v9  ;;  %8036 = vmatpush2.bf16.msra.mxu1 %v10867_v46  ;;  %7924 = vmatprep.subr.bf16.mxu0 %v10872_v38  ;;  %v10876_v9 = vld [vmem:[%s17072_s7 + $0x5b8] ss:$28 sps:$4 sm:$0xff]   ;;  %v4281_v62 = vmul.f32 0.2, %v4028_v18  ;;  %vm4153_vm13 = vcmp.gt.f32.partialorder %v4028_v18, 0.0 }
 0x39f   : > { %17433 = vst [vmem:[#allocation59_spill] sm:$0xff] %v14824_v1  ;;  %v14832_v5 = vpop.f32.mrf.mxu1  ;;  %v4031_v52 = vpop.f32.mrf.mxu0  ;;  %7766 = vmatprep.mubr.bf16.mxu0 %v14824_v1  ;;  %8037 = vmatprep.subr.bf16.mxu1 %v10875_v7  ;;  %v4280_v46 = vmul.f32 0.2, %v4026_v8  ;;  %v10879_v49 = vld [vmem:[%s17072_s7 + $0x938] ss:$28 sps:$4 sm:$0xff]  }
 0x3a0   : > { %vm4160_vm12 = vcmp.gt.f32.partialorder %v4030_v59, 0.0  ;;  %v4288_v6 = vmul.f32 0.2, %v4030_v59  ;;  %v4032_v51 = vadd.f32 %v4031_v52, %v3919_v26  ;;  %7767 = vmatmul.mubr.bf16.gmra.mxu0 %v14829_v34  ;;  %7880 = vmatmul.mubr.bf16.gmra.mxu1 %v14169_v47  ;;  %v10884_v38 = vld [vmem:[%s17072_s7 + $0x584] ss:$28 sps:$4 sm:$0xff]   ;;  %v4409_v20 = vsel %vm4153_vm13, %v4028_v18, %v4281_v62 }
 0x3a1   : > { %v14849_v30 = vpop.f32.mrf.mxu1  ;;  %7925 = vmatpush2.bf16.msra.mxu0 %v10870_v50  ;;  %7889 = vmatprep.mubr.bf16.mxu1 %v14241_v44  ;;  %v10887_v7 = vld [vmem:[%s17072_s7 + $0x904] ss:$28 sps:$4 sm:$0xff]   ;;  %v4408_v31 = vsel %vm4152_vm14, %v4026_v8, %v4280_v46  ;;  %v10890_v8 = vld [vmem:[%s17072_s7 + $0x54c] ss:$28 sps:$4 sm:$0xff]   ;;  %v10899_v62 = vld [vmem:[%s17072_s7 + $0x19c] ss:$28 sps:$4 sm:$0xff]  }
 0x3a2   : > { %vm4161_vm15 = vcmp.gt.f32.partialorder %v4032_v51, 0.0  ;;  %v4289_v39 = vmul.f32 0.2, %v4032_v51  ;;  %8038 = vmatpush2.bf16.msra.mxu1 %v10873_v15  ;;  %7926 = vmatprep.subr.bf16.mxu0 %v10878_v48  ;;  %v4416_v17 = vsel %vm4160_vm12, %v4030_v59, %v4288_v6  ;;  %v10882_v25 = vld [vmem:[%s17072_s7 + $0x580] ss:$28 sps:$4 sm:$0xff]  }
 0x3a3   : > { %v14855_v54 = vpop.f32.mrf.mxu1  ;;  %8039 = vmatprep.subr.bf16.mxu1 %v10881_v10  ;;  %v14871_v50 = vpack.c.bf16 %v4416_v17, %v4408_v31  ;;  %v10885_v18 = vld [vmem:[%s17072_s7 + $0x900] ss:$28 sps:$4 sm:$0xff]   ;;  %v10893_v26 = vld [vmem:[%s17072_s7 + $0x8cc] ss:$28 sps:$4 sm:$0xff]   ;;  %v10896_v10 = vld [vmem:[%s17072_s7 + $0xc14] ss:$28 sps:$4 sm:$0xff]  }
 0x3a4   : > { %v4417_v27 = vsel %vm4161_vm15, %v4032_v51, %v4289_v39  ;;  %v10888_v48 = vld [vmem:[%s17072_s7 + $0x548] ss:$28 sps:$4 sm:$0xff]   ;;  %v10894_v51 = vld [vmem:[%s17072_s7 + $0xc10] ss:$28 sps:$4 sm:$0xff]   ;;  %v10902_v39 = vld [vmem:[%s17072_s7 + $0xbdc] ss:$28 sps:$4 sm:$0xff]  }
 0x3a5   : > { %v14864_v61 = vpop.f32.mrf.mxu1  ;;  %v14866_v55 = vpack.c.bf16 %v4417_v27, %v4409_v20  ;;  %7927 = vmatpush2.bf16.msra.mxu0 %v10876_v9  ;;  %17436 = vst [vmem:[#allocation62_spill] sm:$0xff] %v14871_v50  ;;  %v10891_v9 = vld [vmem:[%s17072_s7 + $0x8c8] ss:$28 sps:$4 sm:$0xff]  }
 0x3a6   : > { %8040 = vmatpush2.bf16.msra.mxu1 %v10879_v49  ;;  %7928 = vmatprep.subr.bf16.mxu0 %v10884_v38  ;;  %v10897_v49 = vld [vmem:[%s17072_s7 + $0x198] ss:$28 sps:$4 sm:$0xff]   ;;  %v10905_v17 = vld [vmem:[%s17072_s7 + $0x164] ss:$28 sps:$4 sm:$0xff]  }
 0x3a7   : > { %17435 = vst [vmem:[#allocation61_spill] sm:$0xff] %v14866_v55  ;;  %v14873_v59 = vpop.f32.mrf.mxu1  ;;  %7776 = vmatprep.mubr.bf16.mxu0 %v14866_v55  ;;  %8041 = vmatprep.subr.bf16.mxu1 %v10887_v7  ;;  %v10900_v7 = vld [vmem:[%s17072_s7 + $0xbd8] ss:$28 sps:$4 sm:$0xff]   ;;  %v10908_v31 = vld [vmem:[%s17072_s7 + $0xba4] ss:$28 sps:$4 sm:$0xff]  }
 0x3a8   : > { %7777 = vmatmul.mubr.bf16.gmra.mxu0 %v14871_v50  ;;  %7890 = vmatmul.mubr.bf16.gmra.mxu1 %v14288_v41 }
 0x3a9   : > { %v14887_v15 = vpop.f32.mrf.mxu1  ;;  %7929 = vmatpush2.bf16.msra.mxu0 %v10882_v25  ;;  %7932 = vmatprep.mubr.bf16.mxu0 %v14050_v45  ;;  %v10903_v25 = vld [vmem:[%s17072_s7 + $0x160] ss:$28 sps:$4 sm:$0xff]  }
 0x3aa   : > { %8042 = vmatpush2.bf16.msra.mxu1 %v10885_v18  ;;  %8045 = vmatprep.mubr.bf16.mxu1 %v14395_v63 }
 0x3ab   : > { %v14894_v52 = vpop.f32.mrf.mxu1  ;;  %7930 = vmatprep.subr.bf16.mxu0 %v10890_v8  ;;  %8043 = vmatprep.subr.bf16.mxu1 %v10893_v26  ;;  %v10911_v8 = vld [vmem:[%s17072_s7 + $0x12c] ss:$28 sps:$4 sm:$0xff]   ;;  %v10906_v26 = vld [vmem:[%s17072_s7 + $0xba0] ss:$28 sps:$4 sm:$0xff]  }
 0x3ad   : > { %v14905_v6 = vpop.f32.mrf.mxu1  ;;  %7931 = vmatpush2.bf16.msra.mxu0 %v10888_v48 }
 0x3ae   : > { %8044 = vmatpush2.bf16.msra.mxu1 %v10891_v9  ;;  %8126 = vmatprep.subr.bf16.mxu0 %v10896_v10  ;;  %v10909_v10 = vld [vmem:[%s17072_s7 + $0x128] ss:$28 sps:$4 sm:$0xff]  }
 0x3af   : > { %v14910_v46 = vpop.f32.mrf.mxu1  ;;  %8239 = vmatprep.subr.bf16.mxu1 %v10899_v62  ;;  %v10914_v62 = vld [vmem:[%s17072_s7 + $0xb6c] ss:$28 sps:$4 sm:$0xff]  }
 0x3b0   : > { %7933 = vmatmul.mubr.bf16.vlgmr.msra.gmra.mxu0 %v14060_v33  ;;  %v14928_v20 = vpop.f32.mrf.mxu0 }
 0x3b1   : > { %v14919_v38 = vpop.f32.mrf.mxu1  ;;  %8046 = vmatmul.mubr.bf16.vlgmr.msra.gmra.mxu1 %v14400_v12  ;;  %8127 = vmatpush1.bf16.msra.mxu0 %v10894_v51 }
 0x3b2   : > { %7942 = vmatprep.mubr.bf16.mxu0 %v14104_v53  ;;  %8055 = vmatprep.mubr.bf16.mxu1 %v14418_v35  ;;  %v14948_v48 = vpop.f32.mrf.mxu0 }
 0x3b3   : > { %v14932_v27 = vpop.f32.mrf.mxu1  ;;  %8240 = vmatpush1.bf16.msra.mxu1 %v10897_v49  ;;  %8128 = vmatprep.subr.bf16.mxu0 %v10902_v39  ;;  %v10917_v49 = vld [vmem:[%s17072_s7 + $0xf4] ss:$28 sps:$4 sm:$0xff]   ;;  %v10912_v39 = vld [vmem:[%s17072_s7 + $0xb68] ss:$28 sps:$4 sm:$0xff]  }
 0x3b4   : > { %8241 = vmatprep.subr.bf16.mxu1 %v10905_v17  ;;  %v14968_v17 = vpop.f32.mrf.mxu0 }
 0x3b5   : > { %v14940_v18 = vpop.f32.mrf.mxu1  ;;  %8129 = vmatpush1.bf16.msra.mxu0 %v10900_v7 }
 0x3b6   : > { %17437 = vst [vmem:[#allocation63_spill] sm:$0xff] %v14940_v18  ;;  %8130 = vmatprep.subr.bf16.mxu0 %v10908_v31  ;;  %v10920_v31 = vld [vmem:[%s17072_s7 + $0xb34] ss:$28 sps:$4 sm:$0xff]   ;;  %v17461_v18 = vld [vmem:[#allocation33_spill] sm:$0xff] }
 0x3b7   : > { %v14950_v9 = vpop.f32.mrf.mxu1  ;;  %8242 = vmatpush1.bf16.msra.mxu1 %v10903_v25  ;;  %v10915_v25 = vld [vmem:[%s17072_s7 + $0xf0] ss:$28 sps:$4 sm:$0xff]  }
 0x3b8   : > { %17438 = vst [vmem:[#allocation64_spill] sm:$0xff] %v14950_v9  ;;  %7943 = vmatmul.mubr.bf16.gmra.mxu0 %v14112_v57  ;;  %8243 = vmatprep.subr.bf16.mxu1 %v10911_v8  ;;  %v17449_v9 = vld [vmem:[#allocation39_spill] sm:$0xff] }
 0x3b9   : > { %v14959_v51 = vpop.f32.mrf.mxu1  ;;  %8056 = vmatmul.mubr.bf16.gmra.mxu1 %v14423_v19  ;;  %8131 = vmatpush1.bf16.msra.mxu0 %v10906_v26  ;;  %v10923_v26 = vld [vmem:[%s17072_s7 + $0xbc] ss:$28 sps:$4 sm:$0xff]  }
 0x3ba   : > { %17439 = vst [vmem:[#allocation65_spill] sm:$0xff] %v14959_v51  ;;  %7952 = vmatprep.mubr.bf16.mxu0 %v14153_v29  ;;  %8065 = vmatprep.mubr.bf16.mxu1 %v14441_v58  ;;  %v14988_v51 = vpop.f32.mrf.mxu0 }
 0x3bb   : > { %v14972_v7 = vpop.f32.mrf.mxu1  ;;  %8244 = vmatpush1.bf16.msra.mxu1 %v10909_v10  ;;  %8132 = vmatprep.subr.bf16.mxu0 %v10914_v62  ;;  %v10921_v62 = vld [vmem:[%s17072_s7 + $0xb8] ss:$28 sps:$4 sm:$0xff]  }
 0x3bc   : > { %17440 = vst [vmem:[#allocation66_spill] sm:$0xff] %v14972_v7  ;;  %8245 = vmatprep.subr.bf16.mxu1 %v10917_v49  ;;  %v10918_v7 = vld [vmem:[%s17072_s7 + $0xb30] ss:$28 sps:$4 sm:$0xff]   ;;  %v10926_v49 = vld [vmem:[%s17072_s7 + $0xafc] ss:$28 sps:$4 sm:$0xff]  }
 0x3bd   : > { %v14980_v8 = vpop.f32.mrf.mxu1  ;;  %8133 = vmatpush1.bf16.msra.mxu0 %v10912_v39 }
 0x3be   : > { %17441 = vst [vmem:[#allocation67_spill] sm:$0xff] %v14980_v8  ;;  %8134 = vmatprep.subr.bf16.mxu0 %v10920_v31  ;;  %v10929_v8 = vld [vmem:[%s17072_s7 + $0x84] ss:$28 sps:$4 sm:$0xff]   ;;  %v10924_v31 = vld [vmem:[%s17072_s7 + $0xaf8] ss:$28 sps:$4 sm:$0xff]  }
 0x3bf   : > { %v14990_v10 = vpop.f32.mrf.mxu1  ;;  %8246 = vmatpush1.bf16.msra.mxu1 %v10915_v25  ;;  %v15008_v25 = vpop.f32.mrf.mxu0 }
 0x3c0   : > { %17442 = vst [vmem:[#allocation68_spill] sm:$0xff] %v14990_v10  ;;  %7953 = vmatmul.mubr.bf16.gmra.mxu0 %v14161_v32  ;;  %8247 = vmatprep.subr.bf16.mxu1 %v10923_v26  ;;  %v17456_v32 = vld [vmem:[#allocation41_spill] sm:$0xff] }
 0x3c1   : > { %v14999_v39 = vpop.f32.mrf.mxu1  ;;  %8066 = vmatmul.mubr.bf16.gmra.mxu1 %v14446_v22  ;;  %8135 = vmatpush1.bf16.msra.mxu0 %v10918_v7  ;;  %v10927_v7 = vld [vmem:[%s17072_s7 + $0x80] ss:$28 sps:$4 sm:$0xff]   ;;  %v10935_v22 = vld [vmem:[%s17072_s7 + $0x4c] ss:$28 sps:$4 sm:$0xff]  }
 0x3c2   : > { %17443 = vst [vmem:[#allocation69_spill] sm:$0xff] %v14999_v39  ;;  %7962 = vmatprep.mubr.bf16.mxu0 %v14202_v14  ;;  %8075 = vmatprep.mubr.bf16.mxu1 %v14464_v28  ;;  %v10932_v39 = vld [vmem:[%s17072_s7 + $0xac4] ss:$28 sps:$4 sm:$0xff]   ;;  %v15028_v28 = vpop.f32.mrf.mxu0  ;;  %v17455_v14 = vld [vmem:[#allocation31_spill] sm:$0xff] }
 0x3c3   : > { %v15012_v26 = vpop.f32.mrf.mxu1  ;;  %8248 = vmatpush1.bf16.msra.mxu1 %v10921_v62  ;;  %8136 = vmatprep.subr.bf16.mxu0 %v10926_v49  ;;  %v10938_v49 = vld [vmem:[%s17072_s7 + $0xa8c] ss:$28 sps:$4 sm:$0xff]  }
 0x3c4   : > { %17444 = vst [vmem:[#allocation70_spill] sm:$0xff] %v15012_v26  ;;  %8249 = vmatprep.subr.bf16.mxu1 %v10929_v8  ;;  %v10930_v26 = vld [vmem:[%s17072_s7 + $0xac0] ss:$28 sps:$4 sm:$0xff]   ;;  %v10933_v8 = vld [vmem:[%s17072_s7 + $0x48] ss:$28 sps:$4 sm:$0xff]  }
 0x3c5   : > { %v15020_v10 = vpop.f32.mrf.mxu1  ;;  %8137 = vmatpush1.bf16.msra.mxu0 %v10924_v31 }
 0x3c6   : > { %17445 = vst [vmem:[#allocation71_spill] sm:$0xff] %v15020_v10  ;;  %8138 = vmatprep.subr.bf16.mxu0 %v10932_v39  ;;  %v10941_v10 = vld [vmem:[%s17072_s7 + $0x14] ss:$28 sps:$4 sm:$0xff]   ;;  %v10936_v39 = vld [vmem:[%s17072_s7 + $0xa88] ss:$28 sps:$4 sm:$0xff]  }
 0x3c7   : > { %v15030_v62 = vpop.f32.mrf.mxu1  ;;  %8250 = vmatpush1.bf16.msra.mxu1 %v10927_v7  ;;  %v15048_v7 = vpop.f32.mrf.mxu0 }
 0x3c8   : > { %17446 = vst [vmem:[#allocation72_spill] sm:$0xff] %v15030_v62  ;;  %7963 = vmatmul.mubr.bf16.gmra.mxu0 %v14210_v16  ;;  %8251 = vmatprep.subr.bf16.mxu1 %v10935_v22  ;;  %v17448_v62 = vld [vmem:[#allocation28_spill] sm:$0xff] }
 0x3c9   : > { %v15039_v31 = vpop.f32.mrf.mxu1  ;;  %8076 = vmatmul.mubr.bf16.gmra.mxu1 %v14469_v43  ;;  %8139 = vmatpush1.bf16.msra.mxu0 %v10930_v26  ;;  %v10939_v26 = vld [vmem:[%s17072_s7 + $0x10] ss:$28 sps:$4 sm:$0xff]   ;;  %v10947_v43 = vld [vmem:[%s17072_s7 + $0x35c] ss:$28 sps:$4 sm:$0xff]  }
 0x3ca   : > { %17447 = vst [vmem:[#allocation73_spill] sm:$0xff] %v15039_v31  ;;  %7972 = vmatprep.mubr.bf16.mxu0 %v17448_v62  ;;  %8085 = vmatprep.mubr.bf16.mxu1 %v17449_v9  ;;  %v10944_v31 = vld [vmem:[%s17072_s7 + $0xdd4] ss:$28 sps:$4 sm:$0xff]   ;;  %v15066_v9 = vpop.f32.mrf.mxu0 }
 0x3cb   : > { %v15052_v22 = vpop.f32.mrf.mxu1  ;;  %8252 = vmatpush1.bf16.msra.mxu1 %v10933_v8  ;;  %8140 = vmatprep.subr.bf16.mxu0 %v10938_v49  ;;  %v10945_v8 = vld [vmem:[%s17072_s7 + $0x358] ss:$28 sps:$4 sm:$0xff]  }
 0x3cc   : > { %17450 = vst [vmem:[#allocation74_spill] sm:$0xff] %v15052_v22  ;;  %8253 = vmatprep.subr.bf16.mxu1 %v10941_v10  ;;  %v10942_v22 = vld [vmem:[%s17072_s7 + $0xdd0] ss:$28 sps:$4 sm:$0xff]   ;;  %v10950_v10 = vld [vmem:[%s17072_s7 + $0xd9c] ss:$28 sps:$4 sm:$0xff]  }
 0x3cd   : > { %8141 = vmatpush1.bf16.msra.mxu0 %v10936_v39  ;;  %v15068_v62 = vpop.f32.mrf.mxu1  ;;  %v17452_v49 = vld [vmem:[#allocation29_spill] sm:$0xff]  ;;  %v10953_v39 = vld [vmem:[%s17072_s7 + $0x324] ss:$28 sps:$4 sm:$0xff]   ;;  %v17453_v16 = vld [vmem:[#allocation40_spill] sm:$0xff] }
 0x3ce   : > { %17451 = vst [vmem:[#allocation75_spill] sm:$0xff] %v15068_v62  ;;  %8142 = vmatprep.subr.bf16.mxu0 %v10944_v31  ;;  %v10948_v31 = vld [vmem:[%s17072_s7 + $0xd98] ss:$28 sps:$4 sm:$0xff]  }
 0x3cf   : > { %8254 = vmatpush1.bf16.msra.mxu1 %v10939_v26  ;;  %v15084_v26 = vpop.f32.mrf.mxu0  ;;  %v15086_v62 = vpop.f32.mrf.mxu1 }
 0x3d0   : > { %7973 = vmatmul.mubr.bf16.gmra.mxu0 %v17452_v49  ;;  %8255 = vmatprep.subr.bf16.mxu1 %v10947_v43  ;;  %17454 = vst [vmem:[#allocation76_spill] sm:$0xff] %v15086_v62  ;;  %v10956_v43 = vld [vmem:[%s17072_s7 + $0xd64] ss:$28 sps:$4 sm:$0xff]  }
 0x3d1   : > { %8086 = vmatmul.mubr.bf16.gmra.mxu1 %v17453_v16  ;;  %8143 = vmatpush2.bf16.msra.mxu0 %v10942_v22  ;;  %v10951_v22 = vld [vmem:[%s17072_s7 + $0x320] ss:$28 sps:$4 sm:$0xff]   ;;  %v10959_v16 = vld [vmem:[%s17072_s7 + $0x2ec] ss:$28 sps:$4 sm:$0xff]  }
 0x3d2   : > { %7982 = vmatprep.mubr.bf16.mxu0 %v17455_v14  ;;  %8095 = vmatprep.mubr.bf16.mxu1 %v17456_v32  ;;  %v10954_v62 = vld [vmem:[%s17072_s7 + $0xd60] ss:$28 sps:$4 sm:$0xff]   ;;  %v15102_v32 = vpop.f32.mrf.mxu0  ;;  %v15104_v14 = vpop.f32.mrf.mxu1 }
 0x3d3   : > { %8256 = vmatpush2.bf16.msra.mxu1 %v10945_v8  ;;  %8144 = vmatprep.subr.bf16.mxu0 %v10950_v10  ;;  %17457 = vst [vmem:[#allocation77_spill] sm:$0xff] %v15104_v14  ;;  %v10957_v8 = vld [vmem:[%s17072_s7 + $0x2e8] ss:$28 sps:$4 sm:$0xff]  }
 0x3d4   : > { %8257 = vmatprep.subr.bf16.mxu1 %v10953_v39  ;;  %v10962_v10 = vld [vmem:[%s17072_s7 + $0xd2c] ss:$28 sps:$4 sm:$0xff]   ;;  %v17458_v39 = vld [vmem:[#allocation32_spill] sm:$0xff]  ;;  %v17459_v49 = vld [vmem:[#allocation42_spill] sm:$0xff]  ;;  %v15122_v14 = vpop.f32.mrf.mxu1 }
 0x3d5   : > { %8145 = vmatpush2.bf16.msra.mxu0 %v10948_v31  ;;  %v10965_v31 = vld [vmem:[%s17072_s7 + $0x2b4] ss:$28 sps:$4 sm:$0xff]   ;;  %17460 = vst [vmem:[#allocation78_spill] sm:$0xff] %v15122_v14 }
 0x3d6   : > { %8146 = vmatprep.subr.bf16.mxu0 %v10956_v43  ;;  %v10960_v43 = vld [vmem:[%s17072_s7 + $0xd28] ss:$28 sps:$4 sm:$0xff]   ;;  %v10966_v14 = vld [vmem:[%s17072_s7 + $0xcf0] ss:$28 sps:$4 sm:$0xff]  }
 0x3d7   : > { %8258 = vmatpush2.bf16.msra.mxu1 %v10951_v22  ;;  %v15120_v22 = vpop.f32.mrf.mxu0 }
 0x3d8   : > { %7983 = vmatmul.mubr.bf16.gmra.mxu0 %v17458_v39  ;;  %8259 = vmatprep.subr.bf16.mxu1 %v10959_v16  ;;  %v10968_v16 = vld [vmem:[%s17072_s7 + $0xcf4] ss:$28 sps:$4 sm:$0xff]   ;;  %v17467_v39 = vld [vmem:[#allocation7_spill] sm:$0xff] }
 0x3d9   : > { %8096 = vmatmul.mubr.bf16.gmra.mxu1 %v17459_v49  ;;  %8147 = vmatpush2.bf16.msra.mxu0 %v10954_v62  ;;  %v10963_v62 = vld [vmem:[%s17072_s7 + $0x2b0] ss:$28 sps:$4 sm:$0xff]   ;;  %v10971_v49 = vld [vmem:[%s17072_s7 + $0x27c] ss:$28 sps:$4 sm:$0xff]  }
 0x3da   : > { %7992 = vmatprep.mubr.bf16.mxu0 %v17461_v18  ;;  %8105 = vmatprep.mubr.bf16.mxu1 %v14540_v24  ;;  %v15138_v24 = vpop.f32.mrf.mxu0  ;;  %v15140_v18 = vpop.f32.mrf.mxu1 }
 0x3db   : > { %8260 = vmatpush2.bf16.msra.mxu1 %v10957_v8  ;;  %8148 = vmatprep.subr.bf16.mxu0 %v10962_v10  ;;  %17462 = vst [vmem:[#allocation79_spill] sm:$0xff] %v15138_v24  ;;  %17463 = vst [vmem:[#allocation80_spill] sm:$0xff] %v15140_v18  ;;  %v10969_v8 = vld [vmem:[%s17072_s7 + $0x278] ss:$28 sps:$4 sm:$0xff]  }
 0x3dc   : > { %8261 = vmatprep.subr.bf16.mxu1 %v10965_v31  ;;  %v10974_v10 = vld [vmem:[%s17072_s7 + $0xcbc] ss:$28 sps:$4 sm:$0xff]   ;;  %v17464_v31 = vld [vmem:[#allocation34_spill] sm:$0xff]  ;;  %v15158_v18 = vpop.f32.mrf.mxu1 }
 0x3dd   : > { %8149 = vmatpush2.bf16.msra.mxu0 %v10960_v43  ;;  %v10977_v43 = vld [vmem:[%s17072_s7 + $0x244] ss:$28 sps:$4 sm:$0xff]   ;;  %17466 = vst [vmem:[#allocation82_spill] sm:$0xff] %v15158_v18 }
 0x3de   : > { %8150 = vmatprep.subr.bf16.mxu0 %v10968_v16  ;;  %v10972_v16 = vld [vmem:[%s17072_s7 + $0xcb8] ss:$28 sps:$4 sm:$0xff]  }
 0x3df   : > { %8262 = vmatpush2.bf16.msra.mxu1 %v10963_v62  ;;  %v15156_v62 = vpop.f32.mrf.mxu0 }
 0x3e0   : > { %7993 = vmatmul.mubr.bf16.gmra.mxu0 %v17464_v31  ;;  %8263 = vmatprep.subr.bf16.mxu1 %v10971_v49  ;;  %17465 = vst [vmem:[#allocation81_spill] sm:$0xff] %v15156_v62  ;;  %v10980_v49 = vld [vmem:[%s17072_s7 + $0xc84] ss:$28 sps:$4 sm:$0xff]  }
 0x3e1   : > { %8106 = vmatmul.mubr.bf16.gmra.mxu1 %v14548_v42  ;;  %8151 = vmatpush2.bf16.msra.mxu0 %v10966_v14  ;;  %v10975_v14 = vld [vmem:[%s17072_s7 + $0x240] ss:$28 sps:$4 sm:$0xff]   ;;  %v10983_v42 = vld [vmem:[%s17072_s7 + $0x20c] ss:$28 sps:$4 sm:$0xff]   ;;  %v15174_v18 = vpop.f32.mrf.mxu0 }
 0x3e2   : > { %8002 = vmatprep.mubr.bf16.mxu0 %v17467_v39  ;;  %8115 = vmatprep.mubr.bf16.mxu1 %v14566_v37  ;;  %v10978_v37 = vld [vmem:[%s17072_s7 + $0xc80] ss:$28 sps:$4 sm:$0xff]   ;;  %17468 = vst [vmem:[#allocation83_spill] sm:$0xff] %v15174_v18  ;;  %v15176_v39 = vpop.f32.mrf.mxu1 }
 0x3e3   : > { %8264 = vmatpush2.bf16.msra.mxu1 %v10969_v8  ;;  %8152 = vmatprep.subr.bf16.mxu0 %v10974_v10  ;;  %17469 = vst [vmem:[#allocation84_spill] sm:$0xff] %v15176_v39  ;;  %v10981_v8 = vld [vmem:[%s17072_s7 + $0x208] ss:$28 sps:$4 sm:$0xff]  }
 0x3e4   : > { %8265 = vmatprep.subr.bf16.mxu1 %v10977_v43  ;;  %v10986_v10 = vld [vmem:[%s17072_s7 + $0xc4c] ss:$28 sps:$4 sm:$0xff]   ;;  %v17470_v43 = vld [vmem:[#allocation8_spill] sm:$0xff]  ;;  %v17471_v31 = vld [vmem:[#allocation46_spill] sm:$0xff]  ;;  %v15194_v39 = vpop.f32.mrf.mxu1 }
 0x3e5   : > { %8153 = vmatpush2.bf16.msra.mxu0 %v10972_v16  ;;  %v10989_v16 = vld [vmem:[%s17072_s7 + $0x1d4] ss:$28 sps:$4 sm:$0xff]   ;;  %17473 = vst [vmem:[#allocation86_spill] sm:$0xff] %v15194_v39  ;;  %v17474_v18 = vld [vmem:[#allocation10_spill] sm:$0xff] }
 0x3e6   : > { %8154 = vmatprep.subr.bf16.mxu0 %v10980_v49  ;;  %v10984_v49 = vld [vmem:[%s17072_s7 + $0xc48] ss:$28 sps:$4 sm:$0xff]  }
 0x3e7   : > { %8266 = vmatpush2.bf16.msra.mxu1 %v10975_v14  ;;  %v15192_v14 = vpop.f32.mrf.mxu0 }
 0x3e8   : > { %8003 = vmatmul.mubr.bf16.gmra.mxu0 %v17470_v43  ;;  %8267 = vmatprep.subr.bf16.mxu1 %v10983_v42  ;;  %17472 = vst [vmem:[#allocation85_spill] sm:$0xff] %v15192_v14  ;;  %v10992_v42 = vld [vmem:[%s17072_s7 + $0x51c] ss:$28 sps:$4 sm:$0xff]   ;;  %v15212_v43 = vpop.f32.mrf.mxu1 }
 0x3e9   : > { %8116 = vmatmul.mubr.bf16.gmra.mxu1 %v17471_v31  ;;  %8155 = vmatpush2.bf16.msra.mxu0 %v10978_v37  ;;  %v10987_v37 = vld [vmem:[%s17072_s7 + $0x1d0] ss:$28 sps:$4 sm:$0xff]   ;;  %v10995_v31 = vld [vmem:[%s17072_s7 + $0x89c] ss:$28 sps:$4 sm:$0xff]   ;;  %17476 = vst [vmem:[#allocation88_spill] sm:$0xff] %v15212_v43 }
 0x3ea   : > { %8158 = vmatprep.mubr.bf16.mxu0 %v14590_v60  ;;  %8271 = vmatprep.mubr.bf16.mxu1 %v17474_v18  ;;  %v10990_v18 = vld [vmem:[%s17072_s7 + $0x518] ss:$28 sps:$4 sm:$0xff]   ;;  %v15210_v60 = vpop.f32.mrf.mxu0 }
 0x3eb   : > { %8268 = vmatpush2.bf16.msra.mxu1 %v10981_v8  ;;  %8156 = vmatprep.subr.bf16.mxu0 %v10986_v10  ;;  %17475 = vst [vmem:[#allocation87_spill] sm:$0xff] %v15210_v60  ;;  %v10998_v8 = vld [vmem:[%s17072_s7 + $0x4e4] ss:$28 sps:$4 sm:$0xff]   ;;  %v10993_v10 = vld [vmem:[%s17072_s7 + $0x898] ss:$28 sps:$4 sm:$0xff]  }
 0x3ec   : > { %8269 = vmatprep.subr.bf16.mxu1 %v10989_v16  ;;  %v17478_v43 = vld [vmem:[#allocation9_spill] sm:$0xff] }
 0x3ed   : > { %8157 = vmatpush2.bf16.msra.mxu0 %v10984_v49  ;;  %v11001_v49 = vld [vmem:[%s17072_s7 + $0x864] ss:$28 sps:$4 sm:$0xff]  }
 0x3ee   : > { %8352 = vmatprep.subr.bf16.mxu0 %v10992_v42  ;;  %v10996_v42 = vld [vmem:[%s17072_s7 + $0x4e0] ss:$28 sps:$4 sm:$0xff]  }
 0x3ef   : > { %8270 = vmatpush2.bf16.msra.mxu1 %v10987_v37  ;;  %v15230_v37 = vpop.f32.mrf.mxu0 }
 0x3f0   : > { %v15220_v16 = vpop.f32.mrf.mxu1  ;;  %8159 = vmatmul.mubr.bf16.vlgmr.msra.gmra.mxu0 %v14595_v21  ;;  %8465 = vmatprep.subr.bf16.mxu1 %v10995_v31  ;;  %17477 = vst [vmem:[#allocation89_spill] sm:$0xff] %v15230_v37  ;;  %v11004_v31 = vld [vmem:[%s17072_s7 + $0x4ac] ss:$28 sps:$4 sm:$0xff]   ;;  %v17479_v21 = vld [vmem:[#allocation12_spill] sm:$0xff] }
 0x3f1   : > { %8353 = vmatpush1.bf16.msra.mxu0 %v10990_v18  ;;  %8168 = vmatprep.mubr.bf16.mxu0 %v14629_v11  ;;  %v10999_v18 = vld [vmem:[%s17072_s7 + $0x860] ss:$28 sps:$4 sm:$0xff]   ;;  %v15250_v37 = vpop.f32.mrf.mxu0 }
 0x3f2   : > { %8272 = vmatmul.mubr.bf16.vlgmr.msra.gmra.mxu1 %v17478_v43  ;;  %v15233_v39 = vpop.f32.mrf.mxu1  ;;  %8354 = vmatprep.subr.bf16.mxu0 %v10998_v8  ;;  %v11007_v43 = vld [vmem:[%s17072_s7 + $0x82c] ss:$28 sps:$4 sm:$0xff]   ;;  %17480 = vst [vmem:[#allocation90_spill] sm:$0xff] %v15250_v37 }
 0x3f3   : > { %8281 = vmatprep.mubr.bf16.mxu1 %v17479_v21  ;;  %8466 = vmatpush1.bf16.msra.mxu1 %v10993_v10  ;;  %v11002_v8 = vld [vmem:[%s17072_s7 + $0x4a8] ss:$28 sps:$4 sm:$0xff]   ;;  %v11010_v10 = vld [vmem:[%s17072_s7 + $0x474] ss:$28 sps:$4 sm:$0xff]  }
 0x3f4   : > { %v15242_v11 = vpop.f32.mrf.mxu1  ;;  %8467 = vmatprep.subr.bf16.mxu1 %v11001_v49  ;;  %v11005_v49 = vld [vmem:[%s17072_s7 + $0x828] ss:$28 sps:$4 sm:$0xff]  }
 0x3f5   : > { %8355 = vmatpush1.bf16.msra.mxu0 %v10996_v42  ;;  %v11013_v42 = vld [vmem:[%s17072_s7 + $0x7f4] ss:$28 sps:$4 sm:$0xff]   ;;  %v17482_v37 = vld [vmem:[#allocation11_spill] sm:$0xff] }
 0x3f6   : > { %v15252_v21 = vpop.f32.mrf.mxu1  ;;  %8356 = vmatprep.subr.bf16.mxu0 %v11004_v31  ;;  %v11008_v31 = vld [vmem:[%s17072_s7 + $0x470] ss:$28 sps:$4 sm:$0xff]  }
 0x3f7   : > { %8468 = vmatpush1.bf16.msra.mxu1 %v10999_v18  ;;  %v15270_v18 = vpop.f32.mrf.mxu0 }
 0x3f8   : > { %v15260_v60 = vpop.f32.mrf.mxu1  ;;  %8169 = vmatmul.mubr.bf16.gmra.mxu0 %v14634_v36  ;;  %8469 = vmatprep.subr.bf16.mxu1 %v11007_v43  ;;  %17481 = vst [vmem:[#allocation91_spill] sm:$0xff] %v15270_v18  ;;  %v11016_v43 = vld [vmem:[%s17072_s7 + $0x43c] ss:$28 sps:$4 sm:$0xff]   ;;  %v17483_v36 = vld [vmem:[#allocation14_spill] sm:$0xff] }
 0x3f9   : > { %8357 = vmatpush1.bf16.msra.mxu0 %v11002_v8  ;;  %8178 = vmatprep.mubr.bf16.mxu0 %v14668_v4  ;;  %v11011_v8 = vld [vmem:[%s17072_s7 + $0x7f0] ss:$28 sps:$4 sm:$0xff]   ;;  %v15290_v18 = vpop.f32.mrf.mxu0 }
 0x3fa   : > { %8282 = vmatmul.mubr.bf16.gmra.mxu1 %v17482_v37  ;;  %v15273_v14 = vpop.f32.mrf.mxu1  ;;  %8358 = vmatprep.subr.bf16.mxu0 %v11010_v10  ;;  %v11019_v37 = vld [vmem:[%s17072_s7 + $0x7bc] ss:$28 sps:$4 sm:$0xff]   ;;  %17484 = vst [vmem:[#allocation92_spill] sm:$0xff] %v15290_v18 }
 0x3fb   : > { %8291 = vmatprep.mubr.bf16.mxu1 %v17483_v36  ;;  %8470 = vmatpush1.bf16.msra.mxu1 %v11005_v49  ;;  %v11014_v10 = vld [vmem:[%s17072_s7 + $0x438] ss:$28 sps:$4 sm:$0xff]   ;;  %v11022_v49 = vld [vmem:[%s17072_s7 + $0x404] ss:$28 sps:$4 sm:$0xff]  }
 0x3fc   : > { %v15282_v4 = vpop.f32.mrf.mxu1  ;;  %8471 = vmatprep.subr.bf16.mxu1 %v11013_v42  ;;  %v11017_v42 = vld [vmem:[%s17072_s7 + $0x7b8] ss:$28 sps:$4 sm:$0xff]  }
 0x3fd   : > { %8359 = vmatpush1.bf16.msra.mxu0 %v11008_v31  ;;  %v11025_v31 = vld [vmem:[%s17072_s7 + $0x784] ss:$28 sps:$4 sm:$0xff]   ;;  %v17486_v18 = vld [vmem:[#allocation13_spill] sm:$0xff] }
 0x3fe   : > { %v15292_v36 = vpop.f32.mrf.mxu1  ;;  %8360 = vmatprep.subr.bf16.mxu0 %v11016_v43  ;;  %v11020_v43 = vld [vmem:[%s17072_s7 + $0x400] ss:$28 sps:$4 sm:$0xff]  }
 0x3ff   : > { %8472 = vmatpush1.bf16.msra.mxu1 %v11011_v8  ;;  %v15310_v8 = vpop.f32.mrf.mxu0 }
 0x400   : > { %v15300_v62 = vpop.f32.mrf.mxu1  ;;  %8179 = vmatmul.mubr.bf16.gmra.mxu0 %v14673_v23  ;;  %8473 = vmatprep.subr.bf16.mxu1 %v11019_v37  ;;  %17485 = vst [vmem:[#allocation93_spill] sm:$0xff] %v15310_v8  ;;  %v11028_v37 = vld [vmem:[%s17072_s7 + $0x3cc] ss:$28 sps:$4 sm:$0xff]   ;;  %v17487_v23 = vld [vmem:[#allocation16_spill] sm:$0xff] }
 0x401   : > { %8361 = vmatpush1.bf16.msra.mxu0 %v11014_v10  ;;  %8188 = vmatprep.mubr.bf16.mxu0 %v14707_v0  ;;  %v11023_v10 = vld [vmem:[%s17072_s7 + $0x780] ss:$28 sps:$4 sm:$0xff]   ;;  %v15330_v8 = vpop.f32.mrf.mxu0 }
 0x402   : > { %8292 = vmatmul.mubr.bf16.gmra.mxu1 %v17486_v18  ;;  %v15313_v24 = vpop.f32.mrf.mxu1  ;;  %8362 = vmatprep.subr.bf16.mxu0 %v11022_v49  ;;  %v11031_v18 = vld [vmem:[%s17072_s7 + $0x74c] ss:$28 sps:$4 sm:$0xff]   ;;  %17489 = vst [vmem:[#allocation95_spill] sm:$0xff] %v15330_v8 }
 0x403   : > { %8301 = vmatprep.mubr.bf16.mxu1 %v17487_v23  ;;  %8474 = vmatpush1.bf16.msra.mxu1 %v11017_v42  ;;  %v11026_v49 = vld [vmem:[%s17072_s7 + $0x3c8] ss:$28 sps:$4 sm:$0xff]   ;;  %v11034_v42 = vld [vmem:[%s17072_s7 + $0x394] ss:$28 sps:$4 sm:$0xff]  }
 0x404   : > { %v15322_v0 = vpop.f32.mrf.mxu1  ;;  %8475 = vmatprep.subr.bf16.mxu1 %v11025_v31  ;;  %v11029_v31 = vld [vmem:[%s17072_s7 + $0x748] ss:$28 sps:$4 sm:$0xff]  }
 0x405   : > { %17488 = vst [vmem:[#allocation94_spill] sm:$0xff] %v15322_v0  ;;  %8363 = vmatpush1.bf16.msra.mxu0 %v11020_v43  ;;  %v11037_v43 = vld [vmem:[%s17072_s7 + $0x714] ss:$28 sps:$4 sm:$0xff]   ;;  %v17492_v8 = vld [vmem:[#allocation15_spill] sm:$0xff] }
 0x406   : > { %v15332_v23 = vpop.f32.mrf.mxu1  ;;  %8364 = vmatprep.subr.bf16.mxu0 %v11028_v37  ;;  %v11032_v37 = vld [vmem:[%s17072_s7 + $0x390] ss:$28 sps:$4 sm:$0xff]  }
 0x407   : > { %17490 = vst [vmem:[#allocation96_spill] sm:$0xff] %v15332_v23  ;;  %8476 = vmatpush1.bf16.msra.mxu1 %v11023_v10  ;;  %v15350_v10 = vpop.f32.mrf.mxu0 }
 0x408   : > { %v15340_v0 = vpop.f32.mrf.mxu1  ;;  %8189 = vmatmul.mubr.bf16.gmra.mxu0 %v14712_v3  ;;  %8477 = vmatprep.subr.bf16.mxu1 %v11031_v18  ;;  %17491 = vst [vmem:[#allocation97_spill] sm:$0xff] %v15350_v10  ;;  %v11040_v18 = vld [vmem:[%s17072_s7 + $0x6dc] ss:$28 sps:$4 sm:$0xff]   ;;  %v17493_v3 = vld [vmem:[#allocation18_spill] sm:$0xff] }
 0x409   : > { %8365 = vmatpush1.bf16.msra.mxu0 %v11026_v49  ;;  %8198 = vmatprep.mubr.bf16.mxu0 %v14746_v2  ;;  %v11035_v49 = vld [vmem:[%s17072_s7 + $0x710] ss:$28 sps:$4 sm:$0xff]   ;;  %v15370_v10 = vpop.f32.mrf.mxu0 }
 0x40a   : > { %8302 = vmatmul.mubr.bf16.gmra.mxu1 %v17492_v8  ;;  %v15353_v23 = vpop.f32.mrf.mxu1  ;;  %8366 = vmatprep.subr.bf16.mxu0 %v11034_v42  ;;  %v11043_v8 = vld [vmem:[%s17072_s7 + $0xa5c] ss:$28 sps:$4 sm:$0xff]   ;;  %17495 = vst [vmem:[#allocation99_spill] sm:$0xff] %v15370_v10 }
 0x40b   : > { %8311 = vmatprep.mubr.bf16.mxu1 %v17493_v3  ;;  %8478 = vmatpush1.bf16.msra.mxu1 %v11029_v31  ;;  %v11038_v42 = vld [vmem:[%s17072_s7 + $0x6d8] ss:$28 sps:$4 sm:$0xff]   ;;  %v11046_v31 = vld [vmem:[%s17072_s7 + $0x6a4] ss:$28 sps:$4 sm:$0xff]  }
 0x40c   : > { %v15362_v2 = vpop.f32.mrf.mxu1  ;;  %8479 = vmatprep.subr.bf16.mxu1 %v11037_v43  ;;  %v11041_v43 = vld [vmem:[%s17072_s7 + $0xa58] ss:$28 sps:$4 sm:$0xff]  }
 0x40d   : > { %17494 = vst [vmem:[#allocation98_spill] sm:$0xff] %v15362_v2  ;;  %8367 = vmatpush1.bf16.msra.mxu0 %v11032_v37  ;;  %v11049_v37 = vld [vmem:[%s17072_s7 + $0xa24] ss:$28 sps:$4 sm:$0xff]   ;;  %v17498_v10 = vld [vmem:[#allocation17_spill] sm:$0xff] }
 0x40e   : > { %v15372_v3 = vpop.f32.mrf.mxu1  ;;  %8368 = vmatprep.subr.bf16.mxu0 %v11040_v18  ;;  %v11044_v18 = vld [vmem:[%s17072_s7 + $0x6a0] ss:$28 sps:$4 sm:$0xff]  }
 0x40f   : > { %17496 = vst [vmem:[#allocation100_spill] sm:$0xff] %v15372_v3  ;;  %8480 = vmatpush1.bf16.msra.mxu1 %v11035_v49  ;;  %v15390_v49 = vpop.f32.mrf.mxu0 }
 0x410   : > { %v15380_v2 = vpop.f32.mrf.mxu1  ;;  %8199 = vmatmul.mubr.bf16.gmra.mxu0 %v14751_v40  ;;  %8481 = vmatprep.subr.bf16.mxu1 %v11043_v8  ;;  %17497 = vst [vmem:[#allocation101_spill] sm:$0xff] %v15390_v49  ;;  %v11052_v8 = vld [vmem:[%s17072_s7 + $0x66c] ss:$28 sps:$4 sm:$0xff]   ;;  %v17499_v40 = vld [vmem:[#allocation20_spill] sm:$0xff] }
 0x411   : > { %8369 = vmatpush2.bf16.msra.mxu0 %v11038_v42  ;;  %8208 = vmatprep.mubr.bf16.mxu0 %v14785_v13  ;;  %v11047_v42 = vld [vmem:[%s17072_s7 + $0xa20] ss:$28 sps:$4 sm:$0xff]   ;;  %v15410_v49 = vpop.f32.mrf.mxu0 }
 0x412   : > { %8312 = vmatmul.mubr.bf16.gmra.mxu1 %v17498_v10  ;;  %v15393_v3 = vpop.f32.mrf.mxu1  ;;  %8370 = vmatprep.subr.bf16.mxu0 %v11046_v31  ;;  %v11055_v10 = vld [vmem:[%s17072_s7 + $0x9ec] ss:$28 sps:$4 sm:$0xff]   ;;  %17501 = vst [vmem:[#allocation103_spill] sm:$0xff] %v15410_v49 }
 0x413   : > { %8321 = vmatprep.mubr.bf16.mxu1 %v17499_v40  ;;  %8482 = vmatpush2.bf16.msra.mxu1 %v11041_v43  ;;  %v11050_v31 = vld [vmem:[%s17072_s7 + $0x668] ss:$28 sps:$4 sm:$0xff]   ;;  %v11058_v43 = vld [vmem:[%s17072_s7 + $0x634] ss:$28 sps:$4 sm:$0xff]  }
 0x414   : > { %v15402_v13 = vpop.f32.mrf.mxu1  ;;  %8483 = vmatprep.subr.bf16.mxu1 %v11049_v37  ;;  %v11053_v37 = vld [vmem:[%s17072_s7 + $0x9e8] ss:$28 sps:$4 sm:$0xff]  }
 0x415   : > { %17500 = vst [vmem:[#allocation102_spill] sm:$0xff] %v15402_v13  ;;  %8371 = vmatpush2.bf16.msra.mxu0 %v11044_v18  ;;  %v11061_v18 = vld [vmem:[%s17072_s7 + $0x9b4] ss:$28 sps:$4 sm:$0xff]   ;;  %v17504_v49 = vld [vmem:[#allocation19_spill] sm:$0xff] }
 0x416   : > { %v15412_v40 = vpop.f32.mrf.mxu1  ;;  %8372 = vmatprep.subr.bf16.mxu0 %v11052_v8  ;;  %v11056_v8 = vld [vmem:[%s17072_s7 + $0x630] ss:$28 sps:$4 sm:$0xff]  }
 0x417   : > { %17502 = vst [vmem:[#allocation104_spill] sm:$0xff] %v15412_v40  ;;  %8484 = vmatpush2.bf16.msra.mxu1 %v11047_v42  ;;  %v15430_v42 = vpop.f32.mrf.mxu0 }
 0x418   : > { %v15420_v13 = vpop.f32.mrf.mxu1  ;;  %8209 = vmatmul.mubr.bf16.gmra.mxu0 %v14790_v56  ;;  %8485 = vmatprep.subr.bf16.mxu1 %v11055_v10  ;;  %17503 = vst [vmem:[#allocation105_spill] sm:$0xff] %v15430_v42  ;;  %v11064_v10 = vld [vmem:[%s17072_s7 + $0x5fc] ss:$28 sps:$4 sm:$0xff]   ;;  %v17505_v56 = vld [vmem:[#allocation24_spill] sm:$0xff] }
 0x419   : > { %8373 = vmatpush2.bf16.msra.mxu0 %v11050_v31  ;;  %8218 = vmatprep.mubr.bf16.mxu0 %v14824_v1  ;;  %v11059_v31 = vld [vmem:[%s17072_s7 + $0x9b0] ss:$28 sps:$4 sm:$0xff]   ;;  %v15450_v42 = vpop.f32.mrf.mxu0 }
 0x41a   : > { %8322 = vmatmul.mubr.bf16.gmra.mxu1 %v17504_v49  ;;  %v15433_v40 = vpop.f32.mrf.mxu1  ;;  %8374 = vmatprep.subr.bf16.mxu0 %v11058_v43  ;;  %v11067_v49 = vld [vmem:[%s17072_s7 + $0x97c] ss:$28 sps:$4 sm:$0xff]   ;;  %17507 = vst [vmem:[#allocation107_spill] sm:$0xff] %v15450_v42 }
 0x41b   : > { %8331 = vmatprep.mubr.bf16.mxu1 %v17505_v56  ;;  %8486 = vmatpush2.bf16.msra.mxu1 %v11053_v37  ;;  %v11062_v43 = vld [vmem:[%s17072_s7 + $0x5f8] ss:$28 sps:$4 sm:$0xff]   ;;  %v11070_v37 = vld [vmem:[%s17072_s7 + $0x5c4] ss:$28 sps:$4 sm:$0xff]  }
 0x41c   : > { %v15442_v1 = vpop.f32.mrf.mxu1  ;;  %8487 = vmatprep.subr.bf16.mxu1 %v11061_v18  ;;  %v11065_v18 = vld [vmem:[%s17072_s7 + $0x978] ss:$28 sps:$4 sm:$0xff]  }
 0x41d   : > { %17506 = vst [vmem:[#allocation106_spill] sm:$0xff] %v15442_v1  ;;  %8375 = vmatpush2.bf16.msra.mxu0 %v11056_v8  ;;  %v11073_v8 = vld [vmem:[%s17072_s7 + $0x944] ss:$28 sps:$4 sm:$0xff]  }
 0x41e   : > { %v15452_v56 = vpop.f32.mrf.mxu1  ;;  %8376 = vmatprep.subr.bf16.mxu0 %v11064_v10  ;;  %v11068_v10 = vld [vmem:[%s17072_s7 + $0x5c0] ss:$28 sps:$4 sm:$0xff]  }
 0x41f   : > { %8488 = vmatpush2.bf16.msra.mxu1 %v11059_v31  ;;  %v15470_v31 = vpop.f32.mrf.mxu0 }
 0x420   : > { %v15460_v1 = vpop.f32.mrf.mxu1  ;;  %8219 = vmatmul.mubr.bf16.gmra.mxu0 %v14829_v34  ;;  %8489 = vmatprep.subr.bf16.mxu1 %v11067_v49  ;;  %17508 = vst [vmem:[#allocation108_spill] sm:$0xff] %v15470_v31  ;;  %v11076_v49 = vld [vmem:[%s17072_s7 + $0x58c] ss:$28 sps:$4 sm:$0xff]   ;;  %v11082_v31 = vld [vmem:[%s17072_s7 + $0x554] ss:$28 sps:$4 sm:$0xff]  }
 0x421   : > { %8377 = vmatpush2.bf16.msra.mxu0 %v11062_v43  ;;  %8228 = vmatprep.mubr.bf16.mxu0 %v14866_v55  ;;  %v11071_v43 = vld [vmem:[%s17072_s7 + $0x940] ss:$28 sps:$4 sm:$0xff]  }
 0x422   : > { %8332 = vmatmul.mubr.bf16.gmra.mxu1 %v14169_v47  ;;  %v15473_v42 = vpop.f32.mrf.mxu1  ;;  %8378 = vmatprep.subr.bf16.mxu0 %v11070_v37  ;;  %v4994_v55 = vld [vmem:[%s17073_s8] sm:$0xff]  ;;  %v11079_v37 = vld [vmem:[%s17072_s7 + $0x90c] ss:$28 sps:$4 sm:$0xff]  }
 0x423   : > { %17509 = vst [vmem:[#allocation109_spill] sm:$0xff] %v15473_v42  ;;  %8341 = vmatprep.mubr.bf16.mxu1 %v14241_v44  ;;  %8490 = vmatpush2.bf16.msra.mxu1 %v11065_v18  ;;  %v11074_v18 = vld [vmem:[%s17072_s7 + $0x588] ss:$28 sps:$4 sm:$0xff]   ;;  %v15493_v44 = vpop.f32.mrf.mxu0 }
 0x424   : > { %v15485_v34 = vpop.f32.mrf.mxu1  ;;  %8491 = vmatprep.subr.bf16.mxu1 %v11073_v8  ;;  %17511 = vst [vmem:[#allocation111_spill] sm:$0xff] %v15493_v44  ;;  %v17514_v44 = vld [vmem:[#allocation4_spill] sm:$0xff] }
 0x425   : > { %17510 = vst [vmem:[#allocation110_spill] sm:$0xff] %v15485_v34  ;;  %8379 = vmatpush2.bf16.msra.mxu0 %v11068_v10  ;;  %v17513_v34 = vld [vmem:[#allocation3_spill] sm:$0xff] }
 0x426   : > { %v15495_v47 = vpop.f32.mrf.mxu1  ;;  %8380 = vmatprep.subr.bf16.mxu0 %v11076_v49  ;;  %v15501_v8 = vrot.slane %v4994_v55, %v17513_v34  ;;  %v11077_v10 = vld [vmem:[%s17072_s7 + $0x908] ss:$28 sps:$4 sm:$0xff]   ;;  %v11085_v49 = vld [vmem:[%s17072_s7 + $0x8d4] ss:$28 sps:$4 sm:$0xff]  }
 0x427   : > { %17512 = vst [vmem:[#allocation112_spill] sm:$0xff] %v15495_v47  ;;  %8492 = vmatpush2.bf16.msra.mxu1 %v11071_v43  ;;  %v15513_v47 = vrot.slane %v4994_v55, %v17514_v44  ;;  %v11080_v34 = vld [vmem:[%s17072_s7 + $0x550] ss:$28 sps:$4 sm:$0xff]   ;;  %v15519_v43 = vpop.f32.mrf.mxu0 }
 0x428   : > { %v15506_v42 = vpop.f32.mrf.mxu1  ;;  %8229 = vmatmul.mubr.bf16.gmra.mxu0 %v14871_v50  ;;  %8493 = vmatprep.subr.bf16.mxu1 %v11079_v37  ;;  %v11088_v37 = vld [vmem:[%s17072_s7 + $0xc1c] ss:$28 sps:$4 sm:$0xff]   ;;  %v7370_v44 = vadd.f32 %v14832_v5, %v15501_v8  ;;  %v11083_v55 = vld [vmem:[%s17072_s7 + $0x8d0] ss:$28 sps:$4 sm:$0xff]  }
 0x429   : > { %8381 = vmatpush2.bf16.msra.mxu0 %v11074_v18  ;;  %8384 = vmatprep.mubr.bf16.mxu0 %v14050_v45  ;;  %v11086_v5 = vld [vmem:[%s17072_s7 + $0xc18] ss:$28 sps:$4 sm:$0xff]  }
 0x42a   : > { %8342 = vmatmul.mubr.bf16.gmra.mxu1 %v14288_v41  ;;  %v15522_v50 = vpop.f32.mrf.mxu1  ;;  %8382 = vmatprep.subr.bf16.mxu0 %v11082_v31  ;;  %v11113_v31 = vld [vmem:[%s17072_s7 + $0x360] ss:$28 sps:$4 sm:$0xff]   ;;  %v7372_v41 = vadd.f32 %v14849_v30, %v15513_v47  ;;  %v7483_v45 = vadd.f32 %v14928_v20, %v7370_v44  ;;  %v7376_v44 = vadd.f32 %v14864_v61, %v15513_v47 }
 0x42b   : > { %8494 = vmatpush2.bf16.msra.mxu1 %v11077_v10  ;;  %8497 = vmatprep.mubr.bf16.mxu1 %v14395_v63  ;;  %v15544_v10 = vpop.f32.mrf.mxu0  ;;  %v11089_v61 = vld [vmem:[%s17072_s7 + $0xbe0] ss:$28 sps:$4 sm:$0xff]  }
 0x42c   : > { %v15533_v18 = vpop.f32.mrf.mxu1  ;;  %8495 = vmatprep.subr.bf16.mxu1 %v11085_v49  ;;  %v11091_v49 = vld [vmem:[%s17072_s7 + $0xbe4] ss:$28 sps:$4 sm:$0xff]   ;;  %v7485_v30 = vadd.f32 %v14948_v48, %v7372_v41  ;;  %v7596_v20 = vadd.f32 %v15220_v16, %v7483_v45  ;;  %v7380_v16 = vadd.f32 %v14873_v59, %v15501_v8 }
 0x42d   : > { %17515 = vst [vmem:[#allocation3_spill] sm:$0xff] %v15533_v18  ;;  %8383 = vmatpush2.bf16.msra.mxu0 %v11080_v34  ;;  %v7374_v18 = vadd.f32 %v14855_v54, %v15501_v8  ;;  %v11114_v34 = vld [vmem:[%s17072_s7 + $0x1a0] ss:$28 sps:$4 sm:$0xff]   ;;  %v11118_v41 = vld [vmem:[%s17072_s7 + $0x328] ss:$28 sps:$4 sm:$0xff]  }
 0x42e   : > { %v15546_v63 = vpop.f32.mrf.mxu1  ;;  %8578 = vmatprep.subr.bf16.mxu0 %v11088_v37  ;;  %v7598_v54 = vadd.f32 %v15233_v39, %v7485_v30  ;;  %v7489_v39 = vadd.f32 %v14988_v51, %v7376_v44  ;;  %v11119_v59 = vld [vmem:[%s17072_s7 + $0x168] ss:$28 sps:$4 sm:$0xff]   ;;  %v7493_v51 = vadd.f32 %v15008_v25, %v7380_v16  ;;  %v11097_v25 = vld [vmem:[%s17072_s7 + $0xb74] ss:$28 sps:$4 sm:$0xff]  }
 0x42f   : > { %17516 = vst [vmem:[#allocation4_spill] sm:$0xff] %v15546_v63  ;;  %8496 = vmatpush2.bf16.msra.mxu1 %v11083_v55  ;;  %v7487_v45 = vadd.f32 %v14968_v17, %v7374_v18  ;;  %v11094_v17 = vld [vmem:[%s17072_s7 + $0xbac] ss:$28 sps:$4 sm:$0xff]  }
 0x430   : > { %v7708_v37 = vpop.f32.mrf.mxu0  ;;  %v15560_v63 = vpop.f32.mrf.mxu1  ;;  %8385 = vmatmul.mubr.bf16.vlgmr.msra.gmra.mxu0 %v14060_v33  ;;  %10156 = vmatprep.subr.bf16.mxu1 %v11113_v31  ;;  %v7602_v44 = vadd.f32 %v15252_v21, %v7489_v39 }
 0x431   : > { %v7709_v48 = vadd.f32 %v7708_v37, %v7596_v20  ;;  %8579 = vmatpush1.bf16.msra.mxu0 %v11086_v5  ;;  %8394 = vmatprep.mubr.bf16.mxu0 %v14104_v53  ;;  %v7600_v18 = vadd.f32 %v15242_v11, %v7487_v45  ;;  %v11123_v11 = vld [vmem:[%s17072_s7 + $0x2f0] ss:$28 sps:$4 sm:$0xff]   ;;  %v11092_v37 = vld [vmem:[%s17072_s7 + $0xba8] ss:$28 sps:$4 sm:$0xff]  }
 0x432   : > { %8498 = vmatmul.mubr.bf16.vlgmr.msra.gmra.mxu1 %v14400_v12  ;;  %v7710_v55 = vpop.f32.mrf.mxu0  ;;  %v15575_v31 = vpop.f32.mrf.mxu1  ;;  %8580 = vmatprep.subr.bf16.mxu0 %v11091_v49  ;;  %v7382_v49 = vadd.f32 %v14887_v15, %v15513_v47  ;;  %v7384_v15 = vadd.f32 %v14894_v52, %v15501_v8  ;;  %v11124_v52 = vld [vmem:[%s17072_s7 + $0x130] ss:$28 sps:$4 sm:$0xff]  }
 0x433   : > { %11198 = vtanh.f32 %v7709_v48  ;;  %8507 = vmatprep.mubr.bf16.mxu1 %v14418_v35  ;;  %v7711_v5 = vadd.f32 %v7710_v55, %v7598_v54  ;;  %10157 = vmatpush3.bf16.msra.mxu1 %v11114_v34  ;;  %v7606_v54 = vadd.f32 %v15260_v60, %v7493_v51 }
 0x434   : > { %v7712_v30 = vpop.f32.mrf.mxu0  ;;  %v15588_v20 = vpop.f32.mrf.mxu1  ;;  %10158 = vmatprep.subr.bf16.mxu1 %v11118_v41  ;;  %v7495_v21 = vadd.f32 %v15028_v28, %v7382_v49  ;;  %v11128_v28 = vld [vmem:[%s17072_s7 + $0x2b8] ss:$28 sps:$4 sm:$0xff]   ;;  %v7497_v60 = vadd.f32 %v15048_v7, %v7384_v15 }
 0x435   : > { %11200 = vtanh.f32 %v7711_v5  ;;  %v7713_v34 = vadd.f32 %v7712_v30, %v7600_v18  ;;  %8581 = vmatpush1.bf16.msra.mxu0 %v11089_v61  ;;  %v7386_v61 = vadd.f32 %v14905_v6, %v15513_v47  ;;  %v11095_v6 = vld [vmem:[%s17072_s7 + $0xb70] ss:$28 sps:$4 sm:$0xff]   ;;  %v7390_v18 = vadd.f32 %v14910_v46, %v15501_v8  ;;  %v11100_v7 = vld [vmem:[%s17072_s7 + $0xb3c] ss:$28 sps:$4 sm:$0xff]  }
 0x436   : > { %v7714_v45 = vpop.f32.mrf.mxu0  ;;  %v15600_v41 = vpop.f32.mrf.mxu1  ;;  %8582 = vmatprep.subr.bf16.mxu0 %v11094_v17  ;;  %v7608_v17 = vadd.f32 %v15273_v14, %v7495_v21  ;;  %v7610_v49 = vadd.f32 %v15282_v4, %v7497_v60  ;;  %v11129_v46 = vld [vmem:[%s17072_s7 + $0xf8] ss:$28 sps:$4 sm:$0xff]   ;;  %v11133_v4 = vld [vmem:[%s17072_s7 + $0x280] ss:$28 sps:$4 sm:$0xff]  }
 0x437   : > { %11202 = vtanh.f32 %v7713_v34  ;;  %v7715_v48 = vadd.f32 %v7714_v45, %v7602_v44  ;;  %10159 = vmatpush3.bf16.msra.mxu1 %v11119_v59  ;;  %v7499_v14 = vadd.f32 %v15066_v9, %v7386_v61  ;;  %v7503_v9 = vadd.f32 %v15084_v26, %v7390_v18  ;;  %v11098_v15 = vld [vmem:[%s17072_s7 + $0xb38] ss:$28 sps:$4 sm:$0xff]   ;;  %v17518_v60 = vld [vmem:[#allocation22_spill] sm:$0xff] }
 0x438   : > { %v7718_v16 = vpop.f32.mrf.mxu0  ;;  %v15612_v55 = vpop.f32.mrf.mxu1  ;;  %8395 = vmatmul.mubr.bf16.gmra.mxu0 %v14112_v57  ;;  %10160 = vmatprep.subr.bf16.mxu1 %v11123_v11  ;;  %v7392_v11 = vadd.f32 %v14919_v38, %v15513_v47  ;;  %v7394_v38 = vadd.f32 %v14932_v27, %v15501_v8  ;;  %v11134_v27 = vld [vmem:[%s17072_s7 + $0xc0] ss:$28 sps:$4 sm:$0xff]  }
 0x439   : > { %11204 = vtanh.f32 %v7715_v48  ;;  %v7719_v39 = vadd.f32 %v7718_v16, %v7606_v54  ;;  %8583 = vmatpush1.bf16.msra.mxu0 %v11092_v37  ;;  %8404 = vmatprep.mubr.bf16.mxu0 %v14153_v29  ;;  %v7612_v34 = vadd.f32 %v15292_v36, %v7499_v14  ;;  %v11103_v36 = vld [vmem:[%s17072_s7 + $0xb04] ss:$28 sps:$4 sm:$0xff]   ;;  %v7616_v21 = vadd.f32 %v15300_v62, %v7503_v9  ;;  %v17524_v9 = vld [vmem:[#allocation37_spill] sm:$0xff] }
 0x43a   : > { %8508 = vmatmul.mubr.bf16.gmra.mxu1 %v14423_v19  ;;  %v7720_v5 = vpop.f32.mrf.mxu0  ;;  %v15628_v59 = vpop.f32.mrf.mxu1  ;;  %8584 = vmatprep.subr.bf16.mxu0 %v11097_v25  ;;  %v7505_v26 = vadd.f32 %v15102_v32, %v7392_v11  ;;  %v11138_v32 = vld [vmem:[%s17072_s7 + $0x248] ss:$28 sps:$4 sm:$0xff]   ;;  %v7507_v62 = vadd.f32 %v15120_v22, %v7394_v38  ;;  %v11101_v18 = vld [vmem:[%s17072_s7 + $0xb00] ss:$28 sps:$4 sm:$0xff]  }
 0x43b   : > { %11206 = vtanh.f32 %v7719_v39  ;;  %8517 = vmatprep.mubr.bf16.mxu1 %v14441_v58  ;;  %v7721_v30 = vadd.f32 %v7720_v5, %v7608_v17  ;;  %10161 = vmatpush3.bf16.msra.mxu1 %v11124_v52  ;;  %v17517_v52 = vld [vmem:[#allocation63_spill] sm:$0xff]  ;;  %v17525_v38 = vld [vmem:[#allocation65_spill] sm:$0xff] }
 0x43c   : > { %v7722_v51 = vpop.f32.mrf.mxu0  ;;  %v15641_v44 = vpop.f32.mrf.mxu1  ;;  %10162 = vmatprep.subr.bf16.mxu1 %v11128_v28  ;;  %v7396_v61 = vadd.f32 %v17517_v52, %v15513_v47  ;;  %v7618_v17 = vadd.f32 %v15313_v24, %v7505_v26  ;;  %v11106_v24 = vld [vmem:[%s17072_s7 + $0xacc] ss:$28 sps:$4 sm:$0xff]  }
 0x43d   : > { %11208 = vtanh.f32 %v7721_v30  ;;  %v7723_v37 = vadd.f32 %v7722_v51, %v7610_v49  ;;  %8585 = vmatpush1.bf16.msra.mxu0 %v11095_v6  ;;  %v17519_v6 = vld [vmem:[#allocation25_spill] sm:$0xff]  ;;  %v17521_v49 = vld [vmem:[#allocation36_spill] sm:$0xff]  ;;  %v17523_v51 = vld [vmem:[#allocation94_spill] sm:$0xff] }
 0x43e   : > { %v7724_v45 = vpop.f32.mrf.mxu0  ;;  %v15658_v25 = vpop.f32.mrf.mxu1  ;;  %8586 = vmatprep.subr.bf16.mxu0 %v11100_v7  ;;  %v17520_v7 = vld [vmem:[#allocation64_spill] sm:$0xff] }
 0x43f   : > { %11210 = vtanh.f32 %v7723_v37  ;;  %v7725_v54 = vadd.f32 %v7724_v45, %v7612_v34  ;;  %10163 = vmatpush3.bf16.msra.mxu1 %v11129_v46  ;;  %v7400_v14 = vadd.f32 %v17520_v7, %v15501_v8  ;;  %v17522_v46 = vld [vmem:[#allocation79_spill] sm:$0xff]  ;;  %v7402_v45 = vadd.f32 %v17525_v38, %v15513_v47  ;;  %v11109_v7 = vld [vmem:[%s17072_s7 + $0xa94] ss:$28 sps:$4 sm:$0xff]   ;;  %v17531_v38 = vld [vmem:[#allocation26_spill] sm:$0xff] }
 0x440   : > { %v11199_v48 = vpop.eup %11198  ;;  %v7728_v16 = vpop.f32.mrf.mxu0  ;;  %8405 = vmatmul.mubr.bf16.gmra.mxu0 %v17518_v60  ;;  %10164 = vmatprep.subr.bf16.mxu1 %v11133_v4  ;;  %v7509_v11 = vadd.f32 %v17522_v46, %v7396_v61  ;;  %v7620_v4 = vadd.f32 %v17523_v51, %v7507_v62  ;;  %v11139_v37 = vld [vmem:[%s17072_s7 + $0x88] ss:$28 sps:$4 sm:$0xff]  }
 0x441   : > { %v15670_v28 = vpop.f32.mrf.mxu1  ;;  %9191 = vst [vmem:[%s15654_s21] sm:$0xff] %v11199_v48  ;;  %11212 = vtanh.f32 %v7725_v54  ;;  %v7729_v39 = vadd.f32 %v7728_v16, %v7616_v21  ;;  %8587 = vmatpush1.bf16.msra.mxu0 %v11098_v15  ;;  %8414 = vmatprep.mubr.bf16.mxu0 %v17519_v6  ;;  %v11143_v21 = vld [vmem:[%s17072_s7 + $0x210] ss:$28 sps:$4 sm:$0xff]   ;;  %v17526_v54 = vld [vmem:[#allocation81_spill] sm:$0xff]  ;;  %v11104_v16 = vld [vmem:[%s17072_s7 + $0xac8] ss:$28 sps:$4 sm:$0xff]  }
 0x442   : > { %v11201_v5 = vpop.eup %11200  ;;  %8518 = vmatmul.mubr.bf16.gmra.mxu1 %v17521_v49  ;;  %v7730_v22 = vpop.f32.mrf.mxu0  ;;  %8588 = vmatprep.subr.bf16.mxu0 %v11103_v36  ;;  %v7513_v48 = vadd.f32 %v17526_v54, %v7400_v14  ;;  %v17529_v14 = vld [vmem:[#allocation83_spill] sm:$0xff] }
 0x443   : > { %v15686_v30 = vpop.f32.mrf.mxu1  ;;  %9192 = vst [vmem:[%s15654_s21 + $0x8] sm:$0xff] %v11201_v5  ;;  %11214 = vtanh.f32 %v7729_v39  ;;  %8527 = vmatprep.mubr.bf16.mxu1 %v17524_v9  ;;  %v7731_v34 = vadd.f32 %v7730_v22, %v7618_v17  ;;  %10165 = vmatpush3.bf16.msra.mxu1 %v11134_v27  ;;  %v17527_v27 = vld [vmem:[#allocation96_spill] sm:$0xff]  ;;  %v7515_v22 = vadd.f32 %v17529_v14, %v7402_v45  ;;  %v17532_v45 = vld [vmem:[#allocation85_spill] sm:$0xff]  ;;  %v17537_v14 = vld [vmem:[#allocation98_spill] sm:$0xff] }
 0x444   : > { %v11203_v15 = vpop.eup %11202  ;;  %v7732_v36 = vpop.f32.mrf.mxu0  ;;  %10166 = vmatprep.subr.bf16.mxu1 %v11138_v32  ;;  %v7622_v52 = vadd.f32 %v17527_v27, %v7509_v11  ;;  %v17528_v32 = vld [vmem:[#allocation66_spill] sm:$0xff]  ;;  %v11144_v11 = vld [vmem:[%s17072_s7 + $0x50] ss:$28 sps:$4 sm:$0xff]  }
 0x445   : > { %v15700_v26 = vpop.f32.mrf.mxu1  ;;  %9198 = vst [vmem:[%s15654_s21 + $0x38] sm:$0xff] %v11203_v15  ;;  %11216 = vtanh.f32 %v7731_v34  ;;  %v7733_v61 = vadd.f32 %v7732_v36, %v7620_v4  ;;  %8589 = vmatpush1.bf16.msra.mxu0 %v11101_v18  ;;  %v7404_v17 = vadd.f32 %v17528_v32, %v15501_v8  ;;  %v7626_v18 = vadd.f32 %v15340_v0, %v7513_v48  ;;  %v11148_v0 = vld [vmem:[%s17072_s7 + $0x1d8] ss:$28 sps:$4 sm:$0xff]   ;;  %v11107_v27 = vld [vmem:[%s17072_s7 + $0xa90] ss:$28 sps:$4 sm:$0xff]  }
 0x446   : > { %v11205_v62 = vpop.eup %11204  ;;  %v7734_v39 = vpop.f32.mrf.mxu0  ;;  %8590 = vmatprep.subr.bf16.mxu0 %v11106_v24  ;;  %v17530_v24 = vld [vmem:[#allocation67_spill] sm:$0xff]  ;;  %v7628_v36 = vadd.f32 %v15353_v23, %v7515_v22  ;;  %v17533_v48 = vld [vmem:[#allocation28_spill] sm:$0xff]  ;;  %v11112_v23 = vld [vmem:[%s17072_s7 + $0xddc] ss:$28 sps:$4 sm:$0xff]  }
 0x447   : > { %v15713_v5 = vpop.f32.mrf.mxu1  ;;  %9199 = vst [vmem:[%s15654_s21 + $0x40] sm:$0xff] %v11205_v62  ;;  %11218 = vtanh.f32 %v7733_v61  ;;  %v7735_v46 = vadd.f32 %v7734_v39, %v7622_v52  ;;  %10167 = vmatpush3.bf16.msra.mxu1 %v11139_v37  ;;  %v7406_v4 = vadd.f32 %v17530_v24, %v15513_v47  ;;  %v7517_v37 = vadd.f32 %v17532_v45, %v7404_v17  ;;  %v17534_v52 = vld [vmem:[#allocation68_spill] sm:$0xff]  ;;  %v17535_v62 = vld [vmem:[#allocation38_spill] sm:$0xff]  ;;  %v17539_v24 = vld [vmem:[#allocation69_spill] sm:$0xff] }
 0x448   : > { %v11207_v51 = vpop.eup %11206  ;;  %v7738_v34 = vpop.f32.mrf.mxu0  ;;  %8415 = vmatmul.mubr.bf16.gmra.mxu0 %v17531_v38  ;;  %10168 = vmatprep.subr.bf16.mxu1 %v11143_v21  ;;  %v7410_v61 = vadd.f32 %v17534_v52, %v15501_v8  ;;  %v17625_v38 = vld [vmem:[#allocation15_spill] sm:$0xff] }
 0x449   : > { %v15726_v15 = vpop.f32.mrf.mxu1  ;;  %9205 = vst [vmem:[%s15654_s21 + $0x70] sm:$0xff] %v11207_v51  ;;  %11220 = vtanh.f32 %v7735_v46  ;;  %v7739_v54 = vadd.f32 %v7738_v34, %v7626_v18  ;;  %8591 = vmatpush1.bf16.msra.mxu0 %v11104_v16  ;;  %8424 = vmatprep.mubr.bf16.mxu0 %v17533_v48  ;;  %v17536_v16 = vld [vmem:[#allocation87_spill] sm:$0xff]  ;;  %v7630_v22 = vadd.f32 %v17537_v14, %v7517_v37  ;;  %v11149_v51 = vld [vmem:[%s17072_s7 + $0x18] ss:$28 sps:$4 sm:$0xff]  }
 0x44a   : > { %v11209_v21 = vpop.eup %11208  ;;  %8528 = vmatmul.mubr.bf16.gmra.mxu1 %v17535_v62  ;;  %v7740_v32 = vpop.f32.mrf.mxu0  ;;  %8592 = vmatprep.subr.bf16.mxu0 %v11109_v7  ;;  %v7519_v39 = vadd.f32 %v17536_v16, %v7406_v4  ;;  %v17538_v18 = vld [vmem:[#allocation39_spill] sm:$0xff]  ;;  %v7412_v34 = vadd.f32 %v17539_v24, %v15513_v47  ;;  %v11159_v4 = vld [vmem:[%s17072_s7 + $0xa60] ss:$28 sps:$4 sm:$0xff]  }
 0x44b   : > { %v15742_v17 = vpop.f32.mrf.mxu1  ;;  %9206 = vst [vmem:[%s15654_s21 + $0x78] sm:$0xff] %v11209_v21  ;;  %11222 = vtanh.f32 %v7739_v54  ;;  %8537 = vmatprep.mubr.bf16.mxu1 %v17538_v18  ;;  %v7741_v46 = vadd.f32 %v7740_v32, %v7628_v36  ;;  %10169 = vmatpush3.bf16.msra.mxu1 %v11144_v11  ;;  %v17540_v37 = vld [vmem:[#allocation89_spill] sm:$0xff]  ;;  %v17541_v11 = vld [vmem:[#allocation100_spill] sm:$0xff]  ;;  %v17548_v62 = vld [vmem:[#allocation91_spill] sm:$0xff] }
 0x44c   : > { %v11211_v7 = vpop.eup %11210  ;;  %v7742_v45 = vpop.f32.mrf.mxu0  ;;  %10170 = vmatprep.subr.bf16.mxu1 %v11148_v0  ;;  %v7523_v36 = vadd.f32 %v17540_v37, %v7410_v61  ;;  %v7632_v54 = vadd.f32 %v17541_v11, %v7519_v39  ;;  %v11110_v32 = vld [vmem:[%s17072_s7 + $0xdd8] ss:$28 sps:$4 sm:$0xff]   ;;  %v17542_v0 = vld [vmem:[#allocation70_spill] sm:$0xff] }
 0x44d   : > { %v15756_v52 = vpop.f32.mrf.mxu1  ;;  %9212 = vst [vmem:[%s15654_s21 + $0xa8] sm:$0xff] %v11211_v7  ;;  %11224 = vtanh.f32 %v7741_v46  ;;  %v7743_v21 = vadd.f32 %v7742_v45, %v7630_v22  ;;  %8593 = vmatpush1.bf16.msra.mxu0 %v11107_v27  ;;  %v7414_v14 = vadd.f32 %v17542_v0, %v15501_v8  ;;  %v11117_v61 = vld [vmem:[%s17072_s7 + $0xda4] ss:$28 sps:$4 sm:$0xff]   ;;  %v17545_v45 = vld [vmem:[#allocation71_spill] sm:$0xff] }
 0x44e   : > { %v11213_v16 = vpop.eup %11212  ;;  %v7744_v24 = vpop.f32.mrf.mxu0  ;;  %8594 = vmatprep.subr.bf16.mxu0 %v11112_v23  ;;  %v17544_v39 = vld [vmem:[#allocation90_spill] sm:$0xff]  ;;  %v7636_v27 = vadd.f32 %v15380_v2, %v7523_v36  ;;  %v7416_v37 = vadd.f32 %v17545_v45, %v15513_v47  ;;  %v17547_v23 = vld [vmem:[#allocation29_spill] sm:$0xff] }
 0x44f   : > { %v15769_v18 = vpop.f32.mrf.mxu1  ;;  %v7525_v22 = vadd.f32 %v17544_v39, %v7412_v34  ;;  %9213 = vst [vmem:[%s15654_s21 + $0xb0] sm:$0xff] %v11213_v16  ;;  %11226 = vtanh.f32 %v7743_v21  ;;  %v7745_v46 = vadd.f32 %v7744_v24, %v7632_v54  ;;  %10171 = vmatpush3.bf16.msra.mxu1 %v11149_v51  ;;  %v7527_v48 = vadd.f32 %v17548_v62, %v7414_v14  ;;  %v17549_v51 = vld [vmem:[#allocation31_spill] sm:$0xff]  ;;  %v11115_v36 = vld [vmem:[%s17072_s7 + $0xda0] ss:$28 sps:$4 sm:$0xff]   ;;  %v17550_v21 = vld [vmem:[#allocation72_spill] sm:$0xff] }
 0x450   : > { %17543 = vst [vmem:[#allocation63_spill] sm:$0xff] %v15769_v18  ;;  %v11215_v7 = vpop.eup %11214  ;;  %v7748_v11 = vpop.f32.mrf.mxu0  ;;  %8425 = vmatmul.mubr.bf16.gmra.mxu0 %v17547_v23  ;;  %10284 = vmatprep.subr.bf16.mxu1 %v11159_v4  ;;  %v7420_v16 = vadd.f32 %v17550_v21, %v15501_v8  ;;  %v17551_v4 = vld [vmem:[#allocation40_spill] sm:$0xff]  ;;  %v17554_v39 = vld [vmem:[#allocation102_spill] sm:$0xff]  ;;  %v17556_v45 = vld [vmem:[#allocation73_spill] sm:$0xff] }
 0x451   : > { %v15779_v0 = vpop.f32.mrf.mxu1  ;;  %v7638_v34 = vadd.f32 %v15393_v3, %v7525_v22  ;;  %9219 = vst [vmem:[%s15654_s21 + $0xe0] sm:$0xff] %v11215_v7  ;;  %11228 = vtanh.f32 %v7745_v46  ;;  %v7749_v2 = vadd.f32 %v7748_v11, %v7636_v27  ;;  %8595 = vmatpush2.bf16.msra.mxu0 %v11110_v32  ;;  %8434 = vmatprep.mubr.bf16.mxu0 %v17549_v51  ;;  %v11122_v32 = vld [vmem:[%s17072_s7 + $0xd6c] ss:$28 sps:$4 sm:$0xff]   ;;  %v17553_v14 = vld [vmem:[#allocation92_spill] sm:$0xff]  ;;  %v17555_v27 = vld [vmem:[#allocation41_spill] sm:$0xff] }
 0x452   : > { %17546 = vst [vmem:[#allocation22_spill] sm:$0xff] %v15779_v0  ;;  %v11217_v54 = vpop.eup %11216  ;;  %8538 = vmatmul.mubr.bf16.gmra.mxu1 %v17551_v4  ;;  %v7750_v62 = vpop.f32.mrf.mxu0  ;;  %8596 = vmatprep.subr.bf16.mxu0 %v11117_v61  ;;  %v7529_v24 = vadd.f32 %v17553_v14, %v7416_v37  ;;  %v7640_v22 = vadd.f32 %v17554_v39, %v7527_v48  ;;  %v17558_v61 = vld [vmem:[#allocation93_spill] sm:$0xff]  ;;  %v17559_v23 = vld [vmem:[#allocation104_spill] sm:$0xff]  ;;  %v11120_v37 = vld [vmem:[%s17072_s7 + $0xd68] ss:$28 sps:$4 sm:$0xff]  }
 0x453   : > { %v15792_v3 = vpop.f32.mrf.mxu1  ;;  %9220 = vst [vmem:[%s15654_s21 + $0xe8] sm:$0xff] %v11217_v54  ;;  %11230 = vtanh.f32 %v7749_v2  ;;  %8547 = vmatprep.mubr.bf16.mxu1 %v17555_v27  ;;  %v7751_v46 = vadd.f32 %v7750_v62, %v7638_v34  ;;  %v7422_v11 = vadd.f32 %v17556_v45, %v15513_v47  ;;  %v7533_v51 = vadd.f32 %v17558_v61, %v7420_v16  ;;  %v17560_v2 = vld [vmem:[#allocation74_spill] sm:$0xff]  ;;  %v17562_v16 = vld [vmem:[#allocation95_spill] sm:$0xff]  ;;  %v17565_v61 = vld [vmem:[#allocation32_spill] sm:$0xff] }
 0x454   : > { %17552 = vst [vmem:[#allocation25_spill] sm:$0xff] %v15792_v3  ;;  %v11219_v7 = vpop.eup %11218  ;;  %v7752_v21 = vpop.f32.mrf.mxu0  ;;  %v7642_v3 = vadd.f32 %v17559_v23, %v7529_v24  ;;  %v7424_v54 = vadd.f32 %v17560_v2, %v15501_v8  ;;  %v11127_v23 = vld [vmem:[%s17072_s7 + $0xd34] ss:$28 sps:$4 sm:$0xff]  }
 0x455   : > { %v15803_v4 = vpop.f32.mrf.mxu1  ;;  %9226 = vst [vmem:[%s15654_s21 + $0x118] sm:$0xff] %v11219_v7  ;;  %11232 = vtanh.f32 %v7751_v46  ;;  %v7753_v48 = vadd.f32 %v7752_v21, %v7640_v22  ;;  %8597 = vmatpush2.bf16.msra.mxu0 %v11115_v36  ;;  %v7535_v24 = vadd.f32 %v17562_v16, %v7422_v11  ;;  %v7646_v36 = vadd.f32 %v15420_v13, %v7533_v51  ;;  %v17563_v46 = vld [vmem:[#allocation75_spill] sm:$0xff]  ;;  %v17567_v51 = vld [vmem:[#allocation33_spill] sm:$0xff] }
 0x456   : > { %17557 = vst [vmem:[#allocation64_spill] sm:$0xff] %v15803_v4  ;;  %v11221_v34 = vpop.eup %11220  ;;  %v7754_v62 = vpop.f32.mrf.mxu0  ;;  %8598 = vmatprep.subr.bf16.mxu0 %v11122_v32  ;;  %v7426_v7 = vadd.f32 %v17563_v46, %v15513_v47  ;;  %v17566_v32 = vld [vmem:[#allocation97_spill] sm:$0xff]  ;;  %v17571_v16 = vld [vmem:[#allocation99_spill] sm:$0xff] }
 0x457   : > { %v15813_v14 = vpop.f32.mrf.mxu1  ;;  %9227 = vst [vmem:[%s15654_s21 + $0x120] sm:$0xff] %v11221_v34  ;;  %11234 = vtanh.f32 %v7753_v48  ;;  %v7755_v39 = vadd.f32 %v7754_v62, %v7642_v3  ;;  %v7537_v2 = vadd.f32 %v17566_v32, %v7424_v54  ;;  %v7648_v27 = vadd.f32 %v15433_v40, %v7535_v24  ;;  %v11125_v3 = vld [vmem:[%s17072_s7 + $0xd30] ss:$28 sps:$4 sm:$0xff]   ;;  %v17569_v62 = vld [vmem:[#allocation42_spill] sm:$0xff]  ;;  %v17574_v32 = vld [vmem:[#allocation77_spill] sm:$0xff] }
 0x458   : > { %17561 = vst [vmem:[#allocation36_spill] sm:$0xff] %v15813_v14  ;;  %v11223_v22 = vpop.eup %11222  ;;  %v7758_v45 = vpop.f32.mrf.mxu0  ;;  %8435 = vmatmul.mubr.bf16.gmra.mxu0 %v17565_v61  ;;  %v17568_v48 = vld [vmem:[#allocation76_spill] sm:$0xff]  ;;  %v7539_v24 = vadd.f32 %v17571_v16, %v7426_v7  ;;  %v17624_v4 = vld [vmem:[#allocation55_spill] sm:$0xff] }
 0x459   : > { %v15823_v21 = vpop.f32.mrf.mxu1  ;;  %9233 = vst [vmem:[%s15654_s21 + $0x150] sm:$0xff] %v11223_v22  ;;  %11236 = vtanh.f32 %v7755_v39  ;;  %v7759_v13 = vadd.f32 %v7758_v45, %v7646_v36  ;;  %8599 = vmatpush2.bf16.msra.mxu0 %v11120_v37  ;;  %8444 = vmatprep.mubr.bf16.mxu0 %v17567_v51  ;;  %v7430_v34 = vadd.f32 %v17568_v48, %v15501_v8  ;;  %v11132_v37 = vld [vmem:[%s17072_s7 + $0xcfc] ss:$28 sps:$4 sm:$0xff]   ;;  %v17572_v36 = vld [vmem:[#allocation106_spill] sm:$0xff]  ;;  %v17573_v22 = vld [vmem:[#allocation43_spill] sm:$0xff] }
 0x45a   : > { %17564 = vst [vmem:[#allocation79_spill] sm:$0xff] %v15823_v21  ;;  %v11225_v11 = vpop.eup %11224  ;;  %8548 = vmatmul.mubr.bf16.gmra.mxu1 %v17569_v62  ;;  %v7760_v54 = vpop.f32.mrf.mxu0  ;;  %8600 = vmatprep.subr.bf16.mxu0 %v11127_v23  ;;  %v7650_v39 = vadd.f32 %v17572_v36, %v7537_v2  ;;  %v7432_v48 = vadd.f32 %v17574_v32, %v15513_v47  ;;  %v17576_v23 = vld [vmem:[#allocation101_spill] sm:$0xff] }
 0x45b   : > { %v15836_v40 = vpop.f32.mrf.mxu1  ;;  %9234 = vst [vmem:[%s15654_s21 + $0x158] sm:$0xff] %v11225_v11  ;;  %11238 = vtanh.f32 %v7759_v13  ;;  %8557 = vmatprep.mubr.bf16.mxu1 %v17573_v22  ;;  %v7761_v46 = vadd.f32 %v7760_v54, %v7648_v27  ;;  %v7543_v61 = vadd.f32 %v17576_v23, %v7430_v34  ;;  %v11130_v27 = vld [vmem:[%s17072_s7 + $0xcf8] ss:$28 sps:$4 sm:$0xff]   ;;  %v17577_v13 = vld [vmem:[#allocation78_spill] sm:$0xff]  ;;  %v17579_v34 = vld [vmem:[#allocation103_spill] sm:$0xff] }
 0x45c   : > { %17570 = vst [vmem:[#allocation94_spill] sm:$0xff] %v15836_v40  ;;  %v11227_v45 = vpop.eup %11226  ;;  %v7762_v62 = vpop.f32.mrf.mxu0  ;;  %v7652_v40 = vadd.f32 %v15452_v56, %v7539_v24  ;;  %v7434_v11 = vadd.f32 %v17577_v13, %v15501_v8  ;;  %v11137_v56 = vld [vmem:[%s17072_s7 + $0xcc4] ss:$28 sps:$4 sm:$0xff]   ;;  %v17584_v22 = vld [vmem:[#allocation109_spill] sm:$0xff] }
 0x45d   : > { %v15847_v51 = vpop.f32.mrf.mxu1  ;;  %9240 = vst [vmem:[%s15654_s21 + $0x188] sm:$0xff] %v11227_v45  ;;  %11240 = vtanh.f32 %v7761_v46  ;;  %v7763_v7 = vadd.f32 %v7762_v62, %v7650_v39  ;;  %8601 = vmatpush2.bf16.msra.mxu0 %v11125_v3  ;;  %v7545_v62 = vadd.f32 %v17579_v34, %v7432_v48  ;;  %v7656_v3 = vadd.f32 %v15460_v1, %v7543_v61  ;;  %v17580_v39 = vld [vmem:[#allocation80_spill] sm:$0xff]  ;;  %v17582_v23 = vld [vmem:[#allocation34_spill] sm:$0xff]  ;;  %v17585_v61 = vld [vmem:[#allocation7_spill] sm:$0xff] }
 0x45e   : > { %17575 = vst [vmem:[#allocation37_spill] sm:$0xff] %v15847_v51  ;;  %v11229_v2 = vpop.eup %11228  ;;  %v7764_v54 = vpop.f32.mrf.mxu0  ;;  %8602 = vmatprep.subr.bf16.mxu0 %v11132_v37  ;;  %v7436_v46 = vadd.f32 %v17580_v39, %v15513_v47  ;;  %v17583_v37 = vld [vmem:[#allocation105_spill] sm:$0xff]  ;;  %v17589_v34 = vld [vmem:[#allocation107_spill] sm:$0xff] }
 0x45f   : > { %v15857_v16 = vpop.f32.mrf.mxu1  ;;  %9241 = vst [vmem:[%s15654_s21 + $0x190] sm:$0xff] %v11229_v2  ;;  %11242 = vtanh.f32 %v7763_v7  ;;  %v7765_v24 = vadd.f32 %v7764_v54, %v7652_v40  ;;  %v7547_v13 = vadd.f32 %v17583_v37, %v7434_v11  ;;  %v11135_v40 = vld [vmem:[%s17072_s7 + $0xcc0] ss:$28 sps:$4 sm:$0xff]   ;;  %v17587_v54 = vld [vmem:[#allocation44_spill] sm:$0xff] }
 0x460   : > { %17578 = vst [vmem:[#allocation65_spill] sm:$0xff] %v15857_v16  ;;  %v11231_v36 = vpop.eup %11230  ;;  %v7768_v45 = vpop.f32.mrf.mxu0  ;;  %8445 = vmatmul.mubr.bf16.gmra.mxu0 %v17582_v23  ;;  %v7658_v16 = vadd.f32 %v17584_v22, %v7545_v62  ;;  %v17586_v7 = vld [vmem:[#allocation82_spill] sm:$0xff]  ;;  %v7549_v62 = vadd.f32 %v17589_v34, %v7436_v46  ;;  %v17592_v37 = vld [vmem:[#allocation84_spill] sm:$0xff] }
 0x461   : > { %v15867_v32 = vpop.f32.mrf.mxu1  ;;  %9247 = vst [vmem:[%s15654_s21 + $0x1c0] sm:$0xff] %v11231_v36  ;;  %11244 = vtanh.f32 %v7765_v24  ;;  %v7769_v1 = vadd.f32 %v7768_v45, %v7656_v3  ;;  %8603 = vmatpush2.bf16.msra.mxu0 %v11130_v27  ;;  %8454 = vmatprep.mubr.bf16.mxu0 %v17585_v61  ;;  %v7440_v2 = vadd.f32 %v17586_v7, %v15501_v8  ;;  %v11142_v27 = vld [vmem:[%s17072_s7 + $0xc8c] ss:$28 sps:$4 sm:$0xff]   ;;  %v17590_v3 = vld [vmem:[#allocation110_spill] sm:$0xff]  ;;  %v17591_v36 = vld [vmem:[#allocation45_spill] sm:$0xff] }
 0x462   : > { %17581 = vst [vmem:[#allocation81_spill] sm:$0xff] %v15867_v32  ;;  %v11233_v48 = vpop.eup %11232  ;;  %8558 = vmatmul.mubr.bf16.gmra.mxu1 %v17587_v54  ;;  %v7770_v11 = vpop.f32.mrf.mxu0  ;;  %8604 = vmatprep.subr.bf16.mxu0 %v11137_v56  ;;  %v7660_v24 = vadd.f32 %v17590_v3, %v7547_v13  ;;  %v7442_v7 = vadd.f32 %v17592_v37, %v15513_v47  ;;  %v17594_v56 = vld [vmem:[#allocation108_spill] sm:$0xff] }
 0x463   : > { %v15880_v22 = vpop.f32.mrf.mxu1  ;;  %9248 = vst [vmem:[%s15654_s21 + $0x1c8] sm:$0xff] %v11233_v48  ;;  %11246 = vtanh.f32 %v7769_v1  ;;  %8567 = vmatprep.mubr.bf16.mxu1 %v17591_v36  ;;  %v7771_v39 = vadd.f32 %v7770_v11, %v7658_v16  ;;  %v7553_v23 = vadd.f32 %v17594_v56, %v7440_v2  ;;  %v11140_v16 = vld [vmem:[%s17072_s7 + $0xc88] ss:$28 sps:$4 sm:$0xff]   ;;  %v11147_v2 = vld [vmem:[%s17072_s7 + $0xc54] ss:$28 sps:$4 sm:$0xff]  }
 0x464   : > { %17588 = vst [vmem:[#allocation96_spill] sm:$0xff] %v15880_v22  ;;  %v11235_v45 = vpop.eup %11234  ;;  %v7772_v54 = vpop.f32.mrf.mxu0  ;;  %v17595_v22 = vld [vmem:[#allocation112_spill] sm:$0xff]  ;;  %v17596_v1 = vld [vmem:[#allocation86_spill] sm:$0xff] }
 0x465   : > { %v15891_v61 = vpop.f32.mrf.mxu1  ;;  %v7662_v32 = vadd.f32 %v17595_v22, %v7549_v62  ;;  %9254 = vst [vmem:[%s15654_s21 + $0x1f8] sm:$0xff] %v11235_v45  ;;  %11248 = vtanh.f32 %v7771_v39  ;;  %v7773_v46 = vadd.f32 %v7772_v54, %v7660_v24  ;;  %8605 = vmatpush2.bf16.msra.mxu0 %v11135_v40  ;;  %v7444_v48 = vadd.f32 %v17596_v1, %v15501_v8  ;;  %v17598_v22 = vld [vmem:[#allocation111_spill] sm:$0xff]  ;;  %v17599_v24 = vld [vmem:[#allocation88_spill] sm:$0xff] }
 0x466   : > { %17593 = vst [vmem:[#allocation66_spill] sm:$0xff] %v15891_v61  ;;  %v11237_v13 = vpop.eup %11236  ;;  %v7774_v11 = vpop.f32.mrf.mxu0  ;;  %8606 = vmatprep.subr.bf16.mxu0 %v11142_v27  ;;  %v7555_v54 = vadd.f32 %v17598_v22, %v7442_v7  ;;  %v7666_v40 = vadd.f32 %v15506_v42, %v7553_v23  ;;  %v7446_v8 = vadd.f32 %v17599_v24, %v15513_v47  ;;  %v17601_v37 = vld [vmem:[#allocation8_spill] sm:$0xff]  ;;  %v17602_v23 = vld [vmem:[#allocation47_spill] sm:$0xff]  ;;  %v17603_v7 = vld [vmem:[#allocation46_spill] sm:$0xff] }
 0x467   : > { %v15901_v34 = vpop.f32.mrf.mxu1  ;;  %9255 = vst [vmem:[%s15654_s21 + $0x200] sm:$0xff] %v11237_v13  ;;  %11250 = vtanh.f32 %v7773_v46  ;;  %v7775_v62 = vadd.f32 %v7774_v11, %v7662_v32  ;;  %v7557_v27 = vadd.f32 %v15519_v43, %v7444_v48  ;;  %v11145_v47 = vld [vmem:[%s17072_s7 + $0xc50] ss:$28 sps:$4 sm:$0xff]   ;;  %v17606_v48 = vld [vmem:[#allocation10_spill] sm:$0xff] }
 0x468   : > { %17597 = vst [vmem:[#allocation83_spill] sm:$0xff] %v15901_v34  ;;  %v11239_v3 = vpop.eup %11238  ;;  %v7778_v39 = vpop.f32.mrf.mxu0  ;;  %8455 = vmatmul.mubr.bf16.gmra.mxu0 %v17601_v37  ;;  %v7668_v56 = vadd.f32 %v15522_v50, %v7555_v54  ;;  %v11150_v50 = vld [vmem:[%s17072_s7 + $0x6e0] ss:$28 sps:$4 sm:$0xff]   ;;  %v7559_v43 = vadd.f32 %v15544_v10, %v7446_v8 }
 0x469   : > { %v15911_v45 = vpop.f32.mrf.mxu1  ;;  %9261 = vst [vmem:[%s15654_s21 + $0x230] sm:$0xff] %v11239_v3  ;;  %11252 = vtanh.f32 %v7775_v62  ;;  %v7779_v42 = vadd.f32 %v7778_v39, %v7666_v40  ;;  %8607 = vmatpush2.bf16.msra.mxu0 %v11140_v16  ;;  %8610 = vmatprep.mubr.bf16.mxu0 %v17602_v23  ;;  %v17605_v16 = vld [vmem:[#allocation3_spill] sm:$0xff]  ;;  %v17608_v62 = vld [vmem:[#allocation4_spill] sm:$0xff]  ;;  %v11151_v10 = vld [vmem:[%s17072_s7 + $0x520] ss:$28 sps:$4 sm:$0xff]  }
 0x46a   : > { %17600 = vst [vmem:[#allocation67_spill] sm:$0xff] %v15911_v45  ;;  %v11241_v32 = vpop.eup %11240  ;;  %8568 = vmatmul.mubr.bf16.gmra.mxu1 %v17603_v7  ;;  %v7780_v46 = vpop.f32.mrf.mxu0  ;;  %8608 = vmatprep.subr.bf16.mxu0 %v11147_v2  ;;  %v7670_v1 = vadd.f32 %v17605_v16, %v7557_v27  ;;  %v7672_v2 = vadd.f32 %v17608_v62, %v7559_v43  ;;  %v11152_v27 = vld [vmem:[%s17072_s7 + $0x6a8] ss:$28 sps:$4 sm:$0xff]   ;;  %v17611_v16 = vld [vmem:[#allocation49_spill] sm:$0xff]  ;;  %v17613_v62 = vld [vmem:[#allocation12_spill] sm:$0xff] }
 0x46b   : > { %v15922_v13 = vpop.f32.mrf.mxu1  ;;  %9262 = vst [vmem:[%s15654_s21 + $0x238] sm:$0xff] %v11241_v32  ;;  %11254 = vtanh.f32 %v7779_v42  ;;  %8723 = vmatprep.mubr.bf16.mxu1 %v17606_v48  ;;  %v7781_v11 = vadd.f32 %v7780_v46, %v7668_v56  ;;  %v11161_v42 = vld [vmem:[%s17072_s7 + $0x8a0] ss:$28 sps:$4 sm:$0xff]   ;;  %v17610_v46 = vld [vmem:[#allocation48_spill] sm:$0xff]  ;;  %v17616_v7 = vld [vmem:[#allocation11_spill] sm:$0xff] }
 0x46c   : > { %17604 = vst [vmem:[#allocation85_spill] sm:$0xff] %v15922_v13  ;;  %v11243_v22 = vpop.eup %11242  ;;  %v7782_v54 = vpop.f32.mrf.mxu0  ;;  %v17619_v13 = vld [vmem:[#allocation53_spill] sm:$0xff] }
 0x46d   : > { %v15931_v40 = vpop.f32.mrf.mxu1  ;;  %9268 = vst [vmem:[%s15654_s21 + $0x268] sm:$0xff] %v11243_v22  ;;  %11256 = vtanh.f32 %v7781_v11  ;;  %v7783_v3 = vadd.f32 %v7782_v54, %v7670_v1  ;;  %8609 = vmatpush2.bf16.msra.mxu0 %v11145_v47  ;;  %v11153_v1 = vld [vmem:[%s17072_s7 + $0x4e8] ss:$28 sps:$4 sm:$0xff]   ;;  %v17612_v11 = vld [vmem:[#allocation9_spill] sm:$0xff]  ;;  %v11154_v54 = vld [vmem:[%s17072_s7 + $0x670] ss:$28 sps:$4 sm:$0xff]  }
 0x46e   : > { %17607 = vst [vmem:[#allocation68_spill] sm:$0xff] %v15931_v40  ;;  %v11245_v24 = vpop.eup %11244  ;;  %v7784_v8 = vpop.f32.mrf.mxu0  ;;  %10220 = vmatprep.subr.bf16.mxu0 %v11150_v50  ;;  %v11162_v50 = vld [vmem:[%s17072_s7 + $0xa28] ss:$28 sps:$4 sm:$0xff]   ;;  %v17618_v40 = vld [vmem:[#allocation52_spill] sm:$0xff] }
 0x46f   : > { %v15938_v39 = vpop.f32.mrf.mxu1  ;;  %9269 = vst [vmem:[%s15654_s21 + $0x270] sm:$0xff] %v11245_v24  ;;  %11258 = vtanh.f32 %v7783_v3  ;;  %v7785_v56 = vadd.f32 %v7784_v8, %v7672_v2  ;;  %v11163_v3 = vld [vmem:[%s17072_s7 + $0x868] ss:$28 sps:$4 sm:$0xff]   ;;  %v11166_v8 = vld [vmem:[%s17072_s7 + $0x9f0] ss:$28 sps:$4 sm:$0xff]  }
 0x470   : > { %17609 = vst [vmem:[#allocation87_spill] sm:$0xff] %v15938_v39  ;;  %v11247_v47 = vpop.eup %11246  ;;  %v15947_v32 = vpop.f32.mrf.mxu0  ;;  %8611 = vmatmul.mubr.bf16.vlgmr.msra.gmra.mxu0 %v17610_v46 }
 0x471   : > { %9275 = vst [vmem:[%s15654_s21 + $0x2a0] sm:$0xff] %v11247_v47  ;;  %11260 = vtanh.f32 %v7785_v56  ;;  %v15954_v43 = vpop.f32.mrf.mxu1  ;;  %10221 = vmatpush3.bf16.msra.mxu0 %v11151_v10  ;;  %8620 = vmatprep.mubr.bf16.mxu0 %v17611_v16  ;;  %v11155_v56 = vld [vmem:[%s17072_s7 + $0x4b0] ss:$28 sps:$4 sm:$0xff]  }
 0x472   : > { %v11249_v48 = vpop.eup %11248  ;;  %8724 = vmatmul.mubr.bf16.vlgmr.msra.gmra.mxu1 %v17612_v11  ;;  %v15961_v22 = vpop.f32.mrf.mxu0  ;;  %10222 = vmatprep.subr.bf16.mxu0 %v11152_v27  ;;  %v17615_v16 = vld [vmem:[#allocation51_spill] sm:$0xff] }
 0x473   : > { %9276 = vst [vmem:[%s15654_s21 + $0x2a8] sm:$0xff] %v11249_v48  ;;  %8731 = vmatprep.mubr.bf16.mxu1 %v17613_v62  ;;  %v15968_v2 = vpop.f32.mrf.mxu1  ;;  %10285 = vmatpush3.bf16.msra.mxu1 %v11161_v42 }
 0x474   : > { %v11251_v10 = vpop.eup %11250  ;;  %v15973_v24 = vpop.f32.mrf.mxu0  ;;  %10286 = vmatprep.subr.bf16.mxu1 %v11162_v50  ;;  %v11156_v50 = vld [vmem:[%s17072_s7 + $0x638] ss:$28 sps:$4 sm:$0xff]  }
 0x475   : > { %9282 = vst [vmem:[%s15654_s21 + $0x2d8] sm:$0xff] %v11251_v10  ;;  %v15979_v27 = vpop.f32.mrf.mxu1  ;;  %10223 = vmatpush3.bf16.msra.mxu0 %v11153_v1  ;;  %v11167_v1 = vld [vmem:[%s17072_s7 + $0x830] ss:$28 sps:$4 sm:$0xff]   ;;  %v17614_v10 = vld [vmem:[#allocation50_spill] sm:$0xff] }
 0x476   : > { %v11253_v42 = vpop.eup %11252  ;;  %v15984_v47 = vpop.f32.mrf.mxu0  ;;  %10224 = vmatprep.subr.bf16.mxu0 %v11154_v54  ;;  %v11168_v54 = vld [vmem:[%s17072_s7 + $0x9b8] ss:$28 sps:$4 sm:$0xff]  }
 0x477   : > { %9283 = vst [vmem:[%s15654_s21 + $0x2e0] sm:$0xff] %v11253_v42  ;;  %v15990_v48 = vpop.f32.mrf.mxu1  ;;  %10287 = vmatpush3.bf16.msra.mxu1 %v11163_v3  ;;  %v11157_v3 = vld [vmem:[%s17072_s7 + $0x478] ss:$28 sps:$4 sm:$0xff]  }
 0x478   : > { %v11255_v11 = vpop.eup %11254  ;;  %v15995_v62 = vpop.f32.mrf.mxu0  ;;  %8621 = vmatmul.mubr.bf16.gmra.mxu0 %v17614_v10  ;;  %10288 = vmatprep.subr.bf16.mxu1 %v11166_v8  ;;  %v11158_v8 = vld [vmem:[%s17072_s7 + $0x600] ss:$28 sps:$4 sm:$0xff]  }
 0x479   : > { %9289 = vst [vmem:[%s15654_s21 + $0x310] sm:$0xff] %v11255_v11  ;;  %v16002_v42 = vpop.f32.mrf.mxu1  ;;  %8630 = vmatprep.mubr.bf16.mxu0 %v17615_v16  ;;  %10225 = vmatpush3.bf16.msra.mxu0 %v11155_v56  ;;  %v17617_v11 = vld [vmem:[#allocation14_spill] sm:$0xff]  ;;  %v11169_v16 = vld [vmem:[%s17072_s7 + $0x7f8] ss:$28 sps:$4 sm:$0xff]  }
 0x47a   : > { %v11257_v46 = vpop.eup %11256  ;;  %8732 = vmatmul.mubr.bf16.gmra.mxu1 %v17616_v7  ;;  %v16009_v10 = vpop.f32.mrf.mxu0  ;;  %10226 = vmatprep.subr.bf16.mxu0 %v11156_v50  ;;  %v11172_v50 = vld [vmem:[%s17072_s7 + $0x980] ss:$28 sps:$4 sm:$0xff]  }
 0x47b   : > { %9290 = vst [vmem:[%s15654_s21 + $0x318] sm:$0xff] %v11257_v46  ;;  %8739 = vmatprep.mubr.bf16.mxu1 %v17617_v11  ;;  %v16016_v56 = vpop.f32.mrf.mxu1  ;;  %10289 = vmatpush3.bf16.msra.mxu1 %v11167_v1  ;;  %v11160_v1 = vld [vmem:[%s17072_s7 + $0x440] ss:$28 sps:$4 sm:$0xff]  }
 0x47c   : > { %v11259_v23 = vpop.eup %11258  ;;  %v16021_v7 = vpop.f32.mrf.mxu0  ;;  %10290 = vmatprep.subr.bf16.mxu1 %v11168_v54  ;;  %v11164_v54 = vld [vmem:[%s17072_s7 + $0x5c8] ss:$28 sps:$4 sm:$0xff]  }
 0x47d   : > { %9296 = vst [vmem:[%s15654_s21 + $0x348] sm:$0xff] %v11259_v23  ;;  %v16027_v46 = vpop.f32.mrf.mxu1  ;;  %10227 = vmatpush3.bf16.msra.mxu0 %v11157_v3  ;;  %v11173_v23 = vld [vmem:[%s17072_s7 + $0x7c0] ss:$28 sps:$4 sm:$0xff]  }
 0x47e   : > { %v11261_v11 = vpop.eup %11260  ;;  %v16032_v37 = vpop.f32.mrf.mxu0  ;;  %10228 = vmatprep.subr.bf16.mxu0 %v11158_v8  ;;  %v11174_v8 = vld [vmem:[%s17072_s7 + $0x948] ss:$28 sps:$4 sm:$0xff]  }
 0x47f   : > { %9297 = vst [vmem:[%s15654_s21 + $0x350] sm:$0xff] %v11261_v11  ;;  %v16038_v39 = vpop.f32.mrf.mxu1  ;;  %10291 = vmatpush3.bf16.msra.mxu1 %v11169_v16  ;;  %v11165_v16 = vld [vmem:[%s17072_s7 + $0x408] ss:$28 sps:$4 sm:$0xff]   ;;  %v17620_v11 = vld [vmem:[#allocation13_spill] sm:$0xff] }
 0x480   : > { %v16043_v3 = vpop.f32.mrf.mxu0  ;;  %8631 = vmatmul.mubr.bf16.gmra.mxu0 %v17618_v40  ;;  %10292 = vmatprep.subr.bf16.mxu1 %v11172_v50  ;;  %v11170_v50 = vld [vmem:[%s17072_s7 + $0x590] ss:$28 sps:$4 sm:$0xff]  }
 0x481   : > { %v16049_v36 = vpop.f32.mrf.mxu1  ;;  %8640 = vmatprep.mubr.bf16.mxu0 %v17619_v13  ;;  %10229 = vmatpush3.bf16.msra.mxu0 %v11160_v1  ;;  %v17621_v40 = vld [vmem:[#allocation16_spill] sm:$0xff]  ;;  %v11175_v1 = vld [vmem:[%s17072_s7 + $0x788] ss:$28 sps:$4 sm:$0xff]  }
 0x482   : > { %8740 = vmatmul.mubr.bf16.gmra.mxu1 %v17620_v11  ;;  %v16056_v45 = vpop.f32.mrf.mxu0  ;;  %10230 = vmatprep.subr.bf16.mxu0 %v11164_v54  ;;  %v11178_v54 = vld [vmem:[%s17072_s7 + $0x910] ss:$28 sps:$4 sm:$0xff]  }
 0x483   : > { %8747 = vmatprep.mubr.bf16.mxu1 %v17621_v40  ;;  %v16062_v34 = vpop.f32.mrf.mxu1  ;;  %10293 = vmatpush3.bf16.msra.mxu1 %v11173_v23  ;;  %v11171_v40 = vld [vmem:[%s17072_s7 + $0x3d0] ss:$28 sps:$4 sm:$0xff]   ;;  %v11176_v23 = vld [vmem:[%s17072_s7 + $0x558] ss:$28 sps:$4 sm:$0xff]  }
 0x484   : > { %v16067_v13 = vpop.f32.mrf.mxu0  ;;  %10294 = vmatprep.subr.bf16.mxu1 %v11174_v8  ;;  %v11179_v8 = vld [vmem:[%s17072_s7 + $0x750] ss:$28 sps:$4 sm:$0xff]  }
 0x485   : > { %v16072_v11 = vpop.f32.mrf.mxu1  ;;  %10231 = vmatpush3.bf16.msra.mxu0 %v11165_v16  ;;  %v17622_v16 = vld [vmem:[#allocation54_spill] sm:$0xff] }
 0x486   : > { %v16077_v61 = vpop.f32.mrf.mxu0  ;;  %10232 = vmatprep.subr.bf16.mxu0 %v11170_v50  ;;  %v11180_v50 = vld [vmem:[%s17072_s7 + $0x8d8] ss:$28 sps:$4 sm:$0xff]  }
 0x487   : > { %v16082_v51 = vpop.f32.mrf.mxu1  ;;  %10295 = vmatpush3.bf16.msra.mxu1 %v11175_v1  ;;  %v11177_v1 = vld [vmem:[%s17072_s7 + $0x398] ss:$28 sps:$4 sm:$0xff]  }
 0x488   : > { %v16087_v21 = vpop.f32.mrf.mxu0  ;;  %8641 = vmatmul.mubr.bf16.gmra.mxu0 %v17622_v16  ;;  %10296 = vmatprep.subr.bf16.mxu1 %v11178_v54  ;;  %v11182_v54 = vld [vmem:[%s17072_s7 + $0xde0] ss:$28 sps:$4 sm:$0xff]  }
 0x489   : > { %v16093_v14 = vpop.f32.mrf.mxu1  ;;  %8650 = vmatprep.mubr.bf16.mxu0 %v17624_v4  ;;  %10233 = vmatpush3.bf16.msra.mxu0 %v11171_v40  ;;  %v17627_v16 = vld [vmem:[#allocation18_spill] sm:$0xff]  ;;  %v11181_v40 = vld [vmem:[%s17072_s7 + $0x718] ss:$28 sps:$4 sm:$0xff]  }
 0x48a   : > { %17623 = vst [vmem:[#allocation98_spill] sm:$0xff] %v16093_v14  ;;  %8748 = vmatmul.mubr.bf16.gmra.mxu1 %v17625_v38  ;;  %v16100_v0 = vpop.f32.mrf.mxu0  ;;  %10234 = vmatprep.subr.bf16.mxu0 %v11176_v23 }
 0x48b   : > { %17626 = vst [vmem:[#allocation69_spill] sm:$0xff] %v16100_v0  ;;  %8755 = vmatprep.mubr.bf16.mxu1 %v17627_v16  ;;  %v16106_v18 = vpop.f32.mrf.mxu1  ;;  %10297 = vmatpush3.bf16.msra.mxu1 %v11179_v8  ;;  %v17636_v0 = vld [vmem:[#allocation57_spill] sm:$0xff] }
 0x48c   : > { %17628 = vst [vmem:[#allocation89_spill] sm:$0xff] %v16106_v18  ;;  %v16111_v4 = vpop.f32.mrf.mxu0  ;;  %10298 = vmatprep.subr.bf16.mxu1 %v11180_v50  ;;  %v17634_v18 = vld [vmem:[#allocation56_spill] sm:$0xff] }
 0x48d   : > { %17629 = vst [vmem:[#allocation100_spill] sm:$0xff] %v16111_v4  ;;  %v16113_v38 = vpop.f32.mrf.mxu1  ;;  %10235 = vmatpush3.bf16.msra.mxu0 %v11177_v1  ;;  %v17637_v4 = vld [vmem:[#allocation17_spill] sm:$0xff]  ;;  %v17639_v1 = vld [vmem:[#allocation20_spill] sm:$0xff] }
 0x48e   : > { %17630 = vst [vmem:[#allocation70_spill] sm:$0xff] %v16113_v38  ;;  %v16115_v23 = vpop.f32.mrf.mxu0  ;;  %10348 = vmatprep.subr.bf16.mxu0 %v11182_v54 }
 0x48f   : > { %17631 = vst [vmem:[#allocation90_spill] sm:$0xff] %v16115_v23  ;;  %v16117_v14 = vpop.f32.mrf.mxu1  ;;  %10299 = vmatpush3.bf16.msra.mxu1 %v11181_v40 }
 0x490   : > { %17632 = vst [vmem:[#allocation71_spill] sm:$0xff] %v16117_v14  ;;  %v16119_v16 = vpop.f32.mrf.mxu0  ;;  %8651 = vmatmul.mubr.bf16.gmra.mxu0 %v17634_v18  ;;  %10412 = vmatprep.subr.bf16.mxu1 %v11182_v54 }
 0x491   : > { %17633 = vst [vmem:[#allocation91_spill] sm:$0xff] %v16119_v16  ;;  %v16122_v8 = vpop.f32.mrf.mxu1  ;;  %8660 = vmatprep.mubr.bf16.mxu0 %v17636_v0 }
 0x492   : > { %17635 = vst [vmem:[#allocation72_spill] sm:$0xff] %v16122_v8  ;;  %8756 = vmatmul.mubr.bf16.gmra.mxu1 %v17637_v4  ;;  %v16126_v50 = vpop.f32.mrf.mxu0  ;;  %v17646_v8 = vld [vmem:[#allocation58_spill] sm:$0xff]  ;;  %v17648_v4 = vld [vmem:[#allocation59_spill] sm:$0xff] }
 0x493   : > { %17638 = vst [vmem:[#allocation92_spill] sm:$0xff] %v16126_v50  ;;  %8763 = vmatprep.mubr.bf16.mxu1 %v17639_v1  ;;  %v16129_v38 = vpop.f32.mrf.mxu1  ;;  %v17649_v50 = vld [vmem:[#allocation19_spill] sm:$0xff] }
 0x494   : > { %17640 = vst [vmem:[#allocation102_spill] sm:$0xff] %v16129_v38  ;;  %v16131_v23 = vpop.f32.mrf.mxu0  ;;  %v17651_v38 = vld [vmem:[#allocation24_spill] sm:$0xff] }
 0x495   : > { %17641 = vst [vmem:[#allocation73_spill] sm:$0xff] %v16131_v23  ;;  %v16133_v40 = vpop.f32.mrf.mxu1 }
 0x496   : > { %17642 = vst [vmem:[#allocation93_spill] sm:$0xff] %v16133_v40  ;;  %v16135_v14 = vpop.f32.mrf.mxu0 }
 0x497   : > { %17643 = vst [vmem:[#allocation104_spill] sm:$0xff] %v16135_v14  ;;  %v16137_v18 = vpop.f32.mrf.mxu1 }
 0x498   : > { %17644 = vst [vmem:[#allocation74_spill] sm:$0xff] %v16137_v18  ;;  %v16139_v54 = vpop.f32.mrf.mxu0  ;;  %8661 = vmatmul.mubr.bf16.gmra.mxu0 %v17646_v8 }
 0x499   : > { %17645 = vst [vmem:[#allocation95_spill] sm:$0xff] %v16139_v54  ;;  %v16142_v0 = vpop.f32.mrf.mxu1  ;;  %8670 = vmatprep.mubr.bf16.mxu0 %v17648_v4 }
 0x49a   : > { %17647 = vst [vmem:[#allocation75_spill] sm:$0xff] %v16142_v0  ;;  %8764 = vmatmul.mubr.bf16.gmra.mxu1 %v17649_v50  ;;  %v16146_v1 = vpop.f32.mrf.mxu0  ;;  %v17658_v0 = vld [vmem:[#allocation60_spill] sm:$0xff]  ;;  %v17660_v50 = vld [vmem:[#allocation61_spill] sm:$0xff] }
 0x49b   : > { %17650 = vst [vmem:[#allocation97_spill] sm:$0xff] %v16146_v1  ;;  %8771 = vmatprep.mubr.bf16.mxu1 %v17651_v38  ;;  %v16149_v23 = vpop.f32.mrf.mxu1  ;;  %v17661_v1 = vld [vmem:[#allocation23_spill] sm:$0xff] }
 0x49c   : > { %17652 = vst [vmem:[#allocation76_spill] sm:$0xff] %v16149_v23  ;;  %v16151_v40 = vpop.f32.mrf.mxu0  ;;  %v17663_v23 = vld [vmem:[#allocation27_spill] sm:$0xff] }
 0x49d   : > { %17653 = vst [vmem:[#allocation99_spill] sm:$0xff] %v16151_v40  ;;  %v16153_v14 = vpop.f32.mrf.mxu1 }
 0x49e   : > { %17654 = vst [vmem:[#allocation106_spill] sm:$0xff] %v16153_v14  ;;  %v16155_v18 = vpop.f32.mrf.mxu0 }
 0x49f   : > { %17655 = vst [vmem:[#allocation77_spill] sm:$0xff] %v16155_v18  ;;  %v16157_v54 = vpop.f32.mrf.mxu1 }
 0x4a0   : > { %17656 = vst [vmem:[#allocation101_spill] sm:$0xff] %v16157_v54  ;;  %v16159_v8 = vpop.f32.mrf.mxu0  ;;  %8671 = vmatmul.mubr.bf16.gmra.mxu0 %v17658_v0  ;;  %v16176_v54 = vld [vmem:[%s17073_s8] sm:$0xff]  ;;  %v17667_v0 = vld [vmem:[#allocation5_spill] sm:$0xff] }
 0x4a1   : > { %17657 = vst [vmem:[#allocation78_spill] sm:$0xff] %v16159_v8  ;;  %v16162_v4 = vpop.f32.mrf.mxu1  ;;  %8680 = vmatprep.mubr.bf16.mxu0 %v17660_v50  ;;  %17666 = vst [vmem:[#allocation82_spill] sm:$0xff] %v16176_v54  ;;  %v17673_v8 = vld [vmem:[#allocation62_spill] sm:$0xff] }
 0x4a2   : > { %17659 = vst [vmem:[#allocation103_spill] sm:$0xff] %v16162_v4  ;;  %8772 = vmatmul.mubr.bf16.gmra.mxu1 %v17661_v1  ;;  %v16166_v38 = vpop.f32.mrf.mxu0  ;;  %v16180_v4 = vrot.slane %v16176_v54, %v17667_v0  ;;  %v17675_v0 = vld [vmem:[#allocation21_spill] sm:$0xff] }
 0x4a3   : > { %17662 = vst [vmem:[#allocation80_spill] sm:$0xff] %v16166_v38  ;;  %8779 = vmatprep.mubr.bf16.mxu1 %v17663_v23  ;;  %v16169_v40 = vpop.f32.mrf.mxu1  ;;  %v17670_v38 = vld [vmem:[#allocation6_spill] sm:$0xff] }
 0x4a4   : > { %17664 = vst [vmem:[#allocation105_spill] sm:$0xff] %v16169_v40  ;;  %v16171_v14 = vpop.f32.mrf.mxu0  ;;  %v16188_v23 = vrot.slane %v16176_v54, %v17670_v38  ;;  %v7822_v18 = vadd.f32 %v15560_v63, %v16180_v4  ;;  %v7826_v63 = vadd.f32 %v15588_v20, %v16180_v4 }
 0x4a5   : > { %17665 = vst [vmem:[#allocation109_spill] sm:$0xff] %v16171_v14  ;;  %v16182_v50 = vpop.f32.mrf.mxu1 }
 0x4a6   : > { %17668 = vst [vmem:[#allocation107_spill] sm:$0xff] %v16182_v50  ;;  %v16184_v1 = vpop.f32.mrf.mxu0  ;;  %v17676_v50 = vld [vmem:[#allocation30_spill] sm:$0xff]  ;;  %v7824_v38 = vadd.f32 %v15575_v31, %v16188_v23  ;;  %v7935_v54 = vadd.f32 %v15947_v32, %v7822_v18  ;;  %v7828_v32 = vadd.f32 %v15600_v41, %v16188_v23  ;;  %v7939_v20 = vadd.f32 %v15973_v24, %v7826_v63 }
 0x4a7   : > { %17669 = vst [vmem:[#allocation110_spill] sm:$0xff] %v16184_v1  ;;  %v16190_v40 = vpop.f32.mrf.mxu1  ;;  %v11184_v18 = vld [vmem:[%s17072_s7 + $0xda8] ss:$28 sps:$4 sm:$0xff]  }
 0x4a8   : > { %17671 = vst [vmem:[#allocation84_spill] sm:$0xff] %v16190_v40  ;;  %v16192_v14 = vpop.f32.mrf.mxu0  ;;  %8681 = vmatmul.mubr.bf16.gmra.mxu0 %v17673_v8  ;;  %v17677_v40 = vld [vmem:[#allocation35_spill] sm:$0xff] }
 0x4a9   : > { %17672 = vst [vmem:[#allocation108_spill] sm:$0xff] %v16192_v14  ;;  %v16197_v16 = vpop.f32.mrf.mxu1  ;;  %8820 = vmatprep.mubr.bf16.mxu0 %v17675_v0  ;;  %v7937_v0 = vadd.f32 %v15961_v22, %v7824_v38  ;;  %v7832_v38 = vadd.f32 %v15612_v55, %v16180_v4  ;;  %v11185_v41 = vld [vmem:[%s17072_s7 + $0xbe8] ss:$28 sps:$4 sm:$0xff]   ;;  %v11186_v55 = vld [vmem:[%s17072_s7 + $0xd70] ss:$28 sps:$4 sm:$0xff]  }
 0x4aa   : > { %17674 = vst [vmem:[#allocation112_spill] sm:$0xff] %v16197_v16  ;;  %8780 = vmatmul.mubr.bf16.gmra.mxu1 %v17676_v50  ;;  %v16201_v1 = vpop.f32.mrf.mxu0  ;;  %v11183_v50 = vld [vmem:[%s17072_s7 + $0xc20] ss:$28 sps:$4 sm:$0xff]  }
 0x4ab   : > { %8917 = vmatprep.mubr.bf16.mxu1 %v17677_v40  ;;  %v16207_v14 = vpop.f32.mrf.mxu1  ;;  %v8048_v40 = vadd.f32 %v15954_v43, %v7935_v54  ;;  %v7834_v43 = vadd.f32 %v15628_v59, %v16188_v23  ;;  %v7836_v59 = vadd.f32 %v15641_v44, %v16180_v4 }
 0x4ac   : > { %17678 = vst [vmem:[#allocation86_spill] sm:$0xff] %v16207_v14  ;;  %v16209_v8 = vpop.f32.mrf.mxu0  ;;  %v7941_v14 = vadd.f32 %v15984_v47, %v7828_v32 }
 0x4ad   : > { %17679 = vst [vmem:[#allocation111_spill] sm:$0xff] %v16209_v8  ;;  %v16214_v16 = vpop.f32.mrf.mxu1  ;;  %v7947_v63 = vadd.f32 %v16009_v10, %v7834_v43  ;;  %v7949_v10 = vadd.f32 %v16021_v7, %v7836_v59  ;;  %v11189_v7 = vld [vmem:[%s17072_s7 + $0xb78] ss:$28 sps:$4 sm:$0xff]  }
 0x4ae   : > { %17680 = vst [vmem:[#allocation88_spill] sm:$0xff] %v16214_v16  ;;  %v16219_v31 = vpop.f32.mrf.mxu0  ;;  %v8054_v54 = vadd.f32 %v15990_v48, %v7941_v14  ;;  %v11188_v14 = vld [vmem:[%s17072_s7 + $0xd38] ss:$28 sps:$4 sm:$0xff]  }
 0x4af   : > { %17681 = vst [vmem:[#allocation3_spill] sm:$0xff] %v16219_v31  ;;  %v16228_v22 = vpop.f32.mrf.mxu1  ;;  %v8050_v31 = vadd.f32 %v15968_v2, %v7937_v0  ;;  %v8052_v2 = vadd.f32 %v15979_v27, %v7939_v20 }
 0x4b0   : > { %v8160_v16 = vpop.f32.mrf.mxu0  ;;  %8821 = vmatmul.mubr.bf16.vlgmr.msra.gmra.mxu0 %v14060_v33 }
 0x4b1   : > { %v8161_v8 = vadd.f32 %v8160_v16, %v8048_v40  ;;  %10349 = vmatpush3.bf16.msra.mxu0 %v11183_v50  ;;  %8828 = vmatprep.mubr.bf16.mxu0 %v14104_v53  ;;  %v7945_v53 = vadd.f32 %v15995_v62, %v7832_v38  ;;  %v7838_v62 = vadd.f32 %v15658_v25, %v16188_v23 }
 0x4b2   : > { %v16241_v24 = vpop.f32.mrf.mxu1  ;;  %8918 = vmatmul.mubr.bf16.vlgmr.msra.gmra.mxu1 %v14400_v12  ;;  %v8162_v33 = vpop.f32.mrf.mxu0  ;;  %10350 = vmatprep.subr.bf16.mxu0 %v11184_v18 }
 0x4b3   : > { %11262 = vtanh.f32 %v8161_v8  ;;  %8925 = vmatprep.mubr.bf16.mxu1 %v14418_v35  ;;  %v8163_v47 = vadd.f32 %v8162_v33, %v8050_v31  ;;  %10420 = vmatpush3.bf16.msra.mxu1 %v11183_v50  ;;  %v11187_v35 = vld [vmem:[%s17072_s7 + $0xbb0] ss:$28 sps:$4 sm:$0xff]   ;;  %v8058_v48 = vadd.f32 %v16002_v42, %v7945_v53  ;;  %v7842_v50 = vadd.f32 %v15670_v28, %v16180_v4 }
 0x4b4   : > { %v16252_v16 = vpop.f32.mrf.mxu1  ;;  %v8164_v12 = vpop.f32.mrf.mxu0  ;;  %10413 = vmatprep.subr.bf16.mxu1 %v11184_v18  ;;  %v8060_v18 = vadd.f32 %v16016_v56, %v7947_v63  ;;  %v7951_v32 = vadd.f32 %v16032_v37, %v7838_v62  ;;  %v7844_v28 = vadd.f32 %v15686_v30, %v16188_v23  ;;  %v11190_v37 = vld [vmem:[%s17072_s7 + $0xd00] ss:$28 sps:$4 sm:$0xff]   ;;  %v7846_v30 = vadd.f32 %v15700_v26, %v16180_v4 }
 0x4b5   : > { %11264 = vtanh.f32 %v8163_v47  ;;  %v8165_v27 = vadd.f32 %v8164_v12, %v8052_v2  ;;  %10351 = vmatpush3.bf16.msra.mxu0 %v11185_v41  ;;  %v7955_v56 = vadd.f32 %v16043_v3, %v7842_v50  ;;  %v7848_v3 = vadd.f32 %v15713_v5, %v16188_v23 }
 0x4b6   : > { %v16261_v8 = vpop.f32.mrf.mxu1  ;;  %v8166_v44 = vpop.f32.mrf.mxu0  ;;  %10352 = vmatprep.subr.bf16.mxu0 %v11186_v55  ;;  %v7957_v43 = vadd.f32 %v16056_v45, %v7844_v28  ;;  %v7852_v5 = vadd.f32 %v15726_v15, %v16180_v4  ;;  %v11193_v15 = vld [vmem:[%s17072_s7 + $0xb08] ss:$28 sps:$4 sm:$0xff]  }
 0x4b7   : > { %11266 = vtanh.f32 %v8165_v27  ;;  %v8167_v0 = vadd.f32 %v8166_v44, %v8054_v54  ;;  %10421 = vmatpush3.bf16.msra.mxu1 %v11185_v41  ;;  %v8064_v41 = vadd.f32 %v16038_v39, %v7951_v32  ;;  %v11192_v39 = vld [vmem:[%s17072_s7 + $0xcc8] ss:$28 sps:$4 sm:$0xff]   ;;  %v8068_v45 = vadd.f32 %v16049_v36, %v7955_v56 }
 0x4b8   : > { %v16270_v31 = vpop.f32.mrf.mxu1  ;;  %v8170_v25 = vpop.f32.mrf.mxu0  ;;  %8829 = vmatmul.mubr.bf16.gmra.mxu0 %v14112_v57  ;;  %10414 = vmatprep.subr.bf16.mxu1 %v11186_v55  ;;  %v7959_v55 = vadd.f32 %v16067_v13, %v7846_v30  ;;  %v8070_v12 = vadd.f32 %v16062_v34, %v7957_v43  ;;  %v7961_v54 = vadd.f32 %v16077_v61, %v7848_v3  ;;  %v17687_v30 = vld [vmem:[#allocation26_spill] sm:$0xff]  ;;  %v17690_v3 = vld [vmem:[#allocation28_spill] sm:$0xff] }
 0x4b9   : > { %11268 = vtanh.f32 %v8167_v0  ;;  %v8171_v42 = vadd.f32 %v8170_v25, %v8058_v48  ;;  %8836 = vmatprep.mubr.bf16.mxu0 %v14153_v29  ;;  %10353 = vmatpush3.bf16.msra.mxu0 %v11187_v35  ;;  %v8062_v29 = vadd.f32 %v16027_v46, %v7949_v10  ;;  %v7965_v27 = vadd.f32 %v16087_v21, %v7852_v5  ;;  %v17689_v43 = vld [vmem:[#allocation90_spill] sm:$0xff] }
 0x4ba   : > { %v16281_v40 = vpop.f32.mrf.mxu1  ;;  %8926 = vmatmul.mubr.bf16.gmra.mxu1 %v14423_v19  ;;  %v8172_v57 = vpop.f32.mrf.mxu0  ;;  %10354 = vmatprep.subr.bf16.mxu0 %v11188_v14  ;;  %v8072_v34 = vadd.f32 %v16072_v11, %v7959_v55  ;;  %v17682_v11 = vld [vmem:[#allocation69_spill] sm:$0xff] }
 0x4bb   : > { %11270 = vtanh.f32 %v8171_v42  ;;  %8933 = vmatprep.mubr.bf16.mxu1 %v14441_v58  ;;  %v8173_v20 = vadd.f32 %v8172_v57, %v8060_v18  ;;  %10422 = vmatpush3.bf16.msra.mxu1 %v11187_v35  ;;  %v11191_v58 = vld [vmem:[%s17072_s7 + $0xb40] ss:$28 sps:$4 sm:$0xff]   ;;  %v17685_v42 = vld [vmem:[#allocation100_spill] sm:$0xff] }
 0x4bc   : > { %v16292_v38 = vpop.f32.mrf.mxu1  ;;  %v8174_v19 = vpop.f32.mrf.mxu0  ;;  %10415 = vmatprep.subr.bf16.mxu1 %v11188_v14  ;;  %v8074_v14 = vadd.f32 %v16082_v51, %v7961_v54  ;;  %v11196_v51 = vld [vmem:[%s17072_s7 + $0xc58] ss:$28 sps:$4 sm:$0xff]   ;;  %v17684_v18 = vld [vmem:[#allocation98_spill] sm:$0xff]  ;;  %v17694_v54 = vld [vmem:[#allocation91_spill] sm:$0xff] }
 0x4bd   : > { %11272 = vtanh.f32 %v8173_v20  ;;  %v8175_v46 = vadd.f32 %v8174_v19, %v8062_v29  ;;  %10355 = vmatpush3.bf16.msra.mxu0 %v11189_v7  ;;  %v8078_v32 = vadd.f32 %v17684_v18, %v7965_v27  ;;  %v17688_v19 = vld [vmem:[#allocation89_spill] sm:$0xff] }
 0x4be   : > { %v16301_v33 = vpop.f32.mrf.mxu1  ;;  %v8176_v26 = vpop.f32.mrf.mxu0  ;;  %10356 = vmatprep.subr.bf16.mxu0 %v11190_v37 }
 0x4bf   : > { %11274 = vtanh.f32 %v8175_v46  ;;  %v8177_v2 = vadd.f32 %v8176_v26, %v8064_v41  ;;  %10423 = vmatpush3.bf16.msra.mxu1 %v11189_v7  ;;  %v11197_v26 = vld [vmem:[%s17072_s7 + $0xa98] ss:$28 sps:$4 sm:$0xff]  }
 0x4c0   : > { %v11263_v53 = vpop.eup %11262  ;;  %v16310_v47 = vpop.f32.mrf.mxu1  ;;  %8837 = vmatmul.mubr.bf16.gmra.mxu0 %v17518_v60  ;;  %10416 = vmatprep.subr.bf16.mxu1 %v11190_v37  ;;  %v7854_v60 = vadd.f32 %v15742_v17, %v16188_v23  ;;  %v17686_v37 = vld [vmem:[#allocation22_spill] sm:$0xff] }
 0x4c1   : > { %v8180_v59 = vpop.f32.mrf.mxu0  ;;  %9193 = vst [vmem:[%s15654_s21 + $0x10] sm:$0xff] %v11263_v53  ;;  %11276 = vtanh.f32 %v8177_v2  ;;  %8844 = vmatprep.mubr.bf16.mxu0 %v17519_v6  ;;  %10357 = vmatpush3.bf16.msra.mxu0 %v11191_v58  ;;  %v11194_v6 = vld [vmem:[%s17072_s7 + $0xc90] ss:$28 sps:$4 sm:$0xff]   ;;  %v7862_v29 = vadd.f32 %v17686_v37, %v16180_v4  ;;  %v17692_v53 = vld [vmem:[#allocation38_spill] sm:$0xff]  ;;  %v17703_v37 = vld [vmem:[#allocation29_spill] sm:$0xff] }
 0x4c2   : > { %v8181_v36 = vadd.f32 %v8180_v59, %v8068_v45  ;;  %v11265_v13 = vpop.eup %11264  ;;  %v16322_v63 = vpop.f32.mrf.mxu1  ;;  %8934 = vmatmul.mubr.bf16.gmra.mxu1 %v17521_v49  ;;  %10358 = vmatprep.subr.bf16.mxu0 %v11192_v39  ;;  %v7856_v49 = vadd.f32 %v15756_v52, %v16180_v4  ;;  %v7967_v48 = vadd.f32 %v17682_v11, %v7854_v60  ;;  %v17683_v52 = vld [vmem:[#allocation63_spill] sm:$0xff]  ;;  %v17691_v45 = vld [vmem:[#allocation25_spill] sm:$0xff]  ;;  %v17693_v59 = vld [vmem:[#allocation70_spill] sm:$0xff] }
 0x4c3   : > { %v8182_v61 = vpop.f32.mrf.mxu0  ;;  %9194 = vst [vmem:[%s15654_s21 + $0x18] sm:$0xff] %v11265_v13  ;;  %8941 = vmatprep.mubr.bf16.mxu1 %v17524_v9  ;;  %10424 = vmatpush3.bf16.msra.mxu1 %v11191_v58  ;;  %v11195_v9 = vld [vmem:[%s17072_s7 + $0xad0] ss:$28 sps:$4 sm:$0xff]   ;;  %v7858_v0 = vadd.f32 %v17683_v52, %v16188_v23  ;;  %v7864_v55 = vadd.f32 %v17691_v45, %v16188_v23 }
 0x4c4   : > { %11278 = vtanh.f32 %v8181_v36  ;;  %v8183_v17 = vadd.f32 %v8182_v61, %v8070_v12  ;;  %v11267_v35 = vpop.eup %11266  ;;  %v16334_v62 = vpop.f32.mrf.mxu1  ;;  %10417 = vmatprep.subr.bf16.mxu1 %v11192_v39  ;;  %v7969_v7 = vadd.f32 %v17685_v42, %v7856_v49  ;;  %v8080_v41 = vadd.f32 %v17688_v19, %v7967_v48  ;;  %v17696_v61 = vld [vmem:[#allocation64_spill] sm:$0xff]  ;;  %v17702_v42 = vld [vmem:[#allocation79_spill] sm:$0xff] }
 0x4c5   : > { %v8184_v44 = vpop.f32.mrf.mxu0  ;;  %9200 = vst [vmem:[%s15654_s21 + $0x48] sm:$0xff] %v11267_v35  ;;  %10359 = vmatpush3.bf16.msra.mxu0 %v11193_v15  ;;  %v7971_v46 = vadd.f32 %v17689_v43, %v7858_v0  ;;  %v7975_v36 = vadd.f32 %v17694_v54, %v7862_v29  ;;  %v17698_v49 = vld [vmem:[#allocation92_spill] sm:$0xff]  ;;  %v17704_v29 = vld [vmem:[#allocation102_spill] sm:$0xff]  ;;  %v17706_v43 = vld [vmem:[#allocation31_spill] sm:$0xff] }
 0x4c6   : > { %11280 = vtanh.f32 %v8183_v17  ;;  %v8185_v21 = vadd.f32 %v8184_v44, %v8072_v34  ;;  %v11269_v10 = vpop.eup %11268  ;;  %v16344_v50 = vpop.f32.mrf.mxu1  ;;  %10360 = vmatprep.subr.bf16.mxu0 %v11194_v6  ;;  %v8082_v12 = vadd.f32 %v17693_v59, %v7969_v7  ;;  %v17697_v17 = vld [vmem:[#allocation71_spill] sm:$0xff]  ;;  %v7977_v44 = vadd.f32 %v17698_v49, %v7864_v55  ;;  %v17699_v48 = vld [vmem:[#allocation36_spill] sm:$0xff]  ;;  %v17709_v55 = vld [vmem:[#allocation93_spill] sm:$0xff] }
 0x4c7   : > { %v8186_v25 = vpop.f32.mrf.mxu0  ;;  %9201 = vst [vmem:[%s15654_s21 + $0x50] sm:$0xff] %v11269_v10  ;;  %10425 = vmatpush3.bf16.msra.mxu1 %v11193_v15  ;;  %v17695_v15 = vld [vmem:[#allocation39_spill] sm:$0xff]  ;;  %v8084_v35 = vadd.f32 %v17697_v17, %v7971_v46  ;;  %v17700_v52 = vld [vmem:[#allocation72_spill] sm:$0xff]  ;;  %v7872_v7 = vadd.f32 %v17702_v42, %v16180_v4  ;;  %v17714_v17 = vld [vmem:[#allocation97_spill] sm:$0xff] }
 0x4c8   : > { %11282 = vtanh.f32 %v8185_v21  ;;  %v8187_v28 = vadd.f32 %v8186_v25, %v8074_v14  ;;  %v11271_v57 = vpop.eup %11270  ;;  %v16354_v56 = vpop.f32.mrf.mxu1  ;;  %8845 = vmatmul.mubr.bf16.gmra.mxu0 %v17687_v30  ;;  %10418 = vmatprep.subr.bf16.mxu1 %v11194_v6  ;;  %v7866_v6 = vadd.f32 %v17696_v61, %v16180_v4  ;;  %v7868_v21 = vadd.f32 %v17699_v48, %v16188_v23  ;;  %v17701_v25 = vld [vmem:[#allocation73_spill] sm:$0xff]  ;;  %v17705_v30 = vld [vmem:[#allocation104_spill] sm:$0xff] }
 0x4c9   : > { %v8190_v20 = vpop.f32.mrf.mxu0  ;;  %9207 = vst [vmem:[%s15654_s21 + $0x80] sm:$0xff] %v11271_v57  ;;  %8852 = vmatprep.mubr.bf16.mxu0 %v17690_v3  ;;  %10361 = vmatpush3.bf16.msra.mxu0 %v11195_v9  ;;  %v8088_v0 = vadd.f32 %v17700_v52, %v7975_v36 }
 0x4ca   : > { %11284 = vtanh.f32 %v8187_v28  ;;  %v8191_v58 = vadd.f32 %v8190_v20, %v8078_v32  ;;  %v11273_v39 = vpop.eup %11272  ;;  %v16366_v2 = vpop.f32.mrf.mxu1  ;;  %8942 = vmatmul.mubr.bf16.gmra.mxu1 %v17692_v53  ;;  %10362 = vmatprep.subr.bf16.mxu0 %v11196_v51  ;;  %v8090_v20 = vadd.f32 %v17704_v29, %v7977_v44  ;;  %v7981_v19 = vadd.f32 %v17705_v30, %v7868_v21  ;;  %v17721_v29 = vld [vmem:[#allocation76_spill] sm:$0xff]  ;;  %v17722_v30 = vld [vmem:[#allocation77_spill] sm:$0xff] }
 0x4cb   : > { %v8192_v5 = vpop.f32.mrf.mxu0  ;;  %9208 = vst [vmem:[%s15654_s21 + $0x88] sm:$0xff] %v11273_v39  ;;  %8949 = vmatprep.mubr.bf16.mxu1 %v17695_v15  ;;  %10426 = vmatpush3.bf16.msra.mxu1 %v11195_v9  ;;  %v17708_v39 = vld [vmem:[#allocation40_spill] sm:$0xff]  ;;  %v17712_v15 = vld [vmem:[#allocation37_spill] sm:$0xff] }
 0x4cc   : > { %11286 = vtanh.f32 %v8191_v58  ;;  %v8193_v13 = vadd.f32 %v8192_v5, %v8080_v41  ;;  %v11275_v60 = vpop.eup %11274  ;;  %v16375_v34 = vpop.f32.mrf.mxu1  ;;  %10419 = vmatprep.subr.bf16.mxu1 %v11196_v51  ;;  %v7979_v51 = vadd.f32 %v17701_v25, %v7866_v6  ;;  %v17707_v58 = vld [vmem:[#allocation94_spill] sm:$0xff]  ;;  %v17710_v5 = vld [vmem:[#allocation95_spill] sm:$0xff] }
 0x4cd   : > { %v8194_v27 = vpop.f32.mrf.mxu0  ;;  %9214 = vst [vmem:[%s15654_s21 + $0xb8] sm:$0xff] %v11275_v60  ;;  %10363 = vmatpush3.bf16.msra.mxu0 %v11197_v26  ;;  %v7874_v3 = vadd.f32 %v17707_v58, %v16188_v23  ;;  %v7985_v59 = vadd.f32 %v17710_v5, %v7872_v7  ;;  %v17713_v6 = vld [vmem:[#allocation74_spill] sm:$0xff]  ;;  %v17724_v58 = vld [vmem:[#allocation96_spill] sm:$0xff] }
 0x4ce   : > { %11288 = vtanh.f32 %v8193_v13  ;;  %v8195_v14 = vadd.f32 %v8194_v27, %v8082_v12  ;;  %v11277_v11 = vpop.eup %11276  ;;  %v16382_v9 = vpop.f32.mrf.mxu1  ;;  %v8092_v53 = vadd.f32 %v17709_v55, %v7979_v51  ;;  %v17711_v12 = vld [vmem:[#allocation41_spill] sm:$0xff]  ;;  %v7876_v13 = vadd.f32 %v17712_v15, %v16180_v4 }
 0x4cf   : > { %v8196_v10 = vpop.f32.mrf.mxu0  ;;  %9215 = vst [vmem:[%s15654_s21 + $0xc0] sm:$0xff] %v11277_v11  ;;  %10427 = vmatpush3.bf16.msra.mxu1 %v11197_v26  ;;  %v8094_v27 = vadd.f32 %v17713_v6, %v7981_v19 }
 0x4d0   : > { %11290 = vtanh.f32 %v8195_v14  ;;  %v8197_v18 = vadd.f32 %v8196_v10, %v8084_v35  ;;  %v16389_v28 = vpop.f32.mrf.mxu1  ;;  %8853 = vmatmul.mubr.bf16.gmra.mxu0 %v17703_v37  ;;  %v7987_v35 = vadd.f32 %v17714_v17, %v7874_v3  ;;  %v17715_v14 = vld [vmem:[#allocation65_spill] sm:$0xff]  ;;  %v17716_v10 = vld [vmem:[#allocation75_spill] sm:$0xff]  ;;  %v17720_v37 = vld [vmem:[#allocation32_spill] sm:$0xff]  ;;  %v7884_v3 = vadd.f32 %v17724_v58, %v16188_v23 }
 0x4d1   : > { %v11279_v32 = vpop.eup %11278  ;;  %v8200_v57 = vpop.f32.mrf.mxu0  ;;  %8860 = vmatprep.mubr.bf16.mxu0 %v17706_v43  ;;  %v7878_v11 = vadd.f32 %v17715_v14, %v16188_v23  ;;  %v8098_v52 = vadd.f32 %v17716_v10, %v7985_v59  ;;  %v17723_v43 = vld [vmem:[#allocation33_spill] sm:$0xff]  ;;  %v17728_v59 = vld [vmem:[#allocation78_spill] sm:$0xff] }
 0x4d2   : > { %9221 = vst [vmem:[%s15654_s21 + $0xf0] sm:$0xff] %v11279_v32  ;;  %11292 = vtanh.f32 %v8197_v18  ;;  %v8201_v41 = vadd.f32 %v8200_v57, %v8088_v0  ;;  %v16398_v26 = vpop.f32.mrf.mxu1  ;;  %8950 = vmatmul.mubr.bf16.gmra.mxu1 %v17708_v39  ;;  %v17717_v0 = vld [vmem:[#allocation99_spill] sm:$0xff]  ;;  %v17718_v32 = vld [vmem:[#allocation81_spill] sm:$0xff] }
 0x4d3   : > { %v11281_v46 = vpop.eup %11280  ;;  %v8202_v45 = vpop.f32.mrf.mxu0  ;;  %8957 = vmatprep.mubr.bf16.mxu1 %v17711_v12  ;;  %v7989_v25 = vadd.f32 %v17717_v0, %v7876_v13  ;;  %v7882_v42 = vadd.f32 %v17718_v32, %v16180_v4  ;;  %v7991_v19 = vadd.f32 %v17722_v30, %v7878_v11  ;;  %v17730_v13 = vld [vmem:[#allocation66_spill] sm:$0xff]  ;;  %v17732_v17 = vld [vmem:[#allocation101_spill] sm:$0xff] }
 0x4d4   : > { %9222 = vst [vmem:[%s15654_s21 + $0xf8] sm:$0xff] %v11281_v46  ;;  %11294 = vtanh.f32 %v8201_v41  ;;  %v8203_v54 = vadd.f32 %v8202_v45, %v8090_v20  ;;  %v16407_v60 = vpop.f32.mrf.mxu1  ;;  %v8100_v20 = vadd.f32 %v17721_v29, %v7987_v35  ;;  %v17726_v45 = vld [vmem:[#allocation42_spill] sm:$0xff] }
 0x4d5   : > { %v11283_v36 = vpop.eup %11282  ;;  %v8204_v61 = vpop.f32.mrf.mxu0  ;;  %v7995_v12 = vadd.f32 %v17728_v59, %v7882_v42  ;;  %v8104_v35 = vadd.f32 %v17732_v17, %v7991_v19  ;;  %v17740_v19 = vld [vmem:[#allocation34_spill] sm:$0xff] }
 0x4d6   : > { %9228 = vst [vmem:[%s15654_s21 + $0x128] sm:$0xff] %v11283_v36  ;;  %11296 = vtanh.f32 %v8203_v54  ;;  %v8205_v49 = vadd.f32 %v8204_v61, %v8092_v53  ;;  %v16414_v48 = vpop.f32.mrf.mxu1  ;;  %v17727_v53 = vld [vmem:[#allocation106_spill] sm:$0xff]  ;;  %v17729_v54 = vld [vmem:[#allocation43_spill] sm:$0xff]  ;;  %v7886_v61 = vadd.f32 %v17730_v13, %v16180_v4  ;;  %v17748_v13 = vld [vmem:[#allocation108_spill] sm:$0xff] }
 0x4d7   : > { %v11285_v44 = vpop.eup %11284  ;;  %v8206_v21 = vpop.f32.mrf.mxu0  ;;  %v8102_v5 = vadd.f32 %v17727_v53, %v7989_v25  ;;  %v17736_v25 = vld [vmem:[#allocation103_spill] sm:$0xff]  ;;  %v17744_v53 = vld [vmem:[#allocation85_spill] sm:$0xff] }
 0x4d8   : > { %9229 = vst [vmem:[%s15654_s21 + $0x130] sm:$0xff] %v11285_v44  ;;  %11298 = vtanh.f32 %v8205_v49  ;;  %v8207_v51 = vadd.f32 %v8206_v21, %v8094_v27  ;;  %v16421_v7 = vpop.f32.mrf.mxu1  ;;  %8861 = vmatmul.mubr.bf16.gmra.mxu0 %v17720_v37  ;;  %v17733_v49 = vld [vmem:[#allocation80_spill] sm:$0xff]  ;;  %v17734_v21 = vld [vmem:[#allocation83_spill] sm:$0xff] }
 0x4d9   : > { %v11287_v18 = vpop.eup %11286  ;;  %17719 = vst [vmem:[#allocation10_spill] sm:$0xff] %v16421_v7  ;;  %v8210_v57 = vpop.f32.mrf.mxu0  ;;  %8868 = vmatprep.mubr.bf16.mxu0 %v17723_v43  ;;  %v7997_v44 = vadd.f32 %v17733_v49, %v7884_v3  ;;  %v7888_v10 = vadd.f32 %v17734_v21, %v16188_v23  ;;  %v17738_v37 = vld [vmem:[#allocation67_spill] sm:$0xff]  ;;  %v17750_v49 = vld [vmem:[#allocation68_spill] sm:$0xff] }
 0x4da   : > { %9235 = vst [vmem:[%s15654_s21 + $0x160] sm:$0xff] %v11287_v18  ;;  %11300 = vtanh.f32 %v8207_v51  ;;  %v8211_v41 = vadd.f32 %v8210_v57, %v8098_v52  ;;  %v16430_v39 = vpop.f32.mrf.mxu1  ;;  %8958 = vmatmul.mubr.bf16.gmra.mxu1 %v17726_v45  ;;  %v8108_v51 = vadd.f32 %v17736_v25, %v7995_v12  ;;  %v17737_v18 = vld [vmem:[#allocation109_spill] sm:$0xff]  ;;  %v7892_v29 = vadd.f32 %v17738_v37, %v16180_v4  ;;  %v17743_v45 = vld [vmem:[#allocation7_spill] sm:$0xff]  ;;  %v17746_v12 = vld [vmem:[#allocation44_spill] sm:$0xff] }
 0x4db   : > { %v11289_v46 = vpop.eup %11288  ;;  %17725 = vst [vmem:[#allocation4_spill] sm:$0xff] %v16430_v39  ;;  %v8212_v55 = vpop.f32.mrf.mxu0  ;;  %8965 = vmatprep.mubr.bf16.mxu1 %v17729_v54  ;;  %v7999_v32 = vadd.f32 %v17737_v18, %v7886_v61  ;;  %v17752_v21 = vld [vmem:[#allocation84_spill] sm:$0xff]  ;;  %v17753_v18 = vld [vmem:[#allocation87_spill] sm:$0xff]  ;;  %v17790_v39 = vld [vmem:[#allocation58_spill] sm:$0xff] }
 0x4dc   : > { %9236 = vst [vmem:[%s15654_s21 + $0x168] sm:$0xff] %v11289_v46  ;;  %11302 = vtanh.f32 %v8211_v41  ;;  %v8213_v36 = vadd.f32 %v8212_v55, %v8100_v20  ;;  %v16439_v6 = vpop.f32.mrf.mxu1  ;;  %v17741_v41 = vld [vmem:[#allocation105_spill] sm:$0xff]  ;;  %v17742_v46 = vld [vmem:[#allocation110_spill] sm:$0xff]  ;;  %v8005_v61 = vadd.f32 %v17748_v13, %v7892_v29  ;;  %v17755_v37 = vld [vmem:[#allocation112_spill] sm:$0xff] }
 0x4dd   : > { %v11291_v15 = vpop.eup %11290  ;;  %17731 = vst [vmem:[#allocation9_spill] sm:$0xff] %v16439_v6  ;;  %v8214_v27 = vpop.f32.mrf.mxu0  ;;  %v8110_v43 = vadd.f32 %v17741_v41, %v7997_v44  ;;  %v8001_v58 = vadd.f32 %v17742_v46, %v7888_v10  ;;  %v7896_v44 = vadd.f32 %v17750_v49, %v16180_v4  ;;  %v17756_v29 = vld [vmem:[#allocation111_spill] sm:$0xff]  ;;  %v17758_v46 = vld [vmem:[#allocation8_spill] sm:$0xff] }
 0x4de   : > { %9242 = vst [vmem:[%s15654_s21 + $0x198] sm:$0xff] %v11291_v15  ;;  %11304 = vtanh.f32 %v8213_v36  ;;  %v8215_v14 = vadd.f32 %v8214_v27, %v8102_v5  ;;  %v16446_v52 = vpop.f32.mrf.mxu1  ;;  %v7894_v5 = vadd.f32 %v17744_v53, %v16188_v23  ;;  %v17747_v36 = vld [vmem:[#allocation107_spill] sm:$0xff]  ;;  %v17749_v27 = vld [vmem:[#allocation45_spill] sm:$0xff]  ;;  %v8118_v4 = vadd.f32 %v17755_v37, %v8005_v61 }
 0x4df   : > { %v11293_v11 = vpop.eup %11292  ;;  %17735 = vst [vmem:[#allocation12_spill] sm:$0xff] %v16446_v52  ;;  %v8216_v0 = vpop.f32.mrf.mxu0  ;;  %v8112_v15 = vadd.f32 %v17747_v36, %v7999_v32  ;;  %v8114_v10 = vadd.f32 %v17752_v21, %v8001_v58  ;;  %v7898_v32 = vadd.f32 %v17753_v18, %v16188_v23  ;;  %v17759_v58 = vld [vmem:[#allocation86_spill] sm:$0xff]  ;;  %v17760_v23 = vld [vmem:[#allocation3_spill] sm:$0xff] }
 0x4e0   : > { %9243 = vst [vmem:[%s15654_s21 + $0x1a0] sm:$0xff] %v11293_v11  ;;  %11306 = vtanh.f32 %v8215_v14  ;;  %v8217_v42 = vadd.f32 %v8216_v0, %v8104_v35  ;;  %v16453_v20 = vpop.f32.mrf.mxu1  ;;  %8869 = vmatmul.mubr.bf16.gmra.mxu0 %v17740_v19  ;;  %v8007_v0 = vadd.f32 %v16201_v1, %v7894_v5  ;;  %v17761_v53 = vld [vmem:[#allocation47_spill] sm:$0xff] }
 0x4e1   : > { %v11295_v57 = vpop.eup %11294  ;;  %17739 = vst [vmem:[#allocation11_spill] sm:$0xff] %v16453_v20  ;;  %v8220_v30 = vpop.f32.mrf.mxu0  ;;  %8876 = vmatprep.mubr.bf16.mxu0 %v17743_v45  ;;  %v8011_v45 = vadd.f32 %v17760_v23, %v7898_v32  ;;  %v17765_v61 = vld [vmem:[#allocation59_spill] sm:$0xff] }
 0x4e2   : > { %9249 = vst [vmem:[%s15654_s21 + $0x1d0] sm:$0xff] %v11295_v57  ;;  %11308 = vtanh.f32 %v8217_v42  ;;  %v8221_v3 = vadd.f32 %v8220_v30, %v8108_v51  ;;  %v16462_v59 = vpop.f32.mrf.mxu1  ;;  %8966 = vmatmul.mubr.bf16.gmra.mxu1 %v17746_v12  ;;  %v8009_v30 = vadd.f32 %v17756_v29, %v7896_v44  ;;  %v17771_v29 = vld [vmem:[#allocation60_spill] sm:$0xff] }
 0x4e3   : > { %v11297_v55 = vpop.eup %11296  ;;  %17745 = vst [vmem:[#allocation14_spill] sm:$0xff] %v16462_v59  ;;  %v8222_v54 = vpop.f32.mrf.mxu0  ;;  %8973 = vmatprep.mubr.bf16.mxu1 %v17749_v27  ;;  %v8124_v44 = vadd.f32 %v16228_v22, %v8011_v45  ;;  %v17770_v22 = vld [vmem:[#allocation49_spill] sm:$0xff] }
 0x4e4   : > { %9250 = vst [vmem:[%s15654_s21 + $0x1d8] sm:$0xff] %v11297_v55  ;;  %11310 = vtanh.f32 %v8221_v3  ;;  %v8223_v17 = vadd.f32 %v8222_v54, %v8110_v43  ;;  %v16471_v14 = vpop.f32.mrf.mxu1  ;;  %v8120_v3 = vadd.f32 %v17759_v58, %v8007_v0  ;;  %v17763_v54 = vld [vmem:[#allocation46_spill] sm:$0xff] }
 0x4e5   : > { %v11299_v35 = vpop.eup %11298  ;;  %17751 = vst [vmem:[#allocation13_spill] sm:$0xff] %v16471_v14  ;;  %v8224_v11 = vpop.f32.mrf.mxu0 }
 0x4e6   : > { %9256 = vst [vmem:[%s15654_s21 + $0x208] sm:$0xff] %v11299_v35  ;;  %11312 = vtanh.f32 %v8223_v17  ;;  %v8225_v25 = vadd.f32 %v8224_v11, %v8112_v15  ;;  %v16478_v42 = vpop.f32.mrf.mxu1  ;;  %v17764_v15 = vld [vmem:[#allocation88_spill] sm:$0xff] }
 0x4e7   : > { %v11301_v51 = vpop.eup %11300  ;;  %17754 = vst [vmem:[#allocation16_spill] sm:$0xff] %v16478_v42  ;;  %v8226_v57 = vpop.f32.mrf.mxu0  ;;  %v8122_v13 = vadd.f32 %v17764_v15, %v8009_v30 }
 0x4e8   : > { %9257 = vst [vmem:[%s15654_s21 + $0x210] sm:$0xff] %v11301_v51  ;;  %11314 = vtanh.f32 %v8225_v25  ;;  %v8227_v19 = vadd.f32 %v8226_v57, %v8114_v10  ;;  %v16483_v41 = vpop.f32.mrf.mxu1  ;;  %8877 = vmatmul.mubr.bf16.gmra.mxu0 %v17758_v46  ;;  %v17769_v57 = vld [vmem:[#allocation48_spill] sm:$0xff] }
 0x4e9   : > { %v11303_v1 = vpop.eup %11302  ;;  %17757 = vst [vmem:[#allocation15_spill] sm:$0xff] %v16483_v41  ;;  %v8230_v43 = vpop.f32.mrf.mxu0  ;;  %9014 = vmatprep.mubr.bf16.mxu0 %v17761_v53 }
 0x4ea   : > { %9263 = vst [vmem:[%s15654_s21 + $0x240] sm:$0xff] %v11303_v1  ;;  %11316 = vtanh.f32 %v8227_v19  ;;  %v8231_v55 = vadd.f32 %v8230_v43, %v8118_v4  ;;  %v16490_v12 = vpop.f32.mrf.mxu1  ;;  %8974 = vmatmul.mubr.bf16.gmra.mxu1 %v17763_v54  ;;  %v17772_v19 = vld [vmem:[#allocation61_spill] sm:$0xff]  ;;  %v17774_v54 = vld [vmem:[#allocation51_spill] sm:$0xff] }
 0x4eb   : > { %v11305_v5 = vpop.eup %11304  ;;  %17762 = vst [vmem:[#allocation18_spill] sm:$0xff] %v16490_v12  ;;  %v8232_v36 = vpop.f32.mrf.mxu0  ;;  %9062 = vmatprep.mubr.bf16.mxu1 %v17765_v61  ;;  %v17781_v12 = vld [vmem:[#allocation56_spill] sm:$0xff] }
 0x4ec   : > { %9264 = vst [vmem:[%s15654_s21 + $0x248] sm:$0xff] %v11305_v5  ;;  %11318 = vtanh.f32 %v8231_v55  ;;  %v8233_v27 = vadd.f32 %v8232_v36, %v8120_v3  ;;  %v16496_v35 = vpop.f32.mrf.mxu1  ;;  %v17773_v5 = vld [vmem:[#allocation50_spill] sm:$0xff] }
 0x4ed   : > { %v11307_v17 = vpop.eup %11306  ;;  %17766 = vst [vmem:[#allocation17_spill] sm:$0xff] %v16496_v35  ;;  %v8234_v49 = vpop.f32.mrf.mxu0 }
 0x4ee   : > { %9270 = vst [vmem:[%s15654_s21 + $0x278] sm:$0xff] %v11307_v17  ;;  %11320 = vtanh.f32 %v8233_v27  ;;  %v8235_v11 = vadd.f32 %v8234_v49, %v8122_v13  ;;  %v16500_v10 = vpop.f32.mrf.mxu1  ;;  %v17775_v13 = vld [vmem:[#allocation62_spill] sm:$0xff] }
 0x4ef   : > { %v11309_v21 = vpop.eup %11308  ;;  %17767 = vst [vmem:[#allocation20_spill] sm:$0xff] %v16500_v10  ;;  %v8236_v0 = vpop.f32.mrf.mxu0 }
 0x4f0   : > { %9271 = vst [vmem:[%s15654_s21 + $0x280] sm:$0xff] %v11309_v21  ;;  %11322 = vtanh.f32 %v8235_v11  ;;  %v8237_v25 = vadd.f32 %v8236_v0, %v8124_v44  ;;  %v16503_v18 = vpop.f32.mrf.mxu1  ;;  %9015 = vmatmul.mubr.bf16.vlgmr.msra.gmra.mxu0 %v17769_v57  ;;  %v17777_v57 = vld [vmem:[#allocation53_spill] sm:$0xff] }
 0x4f1   : > { %v11311_v51 = vpop.eup %11310  ;;  %17768 = vst [vmem:[#allocation19_spill] sm:$0xff] %v16503_v18  ;;  %v16505_v32 = vpop.f32.mrf.mxu0  ;;  %9022 = vmatprep.mubr.bf16.mxu0 %v17770_v22 }
 0x4f2   : > { %9277 = vst [vmem:[%s15654_s21 + $0x2b0] sm:$0xff] %v11311_v51  ;;  %11324 = vtanh.f32 %v8237_v25  ;;  %v16510_v4 = vpop.f32.mrf.mxu1  ;;  %9063 = vmatmul.mubr.bf16.vlgmr.msra.gmra.mxu1 %v17771_v29  ;;  %v17776_v51 = vld [vmem:[#allocation52_spill] sm:$0xff] }
 0x4f3   : > { %v11313_v37 = vpop.eup %11312  ;;  %v16513_v30 = vpop.f32.mrf.mxu0  ;;  %9070 = vmatprep.mubr.bf16.mxu1 %v17772_v19 }
 0x4f4   : > { %9278 = vst [vmem:[%s15654_s21 + $0x2b8] sm:$0xff] %v11313_v37  ;;  %v16517_v43 = vpop.f32.mrf.mxu1 }
 0x4f5   : > { %v11315_v1 = vpop.eup %11314  ;;  %v16519_v46 = vpop.f32.mrf.mxu0 }
 0x4f6   : > { %9284 = vst [vmem:[%s15654_s21 + $0x2e8] sm:$0xff] %v11315_v1  ;;  %v16522_v3 = vpop.f32.mrf.mxu1 }
 0x4f7   : > { %v11317_v58 = vpop.eup %11316  ;;  %v16524_v23 = vpop.f32.mrf.mxu0 }
 0x4f8   : > { %9285 = vst [vmem:[%s15654_s21 + $0x2f0] sm:$0xff] %v11317_v58  ;;  %v16527_v55 = vpop.f32.mrf.mxu1  ;;  %9023 = vmatmul.mubr.bf16.gmra.mxu0 %v17773_v5 }
 0x4f9   : > { %v11319_v45 = vpop.eup %11318  ;;  %v16529_v53 = vpop.f32.mrf.mxu0  ;;  %9030 = vmatprep.mubr.bf16.mxu0 %v17774_v54  ;;  %v17778_v54 = vld [vmem:[#allocation54_spill] sm:$0xff] }
 0x4fa   : > { %9291 = vst [vmem:[%s15654_s21 + $0x320] sm:$0xff] %v11319_v45  ;;  %v16534_v15 = vpop.f32.mrf.mxu1  ;;  %9071 = vmatmul.mubr.bf16.gmra.mxu1 %v17775_v13 }
 0x4fb   : > { %v11321_v36 = vpop.eup %11320  ;;  %v16537_v61 = vpop.f32.mrf.mxu0 }
 0x4fc   : > { %9292 = vst [vmem:[%s15654_s21 + $0x328] sm:$0xff] %v11321_v36  ;;  %v16540_v17 = vpop.f32.mrf.mxu1  ;;  %v17779_v36 = vld [vmem:[#allocation55_spill] sm:$0xff] }
 0x4fd   : > { %v11323_v27 = vpop.eup %11322  ;;  %v16542_v49 = vpop.f32.mrf.mxu0 }
 0x4fe   : > { %9298 = vst [vmem:[%s15654_s21 + $0x358] sm:$0xff] %v11323_v27  ;;  %v16545_v11 = vpop.f32.mrf.mxu1 }
 0x4ff   : > { %v11325_v44 = vpop.eup %11324  ;;  %v16547_v21 = vpop.f32.mrf.mxu0 }
 0x500   : > { %9299 = vst [vmem:[%s15654_s21 + $0x360] sm:$0xff] %v11325_v44  ;;  %v16550_v0 = vpop.f32.mrf.mxu1  ;;  %9031 = vmatmul.mubr.bf16.gmra.mxu0 %v17776_v51 }
 0x501   : > { %v16552_v25 = vpop.f32.mrf.mxu0  ;;  %9038 = vmatprep.mubr.bf16.mxu0 %v17777_v57 }
 0x502   : > { %v16556_v22 = vpop.f32.mrf.mxu1 }
 0x503   : > { %v16558_v37 = vpop.f32.mrf.mxu0 }
 0x504   : > { %v16560_v29 = vpop.f32.mrf.mxu1 }
 0x505   : > { %v16562_v19 = vpop.f32.mrf.mxu0 }
 0x506   : > { %v16564_v1 = vpop.f32.mrf.mxu1 }
 0x507   : > { %v16566_v58 = vpop.f32.mrf.mxu0 }
 0x508   : > { %v16568_v45 = vpop.f32.mrf.mxu1  ;;  %9039 = vmatmul.mubr.bf16.gmra.mxu0 %v17778_v54  ;;  %v17782_v54 = vld [vmem:[#allocation57_spill] sm:$0xff] }
 0x509   : > { %v16570_v5 = vpop.f32.mrf.mxu0  ;;  %9046 = vmatprep.mubr.bf16.mxu0 %v17779_v36 }
 0x50a   : > { %v16574_v13 = vpop.f32.mrf.mxu1 }
 0x50b   : > { %v16576_v27 = vpop.f32.mrf.mxu0 }
 0x50c   : > { %v16578_v44 = vpop.f32.mrf.mxu1 }
 0x50d   : > { %v16580_v51 = vpop.f32.mrf.mxu0 }
 0x50e   : > { %v16582_v57 = vpop.f32.mrf.mxu1 }
 0x50f   : > { %v16584_v18 = vpop.f32.mrf.mxu0 }
 0x510   : > { %v16586_v10 = vpop.f32.mrf.mxu1  ;;  %9047 = vmatmul.mubr.bf16.gmra.mxu0 %v17781_v12 }
 0x511   : > { %17780 = vst [vmem:[#allocation24_spill] sm:$0xff] %v16586_v10  ;;  %v16588_v35 = vpop.f32.mrf.mxu0  ;;  %9054 = vmatprep.mubr.bf16.mxu0 %v17782_v54  ;;  %v17805_v10 = vld [vmem:[#allocation82_spill] sm:$0xff] }
 0x512   : > { %v16592_v36 = vpop.f32.mrf.mxu1 }
 0x513   : > { %17783 = vst [vmem:[#allocation23_spill] sm:$0xff] %v16592_v36  ;;  %v16594_v41 = vpop.f32.mrf.mxu0 }
 0x514   : > { %v16596_v42 = vpop.f32.mrf.mxu1 }
 0x515   : > { %17784 = vst [vmem:[#allocation27_spill] sm:$0xff] %v16596_v42  ;;  %v16598_v14 = vpop.f32.mrf.mxu0 }
 0x516   : > { %17785 = vst [vmem:[#allocation5_spill] sm:$0xff] %v16598_v14  ;;  %v16600_v59 = vpop.f32.mrf.mxu1 }
 0x517   : > { %17786 = vst [vmem:[#allocation6_spill] sm:$0xff] %v16600_v59  ;;  %v16602_v20 = vpop.f32.mrf.mxu0 }
 0x518   : > { %17787 = vst [vmem:[#allocation21_spill] sm:$0xff] %v16602_v20  ;;  %v16604_v52 = vpop.f32.mrf.mxu1  ;;  %9055 = vmatmul.mubr.bf16.gmra.mxu0 %v17790_v39 }
 0x519   : > { %17788 = vst [vmem:[#allocation30_spill] sm:$0xff] %v16604_v52  ;;  %v16606_v6 = vpop.f32.mrf.mxu0 }
 0x51a   : > { %17789 = vst [vmem:[#allocation35_spill] sm:$0xff] %v16606_v6  ;;  %v16609_v12 = vpop.f32.mrf.mxu1 }
 0x51b   : > { %17791 = vst [vmem:[#allocation69_spill] sm:$0xff] %v16609_v12  ;;  %v16611_v54 = vpop.f32.mrf.mxu0 }
 0x51c   : > { %17792 = vst [vmem:[#allocation63_spill] sm:$0xff] %v16611_v54  ;;  %v16613_v36 = vpop.f32.mrf.mxu1  ;;  %v17803_v54 = vld [vmem:[#allocation2_spill] sm:$0xff] }
 0x51d   : > { %17793 = vst [vmem:[#allocation98_spill] sm:$0xff] %v16613_v36  ;;  %v16615_v7 = vpop.f32.mrf.mxu0  ;;  %v17804_v36 = vsub.s32 4, %v17803_v54 }
 0x51e   : > { %17794 = vst [vmem:[#allocation100_spill] sm:$0xff] %v16615_v7  ;;  %v16617_v42 = vpop.f32.mrf.mxu1 }
 0x51f   : > { %17795 = vst [vmem:[#allocation22_spill] sm:$0xff] %v16617_v42  ;;  %v16619_v14 = vpop.f32.mrf.mxu0  ;;  %v16636_v7 = vrot.slane %v17805_v10, %v17804_v36 }
 0x520   : > { %17796 = vst [vmem:[#allocation26_spill] sm:$0xff] %v16619_v14  ;;  %v16621_v59 = vpop.f32.mrf.mxu1 }
 0x521   : > { %17797 = vst [vmem:[#allocation89_spill] sm:$0xff] %v16621_v59  ;;  %v16623_v20 = vpop.f32.mrf.mxu0  ;;  %v17808_v59 = vsub.s32 5, %v17803_v54 }
 0x522   : > { %17798 = vst [vmem:[#allocation90_spill] sm:$0xff] %v16623_v20  ;;  %v16625_v52 = vpop.f32.mrf.mxu1 }
 0x523   : > { %17799 = vst [vmem:[#allocation28_spill] sm:$0xff] %v16625_v52  ;;  %v16627_v6 = vpop.f32.mrf.mxu0  ;;  %v16645_v20 = vrot.slane %v17805_v10, %v17808_v59  ;;  %v8278_v10 = vadd.f32 %v16261_v8, %v16636_v7 }
 0x524   : > { %17800 = vst [vmem:[#allocation25_spill] sm:$0xff] %v16627_v6  ;;  %v16629_v39 = vpop.f32.mrf.mxu1 }
 0x525   : > { %17801 = vst [vmem:[#allocation38_spill] sm:$0xff] %v16629_v39  ;;  %v16631_v12 = vpop.f32.mrf.mxu0  ;;  %v8274_v39 = vadd.f32 %v16241_v24, %v16636_v7 }
 0x526   : > { %17802 = vst [vmem:[#allocation70_spill] sm:$0xff] %v16631_v12  ;;  %v16638_v42 = vpop.f32.mrf.mxu1 }
 0x527   : > { %17806 = vst [vmem:[#allocation91_spill] sm:$0xff] %v16638_v42  ;;  %v16640_v14 = vpop.f32.mrf.mxu0  ;;  %v8276_v42 = vadd.f32 %v16252_v16, %v16645_v20 }
 0x528   : > { %17807 = vst [vmem:[#allocation39_spill] sm:$0xff] %v16640_v14  ;;  %v16647_v52 = vpop.f32.mrf.mxu1  ;;  %v8387_v14 = vadd.f32 %v16505_v32, %v8274_v39  ;;  %v8391_v32 = vadd.f32 %v16519_v46, %v8278_v10  ;;  %v8288_v10 = vadd.f32 %v16301_v33, %v16636_v7 }
 0x529   : > { %17809 = vst [vmem:[#allocation64_spill] sm:$0xff] %v16647_v52  ;;  %v16649_v6 = vpop.f32.mrf.mxu0  ;;  %v8389_v52 = vadd.f32 %v16513_v30, %v8276_v42 }
 0x52a   : > { %17810 = vst [vmem:[#allocation71_spill] sm:$0xff] %v16649_v6  ;;  %v16653_v12 = vpop.f32.mrf.mxu1  ;;  %v8500_v16 = vadd.f32 %v16510_v4, %v8387_v14  ;;  %v8504_v14 = vadd.f32 %v16522_v3, %v8391_v32  ;;  %v8290_v3 = vadd.f32 %v16310_v47, %v16645_v20 }
 0x52b   : > { %17811 = vst [vmem:[#allocation92_spill] sm:$0xff] %v16653_v12  ;;  %v16655_v36 = vpop.f32.mrf.mxu0  ;;  %v8280_v12 = vadd.f32 %v16270_v31, %v16645_v20  ;;  %v8502_v8 = vadd.f32 %v16517_v43, %v8389_v52 }
 0x52c   : > { %v16660_v54 = vpop.f32.mrf.mxu1  ;;  %v8403_v32 = vadd.f32 %v16547_v21, %v8290_v3 }
 0x52d   : > { %17812 = vst [vmem:[#allocation36_spill] sm:$0xff] %v16660_v54  ;;  %v16662_v59 = vpop.f32.mrf.mxu0  ;;  %v8393_v42 = vadd.f32 %v16524_v23, %v8280_v12 }
 0x52e   : > { %17813 = vst [vmem:[#allocation72_spill] sm:$0xff] %v16662_v59  ;;  %v16667_v6 = vpop.f32.mrf.mxu1  ;;  %v8284_v59 = vadd.f32 %v16281_v40, %v16636_v7 }
 0x52f   : > { %17814 = vst [vmem:[#allocation73_spill] sm:$0xff] %v16667_v6  ;;  %v16669_v24 = vpop.f32.mrf.mxu0  ;;  %v8286_v6 = vadd.f32 %v16292_v38, %v16645_v20  ;;  %v8506_v23 = vadd.f32 %v16527_v55, %v8393_v42 }
 0x530   : > { %17815 = vst [vmem:[#allocation79_spill] sm:$0xff] %v16669_v24  ;;  %v16675_v39 = vpop.f32.mrf.mxu1  ;;  %v8397_v4 = vadd.f32 %v16529_v53, %v8284_v59 }
 0x531   : > { %v8612_v54 = vpop.f32.mrf.mxu0  ;;  %v8399_v40 = vadd.f32 %v16537_v61, %v8286_v6  ;;  %v8294_v6 = vadd.f32 %v16322_v63, %v16636_v7 }
 0x532   : > { %v8613_v30 = vadd.f32 %v8612_v54, %v8500_v16  ;;  %v10172_v24 = vpop.f32.mrf.mxu1  ;;  %v8510_v59 = vadd.f32 %v16534_v15, %v8397_v4  ;;  %v8401_v16 = vadd.f32 %v16542_v49, %v8288_v10  ;;  %v8296_v15 = vadd.f32 %v16334_v62, %v16645_v20 }
 0x533   : > { %v8614_v31 = vpop.f32.mrf.mxu0  ;;  %v8512_v55 = vadd.f32 %v16540_v17, %v8399_v40  ;;  %v8298_v17 = vadd.f32 %v16344_v50, %v16636_v7 }
 0x534   : > { %11326 = vtanh.f32 %v8613_v30  ;;  %v8615_v46 = vadd.f32 %v8614_v31, %v8502_v8  ;;  %v10173_v52 = vpop.f32.mrf.mxu1  ;;  %v8514_v30 = vadd.f32 %v16545_v11, %v8401_v16  ;;  %v8407_v31 = vadd.f32 %v16552_v25, %v8294_v6 }
 0x535   : > { %v8616_v43 = vpop.f32.mrf.mxu0  ;;  %v16689_v12 = vadd.f32 %v10173_v52, %v10172_v24  ;;  %v8409_v21 = vadd.f32 %v16558_v37, %v8296_v15  ;;  %v8300_v11 = vadd.f32 %v16354_v56, %v16645_v20  ;;  %v8411_v50 = vadd.f32 %v16562_v19, %v8298_v17 }
 0x536   : > { %11328 = vtanh.f32 %v8615_v46  ;;  %v8617_v38 = vadd.f32 %v8616_v43, %v8504_v14  ;;  %v10175_v54 = vpop.f32.mrf.mxu1  ;;  %v8516_v46 = vadd.f32 %v16550_v0, %v8403_v32  ;;  %v8520_v52 = vadd.f32 %v16556_v22, %v8407_v31 }
 0x537   : > { %v8618_v53 = vpop.f32.mrf.mxu0  ;;  %v8304_v0 = vadd.f32 %v16366_v2, %v16636_v7  ;;  %v8524_v2 = vadd.f32 %v16564_v1, %v8411_v50  ;;  %v8308_v6 = vadd.f32 %v16382_v9, %v16636_v7  ;;  %v17816_v50 = vld [vmem:[#allocation24_spill] sm:$0xff] }
 0x538   : > { %11330 = vtanh.f32 %v8617_v38  ;;  %v8619_v33 = vadd.f32 %v8618_v53, %v8506_v23  ;;  %v10176_v61 = vpop.f32.mrf.mxu1  ;;  %v8522_v23 = vadd.f32 %v16560_v29, %v8409_v21  ;;  %v8306_v53 = vadd.f32 %v16375_v34, %v16645_v20 }
 0x539   : > { %v8622_v24 = vpop.f32.mrf.mxu0  ;;  %v16699_v8 = vadd.f32 %v10176_v61, %v10175_v54  ;;  %v8413_v54 = vadd.f32 %v16566_v58, %v8300_v11  ;;  %v8417_v29 = vadd.f32 %v16570_v5, %v8304_v0  ;;  %v8318_v11 = vadd.f32 %v16414_v48, %v16636_v7 }
 0x53a   : > { %11332 = vtanh.f32 %v8619_v33  ;;  %v8623_v47 = vadd.f32 %v8622_v24, %v8510_v59  ;;  %v10178_v42 = vpop.f32.mrf.mxu1 }
 0x53b   : > { %v8624_v49 = vpop.f32.mrf.mxu0  ;;  %v8526_v34 = vadd.f32 %v16568_v45, %v8413_v54  ;;  %v8530_v9 = vadd.f32 %v16574_v13, %v8417_v29  ;;  %v17819_v54 = vld [vmem:[#allocation5_spill] sm:$0xff] }
 0x53c   : > { %11334 = vtanh.f32 %v8623_v47  ;;  %v8625_v63 = vadd.f32 %v8624_v49, %v8512_v55  ;;  %v10179_v14 = vpop.f32.mrf.mxu1  ;;  %v8419_v55 = vadd.f32 %v16576_v27, %v8306_v53  ;;  %v8310_v47 = vadd.f32 %v16389_v28, %v16645_v20  ;;  %v17820_v53 = vld [vmem:[#allocation4_spill] sm:$0xff] }
 0x53d   : > { %v8626_v4 = vpop.f32.mrf.mxu0  ;;  %v16709_v62 = vadd.f32 %v10179_v14, %v10178_v42  ;;  %v8421_v27 = vadd.f32 %v16580_v51, %v8308_v6  ;;  %v8316_v14 = vadd.f32 %v16407_v60, %v16645_v20 }
 0x53e   : > { %11336 = vtanh.f32 %v8625_v63  ;;  %v8627_v10 = vadd.f32 %v8626_v4, %v8514_v30  ;;  %v10181_v25 = vpop.f32.mrf.mxu1  ;;  %v8314_v30 = vadd.f32 %v16398_v26, %v16636_v7  ;;  %v8532_v31 = vadd.f32 %v16578_v44, %v8419_v55 }
 0x53f   : > { %v8628_v40 = vpop.f32.mrf.mxu0  ;;  %v8423_v28 = vadd.f32 %v16584_v18, %v8310_v47  ;;  %v8534_v26 = vadd.f32 %v16582_v57, %v8421_v27 }
 0x540   : > { %11338 = vtanh.f32 %v8627_v10  ;;  %v8629_v37 = vadd.f32 %v8628_v40, %v8516_v46  ;;  %v10182_v38 = vpop.f32.mrf.mxu1  ;;  %v8427_v44 = vadd.f32 %v16588_v35, %v8314_v30  ;;  %v17827_v30 = vld [vmem:[#allocation12_spill] sm:$0xff] }
 0x541   : > { %v11327_v43 = vpop.eup %11326  ;;  %v8632_v3 = vpop.f32.mrf.mxu0  ;;  %v16720_v56 = vadd.f32 %v10182_v38, %v10181_v25  ;;  %v8429_v25 = vadd.f32 %v16594_v41, %v8316_v14  ;;  %v8536_v60 = vadd.f32 %v17816_v50, %v8423_v28  ;;  %v8431_v41 = vadd.f32 %v17819_v54, %v8318_v11 }
 0x542   : > { %9195 = vst [vmem:[%s15654_s21 + $0x20] sm:$0xff] %v11327_v43  ;;  %11340 = vtanh.f32 %v8629_v37  ;;  %v8633_v22 = vadd.f32 %v8632_v3, %v8520_v52  ;;  %v10184_v59 = vpop.f32.mrf.mxu1  ;;  %v17817_v43 = vld [vmem:[#allocation10_spill] sm:$0xff]  ;;  %v17818_v3 = vld [vmem:[#allocation23_spill] sm:$0xff] }
 0x543   : > { %v11329_v19 = vpop.eup %11328  ;;  %v8634_v16 = vpop.f32.mrf.mxu0  ;;  %v8320_v0 = vadd.f32 %v17817_v43, %v16645_v20  ;;  %v8540_v48 = vadd.f32 %v17818_v3, %v8427_v44  ;;  %v17831_v44 = vld [vmem:[#allocation11_spill] sm:$0xff] }
 0x544   : > { %9196 = vst [vmem:[%s15654_s21 + $0x28] sm:$0xff] %v11329_v19  ;;  %11342 = vtanh.f32 %v8633_v22  ;;  %v8635_v33 = vadd.f32 %v8634_v16, %v8522_v23  ;;  %v10185_v61 = vpop.f32.mrf.mxu1  ;;  %v17821_v16 = vld [vmem:[#allocation27_spill] sm:$0xff] }
 0x545   : > { %v11331_v58 = vpop.eup %11330  ;;  %v8636_v24 = vpop.f32.mrf.mxu0  ;;  %v16732_v32 = vadd.f32 %v10185_v61, %v10184_v59  ;;  %v8324_v59 = vadd.f32 %v17820_v53, %v16636_v7  ;;  %v17838_v53 = vld [vmem:[#allocation13_spill] sm:$0xff] }
 0x546   : > { %9202 = vst [vmem:[%s15654_s21 + $0x58] sm:$0xff] %v11331_v58  ;;  %11344 = vtanh.f32 %v8635_v33  ;;  %v8637_v1 = vadd.f32 %v8636_v24, %v8524_v2  ;;  %v10187_v15 = vpop.f32.mrf.mxu1  ;;  %v8542_v2 = vadd.f32 %v17821_v16, %v8429_v25  ;;  %v17822_v58 = vld [vmem:[#allocation21_spill] sm:$0xff] }
 0x547   : > { %v11333_v5 = vpop.eup %11332  ;;  %v8638_v42 = vpop.f32.mrf.mxu0  ;;  %v8433_v6 = vadd.f32 %v17822_v58, %v8320_v0  ;;  %v17832_v25 = vld [vmem:[#allocation69_spill] sm:$0xff]  ;;  %v17835_v0 = vld [vmem:[#allocation98_spill] sm:$0xff] }
 0x548   : > { %9203 = vst [vmem:[%s15654_s21 + $0x60] sm:$0xff] %v11333_v5  ;;  %11346 = vtanh.f32 %v8637_v1  ;;  %v8639_v49 = vadd.f32 %v8638_v42, %v8526_v34  ;;  %v10188_v63 = vpop.f32.mrf.mxu1  ;;  %v17824_v34 = vld [vmem:[#allocation9_spill] sm:$0xff]  ;;  %v17840_v58 = vld [vmem:[#allocation90_spill] sm:$0xff] }
 0x549   : > { %v11335_v45 = vpop.eup %11334  ;;  %v8642_v17 = vpop.f32.mrf.mxu0  ;;  %v16744_v21 = vadd.f32 %v10188_v63, %v10187_v15  ;;  %v8326_v1 = vadd.f32 %v17824_v34, %v16645_v20  ;;  %v17825_v15 = vld [vmem:[#allocation6_spill] sm:$0xff]  ;;  %v17828_v63 = vld [vmem:[#allocation63_spill] sm:$0xff]  ;;  %v17841_v34 = vld [vmem:[#allocation16_spill] sm:$0xff] }
 0x54a   : > { %9209 = vst [vmem:[%s15654_s21 + $0x90] sm:$0xff] %v11335_v45  ;;  %11348 = vtanh.f32 %v8639_v49  ;;  %v8643_v13 = vadd.f32 %v8642_v17, %v8530_v9  ;;  %v10190_v4 = vpop.f32.mrf.mxu1  ;;  %v8544_v42 = vadd.f32 %v17825_v15, %v8431_v41  ;;  %v17826_v9 = vld [vmem:[#allocation35_spill] sm:$0xff] }
 0x54b   : > { %v11337_v51 = vpop.eup %11336  ;;  %v8644_v46 = vpop.f32.mrf.mxu0  ;;  %v8437_v27 = vadd.f32 %v17826_v9, %v8324_v59  ;;  %v8439_v17 = vadd.f32 %v17828_v63, %v8326_v1  ;;  %v8336_v59 = vadd.f32 %v17838_v53, %v16645_v20  ;;  %v8338_v1 = vadd.f32 %v17841_v34, %v16636_v7  ;;  %v17843_v9 = vld [vmem:[#allocation89_spill] sm:$0xff] }
 0x54c   : > { %9210 = vst [vmem:[%s15654_s21 + $0x98] sm:$0xff] %v11337_v51  ;;  %11350 = vtanh.f32 %v8643_v13  ;;  %v8645_v10 = vadd.f32 %v8644_v46, %v8532_v31  ;;  %v10191_v40 = vpop.f32.mrf.mxu1  ;;  %v8328_v31 = vadd.f32 %v17827_v30, %v16636_v7  ;;  %v17829_v51 = vld [vmem:[#allocation30_spill] sm:$0xff] }
 0x54d   : > { %v11339_v18 = vpop.eup %11338  ;;  %v8646_v52 = vpop.f32.mrf.mxu0  ;;  %v16756_v37 = vadd.f32 %v10191_v40, %v10190_v4  ;;  %v8546_v14 = vadd.f32 %v17829_v51, %v8433_v6  ;;  %v8550_v40 = vadd.f32 %v17832_v25, %v8437_v27 }
 0x54e   : > { %9216 = vst [vmem:[%s15654_s21 + $0xc8] sm:$0xff] %v11339_v18  ;;  %11352 = vtanh.f32 %v8645_v10  ;;  %v8647_v57 = vadd.f32 %v8646_v52, %v8534_v26  ;;  %v10193_v23 = vpop.f32.mrf.mxu1  ;;  %v8330_v10 = vadd.f32 %v17831_v44, %v16645_v20  ;;  %v17833_v52 = vld [vmem:[#allocation100_spill] sm:$0xff] }
 0x54f   : > { %v11341_v35 = vpop.eup %11340  ;;  %v8648_v38 = vpop.f32.mrf.mxu0  ;;  %v8441_v50 = vadd.f32 %v17833_v52, %v8328_v31  ;;  %v17845_v31 = vld [vmem:[#allocation15_spill] sm:$0xff] }
 0x550   : > { %9217 = vst [vmem:[%s15654_s21 + $0xd0] sm:$0xff] %v11341_v35  ;;  %11354 = vtanh.f32 %v8647_v57  ;;  %v8649_v22 = vadd.f32 %v8648_v38, %v8536_v60  ;;  %v10194_v29 = vpop.f32.mrf.mxu1  ;;  %v17834_v35 = vld [vmem:[#allocation14_spill] sm:$0xff]  ;;  %v8340_v63 = vadd.f32 %v17845_v31, %v16645_v20  ;;  %v17860_v31 = vld [vmem:[#allocation36_spill] sm:$0xff] }
 0x551   : > { %v11343_v19 = vpop.eup %11342  ;;  %v8652_v33 = vpop.f32.mrf.mxu0  ;;  %v16768_v55 = vadd.f32 %v10194_v29, %v10193_v23  ;;  %v8334_v43 = vadd.f32 %v17834_v35, %v16636_v7  ;;  %v8552_v23 = vadd.f32 %v17835_v0, %v8439_v17  ;;  %v17839_v29 = vld [vmem:[#allocation22_spill] sm:$0xff]  ;;  %v17852_v0 = vld [vmem:[#allocation17_spill] sm:$0xff] }
 0x552   : > { %9223 = vst [vmem:[%s15654_s21 + $0x100] sm:$0xff] %v11343_v19  ;;  %11356 = vtanh.f32 %v8649_v22  ;;  %v8653_v61 = vadd.f32 %v8652_v33, %v8540_v48  ;;  %v10196_v5 = vpop.f32.mrf.mxu1  ;;  %v17836_v48 = vld [vmem:[#allocation26_spill] sm:$0xff]  ;;  %v8554_v33 = vadd.f32 %v17839_v29, %v8441_v50  ;;  %v17850_v50 = vld [vmem:[#allocation39_spill] sm:$0xff] }
 0x553   : > { %17823 = vst [vmem:[#allocation29_spill] sm:$0xff] %v16768_v55  ;;  %v11345_v24 = vpop.eup %11344  ;;  %v8654_v47 = vpop.f32.mrf.mxu0  ;;  %v8443_v54 = vadd.f32 %v17836_v48, %v8330_v10  ;;  %v8447_v6 = vadd.f32 %v17840_v58, %v8334_v43  ;;  %v17848_v10 = vld [vmem:[#allocation18_spill] sm:$0xff]  ;;  %v17853_v48 = vld [vmem:[#allocation91_spill] sm:$0xff] }
 0x554   : > { %9224 = vst [vmem:[%s15654_s21 + $0x108] sm:$0xff] %v11345_v24  ;;  %11358 = vtanh.f32 %v8653_v61  ;;  %v8655_v49 = vadd.f32 %v8654_v47, %v8542_v2  ;;  %v10197_v28 = vpop.f32.mrf.mxu1 }
 0x555   : > { %v11347_v45 = vpop.eup %11346  ;;  %v8656_v13 = vpop.f32.mrf.mxu0  ;;  %v16780_v4 = vadd.f32 %v10197_v28, %v10196_v5  ;;  %v17842_v5 = vld [vmem:[#allocation25_spill] sm:$0xff]  ;;  %v8556_v27 = vadd.f32 %v17843_v9, %v8443_v54  ;;  %v17858_v9 = vld [vmem:[#allocation92_spill] sm:$0xff] }
 0x556   : > { %9230 = vst [vmem:[%s15654_s21 + $0x138] sm:$0xff] %v11347_v45  ;;  %11360 = vtanh.f32 %v8655_v49  ;;  %v8657_v46 = vadd.f32 %v8656_v13, %v8544_v42  ;;  %v10199_v18 = vpop.f32.mrf.mxu1  ;;  %v8449_v47 = vadd.f32 %v17842_v5, %v8336_v59  ;;  %v17846_v13 = vld [vmem:[#allocation28_spill] sm:$0xff]  ;;  %v17857_v5 = vld [vmem:[#allocation19_spill] sm:$0xff] }
 0x557   : > { %17830 = vst [vmem:[#allocation102_spill] sm:$0xff] %v16780_v4  ;;  %v11349_v26 = vpop.eup %11348  ;;  %v8658_v11 = vpop.f32.mrf.mxu0  ;;  %v8560_v51 = vadd.f32 %v17846_v13, %v8447_v6  ;;  %v17856_v6 = vld [vmem:[#allocation64_spill] sm:$0xff]  ;;  %v17861_v13 = vld [vmem:[#allocation79_spill] sm:$0xff] }
 0x558   : > { %9231 = vst [vmem:[%s15654_s21 + $0x140] sm:$0xff] %v11349_v26  ;;  %11362 = vtanh.f32 %v8657_v46  ;;  %v8659_v60 = vadd.f32 %v8658_v11, %v8546_v14  ;;  %v10200_v38 = vpop.f32.mrf.mxu1  ;;  %v17847_v14 = vld [vmem:[#allocation70_spill] sm:$0xff] }
 0x559   : > { %v11351_v57 = vpop.eup %11350  ;;  %v8662_v3 = vpop.f32.mrf.mxu0  ;;  %v16792_v41 = vadd.f32 %v10200_v38, %v10199_v18  ;;  %v8451_v46 = vadd.f32 %v17847_v14, %v8338_v1  ;;  %v8344_v18 = vadd.f32 %v17848_v10, %v16636_v7  ;;  %v17849_v11 = vld [vmem:[#allocation38_spill] sm:$0xff]  ;;  %v17862_v10 = vld [vmem:[#allocation73_spill] sm:$0xff] }
 0x55a   : > { %9237 = vst [vmem:[%s15654_s21 + $0x170] sm:$0xff] %v11351_v57  ;;  %11364 = vtanh.f32 %v8659_v60  ;;  %v8663_v22 = vadd.f32 %v8662_v3, %v8550_v40  ;;  %v10202_v16 = vpop.f32.mrf.mxu1  ;;  %v8562_v25 = vadd.f32 %v17849_v11, %v8449_v47  ;;  %v8453_v60 = vadd.f32 %v17850_v50, %v8340_v63 }
 0x55b   : > { %17837 = vst [vmem:[#allocation104_spill] sm:$0xff] %v16792_v41  ;;  %v11353_v19 = vpop.eup %11352  ;;  %v8664_v2 = vpop.f32.mrf.mxu0  ;;  %v8564_v54 = vadd.f32 %v17853_v48, %v8451_v46  ;;  %v8350_v47 = vadd.f32 %v17857_v5, %v16645_v20 }
 0x55c   : > { %9238 = vst [vmem:[%s15654_s21 + $0x178] sm:$0xff] %v11353_v19  ;;  %11366 = vtanh.f32 %v8663_v22  ;;  %v8665_v61 = vadd.f32 %v8664_v2, %v8552_v23  ;;  %v10203_v15 = vpop.f32.mrf.mxu1  ;;  %v8346_v23 = vadd.f32 %v17852_v0, %v16645_v20  ;;  %v17854_v22 = vld [vmem:[#allocation71_spill] sm:$0xff] }
 0x55d   : > { %v11355_v24 = vpop.eup %11354  ;;  %v8666_v42 = vpop.f32.mrf.mxu0  ;;  %v16804_v49 = vadd.f32 %v10203_v15, %v10202_v16  ;;  %v8457_v19 = vadd.f32 %v17854_v22, %v8344_v18  ;;  %v17855_v16 = vld [vmem:[#allocation20_spill] sm:$0xff] }
 0x55e   : > { %9244 = vst [vmem:[%s15654_s21 + $0x1a8] sm:$0xff] %v11355_v24  ;;  %11368 = vtanh.f32 %v8665_v61  ;;  %v8667_v45 = vadd.f32 %v8666_v42, %v8554_v33  ;;  %v10205_v17 = vpop.f32.mrf.mxu1  ;;  %v8348_v2 = vadd.f32 %v17855_v16, %v16636_v7  ;;  %v8459_v29 = vadd.f32 %v16655_v36, %v8346_v23 }
 0x55f   : > { %17844 = vst [vmem:[#allocation31_spill] sm:$0xff] %v16804_v49  ;;  %v11357_v30 = vpop.eup %11356  ;;  %v8668_v28 = vpop.f32.mrf.mxu0  ;;  %v8566_v61 = vadd.f32 %v17856_v6, %v8453_v60  ;;  %v8570_v7 = vadd.f32 %v17858_v9, %v8457_v19 }
 0x560   : > { %9245 = vst [vmem:[%s15654_s21 + $0x1b0] sm:$0xff] %v11357_v30  ;;  %11370 = vtanh.f32 %v8667_v45  ;;  %v8669_v26 = vadd.f32 %v8668_v28, %v8556_v27  ;;  %v10206_v40 = vpop.f32.mrf.mxu1  ;;  %v17859_v27 = vld [vmem:[#allocation72_spill] sm:$0xff]  ;;  %v8572_v63 = vadd.f32 %v17860_v31, %v8459_v29 }
 0x561   : > { %v11359_v44 = vpop.eup %11358  ;;  %v8672_v52 = vpop.f32.mrf.mxu0  ;;  %v16816_v57 = vadd.f32 %v10206_v40, %v10205_v17  ;;  %v8461_v36 = vadd.f32 %v17859_v27, %v8348_v2 }
 0x562   : > { %9251 = vst [vmem:[%s15654_s21 + $0x1e0] sm:$0xff] %v11359_v44  ;;  %11372 = vtanh.f32 %v8669_v26  ;;  %v8673_v35 = vadd.f32 %v8672_v52, %v8560_v51  ;;  %v10208_v38 = vpop.f32.mrf.mxu1  ;;  %v8463_v51 = vadd.f32 %v17861_v13, %v8350_v47 }
 0x563   : > { %17851 = vst [vmem:[#allocation94_spill] sm:$0xff] %v16816_v57  ;;  %v11361_v43 = vpop.eup %11360  ;;  %v8674_v3 = vpop.f32.mrf.mxu0  ;;  %v8574_v18 = vadd.f32 %v17862_v10, %v8461_v36 }
 0x564   : > { %9252 = vst [vmem:[%s15654_s21 + $0x1e8] sm:$0xff] %v11361_v43  ;;  %11374 = vtanh.f32 %v8673_v35  ;;  %v8675_v53 = vadd.f32 %v8674_v3, %v8562_v25  ;;  %v10209_v33 = vpop.f32.mrf.mxu1  ;;  %v8576_v50 = vadd.f32 %v16675_v39, %v8463_v51 }
 0x565   : > { %v11363_v59 = vpop.eup %11362  ;;  %v8676_v58 = vpop.f32.mrf.mxu0  ;;  %v16828_v24 = vadd.f32 %v10209_v33, %v10208_v38 }
 0x566   : > { %9258 = vst [vmem:[%s15654_s21 + $0x218] sm:$0xff] %v11363_v59  ;;  %11376 = vtanh.f32 %v8675_v53  ;;  %v8677_v34 = vadd.f32 %v8676_v58, %v8564_v54  ;;  %v10211_v15 = vpop.f32.mrf.mxu1 }
 0x567   : > { %v11365_v1 = vpop.eup %11364  ;;  %v8678_v42 = vpop.f32.mrf.mxu0 }
 0x568   : > { %9259 = vst [vmem:[%s15654_s21 + $0x220] sm:$0xff] %v11365_v1  ;;  %11378 = vtanh.f32 %v8677_v34  ;;  %v8679_v45 = vadd.f32 %v8678_v42, %v8566_v61  ;;  %v10212_v17 = vpop.f32.mrf.mxu1 }
 0x569   : > { %v11367_v30 = vpop.eup %11366  ;;  %v8682_v28 = vpop.f32.mrf.mxu0  ;;  %v16838_v20 = vadd.f32 %v10212_v17, %v10211_v15 }
 0x56a   : > { %9265 = vst [vmem:[%s15654_s21 + $0x250] sm:$0xff] %v11367_v30  ;;  %11380 = vtanh.f32 %v8679_v45  ;;  %v8683_v14 = vadd.f32 %v8682_v28, %v8570_v7  ;;  %v10214_v26 = vpop.f32.mrf.mxu1 }
 0x56b   : > { %v11369_v46 = vpop.eup %11368  ;;  %v8684_v44 = vpop.f32.mrf.mxu0 }
 0x56c   : > { %9266 = vst [vmem:[%s15654_s21 + $0x258] sm:$0xff] %v11369_v46  ;;  %11382 = vtanh.f32 %v8683_v14  ;;  %v8685_v11 = vadd.f32 %v8684_v44, %v8572_v63  ;;  %v10215_v40 = vpop.f32.mrf.mxu1 }
 0x56d   : > { %v11371_v25 = vpop.eup %11370  ;;  %v8686_v52 = vpop.f32.mrf.mxu0  ;;  %v16844_v60 = vadd.f32 %v10215_v40, %v10214_v26 }
 0x56e   : > { %9272 = vst [vmem:[%s15654_s21 + $0x288] sm:$0xff] %v11371_v25  ;;  %11384 = vtanh.f32 %v8685_v11  ;;  %v8687_v35 = vadd.f32 %v8686_v52, %v8574_v18  ;;  %v10217_v0 = vpop.f32.mrf.mxu1 }
 0x56f   : > { %v11373_v43 = vpop.eup %11372  ;;  %v8688_v23 = vpop.f32.mrf.mxu0 }
 0x570   : > { %9273 = vst [vmem:[%s15654_s21 + $0x290] sm:$0xff] %v11373_v43  ;;  %11386 = vtanh.f32 %v8687_v35  ;;  %v8689_v38 = vadd.f32 %v8688_v23, %v8576_v50  ;;  %v10218_v48 = vpop.f32.mrf.mxu1 }
 0x571   : > { %v11375_v3 = vpop.eup %11374  ;;  %v16847_v54 = vpop.f32.mrf.mxu0  ;;  %v16850_v39 = vadd.f32 %v10218_v48, %v10217_v0 }
 0x572   : > { %9279 = vst [vmem:[%s15654_s21 + $0x2c0] sm:$0xff] %v11375_v3  ;;  %11388 = vtanh.f32 %v8689_v38  ;;  %v16852_v19 = vpop.f32.mrf.mxu1 }
 0x573   : > { %v11377_v22 = vpop.eup %11376  ;;  %v16854_v53 = vpop.f32.mrf.mxu0 }
 0x574   : > { %9280 = vst [vmem:[%s15654_s21 + $0x2c8] sm:$0xff] %v11377_v22  ;;  %v16857_v16 = vpop.f32.mrf.mxu1 }
 0x575   : > { %v11379_v59 = vpop.eup %11378  ;;  %v16859_v2 = vpop.f32.mrf.mxu0 }
 0x576   : > { %9286 = vst [vmem:[%s15654_s21 + $0x2f8] sm:$0xff] %v11379_v59  ;;  %v16862_v33 = vpop.f32.mrf.mxu1 }
 0x577   : > { %v11381_v29 = vpop.eup %11380  ;;  %v16864_v58 = vpop.f32.mrf.mxu0 }
 0x578   : > { %9287 = vst [vmem:[%s15654_s21 + $0x300] sm:$0xff] %v11381_v29  ;;  %v16867_v61 = vpop.f32.mrf.mxu1 }
 0x579   : > { %v11383_v6 = vpop.eup %11382  ;;  %v16869_v34 = vpop.f32.mrf.mxu0 }
 0x57a   : > { %9293 = vst [vmem:[%s15654_s21 + $0x330] sm:$0xff] %v11383_v6  ;;  %v16872_v5 = vpop.f32.mrf.mxu1 }
 0x57b   : > { %v11385_v1 = vpop.eup %11384  ;;  %v16874_v47 = vpop.f32.mrf.mxu0 }
 0x57c   : > { %9294 = vst [vmem:[%s15654_s21 + $0x338] sm:$0xff] %v11385_v1  ;;  %v16877_v42 = vpop.f32.mrf.mxu1 }
 0x57d   : > { %v11387_v15 = vpop.eup %11386  ;;  %v16879_v9 = vpop.f32.mrf.mxu0 }
 0x57e   : > { %9300 = vst [vmem:[%s15654_s21 + $0x368] sm:$0xff] %v11387_v15  ;;  %v16882_v27 = vpop.f32.mrf.mxu1 }
 0x57f   : > { %v11389_v7 = vpop.eup %11388  ;;  %v16884_v36 = vpop.f32.mrf.mxu0 }
 0x580   : > { %9301 = vst [vmem:[%s15654_s21 + $0x370] sm:$0xff] %v11389_v7  ;;  %v16887_v45 = vpop.f32.mrf.mxu1 }
 0x581   : > { %v16889_v30 = vpop.f32.mrf.mxu0 }
 0x582   : > { %v16891_v31 = vpop.f32.mrf.mxu1 }
 0x583   : > { %v16893_v63 = vpop.f32.mrf.mxu0 }
 0x584   : > { %v16895_v17 = vpop.f32.mrf.mxu1 }
 0x585   : > { %v16897_v28 = vpop.f32.mrf.mxu0 }
 0x586   : > { %v16899_v13 = vpop.f32.mrf.mxu1 }
 0x587   : > { %v16901_v51 = vpop.f32.mrf.mxu0 }
 0x588   : > { %v16903_v14 = vpop.f32.mrf.mxu1 }
 0x589   : > { %v16905_v46 = vpop.f32.mrf.mxu0 }
 0x58a   : > { %v16907_v26 = vpop.f32.mrf.mxu1 }
 0x58b   : > { %17863 = vst [vmem:[#allocation40_spill] sm:$0xff] %v16907_v26  ;;  %v16909_v44 = vpop.f32.mrf.mxu0 }
 0x58c   : > { %v16911_v10 = vpop.f32.mrf.mxu1 }
 0x58d   : > { %17864 = vst [vmem:[#allocation93_spill] sm:$0xff] %v16911_v10  ;;  %v16913_v18 = vpop.f32.mrf.mxu0 }
 0x58e   : > { %17865 = vst [vmem:[#allocation95_spill] sm:$0xff] %v16913_v18  ;;  %v16915_v11 = vpop.f32.mrf.mxu1 }
 0x58f   : > { %17866 = vst [vmem:[#allocation41_spill] sm:$0xff] %v16915_v11  ;;  %v16917_v25 = vpop.f32.mrf.mxu0 }
 0x590   : > { %17867 = vst [vmem:[#allocation37_spill] sm:$0xff] %v16917_v25  ;;  %v16919_v40 = vpop.f32.mrf.mxu1 }
 0x591   : > { %17868 = vst [vmem:[#allocation74_spill] sm:$0xff] %v16919_v40  ;;  %v16921_v52 = vpop.f32.mrf.mxu0 }
 0x592   : > { %17869 = vst [vmem:[#allocation97_spill] sm:$0xff] %v16921_v52  ;;  %v16923_v50 = vpop.f32.mrf.mxu1 }
 0x593   : > { %17870 = vst [vmem:[#allocation65_spill] sm:$0xff] %v16923_v50  ;;  %v16925_v35 = vpop.f32.mrf.mxu0 }
 0x594   : > { %17871 = vst [vmem:[#allocation75_spill] sm:$0xff] %v16925_v35  ;;  %v16927_v43 = vpop.f32.mrf.mxu1  ;;  %v10241_v35 = vadd.f32 %v16864_v58, %v16859_v2 }
 0x595   : > { %17872 = vst [vmem:[#allocation99_spill] sm:$0xff] %v16927_v43  ;;  %v16929_v0 = vpop.f32.mrf.mxu0 }
 0x596   : > { %17873 = vst [vmem:[#allocation81_spill] sm:$0xff] %v16929_v0  ;;  %v16931_v23 = vpop.f32.mrf.mxu1 }
 0x597   : > { %17874 = vst [vmem:[#allocation32_spill] sm:$0xff] %v16931_v23  ;;  %v16933_v38 = vpop.f32.mrf.mxu0 }
 0x598   : > { %17875 = vst [vmem:[#allocation76_spill] sm:$0xff] %v16933_v38  ;;  %v16935_v3 = vpop.f32.mrf.mxu1 }
 0x599   : > { %17876 = vst [vmem:[#allocation77_spill] sm:$0xff] %v16935_v3  ;;  %v16937_v48 = vpop.f32.mrf.mxu0 }
 0x59a   : > { %17877 = vst [vmem:[#allocation33_spill] sm:$0xff] %v16937_v48  ;;  %v16939_v22 = vpop.f32.mrf.mxu1 }
 0x59b   : > { %17878 = vst [vmem:[#allocation96_spill] sm:$0xff] %v16939_v22  ;;  %v16941_v59 = vpop.f32.mrf.mxu0 }
 0x59c   : > { %17879 = vst [vmem:[#allocation42_spill] sm:$0xff] %v16941_v59  ;;  %v16943_v29 = vpop.f32.mrf.mxu1 }
 0x59d   : > { %17880 = vst [vmem:[#allocation106_spill] sm:$0xff] %v16943_v29  ;;  %v16945_v6 = vpop.f32.mrf.mxu0  ;;  %v11424_v29 = vld [vmem:[%s17073_s8] sm:$0xff] }
 0x59e   : > { %17881 = vst [vmem:[#allocation78_spill] sm:$0xff] %v16945_v6  ;;  %v16947_v1 = vpop.f32.mrf.mxu1  ;;  %v17885_v6 = vld [vmem:[#allocation2_spill] sm:$0xff] }
 0x59f   : > { %17882 = vst [vmem:[#allocation43_spill] sm:$0xff] %v16947_v1  ;;  %v16949_v15 = vpop.f32.mrf.mxu0  ;;  %v17886_v59 = vsub.s32 6, %v17885_v6 }
 0x5a0   : > { %17883 = vst [vmem:[#allocation66_spill] sm:$0xff] %v16949_v15  ;;  %v16951_v7 = vpop.f32.mrf.mxu1 }
 0x5a1   : > { %17884 = vst [vmem:[#allocation101_spill] sm:$0xff] %v16951_v7  ;;  %v10272_v57 = vpop.f32.mrf.mxu0  ;;  %v16958_v1 = vrot.slane %v11424_v29, %v17886_v59  ;;  %v10238_v7 = vadd.f32 %v16854_v53, %v16847_v54 }
 0x5a2   : > { %v10336_v49 = vpop.f32.mrf.mxu1 }
 0x5a3   : > { %v10273_v23 = vpop.f32.mrf.mxu0  ;;  %v8726_v11 = vadd.f32 %v16689_v12, %v16958_v1  ;;  %v8774_v59 = vadd.f32 %v16828_v24, %v16958_v1  ;;  %v8729_v6 = vadd.f32 %v16699_v8, %v16958_v1  ;;  %v10302_v12 = vadd.f32 %v16857_v16, %v16852_v19 }
 0x5a4   : > { %v10337_v3 = vpop.f32.mrf.mxu1  ;;  %v10274_v4 = vadd.f32 %v10273_v23, %v10272_v57  ;;  %v8777_v2 = vadd.f32 %v16838_v20, %v16958_v1  ;;  %v10244_v24 = vadd.f32 %v16874_v47, %v16869_v34 }
 0x5a5   : > { %v10275_v43 = vpop.f32.mrf.mxu0  ;;  %v8823_v29 = vadd.f32 %v10238_v7, %v8726_v11  ;;  %v8826_v58 = vadd.f32 %v10241_v35, %v8729_v6  ;;  %v10338_v11 = vadd.f32 %v10337_v3, %v10336_v49  ;;  %v10247_v49 = vadd.f32 %v16884_v36, %v16879_v9 }
 0x5a6   : > { %v10339_v48 = vpop.f32.mrf.mxu1  ;;  %v8871_v57 = vadd.f32 %v10274_v4, %v8774_v59  ;;  %v8734_v4 = vadd.f32 %v16709_v62, %v16958_v1  ;;  %v8782_v59 = vadd.f32 %v16844_v60, %v16958_v1  ;;  %v8737_v62 = vadd.f32 %v16720_v56, %v16958_v1 }
 0x5a7   : > { %v10276_v50 = vpop.f32.mrf.mxu0  ;;  %v8920_v25 = vadd.f32 %v10302_v12, %v8823_v29  ;;  %v10250_v6 = vadd.f32 %v16893_v63, %v16889_v30 }
 0x5a8   : > { %v10340_v22 = vpop.f32.mrf.mxu1  ;;  %v10277_v54 = vadd.f32 %v10276_v50, %v10275_v43  ;;  %v10305_v50 = vadd.f32 %v16867_v61, %v16862_v33  ;;  %v8968_v20 = vadd.f32 %v10338_v11, %v8871_v57  ;;  %v8831_v61 = vadd.f32 %v10244_v24, %v8734_v4 }
 0x5a9   : > { %v10278_v41 = vpop.f32.mrf.mxu0  ;;  %v10341_v34 = vadd.f32 %v10340_v22, %v10339_v48  ;;  %v8785_v48 = vadd.f32 %v16850_v39, %v16958_v1  ;;  %v8834_v22 = vadd.f32 %v10247_v49, %v8737_v62  ;;  %v17889_v62 = vld [vmem:[#allocation40_spill] sm:$0xff] }
 0x5aa   : > { %v10342_v15 = vpop.f32.mrf.mxu1  ;;  %v8874_v43 = vadd.f32 %v10277_v54, %v8777_v2  ;;  %v8923_v29 = vadd.f32 %v10305_v50, %v8826_v58 }
 0x5ab   : > { %v10279_v38 = vpop.f32.mrf.mxu0 }
 0x5ac   : > { %v10343_v0 = vpop.f32.mrf.mxu1  ;;  %v10280_v7 = vadd.f32 %v10279_v38, %v10278_v41 }
 0x5ad   : > { %v10281_v40 = vpop.f32.mrf.mxu0  ;;  %v10344_v54 = vadd.f32 %v10343_v0, %v10342_v15  ;;  %v10253_v15 = vadd.f32 %v16901_v51, %v16897_v28 }
 0x5ae   : > { %v16966_v52 = vpop.f32.mrf.mxu1 }
 0x5af   : > { %v10282_v55 = vpop.f32.mrf.mxu0 }
 0x5b0   : > { %v16972_v53 = vpop.f32.mrf.mxu1  ;;  %v10283_v3 = vadd.f32 %v10282_v55, %v10281_v40  ;;  %v8742_v55 = vadd.f32 %v16732_v32, %v16958_v1  ;;  %v10311_v40 = vadd.f32 %v16887_v45, %v16882_v27  ;;  %v8745_v45 = vadd.f32 %v16744_v21, %v16958_v1 }
 0x5b1   : > { %v10364_v10 = vpop.f32.mrf.mxu0  ;;  %v10347_v32 = vadd.f32 %v16972_v53, %v16966_v52  ;;  %v10256_v52 = vadd.f32 %v16909_v44, %v16905_v46 }
 0x5b2   : > { %v10400_v23 = vpop.f32.mrf.mxu1  ;;  %v8931_v63 = vadd.f32 %v10311_v40, %v8834_v22  ;;  %v8839_v0 = vadd.f32 %v10250_v6, %v8742_v55  ;;  %v17893_v22 = vld [vmem:[#allocation75_spill] sm:$0xff]  ;;  %v17896_v55 = vld [vmem:[#allocation74_spill] sm:$0xff] }
 0x5b3   : > { %v10365_v26 = vpop.f32.mrf.mxu0 }
 0x5b4   : > { %v10366_v8 = vadd.f32 %v10365_v26, %v10364_v10  ;;  %v10401_v18 = vpop.f32.mrf.mxu1  ;;  %v10308_v10 = vadd.f32 %v16877_v42, %v16872_v5 }
 0x5b5   : > { %v10367_v19 = vpop.f32.mrf.mxu0  ;;  %v10402_v35 = vadd.f32 %v10401_v18, %v10400_v23  ;;  %v8971_v18 = vadd.f32 %v10341_v34, %v8874_v43  ;;  %v8882_v23 = vadd.f32 %v10283_v3, %v8785_v48  ;;  %v10314_v43 = vadd.f32 %v16895_v17, %v16891_v31  ;;  %v17892_v48 = vld [vmem:[#allocation97_spill] sm:$0xff] }
 0x5b6   : > { %v9017_v16 = vadd.f32 %v10366_v8, %v8920_v25  ;;  %v10403_v47 = vpop.f32.mrf.mxu1  ;;  %v8879_v25 = vadd.f32 %v10280_v7, %v8782_v59  ;;  %v8928_v57 = vadd.f32 %v10308_v10, %v8831_v61  ;;  %v8750_v31 = vadd.f32 %v16756_v37, %v16958_v1  ;;  %v17888_v61 = vld [vmem:[#allocation37_spill] sm:$0xff] }
 0x5b7   : > { %v10368_v33 = vpop.f32.mrf.mxu0  ;;  %v9065_v41 = vadd.f32 %v10402_v35, %v8968_v20  ;;  %v8979_v4 = vadd.f32 %v10347_v32, %v8882_v23  ;;  %v8936_v20 = vadd.f32 %v10314_v43, %v8839_v0  ;;  %v17890_v10 = vld [vmem:[#allocation93_spill] sm:$0xff]  ;;  %v10262_v6 = vadd.f32 %v17893_v22, %v17892_v48  ;;  %v17898_v23 = vld [vmem:[#allocation76_spill] sm:$0xff] }
 0x5b8   : > { %11390 = vtanh.f32 %v9017_v16  ;;  %v10369_v26 = vadd.f32 %v10368_v33, %v10367_v19  ;;  %v10404_v60 = vpop.f32.mrf.mxu1  ;;  %v8976_v2 = vadd.f32 %v10344_v54, %v8879_v25  ;;  %v8842_v16 = vadd.f32 %v10253_v15, %v8745_v45  ;;  %v17887_v33 = vld [vmem:[#allocation95_spill] sm:$0xff] }
 0x5b9   : > { %v10370_v38 = vpop.f32.mrf.mxu0  ;;  %11392 = vtanh.f32 %v9065_v41  ;;  %v10405_v36 = vadd.f32 %v10404_v60, %v10403_v47  ;;  %v8847_v46 = vadd.f32 %v10256_v52, %v8750_v31  ;;  %v10259_v41 = vadd.f32 %v17888_v61, %v17887_v33  ;;  %v17901_v45 = vld [vmem:[#allocation99_spill] sm:$0xff]  ;;  %v17903_v52 = vld [vmem:[#allocation42_spill] sm:$0xff] }
 0x5ba   : > { %v9020_v9 = vadd.f32 %v10369_v26, %v8923_v29  ;;  %v10406_v56 = vpop.f32.mrf.mxu1  ;;  %v10317_v29 = vadd.f32 %v16903_v14, %v16899_v13  ;;  %v17891_v14 = vld [vmem:[#allocation29_spill] sm:$0xff]  ;;  %v17907_v33 = vld [vmem:[#allocation78_spill] sm:$0xff] }
 0x5bb   : > { %v10371_v12 = vpop.f32.mrf.mxu0  ;;  %v9068_v5 = vadd.f32 %v10405_v36, %v8971_v18  ;;  %v10320_v18 = vadd.f32 %v17890_v10, %v17889_v62  ;;  %v8753_v25 = vadd.f32 %v17891_v14, %v16958_v1  ;;  %v17908_v61 = vld [vmem:[#allocation66_spill] sm:$0xff] }
 0x5bc   : > { %11394 = vtanh.f32 %v9020_v9  ;;  %v10372_v42 = vadd.f32 %v10371_v12, %v10370_v38  ;;  %v10407_v58 = vpop.f32.mrf.mxu1  ;;  %v8939_v47 = vadd.f32 %v10317_v29, %v8842_v16  ;;  %v17906_v29 = vld [vmem:[#allocation31_spill] sm:$0xff]  ;;  %v17909_v10 = vld [vmem:[#allocation94_spill] sm:$0xff] }
 0x5bd   : > { %v10373_v39 = vpop.f32.mrf.mxu0  ;;  %11396 = vtanh.f32 %v9068_v5  ;;  %v10408_v30 = vadd.f32 %v10407_v58, %v10406_v56  ;;  %v8944_v3 = vadd.f32 %v10320_v18, %v8847_v46  ;;  %v8850_v36 = vadd.f32 %v10259_v41, %v8753_v25  ;;  %v17911_v14 = vld [vmem:[#allocation106_spill] sm:$0xff] }
 0x5be   : > { %v9025_v24 = vadd.f32 %v10372_v42, %v8928_v57  ;;  %v10409_v11 = vpop.f32.mrf.mxu1  ;;  %v17894_v57 = vld [vmem:[#allocation102_spill] sm:$0xff]  ;;  %v17895_v42 = vld [vmem:[#allocation41_spill] sm:$0xff]  ;;  %v10271_v41 = vadd.f32 %v17908_v61, %v17907_v33  ;;  %v8769_v18 = vadd.f32 %v17909_v10, %v16958_v1 }
 0x5bf   : > { %v10374_v8 = vpop.f32.mrf.mxu0  ;;  %v9073_v50 = vadd.f32 %v10408_v30, %v8976_v2  ;;  %v8758_v5 = vadd.f32 %v17894_v57, %v16958_v1  ;;  %v10323_v40 = vadd.f32 %v17896_v55, %v17895_v42 }
 0x5c0   : > { %11398 = vtanh.f32 %v9025_v24  ;;  %v10375_v27 = vadd.f32 %v10374_v8, %v10373_v39  ;;  %v10410_v7 = vpop.f32.mrf.mxu1  ;;  %v17897_v39 = vld [vmem:[#allocation81_spill] sm:$0xff]  ;;  %v17899_v8 = vld [vmem:[#allocation104_spill] sm:$0xff] }
 0x5c1   : > { %v10376_v19 = vpop.f32.mrf.mxu0  ;;  %11400 = vtanh.f32 %v9073_v50  ;;  %v10411_v51 = vadd.f32 %v10410_v7, %v10409_v11  ;;  %v10265_v24 = vadd.f32 %v17898_v23, %v17897_v39  ;;  %v8855_v0 = vadd.f32 %v10262_v6, %v8758_v5  ;;  %v17912_v6 = vld [vmem:[#allocation43_spill] sm:$0xff] }
 0x5c2   : > { %v9028_v28 = vadd.f32 %v10375_v27, %v8931_v63  ;;  %v8947_v63 = vadd.f32 %v10323_v40, %v8850_v36  ;;  %v8761_v32 = vadd.f32 %v17899_v8, %v16958_v1  ;;  %v17900_v27 = vld [vmem:[#allocation65_spill] sm:$0xff] }
 0x5c3   : > { %v10377_v53 = vpop.f32.mrf.mxu0  ;;  %v9076_v35 = vadd.f32 %v10411_v51, %v8979_v4  ;;  %v10326_v43 = vadd.f32 %v17901_v45, %v17900_v27 }
 0x5c4   : > { %11402 = vtanh.f32 %v9028_v28  ;;  %v10378_v21 = vadd.f32 %v10377_v53, %v10376_v19  ;;  %v8858_v4 = vadd.f32 %v10265_v24, %v8761_v32 }
 0x5c5   : > { %v11391_v59 = vpop.eup %11390  ;;  %v10379_v17 = vpop.f32.mrf.mxu0  ;;  %11404 = vtanh.f32 %v9076_v35  ;;  %v8952_v51 = vadd.f32 %v10326_v43, %v8855_v0 }
 0x5c6   : > { %9197 = vst [vmem:[%s15654_s21 + $0x30] sm:$0xff] %v11391_v59  ;;  %v9033_v49 = vadd.f32 %v10378_v21, %v8936_v20  ;;  %v11393_v34 = vpop.eup %11392  ;;  %v17902_v20 = vld [vmem:[#allocation33_spill] sm:$0xff]  ;;  %v17904_v21 = vld [vmem:[#allocation32_spill] sm:$0xff] }
 0x5c7   : > { %v10380_v44 = vpop.f32.mrf.mxu0  ;;  %9281 = vst [vmem:[%s15654_s21 + $0x2d0] sm:$0xff] %v11393_v34  ;;  %v10268_v53 = vadd.f32 %v17903_v52, %v17902_v20  ;;  %v17905_v59 = vld [vmem:[#allocation77_spill] sm:$0xff] }
 0x5c8   : > { %11406 = vtanh.f32 %v9033_v49  ;;  %v10381_v26 = vadd.f32 %v10380_v44, %v10379_v17  ;;  %v10329_v31 = vadd.f32 %v17905_v59, %v17904_v21  ;;  %v8766_v49 = vadd.f32 %v17906_v29, %v16958_v1 }
 0x5c9   : > { %v11395_v37 = vpop.eup %11394  ;;  %v10382_v13 = vpop.f32.mrf.mxu0 }
 0x5ca   : > { %9204 = vst [vmem:[%s15654_s21 + $0x68] sm:$0xff] %v11395_v37  ;;  %v9036_v60 = vadd.f32 %v10381_v26, %v8939_v47  ;;  %v11397_v38 = vpop.eup %11396  ;;  %v8955_v46 = vadd.f32 %v10329_v31, %v8858_v4  ;;  %v8863_v47 = vadd.f32 %v10268_v53, %v8766_v49 }
 0x5cb   : > { %v10383_v9 = vpop.f32.mrf.mxu0  ;;  %9288 = vst [vmem:[%s15654_s21 + $0x308] sm:$0xff] %v11397_v38 }
 0x5cc   : > { %11408 = vtanh.f32 %v9036_v60  ;;  %v10384_v54 = vadd.f32 %v10383_v9, %v10382_v13  ;;  %v17910_v13 = vld [vmem:[#allocation96_spill] sm:$0xff]  ;;  %v8866_v9 = vadd.f32 %v10271_v41, %v8769_v18 }
 0x5cd   : > { %v11399_v56 = vpop.eup %11398  ;;  %v10385_v12 = vpop.f32.mrf.mxu0  ;;  %v10332_v25 = vadd.f32 %v17911_v14, %v17910_v13 }
 0x5ce   : > { %9211 = vst [vmem:[%s15654_s21 + $0xa0] sm:$0xff] %v11399_v56  ;;  %v9041_v2 = vadd.f32 %v10384_v54, %v8944_v3  ;;  %v11401_v58 = vpop.eup %11400  ;;  %v17913_v54 = vld [vmem:[#allocation101_spill] sm:$0xff] }
 0x5cf   : > { %v10386_v30 = vpop.f32.mrf.mxu0  ;;  %9295 = vst [vmem:[%s15654_s21 + $0x340] sm:$0xff] %v11401_v58  ;;  %v8960_v3 = vadd.f32 %v10332_v25, %v8863_v47  ;;  %v10335_v56 = vadd.f32 %v17913_v54, %v17912_v6 }
 0x5d0   : > { %11410 = vtanh.f32 %v9041_v2  ;;  %v10387_v15 = vadd.f32 %v10386_v30, %v10385_v12 }
 0x5d1   : > { %v11403_v11 = vpop.eup %11402  ;;  %v10388_v50 = vpop.f32.mrf.mxu0  ;;  %v8963_v57 = vadd.f32 %v10335_v56, %v8866_v9 }
 0x5d2   : > { %9218 = vst [vmem:[%s15654_s21 + $0xd8] sm:$0xff] %v11403_v11  ;;  %v9044_v7 = vadd.f32 %v10387_v15, %v8947_v63  ;;  %v11405_v19 = vpop.eup %11404 }
 0x5d3   : > { %v10389_v28 = vpop.f32.mrf.mxu0  ;;  %9302 = vst [vmem:[%s15654_s21 + $0x378] sm:$0xff] %v11405_v19 }
 0x5d4   : > { %11412 = vtanh.f32 %v9044_v7  ;;  %v10390_v16 = vadd.f32 %v10389_v28, %v10388_v50 }
 0x5d5   : > { %v11407_v35 = vpop.eup %11406  ;;  %v10391_v17 = vpop.f32.mrf.mxu0 }
 0x5d6   : > { %9225 = vst [vmem:[%s15654_s21 + $0x110] sm:$0xff] %v11407_v35  ;;  %v9049_v34 = vadd.f32 %v10390_v16, %v8952_v51 }
 0x5d7   : > { %v10392_v44 = vpop.f32.mrf.mxu0 }
 0x5d8   : > { %11414 = vtanh.f32 %v9049_v34  ;;  %v10393_v26 = vadd.f32 %v10392_v44, %v10391_v17 }
 0x5d9   : > { %v11409_v37 = vpop.eup %11408  ;;  %v10394_v62 = vpop.f32.mrf.mxu0 }
 0x5da   : > { %9232 = vst [vmem:[%s15654_s21 + $0x148] sm:$0xff] %v11409_v37  ;;  %v9052_v60 = vadd.f32 %v10393_v26, %v8955_v46 }
 0x5db   : > { %v10395_v38 = vpop.f32.mrf.mxu0 }
 0x5dc   : > { %11416 = vtanh.f32 %v9052_v60  ;;  %v10396_v36 = vadd.f32 %v10395_v38, %v10394_v62 }
 0x5dd   : > { %v11411_v48 = vpop.eup %11410  ;;  %v10397_v22 = vpop.f32.mrf.mxu0 }
 0x5de   : > { %9239 = vst [vmem:[%s15654_s21 + $0x180] sm:$0xff] %v11411_v48  ;;  %v9057_v1 = vadd.f32 %v10396_v36, %v8960_v3 }
 0x5df   : > { %v10398_v12 = vpop.f32.mrf.mxu0 }
 0x5e0   : > { %11418 = vtanh.f32 %v9057_v1  ;;  %v10399_v5 = vadd.f32 %v10398_v12, %v10397_v22 }
 0x5e1   : > { %v11413_v42 = vpop.eup %11412 }
 0x5e2   : > { %9246 = vst [vmem:[%s15654_s21 + $0x1b8] sm:$0xff] %v11413_v42  ;;  %v9060_v55 = vadd.f32 %v10399_v5, %v8963_v57 }
 0x5e4   : > { %11420 = vtanh.f32 %v9060_v55 }
 0x5e5   : > { %v11415_v40 = vpop.eup %11414 }
 0x5e6   : > { %9253 = vst [vmem:[%s15654_s21 + $0x1f0] sm:$0xff] %v11415_v40 }
 0x5e9   : > { %v11417_v2 = vpop.eup %11416 }
 0x5ea   : > { %9260 = vst [vmem:[%s15654_s21 + $0x228] sm:$0xff] %v11417_v2 }
 0x5ed   : > { %v11419_v58 = vpop.eup %11418 }
 0x5ee   : > { %9267 = vst [vmem:[%s15654_s21 + $0x260] sm:$0xff] %v11419_v58 }
 0x5f1   : > { %v11421_v39 = vpop.eup %11420 }
 0x5f2   : > { %9274 = vst [vmem:[%s15654_s21 + $0x298] sm:$0xff] %v11421_v39 }
 0x5f3 PF: > { %s19_s30 = sadd.s32 1, %s11431_s30  }
 0x5f4   : > { %p16_p4 = scmp.ge.s32.totalorder %s19_s30, 4  }
 0x5f6   :  { %18 = sbr.rel (!%p16_p4) target bundleno = 1 (0x1), region = 86 }

</bundles_post_ra>
